<compile_context>
chip_gen: v5e
topology: v5e:2x2
jax: 0.10.0
libtpu: 0.0.40
codegen_flags: <defaults>
</compile_context>

<pallas_src>
import functools

import jax
import jax.numpy as jnp
from jax.experimental import pallas as pl
from jax.experimental.pallas import tpu as pltpu

LANES = 128                       # channel padding target -> lane-dense stores
_VMEM_LIMIT = 32 * 1024 * 1024    # explicit scoped-VMEM budget (fits v5e/v6e/v7x)


# ---------------------------------------------------------------------------
# Kernels
# ---------------------------------------------------------------------------
def _conv_body(x, w_ref, *, kh, kw, oh, ow):
    """VALID, stride-1 conv of one image via KH*KW shifted-window matmuls (in VMEM).

    x:     (H, W, C) f32 activations (already BN+ReLU'd when fused).
    w_ref: (KH*KW, C, OC_pad) bf16 weights, tap-major, zero padded.
    Returns (OH*OW, OC_pad) f32.
    """
    x = x.astype(jnp.bfloat16)                       # bf16 operands -> native MXU path
    acc = jnp.zeros((oh * ow, w_ref.shape[-1]), jnp.float32)
    for i in range(kh):
        for j in range(kw):
            win = x[i:i + oh, j:j + ow, :]           # (OH, OW, C) shifted window
            win = win.reshape(oh * ow, win.shape[-1])
            acc = acc + jnp.dot(win, w_ref[i * kw + j],
                                preferred_element_type=jnp.float32)
    return acc


def _conv_stats_kernel(x_ref, w_ref, y_ref, sum_ref, sq_ref, *, kh, kw, oh, ow):
    """Layer-1 pass: y = conv(x) (bias-free) + per-channel sum / sum-of-squares."""
    @pl.when(pl.program_id(0) == 0)
    def _init():
        sum_ref[...] = jnp.zeros_like(sum_ref)
        sq_ref[...] = jnp.zeros_like(sq_ref)

    y = _conv_body(x_ref[0], w_ref, kh=kh, kw=kw, oh=oh, ow=ow)   # (OH*OW, OC_pad) f32
    y_ref[0] = y
    sum_ref[...] += jnp.sum(y, axis=0, keepdims=True)
    sq_ref[...] += jnp.sum(y * y, axis=0, keepdims=True)


def _bn_relu_conv_stats_kernel(x_ref, scale_ref, shift_ref, w_ref,
                               y_ref, sum_ref, sq_ref, *, kh, kw, oh, ow):
    """Layer-2 pass: layer-1's folded BN + ReLU fused onto the input block, then conv+stats."""
    @pl.when(pl.program_id(0) == 0)
    def _init():
        sum_ref[...] = jnp.zeros_like(sum_ref)
        sq_ref[...] = jnp.zeros_like(sq_ref)

    x = jnp.maximum(x_ref[0] * scale_ref[...] + shift_ref[...], 0.0)   # f32 VPU math
    y = _conv_body(x, w_ref, kh=kh, kw=kw, oh=oh, ow=ow)
    y_ref[0] = y
    sum_ref[...] += jnp.sum(y, axis=0, keepdims=True)
    sq_ref[...] += jnp.sum(y * y, axis=0, keepdims=True)


def _bn_relu_kernel(y_ref, scale_ref, shift_ref, o_ref):
    """Final pass: folded BN affine + ReLU (single FMA per element, f32)."""
    o_ref[...] = jnp.maximum(y_ref[...] * scale_ref[...] + shift_ref[...], 0.0)


# ---------------------------------------------------------------------------
# Glue: weight packing, BN folding, pallas_call wrappers
# ---------------------------------------------------------------------------
def _pack_weight(w, c_pad):
    """OIHW conv weight -> (KH*KW, C_pad, LANES) bf16, zero padded, tap-major."""
    oc, ic, kh, kw = w.shape
    assert oc <= LANES and ic <= c_pad
    wt = jnp.transpose(w, (2, 3, 1, 0))                                  # (KH, KW, IC, OC)
    wt = jnp.pad(wt, ((0, 0), (0, 0), (0, c_pad - ic), (0, LANES - oc)))
    return wt.reshape(kh * kw, c_pad, LANES).astype(jnp.bfloat16)


def _pad_channel_vec(v):
    return jnp.pad(v.astype(jnp.float32), (0, LANES - v.shape[0])).reshape(1, LANES)


def _fold_bn(ch_sum, ch_sumsq, count, gamma_pad, beta_pad, eps):
    """Fold train-mode BN (batch stats) into a per-channel scale/shift."""
    mean = ch_sum / count
    # Streaming sum/sumsq variance is fine at these sizes; for very large N*OH*OW prefer a
    # true two-pass (centered) variance to avoid cancellation.
    var = jnp.maximum(ch_sumsq / count - mean * mean, 0.0)
    scale = gamma_pad * jax.lax.rsqrt(var + eps)
    shift = beta_pad - mean * scale
    return scale, shift


def _conv_pass(x_nhwc, w_packed, kh, kw, scale=None, shift=None):
    """One conv layer (VALID, stride 1) + per-channel sum/sumsq, grid over the batch.

    If scale/shift are given, the previous layer's folded BN + ReLU is applied to the
    input block inside the kernel (saves one full HBM sweep of the activations).
    Returns: y_raw (N, OH*OW, LANES) f32, ch_sum (1, LANES), ch_sumsq (1, LANES).
    """
    n, h, w_sp, c = x_nhwc.shape
    oh, ow = h - kh + 1, w_sp - kw + 1
    assert w_packed.shape[1] == c

    if scale is not None:
        kern = functools.partial(_bn_relu_conv_stats_kernel, kh=kh, kw=kw, oh=oh, ow=ow)
        extra_in = [scale, shift]
        extra_specs = [pl.BlockSpec((1, LANES), lambda i: (0, 0)),
                       pl.BlockSpec((1, LANES), lambda i: (0, 0))]
    else:
        kern = functools.partial(_conv_stats_kernel, kh=kh, kw=kw, oh=oh, ow=ow)
        extra_in = []
        extra_specs = []

    flops = 2 * n * oh * ow * (kh * kw * c) * LANES
    bytes_accessed = (x_nhwc.size * 4 + w_packed.size * 2
                      + n * oh * ow * LANES * 4 + 2 * LANES * 4)

    return pl.pallas_call(
        kern,
        out_shape=(jax.ShapeDtypeStruct((n, oh * ow, LANES), jnp.float32),
                   jax.ShapeDtypeStruct((1, LANES), jnp.float32),
                   jax.ShapeDtypeStruct((1, LANES), jnp.float32)),
        grid=(n,),
        in_specs=[pl.BlockSpec((1, h, w_sp, c), lambda i: (i, 0, 0, 0))]
                + extra_specs
                + [pl.BlockSpec(w_packed.shape, lambda i: (0, 0, 0))],
        out_specs=(pl.BlockSpec((1, oh * ow, LANES), lambda i: (i, 0, 0)),
                   pl.BlockSpec((1, LANES), lambda i: (0, 0)),
                   pl.BlockSpec((1, LANES), lambda i: (0, 0))),
        compiler_params=pltpu.CompilerParams(
            dimension_semantics=("arbitrary",),   # batch axis carries the stat accumulators
            vmem_limit_bytes=_VMEM_LIMIT),
        cost_estimate=pl.CostEstimate(flops=flops, transcendentals=0,
                                      bytes_accessed=bytes_accessed),
    )(x_nhwc, *extra_in, w_packed)


def _bn_relu_pass(y_raw, scale, shift):
    """Final folded BN + ReLU over (N, M, 128) conv output, lane-dense, parallel grid."""
    n, m, lanes = y_raw.shape
    return pl.pallas_call(
        _bn_relu_kernel,
        out_shape=jax.ShapeDtypeStruct((n, m, lanes), jnp.float32),
        grid=(n,),
        in_specs=[pl.BlockSpec((1, m, lanes), lambda i: (i, 0, 0)),
                  pl.BlockSpec((1, lanes), lambda i: (0, 0)),
                  pl.BlockSpec((1, lanes), lambda i: (0, 0))],
        out_specs=pl.BlockSpec((1, m, lanes), lambda i: (i, 0, 0)),
        compiler_params=pltpu.CompilerParams(
            dimension_semantics=("parallel",),    # independent per image -> megacore
            vmem_limit_bytes=_VMEM_LIMIT),
        cost_estimate=pl.CostEstimate(flops=2 * n * m * lanes, transcendentals=0,
                                      bytes_accessed=2 * n * m * lanes * 4),
    )(y_raw, scale, shift)


def con2d_forward(x, params, *, eps=1e-5):
    """Con2D.forward with is_bn=True: (Conv2d -> BatchNorm2d(train) -> ReLU) x 2."""
    w1, w2 = params["w1"], params["w2"]
    oc1, _, kh1, kw1 = w1.shape
    oc2, _, kh2, kw2 = w2.shape

    # NCHW -> NHWC once at the module boundary; stay channels-last afterwards.
    x_nhwc = jnp.transpose(x, (0, 2, 3, 1)).astype(jnp.float32)
    n, h, w_sp, c = x_nhwc.shape
    oh1, ow1 = h - kh1 + 1, w_sp - kw1 + 1
    oh2, ow2 = oh1 - kh2 + 1, ow1 - kw2 + 1

    w1p = _pack_weight(w1, c_pad=c)          # (KH*KW, C,   128)
    w2p = _pack_weight(w2, c_pad=LANES)      # (KH*KW, 128, 128)
    g1, bt1 = _pad_channel_vec(params["g1"]), _pad_channel_vec(params["bt1"])
    g2, bt2 = _pad_channel_vec(params["g2"]), _pad_channel_vec(params["bt2"])
    # NOTE: conv biases params["b1"]/params["b2"] are intentionally unused in the kernels:
    # a constant per-channel shift cancels exactly under train-mode BatchNorm.

    # Pass 1: conv1 + per-channel stats.
    y1, s1, q1 = _conv_pass(x_nhwc, w1p, kh1, kw1)
    scale1, shift1 = _fold_bn(s1, q1, n * oh1 * ow1, g1, bt1, eps)

    # Pass 2: bn1 + relu (fused in-kernel) -> conv2 + per-channel stats.
    y1_img = y1.reshape(n, oh1, ow1, LANES)            # contiguous -> free reshape in glue
    y2, s2, q2 = _conv_pass(y1_img, w2p, kh2, kw2, scale1, shift1)
    scale2, shift2 = _fold_bn(s2, q2, n * oh2 * ow2, g2, bt2, eps)

    # Pass 3: bn2 + relu.
    out = _bn_relu_pass(y2, scale2, shift2)            # (N, OH2*OW2, 128)

    # Back to the module's NCHW contract, dropping the lane padding.
    out = out.reshape(n, oh2, ow2, LANES)[..., :oc2]
    return jnp.transpose(out, (0, 3, 1, 2))


# ---------------------------------------------------------------------------
# Pure-JAX reference (conv operands cast to bf16 to mirror the MXU precision;
# f32 accumulation and f32 BN/ReLU, biases included — they must cancel).
# ---------------------------------------------------------------------------
def _ref_forward(x, params, eps=1e-5):
    def conv(x, w, b):
        y = jax.lax.conv_general_dilated(
            x.astype(jnp.bfloat16), w.astype(jnp.bfloat16),
            window_strides=(1, 1), padding="VALID",
            dimension_numbers=("NCHW", "OIHW", "NCHW"),
            preferred_element_type=jnp.float32)
        return y + b[None, :, None, None]

    def bn_relu(y, g, bt):
        m = jnp.mean(y, axis=(0, 2, 3), keepdims=True)
        v = jnp.mean((y - m) ** 2, axis=(0, 2, 3), keepdims=True)
        y = (y - m) * jax.lax.rsqrt(v + eps)
        y = y * g[None, :, None, None] + bt[None, :, None, None]
        return jnp.maximum(y, 0.0)

    y = bn_relu(conv(x, params["w1"], params["b1"]), params["g1"], params["bt1"])
    y = bn_relu(conv(y, params["w2"], params["b2"]), params["g2"], params["bt2"])
    return y


if __name__ == "__main__":
    # Small shapes consistent with Con2D(in_c=4, out_c=8, k_size=3).
    N, IN_C, OUT_C, K, H, W = 2, 4, 8, 3, 16, 16

    key = jax.random.PRNGKey(0)
    ks = jax.random.split(key, 9)
    params = {
        "w1": jax.random.normal(ks[0], (OUT_C, IN_C, K, K), jnp.float32) * 0.1,
        "b1": jax.random.normal(ks[1], (OUT_C,), jnp.float32) * 0.1,
        "g1": jax.random.uniform(ks[2], (OUT_C,), jnp.float32, minval=0.5, maxval=1.5),
        "bt1": jax.random.normal(ks[3], (OUT_C,), jnp.float32) * 0.1,
        "w2": jax.random.normal(ks[4], (OUT_C, OUT_C, K, K), jnp.float32) * 0.1,
        "b2": jax.random.normal(ks[5], (OUT_C,), jnp.float32) * 0.1,
        "g2": jax.random.uniform(ks[6], (OUT_C,), jnp.float32, minval=0.5, maxval=1.5),
        "bt2": jax.random.normal(ks[7], (OUT_C,), jnp.float32) * 0.1,
    }
    x = jax.random.normal(ks[8], (N, IN_C, H, W), jnp.float32)

    out = jax.block_until_ready(jax.jit(con2d_forward)(x, params))
    ref = _ref_forward(x, params)

    assert out.shape == (N, OUT_C, H - 2 * (K - 1), W - 2 * (K - 1)), out.shape
    max_err = float(jnp.max(jnp.abs(out - ref)))
    assert jnp.allclose(out, ref, rtol=2e-3, atol=2e-3), max_err

    print("KERNEL_OK")
</pallas_src>

<mosaic_0001>
module attributes {stable_mosaic.version = 11 : i64} {
  func.func @_conv_stats_kernel(%arg0: i32, %arg1: memref<1x16x16x4xf32, #tpu.memory_space<vmem>>, %arg2: memref<9x4x128xbf16, #tpu.memory_space<vmem>>, %arg3: memref<1x196x128xf32, #tpu.memory_space<vmem>>, %arg4: memref<1x128xf32, #tpu.memory_space<vmem>>, %arg5: memref<1x128xf32, #tpu.memory_space<vmem>>) attributes {dimension_semantics = [#tpu.dimension_semantics<arbitrary>], iteration_bounds = array<i64: 2>, scalar_prefetch = 0 : i64, scratch_operands = 0 : i64, tpu.core_type = #tpu.core_type<tc>, window_params = [{transform_indices = @transform_0, window_bounds = array<i64: 1, 16, 16, 4>}, {pipeline_mode = #tpu.pipeline_mode<synchronous>, transform_indices = @transform_1, window_bounds = array<i64: 9, 4, 128>}, {transform_indices = @transform_2, window_bounds = array<i64: 1, 196, 128>}, {pipeline_mode = #tpu.pipeline_mode<synchronous>, transform_indices = @transform_3, window_bounds = array<i64: 1, 128>}, {pipeline_mode = #tpu.pipeline_mode<synchronous>, transform_indices = @transform_4, window_bounds = array<i64: 1, 128>}]} {
    %c0_i32 = arith.constant 0 : i32
    %0 = arith.cmpi eq, %arg0, %c0_i32 : i32
    %1 = arith.extui %0 : i1 to i32
    %c0_i32_0 = arith.constant 0 : i32
    %2 = arith.cmpi ne, %1, %c0_i32_0 : i32
    scf.if %2 {
      %cst_45 = arith.constant 0.000000e+00 : f32
      %75 = vector.broadcast %cst_45 : f32 to vector<1x128xf32>
      %c0_46 = arith.constant 0 : index
      %c0_47 = arith.constant 0 : index
      %76 = vector.load %arg4[%c0_46, %c0_47] : memref<1x128xf32, #tpu.memory_space<vmem>>, vector<1x128xf32>
      tpu.vector_store %arg4[%c0_46, %c0_47], %75 {strides = array<i32>} : memref<1x128xf32, #tpu.memory_space<vmem>>, vector<1x128xf32>,
      %cst_48 = arith.constant 0.000000e+00 : f32
      %77 = vector.broadcast %cst_48 : f32 to vector<1x128xf32>
      %c0_49 = arith.constant 0 : index
      %c0_50 = arith.constant 0 : index
      %78 = vector.load %arg5[%c0_49, %c0_50] : memref<1x128xf32, #tpu.memory_space<vmem>>, vector<1x128xf32>
      tpu.vector_store %arg5[%c0_49, %c0_50], %77 {strides = array<i32>} : memref<1x128xf32, #tpu.memory_space<vmem>>, vector<1x128xf32>,
    } else {
    }
    %c0 = arith.constant 0 : index
    %c0_1 = arith.constant 0 : index
    %c0_2 = arith.constant 0 : index
    %c0_3 = arith.constant 0 : index
    %3 = vector.load %arg1[%c0, %c0_1, %c0_2, %c0_3] : memref<1x16x16x4xf32, #tpu.memory_space<vmem>>, vector<1x16x16x4xf32>
    %4 = vector.shape_cast %3 : vector<1x16x16x4xf32> to vector<16x16x4xf32>
    %5 = arith.truncf %4 : vector<16x16x4xf32> to vector<16x16x4xbf16>
    %cst = arith.constant 0.000000e+00 : f32
    %6 = vector.broadcast %cst : f32 to vector<196x128xf32>
    %7 = vector.extract_strided_slice %5 {offsets = [0, 0, 0], sizes = [14, 14, 4], strides = [1, 1, 1]} : vector<16x16x4xbf16> to vector<14x14x4xbf16>
    %8 = vector.shape_cast %7 : vector<14x14x4xbf16> to vector<196x4xbf16>
    %c0_4 = arith.constant 0 : index
    %c0_5 = arith.constant 0 : index
    %c0_6 = arith.constant 0 : index
    %9 = vector.load %arg2[%c0_4, %c0_5, %c0_6] : memref<9x4x128xbf16, #tpu.memory_space<vmem>>, vector<1x4x128xbf16>
    %10 = vector.shape_cast %9 : vector<1x4x128xbf16> to vector<4x128xbf16>
    %cst_7 = arith.constant dense<0.000000e+00> : vector<196x128xf32>
    %11 = tpu.matmul %8, %10, %cst_7 {dimension_numbers = #tpu.dot_dimension_numbers<[1], [0], [0], [1], [0, 0, 1, 1], [], []>} : vector<196x4xbf16>, vector<4x128xbf16>, vector<196x128xf32> -> vector<196x128xf32>
    %12 = arith.addf %6, %11 : vector<196x128xf32>
    %13 = vector.extract_strided_slice %5 {offsets = [0, 1, 0], sizes = [14, 14, 4], strides = [1, 1, 1]} : vector<16x16x4xbf16> to vector<14x14x4xbf16>
    %14 = vector.shape_cast %13 : vector<14x14x4xbf16> to vector<196x4xbf16>
    %c1 = arith.constant 1 : index
    %c0_8 = arith.constant 0 : index
    %c0_9 = arith.constant 0 : index
    %15 = vector.load %arg2[%c1, %c0_8, %c0_9] : memref<9x4x128xbf16, #tpu.memory_space<vmem>>, vector<1x4x128xbf16>
    %16 = vector.shape_cast %15 : vector<1x4x128xbf16> to vector<4x128xbf16>
    %cst_10 = arith.constant dense<0.000000e+00> : vector<196x128xf32>
    %17 = tpu.matmul %14, %16, %cst_10 {dimension_numbers = #tpu.dot_dimension_numbers<[1], [0], [0], [1], [0, 0, 1, 1], [], []>} : vector<196x4xbf16>, vector<4x128xbf16>, vector<196x128xf32> -> vector<196x128xf32>
    %18 = arith.addf %12, %17 : vector<196x128xf32>
    %19 = vector.extract_strided_slice %5 {offsets = [0, 2, 0], sizes = [14, 14, 4], strides = [1, 1, 1]} : vector<16x16x4xbf16> to vector<14x14x4xbf16>
    %20 = vector.shape_cast %19 : vector<14x14x4xbf16> to vector<196x4xbf16>
    %c2 = arith.constant 2 : index
    %c0_11 = arith.constant 0 : index
    %c0_12 = arith.constant 0 : index
    %21 = vector.load %arg2[%c2, %c0_11, %c0_12] : memref<9x4x128xbf16, #tpu.memory_space<vmem>>, vector<1x4x128xbf16>
    %22 = vector.shape_cast %21 : vector<1x4x128xbf16> to vector<4x128xbf16>
    %cst_13 = arith.constant dense<0.000000e+00> : vector<196x128xf32>
    %23 = tpu.matmul %20, %22, %cst_13 {dimension_numbers = #tpu.dot_dimension_numbers<[1], [0], [0], [1], [0, 0, 1, 1], [], []>} : vector<196x4xbf16>, vector<4x128xbf16>, vector<196x128xf32> -> vector<196x128xf32>
    %24 = arith.addf %18, %23 : vector<196x128xf32>
    %25 = vector.extract_strided_slice %5 {offsets = [1, 0, 0], sizes = [14, 14, 4], strides = [1, 1, 1]} : vector<16x16x4xbf16> to vector<14x14x4xbf16>
    %26 = vector.shape_cast %25 : vector<14x14x4xbf16> to vector<196x4xbf16>
    %c3 = arith.constant 3 : index
    %c0_14 = arith.constant 0 : index
    %c0_15 = arith.constant 0 : index
    %27 = vector.load %arg2[%c3, %c0_14, %c0_15] : memref<9x4x128xbf16, #tpu.memory_space<vmem>>, vector<1x4x128xbf16>
    %28 = vector.shape_cast %27 : vector<1x4x128xbf16> to vector<4x128xbf16>
    %cst_16 = arith.constant dense<0.000000e+00> : vector<196x128xf32>
    %29 = tpu.matmul %26, %28, %cst_16 {dimension_numbers = #tpu.dot_dimension_numbers<[1], [0], [0], [1], [0, 0, 1, 1], [], []>} : vector<196x4xbf16>, vector<4x128xbf16>, vector<196x128xf32> -> vector<196x128xf32>
    %30 = arith.addf %24, %29 : vector<196x128xf32>
    %31 = vector.extract_strided_slice %5 {offsets = [1, 1, 0], sizes = [14, 14, 4], strides = [1, 1, 1]} : vector<16x16x4xbf16> to vector<14x14x4xbf16>
    %32 = vector.shape_cast %31 : vector<14x14x4xbf16> to vector<196x4xbf16>
    %c4 = arith.constant 4 : index
    %c0_17 = arith.constant 0 : index
    %c0_18 = arith.constant 0 : index
    %33 = vector.load %arg2[%c4, %c0_17, %c0_18] : memref<9x4x128xbf16, #tpu.memory_space<vmem>>, vector<1x4x128xbf16>
    %34 = vector.shape_cast %33 : vector<1x4x128xbf16> to vector<4x128xbf16>
    %cst_19 = arith.constant dense<0.000000e+00> : vector<196x128xf32>
    %35 = tpu.matmul %32, %34, %cst_19 {dimension_numbers = #tpu.dot_dimension_numbers<[1], [0], [0], [1], [0, 0, 1, 1], [], []>} : vector<196x4xbf16>, vector<4x128xbf16>, vector<196x128xf32> -> vector<196x128xf32>
    %36 = arith.addf %30, %35 : vector<196x128xf32>
    %37 = vector.extract_strided_slice %5 {offsets = [1, 2, 0], sizes = [14, 14, 4], strides = [1, 1, 1]} : vector<16x16x4xbf16> to vector<14x14x4xbf16>
    %38 = vector.shape_cast %37 : vector<14x14x4xbf16> to vector<196x4xbf16>
    %c5 = arith.constant 5 : index
    %c0_20 = arith.constant 0 : index
    %c0_21 = arith.constant 0 : index
    %39 = vector.load %arg2[%c5, %c0_20, %c0_21] : memref<9x4x128xbf16, #tpu.memory_space<vmem>>, vector<1x4x128xbf16>
    %40 = vector.shape_cast %39 : vector<1x4x128xbf16> to vector<4x128xbf16>
    %cst_22 = arith.constant dense<0.000000e+00> : vector<196x128xf32>
    %41 = tpu.matmul %38, %40, %cst_22 {dimension_numbers = #tpu.dot_dimension_numbers<[1], [0], [0], [1], [0, 0, 1, 1], [], []>} : vector<196x4xbf16>, vector<4x128xbf16>, vector<196x128xf32> -> vector<196x128xf32>
    %42 = arith.addf %36, %41 : vector<196x128xf32>
    %43 = vector.extract_strided_slice %5 {offsets = [2, 0, 0], sizes = [14, 14, 4], strides = [1, 1, 1]} : vector<16x16x4xbf16> to vector<14x14x4xbf16>
    %44 = vector.shape_cast %43 : vector<14x14x4xbf16> to vector<196x4xbf16>
    %c6 = arith.constant 6 : index
    %c0_23 = arith.constant 0 : index
    %c0_24 = arith.constant 0 : index
    %45 = vector.load %arg2[%c6, %c0_23, %c0_24] : memref<9x4x128xbf16, #tpu.memory_space<vmem>>, vector<1x4x128xbf16>
    %46 = vector.shape_cast %45 : vector<1x4x128xbf16> to vector<4x128xbf16>
    %cst_25 = arith.constant dense<0.000000e+00> : vector<196x128xf32>
    %47 = tpu.matmul %44, %46, %cst_25 {dimension_numbers = #tpu.dot_dimension_numbers<[1], [0], [0], [1], [0, 0, 1, 1], [], []>} : vector<196x4xbf16>, vector<4x128xbf16>, vector<196x128xf32> -> vector<196x128xf32>
    %48 = arith.addf %42, %47 : vector<196x128xf32>
    %49 = vector.extract_strided_slice %5 {offsets = [2, 1, 0], sizes = [14, 14, 4], strides = [1, 1, 1]} : vector<16x16x4xbf16> to vector<14x14x4xbf16>
    %50 = vector.shape_cast %49 : vector<14x14x4xbf16> to vector<196x4xbf16>
    %c7 = arith.constant 7 : index
    %c0_26 = arith.constant 0 : index
    %c0_27 = arith.constant 0 : index
    %51 = vector.load %arg2[%c7, %c0_26, %c0_27] : memref<9x4x128xbf16, #tpu.memory_space<vmem>>, vector<1x4x128xbf16>
    %52 = vector.shape_cast %51 : vector<1x4x128xbf16> to vector<4x128xbf16>
    %cst_28 = arith.constant dense<0.000000e+00> : vector<196x128xf32>
    %53 = tpu.matmul %50, %52, %cst_28 {dimension_numbers = #tpu.dot_dimension_numbers<[1], [0], [0], [1], [0, 0, 1, 1], [], []>} : vector<196x4xbf16>, vector<4x128xbf16>, vector<196x128xf32> -> vector<196x128xf32>
    %54 = arith.addf %48, %53 : vector<196x128xf32>
    %55 = vector.extract_strided_slice %5 {offsets = [2, 2, 0], sizes = [14, 14, 4], strides = [1, 1, 1]} : vector<16x16x4xbf16> to vector<14x14x4xbf16>
    %56 = vector.shape_cast %55 : vector<14x14x4xbf16> to vector<196x4xbf16>
    %c8 = arith.constant 8 : index
    %c0_29 = arith.constant 0 : index
    %c0_30 = arith.constant 0 : index
    %57 = vector.load %arg2[%c8, %c0_29, %c0_30] : memref<9x4x128xbf16, #tpu.memory_space<vmem>>, vector<1x4x128xbf16>
    %58 = vector.shape_cast %57 : vector<1x4x128xbf16> to vector<4x128xbf16>
    %cst_31 = arith.constant dense<0.000000e+00> : vector<196x128xf32>
    %59 = tpu.matmul %56, %58, %cst_31 {dimension_numbers = #tpu.dot_dimension_numbers<[1], [0], [0], [1], [0, 0, 1, 1], [], []>} : vector<196x4xbf16>, vector<4x128xbf16>, vector<196x128xf32> -> vector<196x128xf32>
    %60 = arith.addf %54, %59 : vector<196x128xf32>
    %c0_32 = arith.constant 0 : index
    %c0_33 = arith.constant 0 : index
    %c0_34 = arith.constant 0 : index
    %61 = vector.load %arg3[%c0_32, %c0_33, %c0_34] : memref<1x196x128xf32, #tpu.memory_space<vmem>>, vector<1x196x128xf32>
    %62 = vector.shape_cast %61 : vector<1x196x128xf32> to vector<196x128xf32>
    %63 = vector.shape_cast %60 : vector<196x128xf32> to vector<1x196x128xf32>
    tpu.vector_store %arg3[%c0_32, %c0_33, %c0_34], %63 {strides = array<i32>} : memref<1x196x128xf32, #tpu.memory_space<vmem>>, vector<1x196x128xf32>,
    %c0_35 = arith.constant 0 : index
    %c0_36 = arith.constant 0 : index
    %64 = vector.load %arg4[%c0_35, %c0_36] : memref<1x128xf32, #tpu.memory_space<vmem>>, vector<1x128xf32>
    %cst_37 = arith.constant dense<0.000000e+00> : vector<128xf32>
    %65 = vector.multi_reduction <add>, %60, %cst_37 [0] : vector<196x128xf32> to vector<128xf32>
    %66 = vector.shape_cast %65 : vector<128xf32> to vector<1x128xf32>
    %67 = arith.addf %64, %66 : vector<1x128xf32>
    %c0_38 = arith.constant 0 : index
    %c0_39 = arith.constant 0 : index
    %68 = vector.load %arg4[%c0_38, %c0_39] : memref<1x128xf32, #tpu.memory_space<vmem>>, vector<1x128xf32>
    tpu.vector_store %arg4[%c0_38, %c0_39], %67 {strides = array<i32>} : memref<1x128xf32, #tpu.memory_space<vmem>>, vector<1x128xf32>,
    %c0_40 = arith.constant 0 : index
    %c0_41 = arith.constant 0 : index
    %69 = vector.load %arg5[%c0_40, %c0_41] : memref<1x128xf32, #tpu.memory_space<vmem>>, vector<1x128xf32>
    %70 = arith.mulf %60, %60 : vector<196x128xf32>
    %cst_42 = arith.constant dense<0.000000e+00> : vector<128xf32>
    %71 = vector.multi_reduction <add>, %70, %cst_42 [0] : vector<196x128xf32> to vector<128xf32>
    %72 = vector.shape_cast %71 : vector<128xf32> to vector<1x128xf32>
    %73 = arith.addf %69, %72 : vector<1x128xf32>
    %c0_43 = arith.constant 0 : index
    %c0_44 = arith.constant 0 : index
    %74 = vector.load %arg5[%c0_43, %c0_44] : memref<1x128xf32, #tpu.memory_space<vmem>>, vector<1x128xf32>
    tpu.vector_store %arg5[%c0_43, %c0_44], %73 {strides = array<i32>} : memref<1x128xf32, #tpu.memory_space<vmem>>, vector<1x128xf32>,
    return
  }
  func.func @transform_0(%arg0: i32) -> (i32, i32, i32, i32) {
    %c0_i32 = arith.constant 0 : i32
    %c0_i32_0 = arith.constant 0 : i32
    %c0_i32_1 = arith.constant 0 : i32
    %c0_i32_2 = arith.constant 0 : i32
    return %arg0, %c0_i32, %c0_i32_0, %c0_i32_1 : i32, i32, i32, i32
  }
  func.func @transform_1(%arg0: i32) -> (i32, i32, i32) {
    %c0_i32 = arith.constant 0 : i32
    %c0_i32_0 = arith.constant 0 : i32
    %c0_i32_1 = arith.constant 0 : i32
    %c0_i32_2 = arith.constant 0 : i32
    return %c0_i32, %c0_i32_0, %c0_i32_1 : i32, i32, i32
  }
  func.func @transform_2(%arg0: i32) -> (i32, i32, i32) {
    %c0_i32 = arith.constant 0 : i32
    %c0_i32_0 = arith.constant 0 : i32
    %c0_i32_1 = arith.constant 0 : i32
    return %arg0, %c0_i32, %c0_i32_0 : i32, i32, i32
  }
  func.func @transform_3(%arg0: i32) -> (i32, i32) {
    %c0_i32 = arith.constant 0 : i32
    %c0_i32_0 = arith.constant 0 : i32
    %c0_i32_1 = arith.constant 0 : i32
    return %c0_i32, %c0_i32_0 : i32, i32
  }
  func.func @transform_4(%arg0: i32) -> (i32, i32) {
    %c0_i32 = arith.constant 0 : i32
    %c0_i32_0 = arith.constant 0 : i32
    %c0_i32_1 = arith.constant 0 : i32
    return %c0_i32, %c0_i32_0 : i32, i32
  }
}

module attributes {stable_mosaic.version = 11 : i64} {
  func.func @_bn_relu_kernel(%arg0: i32, %arg1: memref<1x144x128xf32, #tpu.memory_space<vmem>>, %arg2: memref<1x128xf32, #tpu.memory_space<vmem>>, %arg3: memref<1x128xf32, #tpu.memory_space<vmem>>, %arg4: memref<1x144x128xf32, #tpu.memory_space<vmem>>) attributes {dimension_semantics = [#tpu.dimension_semantics<parallel>], iteration_bounds = array<i64: 2>, scalar_prefetch = 0 : i64, scratch_operands = 0 : i64, tpu.core_type = #tpu.core_type<tc>, window_params = [{transform_indices = @transform_0, window_bounds = array<i64: 1, 144, 128>}, {pipeline_mode = #tpu.pipeline_mode<synchronous>, transform_indices = @transform_1, window_bounds = array<i64: 1, 128>}, {pipeline_mode = #tpu.pipeline_mode<synchronous>, transform_indices = @transform_2, window_bounds = array<i64: 1, 128>}, {transform_indices = @transform_3, window_bounds = array<i64: 1, 144, 128>}]} {
    %c0 = arith.constant 0 : index
    %c0_0 = arith.constant 0 : index
    %c0_1 = arith.constant 0 : index
    %0 = vector.load %arg1[%c0, %c0_0, %c0_1] : memref<1x144x128xf32, #tpu.memory_space<vmem>>, vector<1x144x128xf32>
    %c0_2 = arith.constant 0 : index
    %c0_3 = arith.constant 0 : index
    %1 = vector.load %arg2[%c0_2, %c0_3] : memref<1x128xf32, #tpu.memory_space<vmem>>, vector<1x128xf32>
    %2 = vector.shape_cast %1 : vector<1x128xf32> to vector<1x1x128xf32>
    %3 = vector.broadcast %2 : vector<1x1x128xf32> to vector<1x144x128xf32>
    %4 = arith.mulf %0, %3 : vector<1x144x128xf32>
    %c0_4 = arith.constant 0 : index
    %c0_5 = arith.constant 0 : index
    %5 = vector.load %arg3[%c0_4, %c0_5] : memref<1x128xf32, #tpu.memory_space<vmem>>, vector<1x128xf32>
    %6 = vector.shape_cast %5 : vector<1x128xf32> to vector<1x1x128xf32>
    %7 = vector.broadcast %6 : vector<1x1x128xf32> to vector<1x144x128xf32>
    %8 = arith.addf %4, %7 : vector<1x144x128xf32>
    %cst = arith.constant 0.000000e+00 : f32
    %9 = vector.broadcast %cst : f32 to vector<1x144x128xf32>
    %10 = arith.maximumf %8, %9 : vector<1x144x128xf32>
    %c0_6 = arith.constant 0 : index
    %c0_7 = arith.constant 0 : index
    %c0_8 = arith.constant 0 : index
    %11 = vector.load %arg4[%c0_6, %c0_7, %c0_8] : memref<1x144x128xf32, #tpu.memory_space<vmem>>, vector<1x144x128xf32>
    tpu.vector_store %arg4[%c0_6, %c0_7, %c0_8], %10 {strides = array<i32>} : memref<1x144x128xf32, #tpu.memory_space<vmem>>, vector<1x144x128xf32>,
    return
  }
  func.func @transform_0(%arg0: i32) -> (i32, i32, i32) {
    %c0_i32 = arith.constant 0 : i32
    %c0_i32_0 = arith.constant 0 : i32
    %c0_i32_1 = arith.constant 0 : i32
    return %arg0, %c0_i32, %c0_i32_0 : i32, i32, i32
  }
  func.func @transform_1(%arg0: i32) -> (i32, i32) {
    %c0_i32 = arith.constant 0 : i32
    %c0_i32_0 = arith.constant 0 : i32
    %c0_i32_1 = arith.constant 0 : i32
    return %c0_i32, %c0_i32_0 : i32, i32
  }
  func.func @transform_2(%arg0: i32) -> (i32, i32) {
    %c0_i32 = arith.constant 0 : i32
    %c0_i32_0 = arith.constant 0 : i32
    %c0_i32_1 = arith.constant 0 : i32
    return %c0_i32, %c0_i32_0 : i32, i32
  }
  func.func @transform_3(%arg0: i32) -> (i32, i32, i32) {
    %c0_i32 = arith.constant 0 : i32
    %c0_i32_0 = arith.constant 0 : i32
    %c0_i32_1 = arith.constant 0 : i32
    return %arg0, %c0_i32, %c0_i32_0 : i32, i32, i32
  }
}

module attributes {stable_mosaic.version = 11 : i64} {
  func.func @_bn_relu_conv_stats_kernel(%arg0: i32, %arg1: memref<1x14x14x128xf32, #tpu.memory_space<vmem>>, %arg2: memref<1x128xf32, #tpu.memory_space<vmem>>, %arg3: memref<1x128xf32, #tpu.memory_space<vmem>>, %arg4: memref<9x128x128xbf16, #tpu.memory_space<vmem>>, %arg5: memref<1x144x128xf32, #tpu.memory_space<vmem>>, %arg6: memref<1x128xf32, #tpu.memory_space<vmem>>, %arg7: memref<1x128xf32, #tpu.memory_space<vmem>>) attributes {dimension_semantics = [#tpu.dimension_semantics<arbitrary>], iteration_bounds = array<i64: 2>, scalar_prefetch = 0 : i64, scratch_operands = 0 : i64, tpu.core_type = #tpu.core_type<tc>, window_params = [{transform_indices = @transform_0, window_bounds = array<i64: 1, 14, 14, 128>}, {pipeline_mode = #tpu.pipeline_mode<synchronous>, transform_indices = @transform_1, window_bounds = array<i64: 1, 128>}, {pipeline_mode = #tpu.pipeline_mode<synchronous>, transform_indices = @transform_2, window_bounds = array<i64: 1, 128>}, {pipeline_mode = #tpu.pipeline_mode<synchronous>, transform_indices = @transform_3, window_bounds = array<i64: 9, 128, 128>}, {transform_indices = @transform_4, window_bounds = array<i64: 1, 144, 128>}, {pipeline_mode = #tpu.pipeline_mode<synchronous>, transform_indices = @transform_5, window_bounds = array<i64: 1, 128>}, {pipeline_mode = #tpu.pipeline_mode<synchronous>, transform_indices = @transform_6, window_bounds = array<i64: 1, 128>}]} {
    %c0_i32 = arith.constant 0 : i32
    %0 = arith.cmpi eq, %arg0, %c0_i32 : i32
    %1 = arith.extui %0 : i1 to i32
    %c0_i32_0 = arith.constant 0 : i32
    %2 = arith.cmpi ne, %1, %c0_i32_0 : i32
    scf.if %2 {
      %cst_50 = arith.constant 0.000000e+00 : f32
      %85 = vector.broadcast %cst_50 : f32 to vector<1x128xf32>
      %c0_51 = arith.constant 0 : index
      %c0_52 = arith.constant 0 : index
      %86 = vector.load %arg6[%c0_51, %c0_52] : memref<1x128xf32, #tpu.memory_space<vmem>>, vector<1x128xf32>
      tpu.vector_store %arg6[%c0_51, %c0_52], %85 {strides = array<i32>} : memref<1x128xf32, #tpu.memory_space<vmem>>, vector<1x128xf32>,
      %cst_53 = arith.constant 0.000000e+00 : f32
      %87 = vector.broadcast %cst_53 : f32 to vector<1x128xf32>
      %c0_54 = arith.constant 0 : index
      %c0_55 = arith.constant 0 : index
      %88 = vector.load %arg7[%c0_54, %c0_55] : memref<1x128xf32, #tpu.memory_space<vmem>>, vector<1x128xf32>
      tpu.vector_store %arg7[%c0_54, %c0_55], %87 {strides = array<i32>} : memref<1x128xf32, #tpu.memory_space<vmem>>, vector<1x128xf32>,
    } else {
    }
    %c0 = arith.constant 0 : index
    %c0_1 = arith.constant 0 : index
    %c0_2 = arith.constant 0 : index
    %c0_3 = arith.constant 0 : index
    %3 = vector.load %arg1[%c0, %c0_1, %c0_2, %c0_3] : memref<1x14x14x128xf32, #tpu.memory_space<vmem>>, vector<1x14x14x128xf32>
    %4 = vector.shape_cast %3 : vector<1x14x14x128xf32> to vector<14x14x128xf32>
    %c0_4 = arith.constant 0 : index
    %c0_5 = arith.constant 0 : index
    %5 = vector.load %arg2[%c0_4, %c0_5] : memref<1x128xf32, #tpu.memory_space<vmem>>, vector<1x128xf32>
    %6 = vector.shape_cast %5 : vector<1x128xf32> to vector<1x1x128xf32>
    %7 = vector.broadcast %6 : vector<1x1x128xf32> to vector<14x14x128xf32>
    %8 = arith.mulf %4, %7 : vector<14x14x128xf32>
    %c0_6 = arith.constant 0 : index
    %c0_7 = arith.constant 0 : index
    %9 = vector.load %arg3[%c0_6, %c0_7] : memref<1x128xf32, #tpu.memory_space<vmem>>, vector<1x128xf32>
    %10 = vector.shape_cast %9 : vector<1x128xf32> to vector<1x1x128xf32>
    %11 = vector.broadcast %10 : vector<1x1x128xf32> to vector<14x14x128xf32>
    %12 = arith.addf %8, %11 : vector<14x14x128xf32>
    %cst = arith.constant 0.000000e+00 : f32
    %13 = vector.broadcast %cst : f32 to vector<14x14x128xf32>
    %14 = arith.maximumf %12, %13 : vector<14x14x128xf32>
    %15 = arith.truncf %14 : vector<14x14x128xf32> to vector<14x14x128xbf16>
    %cst_8 = arith.constant 0.000000e+00 : f32
    %16 = vector.broadcast %cst_8 : f32 to vector<144x128xf32>
    %17 = vector.extract_strided_slice %15 {offsets = [0, 0, 0], sizes = [12, 12, 128], strides = [1, 1, 1]} : vector<14x14x128xbf16> to vector<12x12x128xbf16>
    %18 = vector.shape_cast %17 : vector<12x12x128xbf16> to vector<144x128xbf16>
    %c0_9 = arith.constant 0 : index
    %c0_10 = arith.constant 0 : index
    %c0_11 = arith.constant 0 : index
    %19 = vector.load %arg4[%c0_9, %c0_10, %c0_11] : memref<9x128x128xbf16, #tpu.memory_space<vmem>>, vector<1x128x128xbf16>
    %20 = vector.shape_cast %19 : vector<1x128x128xbf16> to vector<128x128xbf16>
    %cst_12 = arith.constant dense<0.000000e+00> : vector<144x128xf32>
    %21 = tpu.matmul %18, %20, %cst_12 {dimension_numbers = #tpu.dot_dimension_numbers<[1], [0], [0], [1], [0, 0, 1, 1], [], []>} : vector<144x128xbf16>, vector<128x128xbf16>, vector<144x128xf32> -> vector<144x128xf32>
    %22 = arith.addf %16, %21 : vector<144x128xf32>
    %23 = vector.extract_strided_slice %15 {offsets = [0, 1, 0], sizes = [12, 12, 128], strides = [1, 1, 1]} : vector<14x14x128xbf16> to vector<12x12x128xbf16>
    %24 = vector.shape_cast %23 : vector<12x12x128xbf16> to vector<144x128xbf16>
    %c1 = arith.constant 1 : index
    %c0_13 = arith.constant 0 : index
    %c0_14 = arith.constant 0 : index
    %25 = vector.load %arg4[%c1, %c0_13, %c0_14] : memref<9x128x128xbf16, #tpu.memory_space<vmem>>, vector<1x128x128xbf16>
    %26 = vector.shape_cast %25 : vector<1x128x128xbf16> to vector<128x128xbf16>
    %cst_15 = arith.constant dense<0.000000e+00> : vector<144x128xf32>
    %27 = tpu.matmul %24, %26, %cst_15 {dimension_numbers = #tpu.dot_dimension_numbers<[1], [0], [0], [1], [0, 0, 1, 1], [], []>} : vector<144x128xbf16>, vector<128x128xbf16>, vector<144x128xf32> -> vector<144x128xf32>
    %28 = arith.addf %22, %27 : vector<144x128xf32>
    %29 = vector.extract_strided_slice %15 {offsets = [0, 2, 0], sizes = [12, 12, 128], strides = [1, 1, 1]} : vector<14x14x128xbf16> to vector<12x12x128xbf16>
    %30 = vector.shape_cast %29 : vector<12x12x128xbf16> to vector<144x128xbf16>
    %c2 = arith.constant 2 : index
    %c0_16 = arith.constant 0 : index
    %c0_17 = arith.constant 0 : index
    %31 = vector.load %arg4[%c2, %c0_16, %c0_17] : memref<9x128x128xbf16, #tpu.memory_space<vmem>>, vector<1x128x128xbf16>
    %32 = vector.shape_cast %31 : vector<1x128x128xbf16> to vector<128x128xbf16>
    %cst_18 = arith.constant dense<0.000000e+00> : vector<144x128xf32>
    %33 = tpu.matmul %30, %32, %cst_18 {dimension_numbers = #tpu.dot_dimension_numbers<[1], [0], [0], [1], [0, 0, 1, 1], [], []>} : vector<144x128xbf16>, vector<128x128xbf16>, vector<144x128xf32> -> vector<144x128xf32>
    %34 = arith.addf %28, %33 : vector<144x128xf32>
    %35 = vector.extract_strided_slice %15 {offsets = [1, 0, 0], sizes = [12, 12, 128], strides = [1, 1, 1]} : vector<14x14x128xbf16> to vector<12x12x128xbf16>
    %36 = vector.shape_cast %35 : vector<12x12x128xbf16> to vector<144x128xbf16>
    %c3 = arith.constant 3 : index
    %c0_19 = arith.constant 0 : index
    %c0_20 = arith.constant 0 : index
    %37 = vector.load %arg4[%c3, %c0_19, %c0_20] : memref<9x128x128xbf16, #tpu.memory_space<vmem>>, vector<1x128x128xbf16>
    %38 = vector.shape_cast %37 : vector<1x128x128xbf16> to vector<128x128xbf16>
    %cst_21 = arith.constant dense<0.000000e+00> : vector<144x128xf32>
    %39 = tpu.matmul %36, %38, %cst_21 {dimension_numbers = #tpu.dot_dimension_numbers<[1], [0], [0], [1], [0, 0, 1, 1], [], []>} : vector<144x128xbf16>, vector<128x128xbf16>, vector<144x128xf32> -> vector<144x128xf32>
    %40 = arith.addf %34, %39 : vector<144x128xf32>
    %41 = vector.extract_strided_slice %15 {offsets = [1, 1, 0], sizes = [12, 12, 128], strides = [1, 1, 1]} : vector<14x14x128xbf16> to vector<12x12x128xbf16>
    %42 = vector.shape_cast %41 : vector<12x12x128xbf16> to vector<144x128xbf16>
    %c4 = arith.constant 4 : index
    %c0_22 = arith.constant 0 : index
    %c0_23 = arith.constant 0 : index
    %43 = vector.load %arg4[%c4, %c0_22, %c0_23] : memref<9x128x128xbf16, #tpu.memory_space<vmem>>, vector<1x128x128xbf16>
    %44 = vector.shape_cast %43 : vector<1x128x128xbf16> to vector<128x128xbf16>
    %cst_24 = arith.constant dense<0.000000e+00> : vector<144x128xf32>
    %45 = tpu.matmul %42, %44, %cst_24 {dimension_numbers = #tpu.dot_dimension_numbers<[1], [0], [0], [1], [0, 0, 1, 1], [], []>} : vector<144x128xbf16>, vector<128x128xbf16>, vector<144x128xf32> -> vector<144x128xf32>
    %46 = arith.addf %40, %45 : vector<144x128xf32>
    %47 = vector.extract_strided_slice %15 {offsets = [1, 2, 0], sizes = [12, 12, 128], strides = [1, 1, 1]} : vector<14x14x128xbf16> to vector<12x12x128xbf16>
    %48 = vector.shape_cast %47 : vector<12x12x128xbf16> to vector<144x128xbf16>
    %c5 = arith.constant 5 : index
    %c0_25 = arith.constant 0 : index
    %c0_26 = arith.constant 0 : index
    %49 = vector.load %arg4[%c5, %c0_25, %c0_26] : memref<9x128x128xbf16, #tpu.memory_space<vmem>>, vector<1x128x128xbf16>
    %50 = vector.shape_cast %49 : vector<1x128x128xbf16> to vector<128x128xbf16>
    %cst_27 = arith.constant dense<0.000000e+00> : vector<144x128xf32>
    %51 = tpu.matmul %48, %50, %cst_27 {dimension_numbers = #tpu.dot_dimension_numbers<[1], [0], [0], [1], [0, 0, 1, 1], [], []>} : vector<144x128xbf16>, vector<128x128xbf16>, vector<144x128xf32> -> vector<144x128xf32>
    %52 = arith.addf %46, %51 : vector<144x128xf32>
    %53 = vector.extract_strided_slice %15 {offsets = [2, 0, 0], sizes = [12, 12, 128], strides = [1, 1, 1]} : vector<14x14x128xbf16> to vector<12x12x128xbf16>
    %54 = vector.shape_cast %53 : vector<12x12x128xbf16> to vector<144x128xbf16>
    %c6 = arith.constant 6 : index
    %c0_28 = arith.constant 0 : index
    %c0_29 = arith.constant 0 : index
    %55 = vector.load %arg4[%c6, %c0_28, %c0_29] : memref<9x128x128xbf16, #tpu.memory_space<vmem>>, vector<1x128x128xbf16>
    %56 = vector.shape_cast %55 : vector<1x128x128xbf16> to vector<128x128xbf16>
    %cst_30 = arith.constant dense<0.000000e+00> : vector<144x128xf32>
    %57 = tpu.matmul %54, %56, %cst_30 {dimension_numbers = #tpu.dot_dimension_numbers<[1], [0], [0], [1], [0, 0, 1, 1], [], []>} : vector<144x128xbf16>, vector<128x128xbf16>, vector<144x128xf32> -> vector<144x128xf32>
    %58 = arith.addf %52, %57 : vector<144x128xf32>
    %59 = vector.extract_strided_slice %15 {offsets = [2, 1, 0], sizes = [12, 12, 128], strides = [1, 1, 1]} : vector<14x14x128xbf16> to vector<12x12x128xbf16>
    %60 = vector.shape_cast %59 : vector<12x12x128xbf16> to vector<144x128xbf16>
    %c7 = arith.constant 7 : index
    %c0_31 = arith.constant 0 : index
    %c0_32 = arith.constant 0 : index
    %61 = vector.load %arg4[%c7, %c0_31, %c0_32] : memref<9x128x128xbf16, #tpu.memory_space<vmem>>, vector<1x128x128xbf16>
    %62 = vector.shape_cast %61 : vector<1x128x128xbf16> to vector<128x128xbf16>
    %cst_33 = arith.constant dense<0.000000e+00> : vector<144x128xf32>
    %63 = tpu.matmul %60, %62, %cst_33 {dimension_numbers = #tpu.dot_dimension_numbers<[1], [0], [0], [1], [0, 0, 1, 1], [], []>} : vector<144x128xbf16>, vector<128x128xbf16>, vector<144x128xf32> -> vector<144x128xf32>
    %64 = arith.addf %58, %63 : vector<144x128xf32>
    %65 = vector.extract_strided_slice %15 {offsets = [2, 2, 0], sizes = [12, 12, 128], strides = [1, 1, 1]} : vector<14x14x128xbf16> to vector<12x12x128xbf16>
    %66 = vector.shape_cast %65 : vector<12x12x128xbf16> to vector<144x128xbf16>
    %c8 = arith.constant 8 : index
    %c0_34 = arith.constant 0 : index
    %c0_35 = arith.constant 0 : index
    %67 = vector.load %arg4[%c8, %c0_34, %c0_35] : memref<9x128x128xbf16, #tpu.memory_space<vmem>>, vector<1x128x128xbf16>
    %68 = vector.shape_cast %67 : vector<1x128x128xbf16> to vector<128x128xbf16>
    %cst_36 = arith.constant dense<0.000000e+00> : vector<144x128xf32>
    %69 = tpu.matmul %66, %68, %cst_36 {dimension_numbers = #tpu.dot_dimension_numbers<[1], [0], [0], [1], [0, 0, 1, 1], [], []>} : vector<144x128xbf16>, vector<128x128xbf16>, vector<144x128xf32> -> vector<144x128xf32>
    %70 = arith.addf %64, %69 : vector<144x128xf32>
    %c0_37 = arith.constant 0 : index
    %c0_38 = arith.constant 0 : index
    %c0_39 = arith.constant 0 : index
    %71 = vector.load %arg5[%c0_37, %c0_38, %c0_39] : memref<1x144x128xf32, #tpu.memory_space<vmem>>, vector<1x144x128xf32>
    %72 = vector.shape_cast %71 : vector<1x144x128xf32> to vector<144x128xf32>
    %73 = vector.shape_cast %70 : vector<144x128xf32> to vector<1x144x128xf32>
    tpu.vector_store %arg5[%c0_37, %c0_38, %c0_39], %73 {strides = array<i32>} : memref<1x144x128xf32, #tpu.memory_space<vmem>>, vector<1x144x128xf32>,
    %c0_40 = arith.constant 0 : index
    %c0_41 = arith.constant 0 : index
    %74 = vector.load %arg6[%c0_40, %c0_41] : memref<1x128xf32, #tpu.memory_space<vmem>>, vector<1x128xf32>
    %cst_42 = arith.constant dense<0.000000e+00> : vector<128xf32>
    %75 = vector.multi_reduction <add>, %70, %cst_42 [0] : vector<144x128xf32> to vector<128xf32>
    %76 = vector.shape_cast %75 : vector<128xf32> to vector<1x128xf32>
    %77 = arith.addf %74, %76 : vector<1x128xf32>
    %c0_43 = arith.constant 0 : index
    %c0_44 = arith.constant 0 : index
    %78 = vector.load %arg6[%c0_43, %c0_44] : memref<1x128xf32, #tpu.memory_space<vmem>>, vector<1x128xf32>
    tpu.vector_store %arg6[%c0_43, %c0_44], %77 {strides = array<i32>} : memref<1x128xf32, #tpu.memory_space<vmem>>, vector<1x128xf32>,
    %c0_45 = arith.constant 0 : index
    %c0_46 = arith.constant 0 : index
    %79 = vector.load %arg7[%c0_45, %c0_46] : memref<1x128xf32, #tpu.memory_space<vmem>>, vector<1x128xf32>
    %80 = arith.mulf %70, %70 : vector<144x128xf32>
    %cst_47 = arith.constant dense<0.000000e+00> : vector<128xf32>
    %81 = vector.multi_reduction <add>, %80, %cst_47 [0] : vector<144x128xf32> to vector<128xf32>
    %82 = vector.shape_cast %81 : vector<128xf32> to vector<1x128xf32>
    %83 = arith.addf %79, %82 : vector<1x128xf32>
    %c0_48 = arith.constant 0 : index
    %c0_49 = arith.constant 0 : index
    %84 = vector.load %arg7[%c0_48, %c0_49] : memref<1x128xf32, #tpu.memory_space<vmem>>, vector<1x128xf32>
    tpu.vector_store %arg7[%c0_48, %c0_49], %83 {strides = array<i32>} : memref<1x128xf32, #tpu.memory_space<vmem>>, vector<1x128xf32>,
    return
  }
  func.func @transform_0(%arg0: i32) -> (i32, i32, i32, i32) {
    %c0_i32 = arith.constant 0 : i32
    %c0_i32_0 = arith.constant 0 : i32
    %c0_i32_1 = arith.constant 0 : i32
    %c0_i32_2 = arith.constant 0 : i32
    return %arg0, %c0_i32, %c0_i32_0, %c0_i32_1 : i32, i32, i32, i32
  }
  func.func @transform_1(%arg0: i32) -> (i32, i32) {
    %c0_i32 = arith.constant 0 : i32
    %c0_i32_0 = arith.constant 0 : i32
    %c0_i32_1 = arith.constant 0 : i32
    return %c0_i32, %c0_i32_0 : i32, i32
  }
  func.func @transform_2(%arg0: i32) -> (i32, i32) {
    %c0_i32 = arith.constant 0 : i32
    %c0_i32_0 = arith.constant 0 : i32
    %c0_i32_1 = arith.constant 0 : i32
    return %c0_i32, %c0_i32_0 : i32, i32
  }
  func.func @transform_3(%arg0: i32) -> (i32, i32, i32) {
    %c0_i32 = arith.constant 0 : i32
    %c0_i32_0 = arith.constant 0 : i32
    %c0_i32_1 = arith.constant 0 : i32
    %c0_i32_2 = arith.constant 0 : i32
    return %c0_i32, %c0_i32_0, %c0_i32_1 : i32, i32, i32
  }
  func.func @transform_4(%arg0: i32) -> (i32, i32, i32) {
    %c0_i32 = arith.constant 0 : i32
    %c0_i32_0 = arith.constant 0 : i32
    %c0_i32_1 = arith.constant 0 : i32
    return %arg0, %c0_i32, %c0_i32_0 : i32, i32, i32
  }
  func.func @transform_5(%arg0: i32) -> (i32, i32) {
    %c0_i32 = arith.constant 0 : i32
    %c0_i32_0 = arith.constant 0 : i32
    %c0_i32_1 = arith.constant 0 : i32
    return %c0_i32, %c0_i32_0 : i32, i32
  }
  func.func @transform_6(%arg0: i32) -> (i32, i32) {
    %c0_i32 = arith.constant 0 : i32
    %c0_i32_0 = arith.constant 0 : i32
    %c0_i32_1 = arith.constant 0 : i32
    return %c0_i32, %c0_i32_0 : i32, i32
  }
}

</mosaic_0001>

<bundles_post_ra>
// kernel: con2d_forward.5
= control target key start
LH: loop header
LB: loop body
LE: loop exit
PB: predicated region body
PF: predicated region fallthrough
CT: control target
= control target key end

     0   :  { %s372_s12 = smov 0   ;;  %s475_s0 = inlined_call_operand.vmem [shape: f32[2,144,128], index: 0, kind: input, shape index: {}]   ;;  %s476_s1 = inlined_call_operand.vmem [shape: f32[1,128], index: 1, kind: input, shape index: {}]   ;;  %s477_s2 = inlined_call_operand.vmem [shape: f32[1,128], index: 2, kind: input, shape index: {}]   ;;  %s478_s3 = inlined_call_operand.vmem [shape: f32[2,144,128], index: 3, kind: output, shape index: {}]  }
   0x1 LB: > { %s324_s13 = sadd.s32 4294967295, %s350_s12   ;;  %p328_p0 = scmp.ge.s32.totalorder %s350_s12, 1  ;;  %s350_s12 = sphi %s372_s12, %s13_s12  }
   0x2   : > { %p137_p1 = scmp.lt.s32.totalorder %s350_s12, 3 }
   0x4   : > { %p138_p2 = pnand %p328_p0, %p137_p1 }
   0x5   : > { %p161_p3 = scmp.lt.s32.totalorder (!%p138_p2), %s324_s13, 1 }
   0x6   : > { %141 = sbr.rel (%p138_p2) target bundleno = 40 (0x28), region = 32 }
   0xb   : > { %s480_s13 = smov (!%p161_p3, %s324_s13), 1  ;;  %v383_v0 = vld [vmem:[%s476_s1] ss:$0 sm:$0xff] }
   0xc   : > { %s333_s14 = smul.u32 144, %s480_s13  ;;  %v393_v1 = vld [vmem:[%s477_s2] ss:$0 sm:$0xff] }
   0xe   : > { %s388_s19 = scalar_lea.vmem %s475_s0, %s333_s14  ;;  %s416_s24 = scalar_lea.vmem %s478_s3, %s333_s14 }
   0xf   : > { %v171_v2 = vld [vmem:[%s388_s19] sm:$0xff]  ;;  %v172_v3 = vld [vmem:[%s388_s19 + $0x8] sm:$0xff]  ;;  %v173_v4 = vld [vmem:[%s388_s19 + $0x10] sm:$0xff] }
  0x10   : > { %v193_v5 = vmul.f32 %v383_v0, %v171_v2  ;;  %v194_v6 = vmul.f32 %v383_v0, %v172_v3  ;;  %v195_v7 = vmul.f32 %v383_v0, %v173_v4  ;;  %v174_v8 = vld [vmem:[%s388_s19 + $0x18] sm:$0xff]  ;;  %v175_v9 = vld [vmem:[%s388_s19 + $0x20] sm:$0xff]  ;;  %v176_v10 = vld [vmem:[%s388_s19 + $0x28] sm:$0xff] }
  0x11   : > { %v196_v11 = vmul.f32 %v383_v0, %v174_v8  ;;  %v197_v12 = vmul.f32 %v383_v0, %v175_v9  ;;  %v198_v13 = vmul.f32 %v383_v0, %v176_v10  ;;  %v177_v14 = vld [vmem:[%s388_s19 + $0x30] sm:$0xff]  ;;  %v178_v15 = vld [vmem:[%s388_s19 + $0x38] sm:$0xff]  ;;  %v179_v24 = vld [vmem:[%s388_s19 + $0x40] sm:$0xff] }
  0x12   : > { %v215_v16 = vadd.f32 %v393_v1, %v193_v5  ;;  %v216_v17 = vadd.f32 %v393_v1, %v194_v6  ;;  %v217_v18 = vadd.f32 %v393_v1, %v195_v7  ;;  %v199_v19 = vmul.f32 %v383_v0, %v177_v14  ;;  %v180_v25 = vld [vmem:[%s388_s19 + $0x48] sm:$0xff]  ;;  %v181_v26 = vld [vmem:[%s388_s19 + $0x50] sm:$0xff]  ;;  %v182_v31 = vld [vmem:[%s388_s19 + $0x58] sm:$0xff] }
  0x13   : > { %v218_v20 = vadd.f32 %v393_v1, %v196_v11  ;;  %v219_v21 = vadd.f32 %v393_v1, %v197_v12  ;;  %v220_v22 = vadd.f32 %v393_v1, %v198_v13  ;;  %v200_v23 = vmul.f32 %v383_v0, %v178_v15  ;;  %v183_v32 = vld [vmem:[%s388_s19 + $0x60] sm:$0xff]  ;;  %v184_v33 = vld [vmem:[%s388_s19 + $0x68] sm:$0xff]  ;;  %v185_v37 = vld [vmem:[%s388_s19 + $0x70] sm:$0xff] }
  0x14   : > { %v233_v27 = vmax.f32 %v215_v16, 0.0  ;;  %v234_v28 = vmax.f32 %v216_v17, 0.0  ;;  %v235_v29 = vmax.f32 %v217_v18, 0.0  ;;  %v221_v30 = vadd.f32 %v393_v1, %v199_v19  ;;  %v186_v42 = vld [vmem:[%s388_s19 + $0x78] sm:$0xff]  ;;  %v187_v54 = vld [vmem:[%s388_s19 + $0x80] sm:$0xff]  ;;  %v188_v55 = vld [vmem:[%s388_s19 + $0x88] sm:$0xff] }
  0x15   : > { %v236_v34 = vmax.f32 %v218_v20, 0.0  ;;  %v237_v35 = vmax.f32 %v219_v21, 0.0  ;;  %v222_v36 = vadd.f32 %v393_v1, %v200_v23  ;;  %v238_v38 = vmax.f32 %v220_v22, 0.0 }
  0x16   : > { %251 = vst [vmem:[%s416_s24] sm:$0xff] %v233_v27  ;;  %v201_v39 = vmul.f32 %v383_v0, %v179_v24  ;;  %v202_v40 = vmul.f32 %v383_v0, %v180_v25  ;;  %v203_v41 = vmul.f32 %v383_v0, %v181_v26  ;;  %v239_v43 = vmax.f32 %v221_v30, 0.0 }
  0x17   : > { %252 = vst [vmem:[%s416_s24 + $0x8] sm:$0xff] %v234_v28  ;;  %v204_v44 = vmul.f32 %v383_v0, %v182_v31  ;;  %v205_v45 = vmul.f32 %v383_v0, %v183_v32  ;;  %v206_v46 = vmul.f32 %v383_v0, %v184_v33  ;;  %v207_v50 = vmul.f32 %v383_v0, %v185_v37 }
  0x18   : > { %253 = vst [vmem:[%s416_s24 + $0x10] sm:$0xff] %v235_v29  ;;  %v223_v47 = vadd.f32 %v393_v1, %v201_v39  ;;  %v224_v48 = vadd.f32 %v393_v1, %v202_v40  ;;  %v225_v49 = vadd.f32 %v393_v1, %v203_v41  ;;  %v240_v51 = vmax.f32 %v222_v36, 0.0 }
  0x19   : > { %254 = vst [vmem:[%s416_s24 + $0x18] sm:$0xff] %v236_v34  ;;  %v226_v52 = vadd.f32 %v393_v1, %v204_v44  ;;  %v208_v53 = vmul.f32 %v383_v0, %v186_v42  ;;  %v227_v57 = vadd.f32 %v393_v1, %v205_v45  ;;  %v228_v59 = vadd.f32 %v393_v1, %v206_v46 }
  0x1a   : > { %255 = vst [vmem:[%s416_s24 + $0x20] sm:$0xff] %v237_v35  ;;  %v241_v56 = vmax.f32 %v223_v47, 0.0  ;;  %v242_v58 = vmax.f32 %v224_v48, 0.0  ;;  %v243_v60 = vmax.f32 %v225_v49, 0.0  ;;  %v229_v61 = vadd.f32 %v393_v1, %v207_v50 }
  0x1b   : > { %256 = vst [vmem:[%s416_s24 + $0x28] sm:$0xff] %v238_v38  ;;  %v209_v62 = vmul.f32 %v383_v0, %v187_v54  ;;  %v210_v63 = vmul.f32 %v383_v0, %v188_v55  ;;  %v244_v2 = vmax.f32 %v226_v52, 0.0  ;;  %v230_v3 = vadd.f32 %v393_v1, %v208_v53 }
  0x1c   : > { %257 = vst [vmem:[%s416_s24 + $0x30] sm:$0xff] %v239_v43  ;;  %v245_v4 = vmax.f32 %v227_v57, 0.0  ;;  %v246_v6 = vmax.f32 %v228_v59, 0.0  ;;  %v247_v8 = vmax.f32 %v229_v61, 0.0 }
  0x1d   : > { %258 = vst [vmem:[%s416_s24 + $0x38] sm:$0xff] %v240_v51  ;;  %v231_v5 = vadd.f32 %v393_v1, %v209_v62  ;;  %v232_v7 = vadd.f32 %v393_v1, %v210_v63  ;;  %v248_v0 = vmax.f32 %v230_v3, 0.0 }
  0x1e   : > { %259 = vst [vmem:[%s416_s24 + $0x40] sm:$0xff] %v241_v56 }
  0x1f   : > { %260 = vst [vmem:[%s416_s24 + $0x48] sm:$0xff] %v242_v58  ;;  %v249_v9 = vmax.f32 %v231_v5, 0.0  ;;  %v250_v10 = vmax.f32 %v232_v7, 0.0 }
  0x20   : > { %261 = vst [vmem:[%s416_s24 + $0x50] sm:$0xff] %v243_v60 }
  0x21   : > { %262 = vst [vmem:[%s416_s24 + $0x58] sm:$0xff] %v244_v2 }
  0x22   : > { %263 = vst [vmem:[%s416_s24 + $0x60] sm:$0xff] %v245_v4 }
  0x23   : > { %264 = vst [vmem:[%s416_s24 + $0x68] sm:$0xff] %v246_v6 }
  0x24   : > { %265 = vst [vmem:[%s416_s24 + $0x70] sm:$0xff] %v247_v8 }
  0x25   : > { %266 = vst [vmem:[%s416_s24 + $0x78] sm:$0xff] %v248_v0 }
  0x26   : > { %267 = vst [vmem:[%s416_s24 + $0x80] sm:$0xff] %v249_v9 }
  0x27   : > { %268 = vst [vmem:[%s416_s24 + $0x88] sm:$0xff] %v250_v10 }
  0x28 PF: > { %s13_s12 = sadd.s32 1, %s350_s12  }
  0x29   : > { %p10_p4 = scmp.ge.s32.totalorder %s13_s12, 4  }
  0x2b   :  { %12 = sbr.rel (!%p10_p4) target bundleno = 1 (0x1), region = 62 }

// kernel: con2d_forward.4
= control target key start
LH: loop header
LB: loop body
LE: loop exit
PB: predicated region body
PF: predicated region fallthrough
CT: control target
= control target key end

     0   :  { %s3838_s21 = smov 0   ;;  %s5615_s0 = inlined_call_operand.vmem [shape: f32[2,14,14,128], index: 0, kind: input, shape index: {}]   ;;  %s5616_s1 = inlined_call_operand.vmem [shape: f32[1,128], index: 1, kind: input, shape index: {}]   ;;  %s5617_s2 = inlined_call_operand.vmem [shape: f32[1,128], index: 2, kind: input, shape index: {}]   ;;  %s5618_s3 = inlined_call_operand.vmem [shape: bf16[9,128,128], index: 3, kind: input, shape index: {}]   ;;  %s5619_s4 = inlined_call_operand.vmem [shape: f32[2,144,128], index: 4, kind: output, shape index: {0}]   ;;  %s5620_s5 = inlined_call_operand.vmem [shape: f32[1,128], index: 5, kind: output, shape index: {1}]   ;;  %s5621_s6 = inlined_call_operand.vmem [shape: f32[1,128], index: 6, kind: output, shape index: {2}]  }
   0x1 LB: > { %s3241_s22 = sadd.s32 4294967295, %s3800_s21   ;;  %p3245_p0 = scmp.ge.s32.totalorder %s3800_s21, 1  ;;  %s3800_s21 = sphi %s3838_s21, %s17_s21  }
   0x2   : > { %p207_p1 = scmp.lt.s32.totalorder %s3800_s21, 3 }
   0x4   : > { %p208_p2 = pnand %p3245_p0, %p207_p1 }
   0x6   : > { %211 = sbr.rel (%p208_p2) target bundleno = 839 (0x347), region = 36 }
   0xb   : > { %p237_p3 = scmp.lt.s32.totalorder %s3241_s22, 1  ;;  %p3248_p4 = scmp.ne.s32.totalorder %s3241_s22, 0 }
   0xd   : > { %s238_s23 = scalar_select %p237_p3, %s3241_s22, 1 }
   0xe   : > { %250 = sbr.rel (%p3248_p4) target bundleno = 22 (0x16), region = 40 }
   0xf   : > { %s3777_s24 = smul.u32 224, %s238_s23 }
  0x10   : > { %s3778_s25 = smul.u32 144, %s238_s23 }
  0x11   : > { %s3849_s28 = scalar_lea.vmem %s5615_s0, %s3777_s24 }
  0x12   : > { %s3854_s7 = scalar_lea.vmem %s5619_s4, %s3778_s25 }
  0x13   : > { %v3802_v0 = vmov 0.0  }
  0x14   : > { %251 = vst [vmem:[%s5620_s5] sm:$0x1] %v3802_v0 }
  0x15   : > { %252 = vst [vmem:[%s5621_s6] sm:$0x1] %v3802_v0 }
  0x16 PF: > { %v3696_v1 = vld [vmem:[%s5618_s3 + $0x78] sm:$0xff]  ;;  %v3695_v2 = vld [vmem:[%s5618_s3 + $0x70] sm:$0xff]  ;;  %v253_v3 = vld [vmem:[%s3849_s28] sm:$0xff]  ;;  %vm449_vm0 = vcmask 1041408   ;;  %vm453_vm1 = vcmask 1043458   ;;  %vm1405_vm9 = vcmask 1040384  }
  0x17   : > { %3753 = vmatpush.bf16.msra.mxu1 %v3696_v1  ;;  %3754 = vmatpush.bf16.msra.mxu2 %v3696_v1  ;;  %v254_v4 = vld [vmem:[%s3849_s28 + $0x8] sm:$0x3f]  ;;  %v255_v5 = vld [vmem:[%s3849_s28 + $0x10] sm:$0xff]  ;;  %v260_v8 = vld [vmem:[%s3849_s28 + $0x38] sm:$0x3f]  ;;  %vm1406_vm10 = vcmask 1042434  }
  0x18   : > { %v258_v6 = vld [vmem:[%s3849_s28 + $0x28] sm:$0x3f]  ;;  %3755 = vmatpush.bf16.msra.mxu3 %v3696_v1  ;;  %1164 = vmatpush.bf16.msra.mxu0 %v3696_v1  ;;  %v259_v7 = vld [vmem:[%s3849_s28 + $0x30] sm:$0xff]  ;;  %v3877_v9 = vld [vmem:[%s5616_s1] ss:$0 sm:$0xff]  ;;  %vm1408_vm12 = vcmask 1044484  }
  0x19   : > { %v3882_v10 = vld [vmem:[%s5617_s2] ss:$0 sm:$0xff]  ;;  %v3694_v11 = vld [vmem:[%s5618_s3 + $0x68] sm:$0xff]  ;;  %v256_v12 = vld [vmem:[%s3849_s28 + $0x18] sm:$0x3f]  ;;  %v285_v13 = vmul.f32 %v3877_v9, %v253_v3  ;;  %v286_v14 = vmul.f32 %v3877_v9, %v254_v4  ;;  %v287_v15 = vmul.f32 %v3877_v9, %v255_v5  ;;  %v290_v16 = vmul.f32 %v3877_v9, %v258_v6 }
  0x1a   : > { %v257_v17 = vld [vmem:[%s3849_s28 + $0x20] sm:$0xff]  ;;  %v291_v19 = vmul.f32 %v3877_v9, %v259_v7  ;;  %v292_v20 = vmul.f32 %v3877_v9, %v260_v8  ;;  %v288_v21 = vmul.f32 %v3877_v9, %v256_v12  ;;  %vm611_vm2 = vsmask.f32 1280  ;;  %v262_v27 = vld [vmem:[%s3849_s28 + $0x48] sm:$0x3f]  ;;  %v263_v28 = vld [vmem:[%s3849_s28 + $0x50] sm:$0xff] }
  0x1b   : > { %3756 = vmatpush.bf16.msra.mxu1 %v3695_v2  ;;  %3757 = vmatpush.bf16.msra.mxu2 %v3695_v2  ;;  %v261_v18 = vld [vmem:[%s3849_s28 + $0x40] sm:$0xff]  ;;  %v289_v22 = vmul.f32 %v3877_v9, %v257_v17  ;;  %v317_v23 = vadd.f32 %v3882_v10, %v285_v13  ;;  %v318_v24 = vadd.f32 %v3882_v10, %v286_v14  ;;  %vm612_vm3 = vsmask.f32 3336  ;;  %v3692_v45 = vld [vmem:[%s5618_s3 + $0x58] sm:$0xff]  ;;  %v3691_v61 = vld [vmem:[%s5618_s3 + $0x50] sm:$0xff] }
  0x1c   : > { %3758 = vmatpush.bf16.msra.mxu3 %v3695_v2  ;;  %1165 = vmatpush.bf16.msra.mxu0 %v3695_v2  ;;  %v319_v25 = vadd.f32 %v3882_v10, %v287_v15  ;;  %v322_v26 = vadd.f32 %v3882_v10, %v290_v16  ;;  %v3693_v29 = vld [vmem:[%s5618_s3 + $0x60] sm:$0xff]  ;;  %v323_v30 = vadd.f32 %v3882_v10, %v291_v19  ;;  %vm614_vm4 = vsmask.f32 5392  ;;  %vm613_vm6 = vmor %vm611_vm2, %vm612_vm3  ;;  %v3690_v16 = vld [vmem:[%s5618_s3 + $0x48] sm:$0xff] }
  0x1d   : > { %v324_v31 = vadd.f32 %v3882_v10, %v292_v20  ;;  %v293_v32 = vmul.f32 %v3877_v9, %v261_v18  ;;  %v345_v33 = vmax.f32 %v317_v23, 0.0  ;;  %v346_v34 = vmax.f32 %v318_v24, 0.0  ;;  %vm3982_vm7 = vmor %vm613_vm6, %vm614_vm4 }
  0x1e   : > { %v347_v35 = vmax.f32 %v319_v25, 0.0  ;;  %v350_v36 = vmax.f32 %v322_v26, 0.0  ;;  %v351_v37 = vmax.f32 %v323_v30, 0.0  ;;  %v3911_v39 = vmul.f32 %v3877_v9, %v262_v27  ;;  %vm1407_vm11 = vmor %vm1405_vm9, %vm1406_vm10 }
  0x1f   : > { %3759 = vmatpush.bf16.msra.mxu1 %v3694_v11  ;;  %3760 = vmatpush.bf16.msra.mxu2 %v3694_v11  ;;  %v352_v38 = vmax.f32 %v324_v31, 0.0  ;;  %v3914_v40 = vmul.f32 %v3877_v9, %v263_v28  ;;  %v373_v41 = vpack.c.bf16 %v345_v33, %v345_v33  ;;  %v374_v42 = vpack.c.bf16 %v346_v34, %v346_v34  ;;  %v3689_v34 = vld [vmem:[%s5618_s3 + $0x40] sm:$0xff]  ;;  %vm1409_vm13 = vmor %vm1407_vm11, %vm1408_vm12 }
  0x20   : > { %3761 = vmatpush.bf16.msra.mxu3 %v3694_v11  ;;  %1166 = vmatpush.bf16.msra.mxu0 %v3694_v11  ;;  %v375_v43 = vpack.c.bf16 %v347_v35, %v347_v35  ;;  %v378_v44 = vpack.c.bf16 %v350_v36, %v350_v36  ;;  %v379_v46 = vpack.c.bf16 %v351_v37, %v351_v37  ;;  %vm616_vm5 = vsmask.f32 7448 }
  0x21   : > { %v380_v47 = vpack.c.bf16 %v352_v38, %v352_v38  ;;  %v3920_v48 = vadd.f32 %v3882_v10, %v288_v21  ;;  %v425_v49 = vrot.slane %v373_v41, 2  ;;  %v426_v50 = vrot.slane %v374_v42, 2  ;;  %vm3996_vm8 = vmor %vm3982_vm7, %vm616_vm5 }
  0x22   : > { %v427_v51 = vrot.slane %v375_v43, 2  ;;  %v430_v52 = vrot.slane %v378_v44, 2  ;;  %v431_v53 = vrot.slane %v379_v46, 2  ;;  %v3923_v55 = vadd.f32 %v3882_v10, %v289_v22 }
  0x23   : > { %3762 = vmatpush.bf16.msra.mxu1 %v3693_v29  ;;  %3763 = vmatpush.bf16.msra.mxu2 %v3693_v29  ;;  %v432_v54 = vrot.slane %v380_v47, 2  ;;  %v3926_v56 = vadd.f32 %v3882_v10, %v293_v32  ;;  %v3929_v57 = vsel %vm449_vm0, %v373_v41, %v425_v49  ;;  %v454_v58 = vsel %vm453_vm1, %v373_v41, %v425_v49 }
  0x24   : > { %3764 = vmatpush.bf16.msra.mxu3 %v3693_v29  ;;  %1167 = vmatpush.bf16.msra.mxu0 %v3693_v29  ;;  %v3933_v59 = vsel %vm449_vm0, %v374_v42, %v426_v50  ;;  %v3936_v60 = vsel %vm449_vm0, %v375_v43, %v427_v51  ;;  %v3941_v62 = vrot.slane %v454_v58, 2  ;;  %v463_v63 = vsel %vm453_vm1, %v375_v43, %v427_v51 }
  0x25   : > { %v3945_v0 = vsel %vm449_vm0, %v378_v44, %v430_v52  ;;  %v3948_v1 = vsel %vm449_vm0, %v379_v46, %v431_v53  ;;  %v3950_v2 = vrot.slane %v463_v63, 2  ;;  %v481_v3 = vsel %vm453_vm1, %v379_v46, %v431_v53 }
  0x26   : > { %v3954_v4 = vsel %vm449_vm0, %v380_v47, %v432_v54  ;;  %v3957_v5 = vsel %vm453_vm1, %v374_v42, %v426_v50  ;;  %v3959_v6 = vrot.slane %v481_v3, 2  ;;  %v3963_v8 = vsel %vm453_vm1, %v378_v44, %v430_v52 }
  0x27   : > { %3765 = vmatpush.bf16.msra.mxu1 %v3692_v45  ;;  %3766 = vmatpush.bf16.msra.mxu2 %v3692_v45  ;;  %5771 = vst [vmem:[#allocation2_spill] sm:$0xff] %v3957_v5  ;;  %v5626_v7 = vrot.slane %v3957_v5, 2  ;;  %v3966_v11 = vsel %vm453_vm1, %v380_v47, %v432_v54  ;;  %v5624_v12 = vrot.slane %v3963_v8, 2  ;;  %v618_v14 = vshrl.u32 %v3929_v57, 16 }
  0x28   : > { %3767 = vmatpush.bf16.msra.mxu3 %v3692_v45  ;;  %5772 = vst [vmem:[#allocation3_spill] sm:$0xff] %v3963_v8  ;;  %1168 = vmatpush.bf16.msra.mxu0 %v3692_v45  ;;  %v5623_v13 = vrot.slane %v3966_v11, 2  ;;  %v621_v15 = vshll.u32 %v3929_v57, 16  ;;  %v627_v17 = vshll.u32 %v3941_v62, 16  ;;  %v631_v18 = vshrl.u32 %v3941_v62, 16 }
  0x29   : > { %5773 = vst [vmem:[#allocation4_spill] sm:$0xff] %v3966_v11  ;;  %v636_v19 = vshll.u32 %v3933_v59, 16  ;;  %v640_v20 = vshrl.u32 %v3933_v59, 16  ;;  %v620_v22 = vrot.slane %v618_v14, 6  ;;  %v646_v24 = vshll.u32 %v5626_v7, 16 }
  0x2a   : > { %v623_v23 = vrot.slane %v621_v15, 7  ;;  %v650_v25 = vshrl.u32 %v3936_v60, 16  ;;  %v629_v26 = vrot.slane %v627_v17, 7  ;;  %v633_v27 = vrot.slane %v631_v18, 6 }
  0x2b   : > { %3768 = vmatpush.bf16.msra.mxu1 %v3691_v61  ;;  %3769 = vmatpush.bf16.msra.mxu2 %v3691_v61  ;;  %v638_v28 = vrot.slane %v636_v19, 7  ;;  %v642_v29 = vrot.slane %v640_v20, 6  ;;  %v648_v31 = vrot.slane %v646_v24, 7  ;;  %v653_v33 = vshll.u32 %v3936_v60, 16 }
  0x2c   : > { %3770 = vmatpush.bf16.msra.mxu3 %v3691_v61  ;;  %1169 = vmatpush.bf16.msra.mxu0 %v3691_v61  ;;  %v624_v30 = vor.u32 %v623_v23, %v620_v22  ;;  %v652_v32 = vrot.slane %v650_v25, 6  ;;  %v5776_v35 = vmov 0  ;;  %v634_v36 = vor.u32 %v633_v27, %v629_v26 }
  0x2d   : > { %v5777_v35 = vsel %vm3996_vm8, 4294967295, %v5776_v35  ;;  %v643_v37 = vor.u32 %v642_v29, %v638_v28  ;;  %v659_v38 = vshll.u32 %v3950_v2, 16  ;;  %v700_v41 = vshll.u32 %v3945_v0, 16 }
  0x2e   : > { %5778 = vst [vmem:[#allocation5_spill] sm:$0xff] %v5777_v35  ;;  %v625_v42 = vrot.slane %v624_v30, 2  ;;  %v655_v43 = vrot.slane %v653_v33, 7  ;;  %v704_v44 = vshrl.u32 %v3945_v0, 16  ;;  %v710_v45 = vshll.u32 %v5624_v12, 16 }
  0x2f   : > { %3771 = vmatpush.bf16.msra.mxu1 %v3690_v16  ;;  %3772 = vmatpush.bf16.msra.mxu2 %v3690_v16  ;;  %v635_v46 = vrot.slane %v634_v36, 2  ;;  %v644_v47 = vrot.slane %v643_v37, 2  ;;  %v4005_v49 = vrot.slane %v659_v38, 7  ;;  %v4007_v50 = vrot.slane %v700_v41, 7 }
  0x30   : > { %3773 = vmatpush.bf16.msra.mxu3 %v3690_v16  ;;  %1170 = vmatpush.bf16.msra.mxu0 %v3690_v16  ;;  %v630_v51 = vsel %vm3996_vm8, %v625_v42, %v629_v26  ;;  %v656_v52 = vor.u32 %v655_v43, %v652_v32  ;;  %v706_v53 = vrot.slane %v704_v44, 6  ;;  %v712_v54 = vrot.slane %v710_v45, 7 }
  0x31   : > { %v639_v58 = vsel %vm3996_vm8, %v635_v46, %v638_v28  ;;  %v649_v61 = vsel %vm3996_vm8, %v644_v47, %v648_v31  ;;  %v714_v63 = vshrl.u32 %v3948_v1, 16  ;;  %v717_v3 = vshll.u32 %v3948_v1, 16  ;;  %1020 = vst [vmem:[#allocation1] ss:$4 sm:$0xff] %v630_v51  ;;  %v264_v51 = vld [vmem:[%s3849_s28 + $0x58] sm:$0x3f] }
  0x32   : > { %v657_v14 = vrot.slane %v656_v52, 2  ;;  %v707_v15 = vor.u32 %v706_v53, %v4007_v50  ;;  %v723_v16 = vshll.u32 %v3959_v6, 16  ;;  %v727_v17 = vshrl.u32 %v3959_v6, 16  ;;  %1023 = vst [vmem:[#allocation1 + $0x1] ss:$4 sm:$0xff] %v639_v58 }
  0x33   : > { %3774 = vmatpush.bf16.msra.mxu1 %v3689_v34  ;;  %3775 = vmatpush.bf16.msra.mxu2 %v3689_v34  ;;  %v716_v18 = vrot.slane %v714_v63, 6  ;;  %v719_v19 = vrot.slane %v717_v3, 7  ;;  %v732_v20 = vshll.u32 %v3954_v4, 16  ;;  %v736_v21 = vshrl.u32 %v3954_v4, 16  ;;  %1026 = vst [vmem:[#allocation1 + $0x2] ss:$4 sm:$0xff] %v649_v61 }
  0x34   : > { %3776 = vmatpush.bf16.msra.mxu3 %v3689_v34  ;;  %1171 = vmatpush.bf16.msra.mxu0 %v3689_v34  ;;  %v4025_v22 = vsel %vm3996_vm8, %v657_v14, %v4005_v49  ;;  %v708_v23 = vrot.slane %v707_v15, 2  ;;  %v725_v24 = vrot.slane %v723_v16, 7  ;;  %v729_v25 = vrot.slane %v727_v17, 6 }
  0x35   : > { %5779 = vst [vmem:[#allocation6_spill] sm:$0xff] %v4025_v22  ;;  %v720_v26 = vor.u32 %v719_v19, %v716_v18  ;;  %v734_v27 = vrot.slane %v732_v20, 7  ;;  %v738_v28 = vrot.slane %v736_v21, 6  ;;  %v742_v29 = vshll.u32 %v5623_v13, 16  ;;  %v276_v13 = vld [vmem:[%s3849_s28 + $0xb8] sm:$0x3f] }
  0x36   : > { %1029 = vst [vmem:[#allocation1 + $0x3] ss:$4 sm:$0xff] %v4025_v22  ;;  %v4032_v30 = vsel %vm3996_vm8, %v708_v23, %v712_v54  ;;  %v730_v31 = vor.u32 %v729_v25, %v725_v24  ;;  %v326_v32 = vadd.f32 %v3882_v10, %v3911_v39  ;;  %v327_v33 = vadd.f32 %v3882_v10, %v3914_v40 }
  0x37   : > { %5780 = vst [vmem:[#allocation7_spill] sm:$0xff] %v4032_v30  ;;  %v721_v34 = vrot.slane %v720_v26, 2  ;;  %v739_v36 = vor.u32 %v738_v28, %v734_v27  ;;  %v744_v37 = vrot.slane %v742_v29, 7  ;;  %v348_v38 = vmax.f32 %v3920_v48, 0.0  ;;  %v3688_v29 = vld [vmem:[%s5618_s3 + $0x38] sm:$0xff] }
  0x38   : > { %v731_v41 = vrot.slane %v730_v31, 2  ;;  %v349_v42 = vmax.f32 %v3923_v55, 0.0  ;;  %v353_v43 = vmax.f32 %v3926_v56, 0.0  ;;  %v354_v44 = vmax.f32 %v326_v32, 0.0  ;;  %1327 = vmatpush.bf16.msrb.mxu1 %v3688_v29 }
  0x39   : > { %v4043_v45 = vsel %vm3996_vm8, %v721_v34, %v725_v24  ;;  %v740_v46 = vrot.slane %v739_v36, 2  ;;  %v355_v39 = vmax.f32 %v327_v33, 0.0  ;;  %v376_v47 = vpack.c.bf16 %v348_v38, %v348_v38 }
  0x3a   : > { %5781 = vst [vmem:[#allocation8_spill] sm:$0xff] %v4043_v45  ;;  %v4048_v40 = vsel %vm3996_vm8, %v731_v41, %v734_v27  ;;  %v377_v52 = vpack.c.bf16 %v349_v42, %v349_v42  ;;  %v381_v48 = vpack.c.bf16 %v353_v43, %v353_v43  ;;  %v382_v53 = vpack.c.bf16 %v354_v44, %v354_v44  ;;  %v3687_v42 = vld [vmem:[%s5618_s3 + $0x30] sm:$0xff] }
  0x3b   : > { %5782 = vst [vmem:[#allocation9_spill] sm:$0xff] %v4048_v40  ;;  %v4052_v55 = vsel %vm3996_vm8, %v740_v46, %v744_v37  ;;  %v383_v56 = vpack.c.bf16 %v355_v39, %v355_v39  ;;  %v428_v54 = vrot.slane %v376_v47, 2  ;;  %v663_v58 = vshrl.u32 %v3950_v2, 16 }
  0x3c   : > { %5783 = vst [vmem:[#allocation10_spill] sm:$0xff] %v4052_v55  ;;  %v429_v63 = vrot.slane %v377_v52, 2  ;;  %v433_v3 = vrot.slane %v381_v48, 2  ;;  %v434_v14 = vrot.slane %v382_v53, 2  ;;  %v4056_v15 = vmul.f32 %v3877_v9, %v264_v51  ;;  %1328 = vmatpush.bf16.msrb.mxu1 %v3687_v42 }
  0x3d   : > { %v1042_v61 = vld.sshfl [vmem:[#allocation1] sm:$0xff pattern:$0x73625140]  ;;  %v435_v16 = vrot.slane %v383_v56, 2  ;;  %v4060_v17 = vsel %vm449_vm0, %v376_v47, %v428_v54  ;;  %v4063_v18 = vsel %vm453_vm1, %v376_v47, %v428_v54  ;;  %v665_v19 = vrot.slane %v663_v58, 6 }
  0x3e   : > { %1045 = vst [vmem:[#allocation1] ss:$4 sm:$0xff] %v4032_v30  ;;  %1172 = vmatmul.bf16.vlgmr.msra.gmra.mxu0 %v1042_v61  ;;  %v4067_v20 = vsel %vm449_vm0, %v377_v52, %v429_v63  ;;  %v472_v21 = vsel %vm453_vm1, %v377_v52, %v429_v63  ;;  %v4071_v23 = vsel %vm449_vm0, %v381_v48, %v433_v3  ;;  %v5625_v32 = vrot.slane %v4063_v18, 2 }
  0x3f   : > { %5784 = vst [vmem:[#allocation11_spill] sm:$0xff] %v4063_v18  ;;  %v490_v24 = vsel %vm453_vm1, %v381_v48, %v433_v3  ;;  %v4075_v25 = vrot.slane %v472_v21, 2  ;;  %v4080_v27 = vsel %vm449_vm0, %v382_v53, %v434_v14  ;;  %v4083_v28 = vsel %vm449_vm0, %v383_v56, %v435_v16 }
  0x40   : > { %1047 = vst [vmem:[#allocation1 + $0x1] ss:$4 sm:$0xff] %v4043_v45  ;;  %v4077_v26 = vrot.slane %v490_v24, 2  ;;  %v499_v31 = vsel %vm453_vm1, %v383_v56, %v435_v16  ;;  %v4092_v33 = vsel %vm453_vm1, %v382_v53, %v434_v14  ;;  %v666_v34 = vor.u32 %v665_v19, %v4005_v49 }
  0x41   : > { %1049 = vst [vmem:[#allocation1 + $0x2] ss:$4 sm:$0xff] %v4048_v40  ;;  %v4095_v36 = vrot.slane %v499_v31, 2  ;;  %v5622_v37 = vrot.slane %v4092_v33, 2  ;;  %v668_v38 = vshll.u32 %v4060_v17, 16  ;;  %v672_v41 = vshrl.u32 %v4060_v17, 16 }
  0x42   : > { %1051 = vst [vmem:[#allocation1 + $0x3] ss:$4 sm:$0xff] %v4052_v55  ;;  %v667_v43 = vrot.slane %v666_v34, 2  ;;  %v678_v44 = vshll.u32 %v5625_v32, 16  ;;  %v682_v46 = vshrl.u32 %v4067_v20, 16  ;;  %v685_v49 = vshll.u32 %v4067_v20, 16 }
  0x43   : > { %5785 = vst [vmem:[#allocation12_spill] sm:$0xff] %v4092_v33  ;;  %v670_v39 = vrot.slane %v668_v38, 7  ;;  %v674_v47 = vrot.slane %v672_v41, 6  ;;  %v691_v51 = vshll.u32 %v4075_v25, 16  ;;  %v695_v52 = vshrl.u32 %v4075_v25, 16 }
  0x44   : > { %v680_v48 = vrot.slane %v678_v44, 7  ;;  %v684_v53 = vrot.slane %v682_v46, 6  ;;  %v687_v56 = vrot.slane %v685_v49, 7  ;;  %v746_v54 = vshrl.u32 %v4071_v23, 16 }
  0x45   : > { %v4112_v58 = vsel %vm3996_vm8, %v667_v43, %v670_v39  ;;  %v675_v61 = vor.u32 %v674_v47, %v670_v39  ;;  %v693_v63 = vrot.slane %v691_v51, 7  ;;  %v697_v3 = vrot.slane %v695_v52, 6  ;;  %v265_v51 = vld [vmem:[%s3849_s28 + $0x60] sm:$0xff] }
  0x46   : > { %5786 = vst [vmem:[#allocation13_spill] sm:$0xff] %v4112_v58  ;;  %v688_v14 = vor.u32 %v687_v56, %v684_v53  ;;  %v748_v16 = vrot.slane %v746_v54, 6  ;;  %v749_v19 = vshll.u32 %v4071_v23, 16  ;;  %v755_v21 = vshll.u32 %v4077_v26, 16 }
  0x47   : > { %1032 = vst [vmem:[#allocation1 + $0x20] ss:$4 sm:$0xff] %v4112_v58  ;;  %v676_v29 = vrot.slane %v675_v61, 2  ;;  %v698_v31 = vor.u32 %v697_v3, %v693_v63  ;;  %v759_v34 = vshrl.u32 %v4077_v26, 16  ;;  %v764_v38 = vshll.u32 %v4080_v27, 16 }
  0x48   : > { %v689_v41 = vrot.slane %v688_v14, 2  ;;  %v751_v42 = vrot.slane %v749_v19, 7  ;;  %v757_v43 = vrot.slane %v755_v21, 7  ;;  %v768_v44 = vshrl.u32 %v4080_v27, 16  ;;  %v270_v19 = vld [vmem:[%s3849_s28 + $0x88] sm:$0x3f] }
  0x49   : > { %v1060_v24 = vld.sshfl [vmem:[#allocation1] sm:$0xff pattern:$0x73625140]  ;;  %v4122_v46 = vsel %vm3996_vm8, %v676_v29, %v680_v48  ;;  %v699_v49 = vrot.slane %v698_v31, 2  ;;  %v761_v39 = vrot.slane %v759_v34, 6  ;;  %v766_v47 = vrot.slane %v764_v38, 7 }
  0x4a   : > { %1182 = vmatmul.bf16.vlgmr.msra.gmra.mxu1 %v1060_v24  ;;  %5787 = vst [vmem:[#allocation14_spill] sm:$0xff] %v4122_v46  ;;  %v4127_v52 = vsel %vm3996_vm8, %v689_v41, %v693_v63  ;;  %v752_v53 = vor.u32 %v751_v42, %v748_v16  ;;  %v770_v56 = vrot.slane %v768_v44, 6  ;;  %v774_v54 = vshll.u32 %v5622_v37, 16  ;;  %v266_v48 = vld [vmem:[%s3849_s28 + $0x68] sm:$0x3f]  ;;  %v267_v31 = vld [vmem:[%s3849_s28 + $0x70] sm:$0xff] }
  0x4b   : > { %5788 = vst [vmem:[#allocation15_spill] sm:$0xff] %v4127_v52  ;;  %v4136_v61 = vsel %vm3996_vm8, %v699_v49, %v4007_v50  ;;  %v762_v3 = vor.u32 %v761_v39, %v757_v43  ;;  %v778_v63 = vshrl.u32 %v4083_v28, 16  ;;  %v781_v14 = vshll.u32 %v4083_v28, 16  ;;  %v268_v16 = vld [vmem:[%s3849_s28 + $0x78] sm:$0x3f]  ;;  %v269_v42 = vld [vmem:[%s3849_s28 + $0x80] sm:$0xff] }
  0x4c   : > { %1035 = vst [vmem:[#allocation1 + $0x21] ss:$4 sm:$0xff] %v4122_v46  ;;  %v753_v21 = vrot.slane %v752_v53, 2  ;;  %v771_v24 = vor.u32 %v770_v56, %v766_v47  ;;  %v776_v29 = vrot.slane %v774_v54, 7  ;;  %v787_v50 = vshll.u32 %v4095_v36, 16  ;;  %v271_v44 = vld [vmem:[%s3849_s28 + $0x90] sm:$0xff] }
  0x4d   : > { %5789 = vst [vmem:[#allocation16_spill] sm:$0xff] %v4136_v61  ;;  %v763_v34 = vrot.slane %v762_v3, 2  ;;  %v780_v38 = vrot.slane %v778_v63, 6  ;;  %v783_v41 = vrot.slane %v781_v14, 7  ;;  %v275_v49 = vld [vmem:[%s3849_s28 + $0xb0] sm:$0xff]  ;;  %v297_v39 = vmul.f32 %v3877_v9, %v265_v51 }
  0x4e   : > { %1038 = vst [vmem:[#allocation1 + $0x22] ss:$4 sm:$0xff] %v4127_v52  ;;  %v4152_v53 = vsel %vm3996_vm8, %v753_v21, %v757_v43  ;;  %v772_v56 = vrot.slane %v771_v24, 2  ;;  %v4154_v37 = vrot.slane %v787_v50, 7  ;;  %v274_v54 = vld [vmem:[%s3849_s28 + $0xa8] sm:$0x3f]  ;;  %v298_v12 = vmul.f32 %v3877_v9, %v266_v48 }
  0x4f   : > { %1041 = vst [vmem:[#allocation1 + $0x23] ss:$4 sm:$0xff] %v4136_v61  ;;  %v4161_v3 = vsel %vm3996_vm8, %v763_v34, %v766_v47  ;;  %v784_v63 = vor.u32 %v783_v41, %v780_v38  ;;  %v299_v14 = vmul.f32 %v3877_v9, %v267_v31  ;;  %v300_v51 = vmul.f32 %v3877_v9, %v268_v16 }
  0x50   : > { %5790 = vst [vmem:[#allocation17_spill] sm:$0xff] %v4152_v53  ;;  %v4167_v43 = vsel %vm3996_vm8, %v772_v56, %v776_v29  ;;  %v301_v21 = vmul.f32 %v3877_v9, %v269_v42  ;;  %v302_v24 = vmul.f32 %v3877_v9, %v270_v19  ;;  %v303_v50 = vmul.f32 %v3877_v9, %v271_v44 }
  0x51   : > { %5791 = vst [vmem:[#allocation18_spill] sm:$0xff] %v4161_v3  ;;  %v785_v48 = vrot.slane %v784_v63, 2  ;;  %v306_v32 = vmul.f32 %v3877_v9, %v274_v54  ;;  %v307_v47 = vmul.f32 %v3877_v9, %v275_v49  ;;  %v308_v34 = vmul.f32 %v3877_v9, %v276_v13 }
  0x52   : > { %5792 = vst [vmem:[#allocation19_spill] sm:$0xff] %v4167_v43  ;;  %v328_v16 = vadd.f32 %v3882_v10, %v4056_v15  ;;  %v329_v31 = vadd.f32 %v3882_v10, %v297_v39  ;;  %v330_v29 = vadd.f32 %v3882_v10, %v298_v12  ;;  %v331_v38 = vadd.f32 %v3882_v10, %v299_v14 }
  0x53   : > { %v4183_v19 = vsel %vm3996_vm8, %v785_v48, %v4154_v37  ;;  %v332_v42 = vadd.f32 %v3882_v10, %v300_v51  ;;  %v333_v44 = vadd.f32 %v3882_v10, %v301_v21  ;;  %v334_v9 = vadd.f32 %v3882_v10, %v302_v24 }
  0x54   : > { %5793 = vst [vmem:[#allocation20_spill] sm:$0xff] %v4183_v19  ;;  %v335_v13 = vadd.f32 %v3882_v10, %v303_v50  ;;  %v338_v12 = vadd.f32 %v3882_v10, %v306_v32  ;;  %v339_v15 = vadd.f32 %v3882_v10, %v307_v47  ;;  %v340_v49 = vadd.f32 %v3882_v10, %v308_v34 }
  0x55   : > { %v356_v39 = vmax.f32 %v328_v16, 0.0  ;;  %v357_v56 = vmax.f32 %v329_v31, 0.0  ;;  %v358_v54 = vmax.f32 %v330_v29, 0.0  ;;  %v359_v63 = vmax.f32 %v331_v38, 0.0 }
  0x56   : > { %v1043_v41 = vld.sshfl [vmem:[#allocation1 + $0x20] sm:$0xff pattern:$0x73625140]  ;;  %v360_v14 = vmax.f32 %v332_v42, 0.0  ;;  %v361_v51 = vmax.f32 %v333_v44, 0.0  ;;  %v362_v21 = vmax.f32 %v334_v9, 0.0 }
  0x57   : > { %1053 = vst [vmem:[#allocation1 + $0x20] ss:$4 sm:$0xff] %v4152_v53  ;;  %1177 = vmatmul.bf16.gmra.mxu0 %v1043_v41  ;;  %v363_v24 = vmax.f32 %v335_v13, 0.0  ;;  %v366_v32 = vmax.f32 %v338_v12, 0.0  ;;  %v367_v50 = vmax.f32 %v339_v15, 0.0  ;;  %v368_v48 = vmax.f32 %v340_v49, 0.0 }
  0x58   : > { %1055 = vst [vmem:[#allocation1 + $0x21] ss:$4 sm:$0xff] %v4161_v3  ;;  %v384_v47 = vpack.c.bf16 %v356_v39, %v356_v39  ;;  %v385_v10 = vpack.c.bf16 %v357_v56, %v357_v56  ;;  %v386_v34 = vpack.c.bf16 %v358_v54, %v358_v54  ;;  %v387_v7 = vpack.c.bf16 %v359_v63, %v359_v63 }
  0x59   : > { %1057 = vst [vmem:[#allocation1 + $0x22] ss:$4 sm:$0xff] %v4167_v43  ;;  %v388_v16 = vpack.c.bf16 %v360_v14, %v360_v14  ;;  %v389_v31 = vpack.c.bf16 %v361_v51, %v361_v51  ;;  %v390_v29 = vpack.c.bf16 %v362_v21, %v362_v21  ;;  %v391_v38 = vpack.c.bf16 %v363_v24, %v363_v24 }
  0x5a   : > { %1059 = vst [vmem:[#allocation1 + $0x23] ss:$4 sm:$0xff] %v4183_v19  ;;  %v394_v41 = vpack.c.bf16 %v366_v32, %v366_v32  ;;  %v395_v3 = vpack.c.bf16 %v367_v50, %v367_v50  ;;  %v396_v43 = vpack.c.bf16 %v368_v48, %v368_v48  ;;  %v436_v42 = vrot.slane %v384_v47, 2 }
  0x5b   : > { %v437_v44 = vrot.slane %v385_v10, 2  ;;  %v438_v9 = vrot.slane %v386_v34, 2  ;;  %v439_v13 = vrot.slane %v387_v7, 2  ;;  %v440_v53 = vrot.slane %v388_v16, 2 }
  0x5c   : > { %v441_v55 = vrot.slane %v389_v31, 2  ;;  %v442_v12 = vrot.slane %v390_v29, 2  ;;  %v443_v15 = vrot.slane %v391_v38, 2  ;;  %v446_v49 = vrot.slane %v394_v41, 2 }
  0x5d   : > { %v447_v39 = vrot.slane %v395_v3, 2  ;;  %v448_v56 = vrot.slane %v396_v43, 2  ;;  %v4197_v54 = vsel %vm449_vm0, %v384_v47, %v436_v42  ;;  %v508_v63 = vsel %vm453_vm1, %v385_v10, %v437_v44 }
  0x5e   : > { %v4201_v51 = vsel %vm449_vm0, %v385_v10, %v437_v44  ;;  %v4203_v21 = vrot.slane %v508_v63, 2  ;;  %v4206_v24 = vsel %vm449_vm0, %v386_v34, %v438_v9  ;;  %v517_v32 = vsel %vm453_vm1, %v387_v7, %v439_v13 }
  0x5f   : > { %v4210_v50 = vsel %vm449_vm0, %v387_v7, %v439_v13  ;;  %v4212_v48 = vrot.slane %v517_v32, 2  ;;  %v4215_v19 = vsel %vm449_vm0, %v388_v16, %v440_v53  ;;  %v526_v52 = vsel %vm453_vm1, %v389_v31, %v441_v55 }
  0x60   : > { %v4219_v10 = vsel %vm449_vm0, %v389_v31, %v441_v55  ;;  %v4221_v44 = vrot.slane %v526_v52, 2  ;;  %v4224_v63 = vsel %vm449_vm0, %v390_v29, %v442_v12  ;;  %v4228_v7 = vsel %vm449_vm0, %v391_v38, %v443_v15 }
  0x61   : > { %v1061_v14 = vld.sshfl [vmem:[#allocation1 + $0x20] sm:$0xff pattern:$0x73625140]  ;;  %5794 = vst [vmem:[#allocation21_spill] sm:$0xff] %v4224_v63  ;;  %v4233_v32 = vsel %vm449_vm0, %v394_v41, %v446_v49  ;;  %v553_v46 = vsel %vm453_vm1, %v395_v3, %v447_v39  ;;  %v4237_v55 = vsel %vm449_vm0, %v395_v3, %v447_v39  ;;  %v4242_v31 = vsel %vm453_vm1, %v384_v47, %v436_v42 }
  0x62   : > { %1187 = vmatmul.bf16.gmra.mxu1 %v1061_v14  ;;  %v535_v14 = vsel %vm453_vm1, %v391_v38, %v443_v15  ;;  %5795 = vst [vmem:[#allocation22_spill] sm:$0xff] %v4228_v7  ;;  %v4239_v52 = vrot.slane %v553_v46, 2  ;;  %v4245_v58 = vsel %vm453_vm1, %v386_v34, %v438_v9  ;;  %v4248_v38 = vsel %vm449_vm0, %v396_v43, %v448_v56 }
  0x63   : > { %v4230_v13 = vrot.slane %v535_v14, 2  ;;  %5797 = vst [vmem:[#allocation24_spill] sm:$0xff] %v4233_v32  ;;  %v5650_v15 = vrot.slane %v4242_v31, 2  ;;  %v4252_v14 = vsel %vm453_vm1, %v388_v16, %v440_v53  ;;  %v4255_v22 = vsel %vm453_vm1, %v390_v29, %v442_v12 }
  0x64   : > { %5798 = vst [vmem:[#allocation25_spill] sm:$0xff] %v4237_v55  ;;  %v4261_v34 = vsel %vm453_vm1, %v394_v41, %v446_v49  ;;  %v4265_v9 = vsel %vm453_vm1, %v396_v43, %v448_v56  ;;  %v791_v53 = vshrl.u32 %v4095_v36, 16  ;;  %v796_v16 = vshll.u32 %v4197_v54, 16 }
  0x65   : > { %5796 = vst [vmem:[#allocation23_spill] sm:$0xff] %v4230_v13  ;;  %v800_v29 = vshrl.u32 %v4197_v54, 16  ;;  %v806_v12 = vshll.u32 %v5650_v15, 16  ;;  %v810_v39 = vshrl.u32 %v4201_v51, 16  ;;  %v813_v47 = vshll.u32 %v4201_v51, 16 }
  0x66   : > { %5799 = vst [vmem:[#allocation26_spill] sm:$0xff] %v4239_v52  ;;  %v793_v41 = vrot.slane %v791_v53, 6  ;;  %v798_v49 = vrot.slane %v796_v16, 7  ;;  %v819_v42 = vshll.u32 %v4203_v21, 16  ;;  %v823_v43 = vshrl.u32 %v4203_v21, 16 }
  0x67   : > { %5800 = vst [vmem:[#allocation27_spill] sm:$0xff] %v4242_v31  ;;  %v802_v56 = vrot.slane %v800_v29, 6  ;;  %v808_v3 = vrot.slane %v806_v12, 7  ;;  %v812_v46 = vrot.slane %v810_v39, 6  ;;  %v815_v40 = vrot.slane %v813_v47, 7 }
  0x68   : > { %5801 = vst [vmem:[#allocation28_spill] sm:$0xff] %v4248_v38  ;;  %v794_v45 = vor.u32 %v793_v41, %v4154_v37  ;;  %v821_v30 = vrot.slane %v819_v42, 7  ;;  %v825_v61 = vrot.slane %v823_v43, 6  ;;  %v828_v15 = vshll.u32 %v4206_v24, 16 }
  0x69   : > { %5802 = vst [vmem:[#allocation29_spill] sm:$0xff] %v4252_v14  ;;  %v803_v33 = vor.u32 %v802_v56, %v798_v49  ;;  %v816_v31 = vor.u32 %v815_v40, %v812_v46  ;;  %v832_v11 = vshrl.u32 %v4206_v24, 16  ;;  %v5805_v53 = vrot.slane %v4245_v58, 2 }
  0x6a   : > { %5803 = vst [vmem:[#allocation30_spill] sm:$0xff] %v4261_v34  ;;  %v795_v8 = vrot.slane %v794_v45, 2  ;;  %v826_v18 = vor.u32 %v825_v61, %v821_v30  ;;  %v830_v5 = vrot.slane %v828_v15, 7  ;;  %v842_v29 = vshrl.u32 %v4210_v50, 16 }
  0x6b   : > { %5804 = vst [vmem:[#allocation31_spill] sm:$0xff] %v4265_v9  ;;  %v838_v16 = vshll.u32 %v5805_v53, 16  ;;  %v804_v12 = vrot.slane %v803_v33, 2  ;;  %v817_v47 = vrot.slane %v816_v31, 2  ;;  %v834_v39 = vrot.slane %v832_v11, 6 }
  0x6c   : > { %v4284_v42 = vsel %vm3996_vm8, %v795_v8, %v798_v49  ;;  %v827_v41 = vrot.slane %v826_v18, 2  ;;  %v844_v40 = vrot.slane %v842_v29, 6  ;;  %v845_v46 = vshll.u32 %v4210_v50, 16 }
  0x6d   : > { %v840_v37 = vrot.slane %v838_v16, 7  ;;  %5806 = vst [vmem:[#allocation32_spill] sm:$0xff] %v4284_v42  ;;  %v4289_v43 = vsel %vm3996_vm8, %v804_v12, %v808_v3  ;;  %v4293_v45 = vsel %vm3996_vm8, %v817_v47, %v821_v30  ;;  %v835_v33 = vor.u32 %v834_v39, %v830_v5 }
  0x6e   : > { %5807 = vst [vmem:[#allocation33_spill] sm:$0xff] %v4289_v43  ;;  %v851_v11 = vshll.u32 %v4212_v48, 16  ;;  %v4299_v8 = vsel %vm3996_vm8, %v827_v41, %v830_v5  ;;  %v847_v18 = vrot.slane %v845_v46, 7  ;;  %v855_v61 = vshrl.u32 %v4212_v48, 16 }
  0x6f   : > { %5808 = vst [vmem:[#allocation34_spill] sm:$0xff] %v4293_v45  ;;  %v860_v31 = vshll.u32 %v4215_v19, 16  ;;  %v836_v15 = vrot.slane %v835_v33, 2  ;;  %v864_v30 = vshrl.u32 %v4215_v19, 16  ;;  %v5810_v49 = vrot.slane %v4252_v14, 2 }
  0x70   : > { %1063 = vst [vmem:[#allocation1] ss:$4 sm:$0xff] %v4284_v42  ;;  %v853_v3 = vrot.slane %v851_v11, 7  ;;  %v848_v53 = vor.u32 %v847_v18, %v844_v40  ;;  %v857_v16 = vrot.slane %v855_v61, 6  ;;  %v874_v29 = vshrl.u32 %v4219_v10, 16 }
  0x71   : > { %5809 = vst [vmem:[#allocation35_spill] sm:$0xff] %v4299_v8  ;;  %v870_v56 = vshll.u32 %v5810_v49, 16  ;;  %v862_v5 = vrot.slane %v860_v31, 7  ;;  %v4312_v12 = vsel %vm3996_vm8, %v836_v15, %v840_v37  ;;  %v866_v47 = vrot.slane %v864_v30, 6  ;;  %v272_v42 = vld [vmem:[%s3849_s28 + $0x98] sm:$0x3f] }
  0x72   : > { %1065 = vst [vmem:[#allocation1 + $0x1] ss:$4 sm:$0xff] %v4289_v43  ;;  %v877_v41 = vshll.u32 %v4219_v10, 16  ;;  %v849_v46 = vrot.slane %v848_v53, 2  ;;  %v858_v33 = vor.u32 %v857_v16, %v853_v3  ;;  %v876_v11 = vrot.slane %v874_v29, 6 }
  0x73   : > { %1067 = vst [vmem:[#allocation1 + $0x2] ss:$4 sm:$0xff] %v4293_v45  ;;  %v872_v39 = vrot.slane %v870_v56, 7  ;;  %v883_v49 = vshll.u32 %v4221_v44, 16  ;;  %v867_v40 = vor.u32 %v866_v47, %v862_v5  ;;  %v887_v61 = vshrl.u32 %v4221_v44, 16 }
  0x74   : > { %1069 = vst [vmem:[#allocation1 + $0x3] ss:$4 sm:$0xff] %v4299_v8  ;;  %v879_v18 = vrot.slane %v877_v41, 7  ;;  %v892_v31 = vshll.u32 %v4224_v63, 16  ;;  %v4321_v37 = vsel %vm3996_vm8, %v849_v46, %v853_v3  ;;  %v859_v15 = vrot.slane %v858_v33, 2 }
  0x75   : > { %5811 = vst [vmem:[#allocation36_spill] sm:$0xff] %v4312_v12  ;;  %v885_v30 = vrot.slane %v883_v49, 7  ;;  %v896_v56 = vshrl.u32 %v4224_v63, 16  ;;  %v868_v53 = vrot.slane %v867_v40, 2  ;;  %v889_v29 = vrot.slane %v887_v61, 6 }
  0x76   : > { %1071 = vst [vmem:[#allocation1 + $0x20] ss:$4 sm:$0xff] %v4312_v12  ;;  %v880_v16 = vor.u32 %v879_v18, %v876_v11  ;;  %v894_v8 = vrot.slane %v892_v31, 7  ;;  %v4327_v47 = vsel %vm3996_vm8, %v859_v15, %v862_v5  ;;  %v5814_v12 = vrot.slane %v4255_v22, 2 }
  0x77   : > { %5812 = vst [vmem:[#allocation37_spill] sm:$0xff] %v4321_v37  ;;  %v898_v41 = vrot.slane %v896_v56, 6  ;;  %v906_v3 = vshrl.u32 %v4228_v7, 16  ;;  %v4334_v46 = vsel %vm3996_vm8, %v868_v53, %v872_v39  ;;  %v890_v11 = vor.u32 %v889_v29, %v885_v30 }
  0x78   : > { %1073 = vst [vmem:[#allocation1 + $0x21] ss:$4 sm:$0xff] %v4321_v37  ;;  %v902_v45 = vshll.u32 %v5814_v12, 16  ;;  %v881_v33 = vrot.slane %v880_v16, 2  ;;  %v909_v49 = vshll.u32 %v4228_v7, 16  ;;  %v915_v61 = vshll.u32 %v4230_v13, 16 }
  0x79   : > { %5813 = vst [vmem:[#allocation38_spill] sm:$0xff] %v4327_v47  ;;  %v899_v40 = vor.u32 %v898_v41, %v894_v8  ;;  %v908_v5 = vrot.slane %v906_v3, 6  ;;  %v891_v31 = vrot.slane %v890_v11, 2  ;;  %v956_v15 = vshll.u32 %v4233_v32, 16 }
  0x7a   : > { %5815 = vst [vmem:[#allocation39_spill] sm:$0xff] %v4334_v46  ;;  %v904_v18 = vrot.slane %v902_v45, 7  ;;  %v4342_v12 = vsel %vm3996_vm8, %v881_v33, %v885_v30  ;;  %v911_v39 = vrot.slane %v909_v49, 7  ;;  %v4346_v29 = vrot.slane %v915_v61, 7 }
  0x7b   : > { %1075 = vst [vmem:[#allocation1 + $0x22] ss:$4 sm:$0xff] %v4327_v47  ;;  %v1078_v56 = vld.sshfl [vmem:[#allocation1] sm:$0xff pattern:$0x73625140]  ;;  %v900_v16 = vrot.slane %v899_v40, 2  ;;  %v4352_v41 = vsel %vm3996_vm8, %v891_v31, %v894_v8 }
  0x7c   : > { %1077 = vst [vmem:[#allocation1 + $0x23] ss:$4 sm:$0xff] %v4334_v46  ;;  %v960_v45 = vshrl.u32 %v4233_v32, 16  ;;  %1192 = vmatmul.bf16.gmra.mxu1 %v1078_v56  ;;  %v912_v30 = vor.u32 %v911_v39, %v908_v5  ;;  %v4354_v3 = vrot.slane %v956_v15, 7  ;;  %v970_v33 = vshrl.u32 %v4237_v55, 16 }
  0x7d   : > { %5816 = vst [vmem:[#allocation40_spill] sm:$0xff] %v4342_v12  ;;  %v4359_v11 = vsel %vm3996_vm8, %v900_v16, %v904_v18  ;;  %v5819_v40 = vrot.slane %v4261_v34, 2  ;;  %v973_v56 = vshll.u32 %v4237_v55, 16  ;;  %v979_v5 = vshll.u32 %v4239_v52, 16 }
  0x7e   : > { %1081 = vst [vmem:[#allocation1] ss:$4 sm:$0xff] %v4342_v12  ;;  %v962_v49 = vrot.slane %v960_v45, 6  ;;  %v913_v8 = vrot.slane %v912_v30, 2  ;;  %v972_v31 = vrot.slane %v970_v33, 6  ;;  %v983_v39 = vshrl.u32 %v4239_v52, 16 }
  0x7f   : > { %5817 = vst [vmem:[#allocation41_spill] sm:$0xff] %v4352_v41  ;;  %v966_v61 = vshll.u32 %v5819_v40, 16  ;;  %v975_v18 = vrot.slane %v973_v56, 7  ;;  %v988_v16 = vshll.u32 %v4248_v38, 16  ;;  %v992_v45 = vshrl.u32 %v4248_v38, 16  ;;  %v273_v40 = vld [vmem:[%s3849_s28 + $0xa0] sm:$0xff] }
  0x80   : > { %5818 = vst [vmem:[#allocation42_spill] sm:$0xff] %v4359_v11  ;;  %v963_v15 = vor.u32 %v962_v49, %v4354_v3  ;;  %v4375_v30 = vsel %vm3996_vm8, %v913_v8, %v4346_v29  ;;  %v981_v33 = vrot.slane %v979_v5, 7  ;;  %v985_v53 = vrot.slane %v983_v39, 6  ;;  %v4384_v8 = vld [vmem:[%s5616_s1] ss:$0 sm:$0xff] }
  0x81   : > { %1083 = vst [vmem:[#allocation1 + $0x1] ss:$4 sm:$0xff] %v4352_v41  ;;  %v976_v12 = vor.u32 %v975_v18, %v972_v31  ;;  %v990_v46 = vrot.slane %v988_v16, 7  ;;  %v5821_v49 = vrot.slane %v4265_v9, 2  ;;  %v968_v37 = vrot.slane %v966_v61, 7 }
  0x82   : > { %1085 = vst [vmem:[#allocation1 + $0x2] ss:$4 sm:$0xff] %v4359_v11  ;;  %v994_v11 = vrot.slane %v992_v45, 6  ;;  %v964_v47 = vrot.slane %v963_v15, 2  ;;  %v986_v43 = vor.u32 %v985_v53, %v981_v33  ;;  %v305_v5 = vmul.f32 %v4384_v8, %v273_v40  ;;  %v3686_v45 = vld [vmem:[%s5618_s3 + $0x28] sm:$0xff] }
  0x83   : > { %5820 = vst [vmem:[#allocation43_spill] sm:$0xff] %v4375_v30  ;;  %v1079_v41 = vld.sshfl [vmem:[#allocation1 + $0x20] sm:$0xff pattern:$0x73625140]  ;;  %v998_v56 = vshll.u32 %v5821_v49, 16  ;;  %v977_v31 = vrot.slane %v976_v12, 2  ;;  %v304_v18 = vmul.f32 %v4384_v8, %v272_v42  ;;  %1329 = vmatpush.bf16.msrb.mxu1 %v3686_v45 }
  0x84   : > { %1087 = vst [vmem:[#allocation1 + $0x3] ss:$4 sm:$0xff] %v4375_v30  ;;  %1197 = vmatmul.bf16.vlgmr.msra.gmra.mxu2 %v1079_v41  ;;  %v995_v39 = vor.u32 %v994_v11, %v990_v46  ;;  %v987_v16 = vrot.slane %v986_v43, 2  ;;  %v4391_v41 = vld [vmem:[%s5617_s2] ss:$0 sm:$0xff]  ;;  %v4400_v12 = vsel %vm3996_vm8, %v964_v47, %v968_v37  ;;  %vm1410_vm14 = vcmask 1046534  }
  0x85   : > { %5822 = vst [vmem:[#allocation44_spill] sm:$0xff] %v4384_v8  ;;  %v337_v53 = vadd.f32 %v4391_v41, %v305_v5  ;;  %v1000_v15 = vrot.slane %v998_v56, 7  ;;  %v336_v40 = vadd.f32 %v4391_v41, %v304_v18  ;;  %v4404_v43 = vsel %vm3996_vm8, %v977_v31, %v981_v33  ;;  %v3685_v37 = vld [vmem:[%s5618_s3 + $0x20] sm:$0xff]  ;;  %vm4549_vm15 = vmor %vm1409_vm13, %vm1410_vm14 }
  0x86   : > { %5823 = vst [vmem:[#allocation45_spill] sm:$0xff] %v4391_v41  ;;  %v996_v61 = vrot.slane %v995_v39, 2  ;;  %v4408_v49 = vsel %vm3996_vm8, %v987_v16, %v990_v46  ;;  %v3684_v16 = vld [vmem:[%s5618_s3 + $0x18] sm:$0xff] }
  0x87   : > { %5824 = vst [vmem:[#allocation46_spill] sm:$0xff] %v4400_v12  ;;  %v365_v42 = vmax.f32 %v337_v53, 0.0  ;;  %v364_v11 = vmax.f32 %v336_v40, 0.0  ;;  %1330 = vmatpush.bf16.msrb.mxu1 %v3685_v37 }
  0x88   : > { %5825 = vst [vmem:[#allocation47_spill] sm:$0xff] %v4404_v43  ;;  %v4412_v39 = vsel %vm3996_vm8, %v996_v61, %v1000_v15  ;;  %v919_v15 = vshrl.u32 %v4230_v13, 16 }
  0x89   : > { %5826 = vst [vmem:[#allocation48_spill] sm:$0xff] %v4408_v49  ;;  %v393_v5 = vpack.c.bf16 %v365_v42, %v365_v42  ;;  %v392_v47 = vpack.c.bf16 %v364_v11, %v364_v11 }
  0x8a   : > { %5827 = vst [vmem:[#allocation49_spill] sm:$0xff] %v4412_v39 }
  0x8b   : > { %v1096_v56 = vld.sshfl [vmem:[#allocation1] sm:$0xff pattern:$0x73625140]  ;;  %v445_v33 = vrot.slane %v393_v5, 2  ;;  %v444_v46 = vrot.slane %v392_v47, 2  ;;  %1331 = vmatpush.bf16.msrb.mxu1 %v3684_v16 }
  0x8c   : > { %1099 = vst [vmem:[#allocation1] ss:$4 sm:$0xff] %v4400_v12 }
  0x8d   : > { %1101 = vst [vmem:[#allocation1 + $0x1] ss:$4 sm:$0xff] %v4404_v43  ;;  %v4422_v31 = vsel %vm449_vm0, %v393_v5, %v445_v33  ;;  %v544_v18 = vsel %vm453_vm1, %v393_v5, %v445_v33  ;;  %v4429_v53 = vsel %vm449_vm0, %v392_v47, %v444_v46  ;;  %v4436_v40 = vsel %vm453_vm1, %v392_v47, %v444_v46  ;;  %v3683_v47 = vld [vmem:[%s5618_s3 + $0x10] sm:$0xff] }
  0x8e   : > { %1103 = vst [vmem:[#allocation1 + $0x2] ss:$4 sm:$0xff] %v4408_v49  ;;  %v4431_v61 = vrot.slane %v544_v18, 2  ;;  %v938_v45 = vshrl.u32 %v4422_v31, 16  ;;  %v924_v42 = vshll.u32 %v4429_v53, 16  ;;  %v928_v11 = vshrl.u32 %v4429_v53, 16 }
  0x8f   : > { %1105 = vst [vmem:[#allocation1 + $0x3] ss:$4 sm:$0xff] %v4412_v39  ;;  %v941_v5 = vshll.u32 %v4422_v31, 16  ;;  %v5696_v37 = vrot.slane %v4436_v40, 2  ;;  %v921_v33 = vrot.slane %v919_v15, 6  ;;  %1332 = vmatpush.bf16.msrb.mxu1 %v3683_v47  ;;  %v3699_v47 = vld [vmem:[%s5618_s3 + $0x90] sm:$0xff] }
  0x90   : > { %5828 = vst [vmem:[#allocation50_spill] sm:$0xff] %v4422_v31  ;;  %v940_v39 = vrot.slane %v938_v45, 6  ;;  %v947_v18 = vshll.u32 %v4431_v61, 16  ;;  %v926_v49 = vrot.slane %v924_v42, 7  ;;  %v930_v43 = vrot.slane %v928_v11, 6 }
  0x91   : > { %5829 = vst [vmem:[#allocation51_spill] sm:$0xff] %v4429_v53  ;;  %v943_v12 = vrot.slane %v941_v5, 7  ;;  %v951_v30 = vshrl.u32 %v4431_v61, 16  ;;  %v922_v46 = vor.u32 %v921_v33, %v4346_v29  ;;  %v934_v16 = vshll.u32 %v5696_v37, 16  ;;  %v3682_v29 = vld [vmem:[%s5618_s3 + $0x8] sm:$0xff]  ;;  %v3700_v33 = vld [vmem:[%s5618_s3 + $0x98] sm:$0xff] }
  0x92   : > { %5830 = vst [vmem:[#allocation52_spill] sm:$0xff] %v4431_v61  ;;  %v949_v41 = vrot.slane %v947_v18, 7  ;;  %v931_v15 = vor.u32 %v930_v43, %v926_v49 }
  0x93   : > { %v944_v45 = vor.u32 %v943_v12, %v940_v39  ;;  %v953_v8 = vrot.slane %v951_v30, 6  ;;  %v923_v42 = vrot.slane %v922_v46, 2  ;;  %v936_v11 = vrot.slane %v934_v16, 7  ;;  %v3704_v30 = vld [vmem:[%s5618_s3 + $0xb8] sm:$0xff]  ;;  %1333 = vmatpush.bf16.msrb.mxu1 %v3682_v29  ;;  %v3698_v16 = vld [vmem:[%s5618_s3 + $0x88] sm:$0xff] }
  0x94   : > { %1202 = vmatmul.bf16.gmra.mxu2 %v1096_v56  ;;  %v932_v5 = vrot.slane %v931_v15, 2  ;;  %v3681_v56 = vld [vmem:[%s5618_s3] sm:$0xff] }
  0x95   : > { %v945_v34 = vrot.slane %v944_v45, 2  ;;  %v954_v14 = vor.u32 %v953_v8, %v949_v41  ;;  %v4460_v12 = vsel %vm3996_vm8, %v923_v42, %v926_v49  ;;  %1694 = vmatpush.bf16.msrb.mxu2 %v3704_v30  ;;  %v3697_v15 = vld [vmem:[%s5618_s3 + $0x80] sm:$0xff]  ;;  %v3712_v42 = vld [vmem:[%s5618_s3 + $0xf8] sm:$0xff]  ;;  %v1414_v30 = vrot.slane %v3941_v62, 7 }
  0x96   : > { %v1106_v9 = vld.sshfl [vmem:[#allocation1] sm:$0xff pattern:$0x73625140]  ;;  %5831 = vst [vmem:[#allocation53_spill] sm:$0xff] %v4460_v12  ;;  %v4465_v8 = vsel %vm3996_vm8, %v932_v5, %v936_v11  ;;  %1906 = vmatpush.bf16.msrb.mxu3 %v3712_v42  ;;  %v3711_v11 = vld [vmem:[%s5618_s3 + $0xf0] sm:$0xff] }
  0x97   : > { %1218 = vst [vmem:[#allocation1] ss:$4 sm:$0xff] %v3929_v57  ;;  %1212 = vmatmul.bf16.vlgmr.msra.gmra.mxu3 %v1106_v9  ;;  %v955_v9 = vrot.slane %v954_v14, 2  ;;  %v4470_v43 = vsel %vm3996_vm8, %v945_v34, %v949_v41  ;;  %v3703_v14 = vld [vmem:[%s5618_s3 + $0xb0] sm:$0xff]  ;;  %1334 = vmatpush.bf16.msrb.mxu1 %v3681_v56  ;;  %v3702_v34 = vld [vmem:[%s5618_s3 + $0xa8] sm:$0xff]  ;;  %v3701_v41 = vld [vmem:[%s5618_s3 + $0xa0] sm:$0xff] }
  0x98   : > { %1220 = vst [vmem:[#allocation1 + $0x1] ss:$4 sm:$0xff] %v3941_v62  ;;  %v1427_v62 = vrot.slane %v4060_v17, 7 }
  0x99   : > { %1222 = vst [vmem:[#allocation1 + $0x2] ss:$4 sm:$0xff] %v3933_v59  ;;  %v4475_v49 = vsel %vm3996_vm8, %v955_v9, %v4354_v3  ;;  %1695 = vmatpush.bf16.msrb.mxu2 %v3703_v14  ;;  %v1417_v9 = vrot.slane %v3933_v59, 7  ;;  %v3329_v14 = vrot.slane %v3929_v57, 9  ;;  %v3330_v57 = vrot.slane %v3936_v60, 9 }
  0x9a   : > { %5832 = vst [vmem:[#allocation54_spill] sm:$0xff] %v4465_v8  ;;  %1907 = vmatpush.bf16.msrb.mxu3 %v3711_v11  ;;  %v1429_v42 = vrot.slane %v1427_v62, 2  ;;  %v5839_v11 = vld [vmem:[#allocation11_spill] sm:$0xff] }
  0x9b   : > { %1224 = vst [vmem:[#allocation1 + $0x3] ss:$4 sm:$0xff] %v3936_v60 }
  0x9c   : > { %5833 = vst [vmem:[#allocation55_spill] sm:$0xff] %v4470_v43 }
  0x9d   : > { %5834 = vst [vmem:[#allocation56_spill] sm:$0xff] %v4475_v49  ;;  %1696 = vmatpush.bf16.msrb.mxu2 %v3702_v34 }
  0x9e   : > { %1089 = vst [vmem:[#allocation1 + $0x20] ss:$4 sm:$0xff] %v4460_v12 }
  0x9f   : > { %1091 = vst [vmem:[#allocation1 + $0x21] ss:$4 sm:$0xff] %v4465_v8 }
  0xa0   : > { %1093 = vst [vmem:[#allocation1 + $0x22] ss:$4 sm:$0xff] %v4470_v43 }
  0xa1   : > { %1095 = vst [vmem:[#allocation1 + $0x23] ss:$4 sm:$0xff] %v4475_v49  ;;  %1697 = vmatpush.bf16.msrb.mxu2 %v3701_v41  ;;  %v1419_v41 = vrot.slane %v1417_v9, 2  ;;  %v3331_v49 = vrot.slane %v4067_v20, 9 }
  0xa2   : > { %v1233_v3 = vld.sshfl [vmem:[#allocation1] sm:$0xff pattern:$0x73625140] }
  0xa3   : > { %1235 = vst [vmem:[#allocation1] ss:$4 sm:$0xff] %v3945_v0  ;;  %1335 = vmatmul.bf16.vlgmr.msrb.gmra.mxu1 %v1233_v3  ;;  %v1416_v3 = vrot.slane %v1414_v30, 2 }
  0xa4   : > { %1236 = vst [vmem:[#allocation1 + $0x1] ss:$4 sm:$0xff] %v3948_v1 }
  0xa5   : > { %1237 = vst [vmem:[#allocation1 + $0x2] ss:$4 sm:$0xff] %v3959_v6  ;;  %1698 = vmatpush.bf16.msrb.mxu2 %v3700_v33 }
  0xa6   : > { %1238 = vst [vmem:[#allocation1 + $0x3] ss:$4 sm:$0xff] %v3954_v4 }
  0xa8   : > { %v1097_v39 = vld.sshfl [vmem:[#allocation1 + $0x20] sm:$0xff pattern:$0x73625140] }
  0xa9   : > { %1226 = vst [vmem:[#allocation1 + $0x20] ss:$4 sm:$0xff] %v3950_v2  ;;  %1207 = vmatmul.bf16.gmra.mxu2 %v1097_v39  ;;  %v5837_v39 = vld [vmem:[#allocation2_spill] sm:$0xff] }
  0xaa   : > { %1228 = vst [vmem:[#allocation1 + $0x21] ss:$4 sm:$0xff] %v4060_v17  ;;  %1699 = vmatpush.bf16.msrb.mxu2 %v3699_v47  ;;  %v5838_v59 = vrot.slane %v5837_v39, 2  ;;  %v1434_v47 = vrot.slane %v4075_v25, 7  ;;  %v5840_v39 = vrot.slane %v5839_v11, 2 }
  0xab   : > { %1230 = vst [vmem:[#allocation1 + $0x22] ss:$4 sm:$0xff] %v4067_v20 }
  0xac   : > { %1232 = vst [vmem:[#allocation1 + $0x23] ss:$4 sm:$0xff] %v4075_v25  ;;  %v1420_v33 = vrot.slane %v5838_v59, 7  ;;  %v1430_v59 = vrot.slane %v5840_v39, 7 }
  0xad   : > { %v1243_v18 = vld.sshfl [vmem:[#allocation1] sm:$0xff pattern:$0x73625140] }
  0xae   : > { %1245 = vst [vmem:[#allocation1] ss:$4 sm:$0xff] %v4095_v36  ;;  %1700 = vmatpush.bf16.msrb.mxu2 %v3698_v16  ;;  %v1421_v35 = vsel %vm4549_vm15, %v1419_v41, %v1420_v33  ;;  %v1444_v41 = vrot.slane %v3959_v6, 7 }
  0xaf   : > { %1246 = vst [vmem:[#allocation1 + $0x1] ss:$4 sm:$0xff] %v4197_v54 }
  0xb0   : > { %1247 = vst [vmem:[#allocation1 + $0x2] ss:$4 sm:$0xff] %v4201_v51  ;;  %v1446_v11 = vrot.slane %v1444_v41, 2 }
  0xb1   : > { %1248 = vst [vmem:[#allocation1 + $0x3] ss:$4 sm:$0xff] %v4203_v21 }
  0xb2   : > { %1701 = vmatpush.bf16.msrb.mxu2 %v3697_v15  ;;  %v1418_v15 = vsel %vm4549_vm15, %v1416_v3, %v1417_v9  ;;  %v4584_v3 = vsel %vm4549_vm15, %v1429_v42, %v1430_v59  ;;  %v3332_v42 = vrot.slane %v3948_v1, 9 }
  0xb3   : > { %v1234_v46 = vld.sshfl [vmem:[#allocation1 + $0x20] sm:$0xff pattern:$0x73625140]  ;;  %5843 = vst [vmem:[#allocation57_spill] sm:$0xff] %v4584_v3 }
  0xb4   : > { %1239 = vst [vmem:[#allocation1 + $0x20] ss:$4 sm:$0xff] %v4071_v23  ;;  %1340 = vmatmul.bf16.gmra.mxu1 %v1234_v46  ;;  %v1415_v46 = vsel %vm4549_vm15, %v3329_v14, %v1414_v30  ;;  %v1436_v30 = vrot.slane %v1434_v47, 2  ;;  %v1437_v14 = vrot.slane %v3945_v0, 7 }
  0xb5   : > { %1240 = vst [vmem:[#allocation1 + $0x21] ss:$4 sm:$0xff] %v4077_v26 }
  0xb6   : > { %1241 = vst [vmem:[#allocation1 + $0x22] ss:$4 sm:$0xff] %v4080_v27 }
  0xb7   : > { %1242 = vst [vmem:[#allocation1 + $0x23] ss:$4 sm:$0xff] %v4083_v28 }
  0xb8   : > { %v4521_v45 = vld.sshfl [vmem:[#allocation1] sm:$0xff pattern:$0x73625140] }
  0xb9   : > { %1255 = vst [vmem:[#allocation1] ss:$4 sm:$0xff] %v4219_v10 }
  0xba   : > { %1256 = vst [vmem:[#allocation1 + $0x1] ss:$4 sm:$0xff] %v4221_v44 }
  0xbb   : > { %1257 = vst [vmem:[#allocation1 + $0x2] ss:$4 sm:$0xff] %v4224_v63 }
  0xbc   : > { %1258 = vst [vmem:[#allocation1 + $0x3] ss:$4 sm:$0xff] %v4228_v7 }
  0xbe   : > { %v1244_v5 = vld.sshfl [vmem:[#allocation1 + $0x20] sm:$0xff pattern:$0x73625140] }
  0xbf   : > { %1249 = vst [vmem:[#allocation1 + $0x20] ss:$4 sm:$0xff] %v4206_v24 }
  0xc0   : > { %1250 = vst [vmem:[#allocation1 + $0x21] ss:$4 sm:$0xff] %v4210_v50 }
  0xc1   : > { %1251 = vst [vmem:[#allocation1 + $0x22] ss:$4 sm:$0xff] %v4212_v48 }
  0xc2   : > { %1252 = vst [vmem:[#allocation1 + $0x23] ss:$4 sm:$0xff] %v4215_v19 }
  0xc3   : > { %v4537_v29 = vld.sshfl [vmem:[#allocation1] sm:$0xff pattern:$0x73625140] }
  0xc4   : > { %1345 = vmatmul.bf16.gmra.mxu1 %v1243_v18  ;;  %1265 = vst [vmem:[#allocation1] ss:$4 sm:$0xff] %v4233_v32  ;;  %v1424_v18 = vrot.slane %v3950_v2, 7 }
  0xc5   : > { %1266 = vst [vmem:[#allocation1 + $0x1] ss:$4 sm:$0xff] %v4237_v55 }
  0xc6   : > { %1267 = vst [vmem:[#allocation1 + $0x2] ss:$4 sm:$0xff] %v4239_v52  ;;  %v1426_v16 = vrot.slane %v1424_v18, 2  ;;  %v4575_v43 = vsel %vm4549_vm15, %v3330_v57, %v1424_v18  ;;  %v4592_v18 = vsel %vm4549_vm15, %v3331_v49, %v1434_v47  ;;  %v1447_v57 = vrot.slane %v3954_v4, 7  ;;  %v5848_v47 = vld [vmem:[#allocation4_spill] sm:$0xff] }
  0xc7   : > { %1268 = vst [vmem:[#allocation1 + $0x3] ss:$4 sm:$0xff] %v4248_v38  ;;  %v5849_v39 = vrot.slane %v5848_v47, 2  ;;  %v1464_v47 = vrot.slane %v4095_v36, 7 }
  0xc8   : > { %5841 = vst [vmem:[#allocation2_spill] sm:$0xff] %v4575_v43  ;;  %v4580_v9 = vsel %vm4549_vm15, %v1426_v16, %v1427_v62  ;;  %v4597_v62 = vsel %vm4549_vm15, %v1436_v30, %v1437_v14  ;;  %v1449_v49 = vrot.slane %v1447_v57, 2 }
  0xc9   : > { %v4545_v56 = vld.sshfl [vmem:[#allocation1 + $0x20] sm:$0xff pattern:$0x73625140]  ;;  %5842 = vst [vmem:[#allocation11_spill] sm:$0xff] %v4580_v9  ;;  %v1450_v59 = vrot.slane %v5849_v39, 7 }
  0xca   : > { %1259 = vst [vmem:[#allocation1 + $0x20] ss:$4 sm:$0xff] %v4230_v13 }
  0xcb   : > { %1260 = vst [vmem:[#allocation1 + $0x21] ss:$4 sm:$0xff] %v4429_v53 }
  0xcc   : > { %1261 = vst [vmem:[#allocation1 + $0x22] ss:$4 sm:$0xff] %v4422_v31 }
  0xcd   : > { %1262 = vst [vmem:[#allocation1 + $0x23] ss:$4 sm:$0xff] %v4431_v61 }
  0xce   : > { %v4568_v37 = vld.sshfl [vmem:[#allocation1] sm:$0xff pattern:$0x73625140]  ;;  %5844 = vst [vmem:[#allocation58_spill] sm:$0xff] %v4592_v18 }
  0xcf   : > { %1550 = vst [vmem:[#allocation1] ss:$4 sm:$0xff] %v1415_v46  ;;  %v5846_v46 = vld [vmem:[#allocation3_spill] sm:$0xff] }
  0xd0   : > { %1553 = vst [vmem:[#allocation1 + $0x1] ss:$4 sm:$0xff] %v1418_v15  ;;  %v5847_v16 = vrot.slane %v5846_v46, 2  ;;  %v4618_v46 = vsel %vm4549_vm15, %v1446_v11, %v1447_v57  ;;  %v1474_v57 = vrot.slane %v4203_v21, 7  ;;  %v5854_v11 = vld [vmem:[#allocation27_spill] sm:$0xff] }
  0xd1   : > { %1556 = vst [vmem:[#allocation1 + $0x2] ss:$4 sm:$0xff] %v1421_v35  ;;  %v1439_v35 = vrot.slane %v1437_v14, 2 }
  0xd2   : > { %1559 = vst [vmem:[#allocation1 + $0x3] ss:$4 sm:$0xff] %v4575_v43  ;;  %v1440_v15 = vrot.slane %v5847_v16, 7  ;;  %v4622_v16 = vsel %vm4549_vm15, %v1449_v49, %v1450_v59  ;;  %v5855_v49 = vrot.slane %v5854_v11, 2  ;;  %v3709_v59 = vld [vmem:[%s5618_s3 + $0xe0] sm:$0xff]  ;;  %v1477_v43 = vrot.slane %v4206_v24, 7 }
  0xd3   : > { %5845 = vst [vmem:[#allocation59_spill] sm:$0xff] %v4597_v62 }
  0xd4   : > { %v4588_v33 = vld.sshfl [vmem:[#allocation1 + $0x20] sm:$0xff pattern:$0x73625140]  ;;  %1350 = vmatmul.bf16.gmra.mxu1 %v1244_v5  ;;  %v4610_v30 = vsel %vm4549_vm15, %v1439_v35, %v1440_v15  ;;  %v4614_v5 = vsel %vm4549_vm15, %v3332_v42, %v1444_v41  ;;  %5852 = vst [vmem:[#allocation60_spill] sm:$0xff] %v4618_v46  ;;  %v1467_v35 = vrot.slane %v4197_v54, 7  ;;  %v3710_v41 = vld [vmem:[%s5618_s3 + $0xe8] sm:$0xff] }
  0xd5   : > { %1562 = vst [vmem:[#allocation1 + $0x20] ss:$4 sm:$0xff] %v4580_v9  ;;  %1908 = vmatpush.bf16.msrb.mxu3 %v3710_v41  ;;  %v1466_v15 = vrot.slane %v1464_v47, 2  ;;  %v1470_v39 = vrot.slane %v5855_v49, 7  ;;  %v1476_v9 = vrot.slane %v1474_v57, 2  ;;  %v3333_v41 = vrot.slane %v4071_v23, 9 }
  0xd6   : > { %1565 = vst [vmem:[#allocation1 + $0x21] ss:$4 sm:$0xff] %v4584_v3  ;;  %v1469_v42 = vrot.slane %v1467_v35, 2  ;;  %v3335_v3 = vrot.slane %v4201_v51, 9 }
  0xd7   : > { %1568 = vst [vmem:[#allocation1 + $0x22] ss:$4 sm:$0xff] %v4592_v18  ;;  %v1457_v18 = vrot.slane %v4080_v27, 7  ;;  %v4646_v11 = vsel %vm4549_vm15, %v1466_v15, %v1467_v35 }
  0xd8   : > { %1571 = vst [vmem:[#allocation1 + $0x23] ss:$4 sm:$0xff] %v4597_v62  ;;  %v5859_v62 = vld [vmem:[#allocation12_spill] sm:$0xff]  ;;  %v4664_v8 = vsel %vm4549_vm15, %v3335_v3, %v1474_v57  ;;  %v1497_v57 = vrot.slane %v4224_v63, 7 }
  0xd9   : > { %5850 = vst [vmem:[#allocation3_spill] sm:$0xff] %v4610_v30  ;;  %v1572_v14 = vld.sshfl [vmem:[#allocation1] sm:$0xff pattern:$0x73625140]  ;;  %1909 = vmatpush.bf16.msrb.mxu3 %v3709_v59  ;;  %v5860_v35 = vrot.slane %v5859_v62, 2  ;;  %v1494_v62 = vrot.slane %v4221_v44, 7 }
  0xda   : > { %5851 = vst [vmem:[#allocation4_spill] sm:$0xff] %v4614_v5  ;;  %1702 = vmatmul.bf16.vlgmr.msrb.gmra.mxu2 %v1572_v14  ;;  %v1454_v14 = vrot.slane %v4077_v26, 7 }
  0xdb   : > { %5853 = vst [vmem:[#allocation61_spill] sm:$0xff] %v4622_v16  ;;  %v1460_v15 = vrot.slane %v5860_v35, 7  ;;  %v5866_v35 = vrot.slane %v4255_v22, 2  ;;  %v1479_v22 = vrot.slane %v1477_v43, 2 }
  0xdc   : > { %1575 = vst [vmem:[#allocation1] ss:$4 sm:$0xff] %v4610_v30  ;;  %v1456_v49 = vrot.slane %v1454_v14, 2  ;;  %v4658_v59 = vsel %vm4549_vm15, %v3333_v41, %v1454_v14  ;;  %v1459_v30 = vrot.slane %v1457_v18, 2  ;;  %v1496_v41 = vrot.slane %v1494_v62, 2 }
  0xdd   : > { %1577 = vst [vmem:[#allocation1 + $0x1] ss:$4 sm:$0xff] %v4614_v5  ;;  %v3708_v5 = vld [vmem:[%s5618_s3 + $0xd8] sm:$0xff] }
  0xde   : > { %1579 = vst [vmem:[#allocation1 + $0x2] ss:$4 sm:$0xff] %v4618_v46  ;;  %1910 = vmatpush.bf16.msrb.mxu3 %v3708_v5  ;;  %v4679_v3 = vsel %vm4549_vm15, %v1456_v49, %v1457_v18  ;;  %v4688_v14 = vsel %vm4549_vm15, %v1459_v30, %v1460_v15  ;;  %v3337_v18 = vrot.slane %v4219_v10, 9  ;;  %v1499_v49 = vrot.slane %v1497_v57, 2  ;;  %v3706_v15 = vld [vmem:[%s5618_s3 + $0xc8] sm:$0xff] }
  0xdf   : > { %1581 = vst [vmem:[#allocation1 + $0x3] ss:$4 sm:$0xff] %v4622_v16  ;;  %v4650_v16 = vsel %vm4549_vm15, %v1469_v42, %v1470_v39  ;;  %v1573_v46 = vld.sshfl [vmem:[#allocation1 + $0x20] sm:$0xff pattern:$0x73625140]  ;;  %v3334_v39 = vrot.slane %v4083_v28, 9 }
  0xe0   : > { %5856 = vst [vmem:[#allocation27_spill] sm:$0xff] %v4646_v11  ;;  %v1500_v30 = vrot.slane %v5866_v35, 7  ;;  %v5868_v35 = vrot.slane %v4245_v58, 2 }
  0xe1   : > { %5857 = vst [vmem:[#allocation62_spill] sm:$0xff] %v4650_v16  ;;  %v4693_v5 = vsel %vm4549_vm15, %v3334_v39, %v1464_v47  ;;  %v1484_v47 = vrot.slane %v4212_v48, 7  ;;  %v3338_v39 = vrot.slane %v4228_v7, 9 }
  0xe2   : > { %5858 = vst [vmem:[#allocation63_spill] sm:$0xff] %v4658_v59 }
  0xe3   : > { %5861 = vst [vmem:[#allocation12_spill] sm:$0xff] %v4664_v8 }
  0xe4   : > { %1355 = vmatmul.bf16.gmra.mxu1 %v4521_v45  ;;  %1583 = vst [vmem:[#allocation1 + $0x20] ss:$4 sm:$0xff] %v4658_v59  ;;  %v4672_v45 = vsel %vm4549_vm15, %v1476_v9, %v1477_v43  ;;  %v3707_v9 = vld [vmem:[%s5618_s3 + $0xd0] sm:$0xff]  ;;  %v3336_v59 = vrot.slane %v4210_v50, 9  ;;  %v1486_v43 = vrot.slane %v1484_v47, 2 }
  0xe5   : > { %5862 = vst [vmem:[#allocation64_spill] sm:$0xff] %v4672_v45  ;;  %1911 = vmatpush.bf16.msrb.mxu3 %v3707_v9  ;;  %v1504_v9 = vrot.slane %v4230_v13, 7 }
  0xe6   : > { %v4666_v42 = vld.sshfl [vmem:[#allocation1] sm:$0xff pattern:$0x73625140]  ;;  %5863 = vst [vmem:[#allocation65_spill] sm:$0xff] %v4679_v3 }
  0xe7   : > { %1593 = vst [vmem:[#allocation1] ss:$4 sm:$0xff] %v4646_v11  ;;  %v4730_v58 = vsel %vm4549_vm15, %v3338_v39, %v1504_v9  ;;  %v4745_v11 = vsel %vm4549_vm15, %v3336_v59, %v1484_v47  ;;  %v1507_v47 = vrot.slane %v4429_v53, 7 }
  0xe8   : > { %1595 = vst [vmem:[#allocation1 + $0x1] ss:$4 sm:$0xff] %v4650_v16 }
  0xe9   : > { %1597 = vst [vmem:[#allocation1 + $0x2] ss:$4 sm:$0xff] %v4664_v8  ;;  %1912 = vmatpush.bf16.msrb.mxu3 %v3706_v15  ;;  %v4721_v8 = vsel %vm4549_vm15, %v1499_v49, %v1500_v30 }
  0xea   : > { %5864 = vst [vmem:[#allocation66_spill] sm:$0xff] %v4688_v14  ;;  %1707 = vmatmul.bf16.gmra.mxu2 %v1573_v46  ;;  %v1487_v46 = vrot.slane %v4215_v19, 7 }
  0xeb   : > { %1599 = vst [vmem:[#allocation1 + $0x3] ss:$4 sm:$0xff] %v4672_v45  ;;  %v4710_v45 = vsel %vm4549_vm15, %v3337_v18, %v1494_v62  ;;  %v3705_v62 = vld [vmem:[%s5618_s3 + $0xc0] sm:$0xff] }
  0xec   : > { %5865 = vst [vmem:[#allocation67_spill] sm:$0xff] %v4693_v5  ;;  %v1489_v18 = vrot.slane %v1487_v46, 2 }
  0xed   : > { %1585 = vst [vmem:[#allocation1 + $0x21] ss:$4 sm:$0xff] %v4679_v3  ;;  %v4716_v3 = vsel %vm4549_vm15, %v1496_v41, %v1497_v57  ;;  %v1517_v57 = vrot.slane %v4233_v32, 7  ;;  %v5872_v41 = vld [vmem:[#allocation29_spill] sm:$0xff]  ;;  %1913 = vmatpush.bf16.msrb.mxu3 %v3705_v62  ;;  %v4752_v62 = vsel %vm4549_vm15, %v1486_v43, %v1487_v46  ;;  %v3719_v43 = vld [vmem:[%s5618_s3 + $0x130] sm:$0xff] }
  0xee   : > { %1587 = vst [vmem:[#allocation1 + $0x22] ss:$4 sm:$0xff] %v4688_v14  ;;  %v1480_v14 = vrot.slane %v5868_v35, 7  ;;  %v5873_v15 = vrot.slane %v5872_v41, 2  ;;  %v1524_v35 = vrot.slane %v4239_v52, 7 }
  0xef   : > { %1589 = vst [vmem:[#allocation1 + $0x23] ss:$4 sm:$0xff] %v4693_v5 }
  0xf0   : > { %5867 = vst [vmem:[#allocation68_spill] sm:$0xff] %v4710_v45  ;;  %v1490_v49 = vrot.slane %v5873_v15, 7  ;;  %v4739_v30 = vsel %vm4549_vm15, %v1479_v22, %v1480_v14  ;;  %v1519_v14 = vrot.slane %v1517_v57, 2  ;;  %v5877_v22 = vld [vmem:[#allocation30_spill] sm:$0xff]  ;;  %v1526_v46 = vrot.slane %v1524_v35, 2 }
  0xf1   : > { %5869 = vst [vmem:[#allocation69_spill] sm:$0xff] %v4716_v3  ;;  %v5878_v41 = vrot.slane %v5877_v22, 2 }
  0xf2   : > { %5870 = vst [vmem:[#allocation70_spill] sm:$0xff] %v4721_v8  ;;  %v4723_v16 = vld.sshfl [vmem:[#allocation1] sm:$0xff pattern:$0x73625140]  ;;  %v4761_v59 = vsel %vm4549_vm15, %v1489_v18, %v1490_v49 }
  0xf3   : > { %5871 = vst [vmem:[#allocation71_spill] sm:$0xff] %v4730_v58  ;;  %v1520_v15 = vrot.slane %v5878_v41, 7  ;;  %v5880_v41 = vld [vmem:[#allocation31_spill] sm:$0xff] }
  0xf4   : > { %1611 = vst [vmem:[#allocation1] ss:$4 sm:$0xff] %v4710_v45  ;;  %v1527_v45 = vrot.slane %v4248_v38, 7  ;;  %1360 = vmatmul.bf16.gmra.mxu1 %v4545_v56  ;;  %v3340_v56 = vrot.slane %v4237_v55, 9  ;;  %v5881_v18 = vrot.slane %v5880_v41, 2 }
  0xf5   : > { %1613 = vst [vmem:[#allocation1 + $0x1] ss:$4 sm:$0xff] %v4716_v3  ;;  %v4777_v3 = vsel %vm4549_vm15, %v1519_v14, %v1520_v15  ;;  %v3339_v14 = vrot.slane %v4422_v31, 9 }
  0xf6   : > { %5874 = vst [vmem:[#allocation29_spill] sm:$0xff] %v4739_v30  ;;  %v1591_v39 = vld.sshfl [vmem:[#allocation1 + $0x20] sm:$0xff pattern:$0x73625140]  ;;  %v1529_v22 = vrot.slane %v1527_v45, 2  ;;  %v1530_v49 = vrot.slane %v5881_v18, 7  ;;  %v4787_v41 = vsel %vm4549_vm15, %v1526_v46, %v1527_v45 }
  0xf7   : > { %1615 = vst [vmem:[#allocation1 + $0x2] ss:$4 sm:$0xff] %v4721_v8  ;;  %v3720_v8 = vld [vmem:[%s5618_s3 + $0x138] sm:$0xff] }
  0xf8   : > { %5875 = vst [vmem:[#allocation72_spill] sm:$0xff] %v4745_v11  ;;  %2141 = vmatpush.bf16.msrb.mxu0 %v3720_v8  ;;  %v4781_v8 = vsel %vm4549_vm15, %v3340_v56, %v1524_v35  ;;  %v277_v56 = vld [vmem:[%s3849_s28 + $0xc0] sm:$0xff] }
  0xf9   : > { %1617 = vst [vmem:[#allocation1 + $0x3] ss:$4 sm:$0xff] %v4730_v58  ;;  %v1514_v58 = vrot.slane %v4431_v61, 7 }
  0xfa   : > { %5876 = vst [vmem:[#allocation73_spill] sm:$0xff] %v4752_v62  ;;  %1712 = vmatmul.bf16.gmra.mxu2 %v4666_v42 }
  0xfb   : > { %5879 = vst [vmem:[#allocation30_spill] sm:$0xff] %v4761_v59  ;;  %v1516_v35 = vrot.slane %v1514_v58, 2  ;;  %v4811_v45 = vsel %vm4549_vm15, %v3339_v14, %v1514_v58 }
  0xfc   : > { %1601 = vst [vmem:[#allocation1 + $0x20] ss:$4 sm:$0xff] %v4739_v30  ;;  %v1509_v30 = vrot.slane %v1507_v47, 2  ;;  %2142 = vmatpush.bf16.msrb.mxu0 %v3719_v43 }
  0xfd   : > { %1603 = vst [vmem:[#allocation1 + $0x21] ss:$4 sm:$0xff] %v4745_v11  ;;  %v1506_v11 = vrot.slane %v1504_v9, 2  ;;  %v4795_v9 = vsel %vm4549_vm15, %v1529_v22, %v1530_v49  ;;  %v4817_v15 = vsel %vm4549_vm15, %v1516_v35, %v1517_v57  ;;  %v3716_v57 = vld [vmem:[%s5618_s3 + $0x118] sm:$0xff]  ;;  %v278_v22 = vld [vmem:[%s3849_s28 + $0xc8] sm:$0x3f] }
  0xfe   : > { %1605 = vst [vmem:[#allocation1 + $0x22] ss:$4 sm:$0xff] %v4752_v62  ;;  %v5882_v62 = vrot.slane %v4436_v40, 2 }
  0xff   : > { %1607 = vst [vmem:[#allocation1 + $0x23] ss:$4 sm:$0xff] %v4761_v59  ;;  %v4801_v40 = vsel %vm4549_vm15, %v1506_v11, %v1507_v47  ;;  %v3718_v11 = vld [vmem:[%s5618_s3 + $0x128] sm:$0xff]  ;;  %v5886_v47 = vld [vmem:[#allocation44_spill] sm:$0xff] }
 0x100   : > { %v1510_v5 = vrot.slane %v5882_v62, 7  ;;  %v4789_v18 = vld.sshfl [vmem:[#allocation1] sm:$0xff pattern:$0x73625140]  ;;  %5883 = vst [vmem:[#allocation31_spill] sm:$0xff] %v4801_v40  ;;  %2143 = vmatpush.bf16.msrb.mxu0 %v3718_v11  ;;  %v309_v46 = vmul.f32 %v5886_v47, %v277_v56  ;;  %v310_v14 = vmul.f32 %v5886_v47, %v278_v22  ;;  %v3728_v56 = vld [vmem:[%s5618_s3 + $0x178] sm:$0xff] }
 0x101   : > { %1629 = vst [vmem:[#allocation1] ss:$4 sm:$0xff] %v4777_v3  ;;  %2354 = vmatpush.bf16.msra.mxu1 %v3728_v56  ;;  %v3727_v22 = vld [vmem:[%s5618_s3 + $0x170] sm:$0xff] }
 0x102   : > { %1631 = vst [vmem:[#allocation1 + $0x1] ss:$4 sm:$0xff] %v4781_v8  ;;  %v4806_v42 = vsel %vm4549_vm15, %v1509_v30, %v1510_v5  ;;  %v3717_v5 = vld [vmem:[%s5618_s3 + $0x120] sm:$0xff]  ;;  %v5891_v56 = vld [vmem:[#allocation7_spill] sm:$0xff] }
 0x103   : > { %1633 = vst [vmem:[#allocation1 + $0x2] ss:$4 sm:$0xff] %v4787_v41 }
 0x104   : > { %5884 = vst [vmem:[#allocation74_spill] sm:$0xff] %v4806_v42  ;;  %1365 = vmatmul.bf16.gmra.mxu1 %v4537_v29  ;;  %2144 = vmatpush.bf16.msrb.mxu0 %v3717_v5  ;;  %v3713_v29 = vld [vmem:[%s5618_s3 + $0x100] sm:$0xff] }
 0x105   : > { %1635 = vst [vmem:[#allocation1 + $0x3] ss:$4 sm:$0xff] %v4795_v9  ;;  %2355 = vmatpush.bf16.msra.mxu1 %v3727_v22  ;;  %v5892_v22 = vld [vmem:[#allocation8_spill] sm:$0xff] }
 0x106   : > { %5885 = vst [vmem:[#allocation75_spill] sm:$0xff] %v4811_v45  ;;  %v4813_v62 = vld.sshfl [vmem:[#allocation1 + $0x20] sm:$0xff pattern:$0x73625140] }
 0x107   : > { %1619 = vst [vmem:[#allocation1 + $0x20] ss:$4 sm:$0xff] %v4801_v40 }
 0x108   : > { %1621 = vst [vmem:[#allocation1 + $0x21] ss:$4 sm:$0xff] %v4806_v42  ;;  %2145 = vmatpush.bf16.msrb.mxu0 %v3716_v57 }
 0x109   : > { %1623 = vst [vmem:[#allocation1 + $0x22] ss:$4 sm:$0xff] %v4811_v45 }
 0x10a   : > { %1625 = vst [vmem:[#allocation1 + $0x23] ss:$4 sm:$0xff] %v4817_v15  ;;  %1717 = vmatmul.bf16.gmra.mxu2 %v1591_v39 }
 0x10c   : > { %v4830_v58 = vld.sshfl [vmem:[#allocation1] sm:$0xff pattern:$0x73625140] }
 0x10d   : > { %1796 = vst [vmem:[#allocation1] ss:$4 sm:$0xff] %v3936_v60  ;;  %v3715_v60 = vld [vmem:[%s5618_s3 + $0x110] sm:$0xff] }
 0x10e   : > { %1798 = vst [vmem:[#allocation1 + $0x1] ss:$4 sm:$0xff] %v3950_v2  ;;  %2146 = vmatpush.bf16.msrb.mxu0 %v3715_v60 }
 0x10f   : > { %1800 = vst [vmem:[#allocation1 + $0x2] ss:$4 sm:$0xff] %v4060_v17  ;;  %v3714_v17 = vld [vmem:[%s5618_s3 + $0x108] sm:$0xff] }
 0x110   : > { %1802 = vst [vmem:[#allocation1 + $0x3] ss:$4 sm:$0xff] %v4067_v20 }
 0x111   : > { %v4839_v30 = vld.sshfl [vmem:[#allocation1 + $0x20] sm:$0xff pattern:$0x73625140] }
 0x112   : > { %1804 = vst [vmem:[#allocation1 + $0x20] ss:$4 sm:$0xff] %v4075_v25  ;;  %2147 = vmatpush.bf16.msrb.mxu0 %v3714_v17 }
 0x113   : > { %1806 = vst [vmem:[#allocation1 + $0x21] ss:$4 sm:$0xff] %v3945_v0 }
 0x114   : > { %1808 = vst [vmem:[#allocation1 + $0x22] ss:$4 sm:$0xff] %v3948_v1  ;;  %1370 = vmatmul.bf16.gmra.mxu1 %v4588_v33  ;;  %v5887_v33 = vld [vmem:[#allocation45_spill] sm:$0xff] }
 0x115   : > { %1810 = vst [vmem:[#allocation1 + $0x23] ss:$4 sm:$0xff] %v3959_v6  ;;  %v341_v49 = vadd.f32 %v5887_v33, %v309_v46  ;;  %v342_v11 = vadd.f32 %v5887_v33, %v310_v14 }
 0x116   : > { %2148 = vmatpush.bf16.msrb.mxu0 %v3713_v29  ;;  %v3736_v29 = vld [vmem:[%s5618_s3 + $0x1b8] sm:$0xff] }
 0x117   : > { %v1811_v2 = vld.sshfl [vmem:[#allocation1] sm:$0xff pattern:$0x73625140]  ;;  %v369_v35 = vmax.f32 %v341_v49, 0.0  ;;  %v370_v57 = vmax.f32 %v342_v11, 0.0  ;;  %2566 = vmatpush.bf16.msra.mxu2 %v3736_v29  ;;  %v5890_v29 = vld [vmem:[#allocation16_spill] sm:$0xff] }
 0x118   : > { %1813 = vst [vmem:[#allocation1] ss:$4 sm:$0xff] %v3954_v4  ;;  %1914 = vmatmul.bf16.vlgmr.msrb.gmra.mxu3 %v1811_v2  ;;  %v4885_v2 = vpop.f32.mrf.mxu1 }
 0x119   : > { %1814 = vst [vmem:[#allocation1 + $0x1] ss:$4 sm:$0xff] %v4071_v23 }
 0x11a   : > { %1815 = vst [vmem:[#allocation1 + $0x2] ss:$4 sm:$0xff] %v4077_v26  ;;  %1722 = vmatmul.bf16.gmra.mxu2 %v4723_v16  ;;  %v397_v16 = vpack.c.bf16 %v369_v35, %v369_v35 }
 0x11b   : > { %1816 = vst [vmem:[#allocation1 + $0x3] ss:$4 sm:$0xff] %v4080_v27 }
 0x11c   : > { %v1812_v39 = vld.sshfl [vmem:[#allocation1 + $0x20] sm:$0xff pattern:$0x73625140]  ;;  %v1768_v17 = vrot.slane %v397_v16, 2 }
 0x11d   : > { %1817 = vst [vmem:[#allocation1 + $0x20] ss:$4 sm:$0xff] %v4083_v28 }
 0x11e   : > { %1818 = vst [vmem:[#allocation1 + $0x21] ss:$4 sm:$0xff] %v4095_v36  ;;  %v1773_v47 = vsel %vm453_vm1, %v397_v16, %v1768_v17  ;;  %v4911_v33 = vsel %vm449_vm0, %v397_v16, %v1768_v17  ;;  %v3726_v17 = vld [vmem:[%s5618_s3 + $0x168] sm:$0xff] }
 0x11f   : > { %1819 = vst [vmem:[#allocation1 + $0x22] ss:$4 sm:$0xff] %v4197_v54  ;;  %v4913_v49 = vrot.slane %v1773_v47, 2  ;;  %v3743_v47 = vld [vmem:[%s5618_s3 + $0x1f0] sm:$0xff]  ;;  %2356 = vmatpush.bf16.msra.mxu1 %v3726_v17  ;;  %v3724_v17 = vld [vmem:[%s5618_s3 + $0x158] sm:$0xff] }
 0x120   : > { %1820 = vst [vmem:[#allocation1 + $0x23] ss:$4 sm:$0xff] %v4201_v51  ;;  %v4926_v11 = vpop.f32.mrf.mxu1 }
 0x121   : > { %5888 = vst [vmem:[#allocation44_spill] sm:$0xff] %v4926_v11 }
 0x122   : > { %v1821_v43 = vld.sshfl [vmem:[#allocation1] sm:$0xff pattern:$0x73625140] }
 0x123   : > { %1823 = vst [vmem:[#allocation1] ss:$4 sm:$0xff] %v4203_v21 }
 0x124   : > { %1824 = vst [vmem:[#allocation1 + $0x1] ss:$4 sm:$0xff] %v4206_v24  ;;  %1375 = vmatmul.bf16.gmra.mxu1 %v4568_v37  ;;  %v4889_v37 = vpack.c.bf16 %v370_v57, %v370_v57  ;;  %v3752_v57 = vld [vmem:[%s5618_s3 + $0x238] sm:$0xff] }
 0x125   : > { %1825 = vst [vmem:[#allocation1 + $0x2] ss:$4 sm:$0xff] %v4210_v50  ;;  %3014 = vmatpush.bf16.msra.mxu0 %v3752_v57  ;;  %v5894_v57 = vld [vmem:[#allocation6_spill] sm:$0xff] }
 0x126   : > { %1826 = vst [vmem:[#allocation1 + $0x3] ss:$4 sm:$0xff] %v4212_v48  ;;  %v5750_v46 = vrot.slane %v4889_v37, 2 }
 0x127   : > { %v4874_v5 = vld.sshfl [vmem:[#allocation1 + $0x20] sm:$0xff pattern:$0x73625140] }
 0x128   : > { %1919 = vmatmul.bf16.gmra.mxu3 %v1812_v39  ;;  %1827 = vst [vmem:[#allocation1 + $0x20] ss:$4 sm:$0xff] %v4215_v19  ;;  %v3744_v39 = vld [vmem:[%s5618_s3 + $0x1f8] sm:$0xff]  ;;  %v4923_v35 = vsel %vm449_vm0, %v4889_v37, %v5750_v46  ;;  %v3725_v46 = vld [vmem:[%s5618_s3 + $0x160] sm:$0xff] }
 0x129   : > { %1828 = vst [vmem:[#allocation1 + $0x21] ss:$4 sm:$0xff] %v4219_v10  ;;  %2801 = vmatpush.bf16.msra.mxu3 %v3744_v39  ;;  %v3735_v39 = vld [vmem:[%s5618_s3 + $0x1b0] sm:$0xff]  ;;  %2357 = vmatpush.bf16.msra.mxu1 %v3725_v46 }
 0x12a   : > { %1829 = vst [vmem:[#allocation1 + $0x22] ss:$4 sm:$0xff] %v4221_v44  ;;  %1727 = vmatmul.bf16.gmra.mxu2 %v4813_v62 }
 0x12b   : > { %1830 = vst [vmem:[#allocation1 + $0x23] ss:$4 sm:$0xff] %v4224_v63  ;;  %2567 = vmatpush.bf16.msra.mxu2 %v3735_v39  ;;  %v5898_v39 = vld [vmem:[#allocation15_spill] sm:$0xff] }
 0x12d   : > { %v4880_v60 = vld.sshfl [vmem:[#allocation1] sm:$0xff pattern:$0x73625140]  ;;  %2802 = vmatpush.bf16.msra.mxu3 %v3743_v47  ;;  %2358 = vmatpush.bf16.msra.mxu1 %v3724_v17  ;;  %v3722_v17 = vld [vmem:[%s5618_s3 + $0x148] sm:$0xff] }
 0x12e   : > { %1833 = vst [vmem:[#allocation1] ss:$4 sm:$0xff] %v4228_v7 }
 0x12f   : > { %1834 = vst [vmem:[#allocation1 + $0x1] ss:$4 sm:$0xff] %v4230_v13 }
 0x130   : > { %1835 = vst [vmem:[#allocation1 + $0x2] ss:$4 sm:$0xff] %v4429_v53 }
 0x131   : > { %1836 = vst [vmem:[#allocation1 + $0x3] ss:$4 sm:$0xff] %v4422_v31 }
 0x132   : > { %v4902_v62 = vld.sshfl [vmem:[#allocation1 + $0x20] sm:$0xff pattern:$0x73625140] }
 0x133   : > { %1837 = vst [vmem:[#allocation1 + $0x20] ss:$4 sm:$0xff] %v4431_v61 }
 0x134   : > { %1838 = vst [vmem:[#allocation1 + $0x21] ss:$4 sm:$0xff] %v4233_v32  ;;  %v5917_v32 = vld [vmem:[#allocation40_spill] sm:$0xff] }
 0x135   : > { %1839 = vst [vmem:[#allocation1 + $0x22] ss:$4 sm:$0xff] %v4237_v55 }
 0x136   : > { %1840 = vst [vmem:[#allocation1 + $0x23] ss:$4 sm:$0xff] %v4239_v52 }
 0x138   : > { %1924 = vmatmul.bf16.gmra.mxu3 %v1821_v43  ;;  %v4916_v14 = vld.sshfl [vmem:[#allocation1] sm:$0xff pattern:$0x73625140]  ;;  %v4931_v43 = vpop.f32.mrf.mxu2 }
 0x139   : > { %1843 = vst [vmem:[#allocation1] ss:$4 sm:$0xff] %v4248_v38  ;;  %v5903_v38 = vld [vmem:[#allocation34_spill] sm:$0xff] }
 0x13a   : > { %1844 = vst [vmem:[#allocation1 + $0x1] ss:$4 sm:$0xff] %v4911_v33  ;;  %1732 = vmatmul.bf16.gmra.mxu2 %v4789_v18  ;;  %v4957_v18 = vpop.f32.mrf.mxu1 }
 0x13b   : > { %1846 = vst [vmem:[#allocation1 + $0x2] ss:$4 sm:$0xff] %v4913_v49 }
 0x13c   : > { %1847 = vst [vmem:[#allocation1 + $0x3] ss:$4 sm:$0xff] %v4923_v35 }
 0x13d   : > { %5889 = vst [vmem:[#allocation45_spill] sm:$0xff] %v4931_v43  ;;  %v4933_v16 = vld.sshfl [vmem:[#allocation1 + $0x20] sm:$0xff pattern:$0x73625140]  ;;  %v5896_v43 = vld [vmem:[#allocation14_spill] sm:$0xff] }
 0x13e   : > { %2037 = vst [vmem:[#allocation1 + $0x20] ss:$4 sm:$0xff] %v5890_v29  ;;  %v5893_v29 = vld [vmem:[#allocation9_spill] sm:$0xff] }
 0x13f   : > { %2039 = vst [vmem:[#allocation1 + $0x21] ss:$4 sm:$0xff] %v5891_v56  ;;  %v5895_v56 = vld [vmem:[#allocation13_spill] sm:$0xff] }
 0x140   : > { %2041 = vst [vmem:[#allocation1 + $0x22] ss:$4 sm:$0xff] %v5892_v22  ;;  %v4962_v22 = vpop.f32.mrf.mxu2 }
 0x141   : > { %2043 = vst [vmem:[#allocation1 + $0x23] ss:$4 sm:$0xff] %v5893_v29 }
 0x142   : > { %5897 = vst [vmem:[#allocation6_spill] sm:$0xff] %v4962_v22  ;;  %v5901_v22 = vld [vmem:[#allocation33_spill] sm:$0xff]  ;;  %v4975_v46 = vpop.f32.mrf.mxu1 }
 0x143   : > { %v4954_v11 = vld.sshfl [vmem:[#allocation1] sm:$0xff pattern:$0x73625140]  ;;  %5902 = vst [vmem:[#allocation13_spill] sm:$0xff] %v4975_v46  ;;  %v5907_v46 = vld [vmem:[#allocation18_spill] sm:$0xff] }
 0x144   : > { %2029 = vst [vmem:[#allocation1] ss:$4 sm:$0xff] %v5894_v57  ;;  %v3723_v57 = vld [vmem:[%s5618_s3 + $0x150] sm:$0xff] }
 0x145   : > { %2031 = vst [vmem:[#allocation1 + $0x1] ss:$4 sm:$0xff] %v5895_v56  ;;  %v5899_v56 = vld [vmem:[#allocation20_spill] sm:$0xff]  ;;  %2359 = vmatpush.bf16.msra.mxu1 %v3723_v57  ;;  %v3721_v57 = vld [vmem:[%s5618_s3 + $0x140] sm:$0xff] }
 0x146   : > { %2033 = vst [vmem:[#allocation1 + $0x2] ss:$4 sm:$0xff] %v5896_v43  ;;  %v5900_v43 = vld [vmem:[#allocation32_spill] sm:$0xff] }
 0x147   : > { %2035 = vst [vmem:[#allocation1 + $0x3] ss:$4 sm:$0xff] %v5898_v39 }
 0x148   : > { %1929 = vmatmul.bf16.gmra.mxu3 %v4874_v5  ;;  %v2045_v47 = vld.sshfl [vmem:[#allocation1 + $0x20] sm:$0xff pattern:$0x73625140]  ;;  %v5904_v5 = vld [vmem:[#allocation10_spill] sm:$0xff] }
 0x149   : > { %2050 = vst [vmem:[#allocation1 + $0x20] ss:$4 sm:$0xff] %v5899_v56  ;;  %v3751_v56 = vld [vmem:[%s5618_s3 + $0x230] sm:$0xff]  ;;  %2360 = vmatpush.bf16.msra.mxu1 %v3722_v17  ;;  %v1981_v17 = vshrl.u32 %v4911_v33, 16 }
 0x14a   : > { %2051 = vst [vmem:[#allocation1 + $0x21] ss:$4 sm:$0xff] %v5900_v43  ;;  %v5905_v43 = vld [vmem:[#allocation17_spill] sm:$0xff]  ;;  %1737 = vmatmul.bf16.gmra.mxu2 %v4839_v30  ;;  %3015 = vmatpush.bf16.msra.mxu0 %v3751_v56  ;;  %v5913_v56 = vld [vmem:[#allocation38_spill] sm:$0xff] }
 0x14b   : > { %2052 = vst [vmem:[#allocation1 + $0x22] ss:$4 sm:$0xff] %v5901_v22  ;;  %v4986_v22 = vpop.f32.mrf.mxu2  ;;  %v5912_v30 = vld [vmem:[#allocation37_spill] sm:$0xff]  ;;  %v1983_v52 = vrot.slane %v1981_v17, 6 }
 0x14c   : > { %2053 = vst [vmem:[#allocation1 + $0x23] ss:$4 sm:$0xff] %v5903_v38  ;;  %v4994_v38 = vpop.f32.mrf.mxu1 }
 0x14d   : > { %5906 = vst [vmem:[#allocation14_spill] sm:$0xff] %v4986_v22  ;;  %2361 = vmatpush.bf16.msra.mxu1 %v3721_v57  ;;  %v5910_v22 = vld [vmem:[#allocation35_spill] sm:$0xff]  ;;  %v1989_v57 = vshll.u32 %v4913_v49, 16 }
 0x14e   : > { %v2044_v29 = vld.sshfl [vmem:[#allocation1] sm:$0xff pattern:$0x73625140] }
 0x14f   : > { %2149 = vmatmul.bf16.vlgmr.msrb.gmra.mxu0 %v2044_v29  ;;  %2046 = vst [vmem:[#allocation1] ss:$4 sm:$0xff] %v5904_v5  ;;  %v5908_v29 = vld [vmem:[#allocation19_spill] sm:$0xff]  ;;  %v1998_v5 = vshll.u32 %v4923_v35, 16  ;;  %v1991_v31 = vrot.slane %v1989_v57, 7 }
 0x150   : > { %2047 = vst [vmem:[#allocation1 + $0x1] ss:$4 sm:$0xff] %v5905_v43 }
 0x151   : > { %2048 = vst [vmem:[#allocation1 + $0x2] ss:$4 sm:$0xff] %v5907_v46  ;;  %v5911_v46 = vld [vmem:[#allocation36_spill] sm:$0xff] }
 0x152   : > { %2049 = vst [vmem:[#allocation1 + $0x3] ss:$4 sm:$0xff] %v5908_v29  ;;  %v1984_v29 = vshll.u32 %v4911_v33, 16 }
 0x153   : > { %v4997_v43 = vpop.f32.mrf.mxu2 }
 0x154   : > { %5909 = vst [vmem:[#allocation76_spill] sm:$0xff] %v4997_v43  ;;  %v5914_v43 = vrot.slane %v4889_v37, 2  ;;  %v1986_v55 = vrot.slane %v1984_v29, 7 }
 0x156   : > { %v1987_v17 = vor.u32 %v1986_v55, %v1983_v52  ;;  %v3742_v55 = vld [vmem:[%s5618_s3 + $0x1e8] sm:$0xff] }
 0x157   : > { %v3750_v52 = vld [vmem:[%s5618_s3 + $0x228] sm:$0xff]  ;;  %2803 = vmatpush.bf16.msra.mxu3 %v3742_v55  ;;  %v5933_v55 = vld [vmem:[#allocation49_spill] sm:$0xff] }
 0x158   : > { %1934 = vmatmul.bf16.gmra.mxu3 %v4880_v60  ;;  %v1993_v60 = vshrl.u32 %v4913_v49, 16  ;;  %3016 = vmatpush.bf16.msra.mxu0 %v3750_v52  ;;  %v3749_v52 = vld [vmem:[%s5618_s3 + $0x220] sm:$0xff] }
 0x159   : > { %v2054_v39 = vld.sshfl [vmem:[#allocation1] sm:$0xff pattern:$0x73625140] }
 0x15a   : > { %2056 = vst [vmem:[#allocation1] ss:$4 sm:$0xff] %v5910_v22  ;;  %1742 = vmatmul.bf16.gmra.mxu2 %v4830_v58  ;;  %v5915_v22 = vld [vmem:[#allocation39_spill] sm:$0xff]  ;;  %v1995_v53 = vrot.slane %v1993_v60, 6  ;;  %v5920_v58 = vld [vmem:[#allocation42_spill] sm:$0xff] }
 0x15b   : > { %2057 = vst [vmem:[#allocation1 + $0x1] ss:$4 sm:$0xff] %v5911_v46  ;;  %v5012_v46 = vsel %vm453_vm1, %v4889_v37, %v5914_v43  ;;  %v2000_v37 = vrot.slane %v1998_v5, 7  ;;  %v5918_v43 = vld [vmem:[#allocation41_spill] sm:$0xff]  ;;  %v5024_v13 = vpop.f32.mrf.mxu2  ;;  %v5923_v60 = vld [vmem:[#allocation55_spill] sm:$0xff] }
 0x15c   : > { %2058 = vst [vmem:[#allocation1 + $0x2] ss:$4 sm:$0xff] %v5912_v30  ;;  %v2002_v30 = vshrl.u32 %v4923_v35, 16  ;;  %v5761_v61 = vrot.slane %v5012_v46, 2  ;;  %v1996_v29 = vor.u32 %v1995_v53, %v1991_v31  ;;  %v1988_v53 = vrot.slane %v1987_v17, 2  ;;  %v5929_v17 = vld [vmem:[#allocation47_spill] sm:$0xff]  ;;  %3017 = vmatpush.bf16.msra.mxu0 %v3749_v52 }
 0x15d   : > { %2059 = vst [vmem:[#allocation1 + $0x3] ss:$4 sm:$0xff] %v5913_v56  ;;  %v5015_v56 = vld.sshfl [vmem:[#allocation1 + $0x20] sm:$0xff pattern:$0x73625140] }
 0x15e   : > { %2060 = vst [vmem:[#allocation1 + $0x20] ss:$4 sm:$0xff] %v5915_v22  ;;  %v2004_v7 = vrot.slane %v2002_v30, 6  ;;  %v5921_v22 = vld [vmem:[#allocation43_spill] sm:$0xff]  ;;  %v2008_v57 = vshll.u32 %v5761_v61, 16  ;;  %v3734_v30 = vld [vmem:[%s5618_s3 + $0x1a8] sm:$0xff] }
 0x15f   : > { %2154 = vmatmul.bf16.gmra.mxu0 %v2045_v47  ;;  %v5019_v47 = vpop.f32.mrf.mxu1  ;;  %2061 = vst [vmem:[#allocation1 + $0x21] ss:$4 sm:$0xff] %v5917_v32  ;;  %2568 = vmatpush.bf16.msra.mxu2 %v3734_v30 }
 0x160   : > { %5916 = vst [vmem:[#allocation77_spill] sm:$0xff] %v5019_v47  ;;  %v5922_v47 = vld [vmem:[#allocation54_spill] sm:$0xff]  ;;  %v2005_v5 = vor.u32 %v2004_v7, %v2000_v37 }
 0x161   : > { %2062 = vst [vmem:[#allocation1 + $0x22] ss:$4 sm:$0xff] %v5918_v43 }
 0x162   : > { %5919 = vst [vmem:[#allocation40_spill] sm:$0xff] %v5024_v13  ;;  %v2006_v13 = vrot.slane %v2005_v5, 2 }
 0x163   : > { %2063 = vst [vmem:[#allocation1 + $0x23] ss:$4 sm:$0xff] %v5920_v58  ;;  %v5053_v58 = vsel %vm3996_vm8, %v1988_v53, %v1991_v31  ;;  %v5055_v43 = vpop.f32.mrf.mxu2 }
 0x164   : > { %v5026_v63 = vld.sshfl [vmem:[#allocation1] sm:$0xff pattern:$0x73625140] }
 0x165   : > { %2066 = vst [vmem:[#allocation1] ss:$4 sm:$0xff] %v5921_v22  ;;  %v5939_v22 = vld [vmem:[#allocation2_spill] sm:$0xff] }
 0x166   : > { %2067 = vst [vmem:[#allocation1 + $0x1] ss:$4 sm:$0xff] %v4460_v12  ;;  %v5925_v12 = vld [vmem:[#allocation46_spill] sm:$0xff] }
 0x167   : > { %2068 = vst [vmem:[#allocation1 + $0x2] ss:$4 sm:$0xff] %v5922_v47  ;;  %v5047_v61 = vpop.f32.mrf.mxu1  ;;  %v5924_v47 = vld [vmem:[#allocation56_spill] sm:$0xff] }
 0x168   : > { %1939 = vmatmul.bf16.gmra.mxu3 %v4902_v62  ;;  %2069 = vst [vmem:[#allocation1 + $0x3] ss:$4 sm:$0xff] %v5923_v60  ;;  %v1997_v62 = vrot.slane %v1996_v29, 2  ;;  %v2010_v60 = vrot.slane %v2008_v57, 7  ;;  %v5931_v57 = vld [vmem:[#allocation48_spill] sm:$0xff] }
 0x169   : > { %5927 = vst [vmem:[#allocation56_spill] sm:$0xff] %v5053_v58 }
 0x16a   : > { %v5045_v7 = vld.sshfl [vmem:[#allocation1 + $0x20] sm:$0xff pattern:$0x73625140]  ;;  %5928 = vst [vmem:[#allocation46_spill] sm:$0xff] %v5055_v43  ;;  %v5060_v29 = vsel %vm3996_vm8, %v1997_v62, %v2000_v37  ;;  %v5067_v30 = vsel %vm3996_vm8, %v2006_v13, %v2010_v60  ;;  %v5935_v60 = vld [vmem:[#allocation59_spill] sm:$0xff]  ;;  %v5938_v43 = vld [vmem:[#allocation60_spill] sm:$0xff] }
 0x16b   : > { %2070 = vst [vmem:[#allocation1 + $0x20] ss:$4 sm:$0xff] %v5924_v47  ;;  %v3733_v37 = vld [vmem:[%s5618_s3 + $0x1a0] sm:$0xff]  ;;  %v5087_v53 = vpop.f32.mrf.mxu2  ;;  %v5936_v62 = vld [vmem:[#allocation3_spill] sm:$0xff] }
 0x16c   : > { %2071 = vst [vmem:[#allocation1 + $0x21] ss:$4 sm:$0xff] %v5925_v12  ;;  %v3741_v13 = vld [vmem:[%s5618_s3 + $0x1e0] sm:$0xff]  ;;  %2569 = vmatpush.bf16.msra.mxu2 %v3733_v37 }
 0x16d   : > { %2072 = vst [vmem:[#allocation1 + $0x22] ss:$4 sm:$0xff] %v5929_v17  ;;  %2804 = vmatpush.bf16.msra.mxu3 %v3741_v13  ;;  %v5941_v37 = vld [vmem:[#allocation57_spill] sm:$0xff] }
 0x16e   : > { %5930 = vst [vmem:[#allocation47_spill] sm:$0xff] %v5060_v29 }
 0x16f   : > { %2159 = vmatmul.bf16.gmra.mxu0 %v2054_v39  ;;  %v5062_v5 = vld.sshfl [vmem:[#allocation1] sm:$0xff pattern:$0x73625140]  ;;  %2073 = vst [vmem:[#allocation1 + $0x23] ss:$4 sm:$0xff] %v5931_v57  ;;  %v5073_v31 = vpop.f32.mrf.mxu1 }
 0x170   : > { %5932 = vst [vmem:[#allocation48_spill] sm:$0xff] %v5067_v30 }
 0x171   : > { %2076 = vst [vmem:[#allocation1] ss:$4 sm:$0xff] %v5933_v55 }
 0x172   : > { %2078 = vst [vmem:[#allocation1 + $0x1] ss:$4 sm:$0xff] %v5053_v58  ;;  %v5947_v58 = vld [vmem:[#allocation12_spill] sm:$0xff] }
 0x173   : > { %2080 = vst [vmem:[#allocation1 + $0x2] ss:$4 sm:$0xff] %v5060_v29  ;;  %v5940_v29 = vld [vmem:[#allocation11_spill] sm:$0xff] }
 0x174   : > { %2082 = vst [vmem:[#allocation1 + $0x3] ss:$4 sm:$0xff] %v5067_v30  ;;  %v5937_v30 = vld [vmem:[#allocation4_spill] sm:$0xff] }
 0x175   : > { %5934 = vst [vmem:[#allocation49_spill] sm:$0xff] %v5073_v31  ;;  %v3732_v31 = vld [vmem:[%s5618_s3 + $0x198] sm:$0xff] }
 0x176   : > { %v5075_v39 = vld.sshfl [vmem:[#allocation1 + $0x20] sm:$0xff pattern:$0x73625140]  ;;  %2570 = vmatpush.bf16.msra.mxu2 %v3732_v31  ;;  %v5946_v31 = vld [vmem:[#allocation62_spill] sm:$0xff] }
 0x177   : > { %2250 = vst [vmem:[#allocation1 + $0x20] ss:$4 sm:$0xff] %v5935_v60  ;;  %v5106_v13 = vpop.f32.mrf.mxu1 }
 0x178   : > { %1944 = vmatmul.bf16.gmra.mxu3 %v4916_v14  ;;  %2252 = vst [vmem:[#allocation1 + $0x21] ss:$4 sm:$0xff] %v5936_v62  ;;  %v3731_v14 = vld [vmem:[%s5618_s3 + $0x190] sm:$0xff]  ;;  %v5942_v62 = vld [vmem:[#allocation58_spill] sm:$0xff] }
 0x179   : > { %2254 = vst [vmem:[#allocation1 + $0x22] ss:$4 sm:$0xff] %v5937_v30  ;;  %v5943_v30 = vld [vmem:[#allocation67_spill] sm:$0xff] }
 0x17a   : > { %2256 = vst [vmem:[#allocation1 + $0x23] ss:$4 sm:$0xff] %v5938_v43  ;;  %2571 = vmatpush.bf16.msra.mxu2 %v3731_v14  ;;  %v5949_v14 = vld [vmem:[#allocation63_spill] sm:$0xff] }
 0x17b   : > { %v5095_v60 = vld.sshfl [vmem:[#allocation1] sm:$0xff pattern:$0x73625140] }
 0x17c   : > { %2242 = vst [vmem:[#allocation1] ss:$4 sm:$0xff] %v5939_v22  ;;  %v5109_v22 = vpop.f32.mrf.mxu2 }
 0x17d   : > { %2244 = vst [vmem:[#allocation1 + $0x1] ss:$4 sm:$0xff] %v5940_v29  ;;  %v5945_v29 = vld [vmem:[#allocation27_spill] sm:$0xff] }
 0x17e   : > { %2246 = vst [vmem:[#allocation1 + $0x2] ss:$4 sm:$0xff] %v5941_v37  ;;  %v5948_v37 = vld [vmem:[#allocation61_spill] sm:$0xff] }
 0x17f   : > { %2248 = vst [vmem:[#allocation1 + $0x3] ss:$4 sm:$0xff] %v5942_v62  ;;  %2164 = vmatmul.bf16.gmra.mxu0 %v5015_v56  ;;  %v3730_v56 = vld [vmem:[%s5618_s3 + $0x188] sm:$0xff]  ;;  %v5950_v62 = vld [vmem:[#allocation65_spill] sm:$0xff] }
 0x180   : > { %5944 = vst [vmem:[#allocation2_spill] sm:$0xff] %v5109_v22  ;;  %2572 = vmatpush.bf16.msra.mxu2 %v3730_v56  ;;  %v3729_v22 = vld [vmem:[%s5618_s3 + $0x180] sm:$0xff] }
 0x181   : > { %v2258_v52 = vld.sshfl [vmem:[#allocation1 + $0x20] sm:$0xff pattern:$0x73625140] }
 0x182   : > { %2263 = vst [vmem:[#allocation1 + $0x20] ss:$4 sm:$0xff] %v5943_v30 }
 0x183   : > { %2264 = vst [vmem:[#allocation1 + $0x21] ss:$4 sm:$0xff] %v5945_v29 }
 0x184   : > { %2265 = vst [vmem:[#allocation1 + $0x22] ss:$4 sm:$0xff] %v5946_v31  ;;  %v5951_v31 = vld [vmem:[#allocation66_spill] sm:$0xff]  ;;  %v5127_v29 = vpop.f32.mrf.mxu2  ;;  %2573 = vmatpush.bf16.msra.mxu2 %v3729_v22  ;;  %v5959_v22 = vld [vmem:[#allocation69_spill] sm:$0xff] }
 0x185   : > { %2266 = vst [vmem:[#allocation1 + $0x23] ss:$4 sm:$0xff] %v5947_v58  ;;  %v5953_v58 = vld [vmem:[#allocation64_spill] sm:$0xff] }
 0x186   : > { %v2257_v43 = vld.sshfl [vmem:[#allocation1] sm:$0xff pattern:$0x73625140] }
 0x187   : > { %2362 = vmatmul.bf16.vlgmr.msra.gmra.mxu1 %v2257_v43  ;;  %2259 = vst [vmem:[#allocation1] ss:$4 sm:$0xff] %v5948_v37  ;;  %v5125_v43 = vpop.f32.mrf.mxu1 }
 0x188   : > { %2260 = vst [vmem:[#allocation1 + $0x1] ss:$4 sm:$0xff] %v5949_v14  ;;  %1949 = vmatmul.bf16.gmra.mxu3 %v4933_v16  ;;  %v5955_v16 = vld [vmem:[#allocation72_spill] sm:$0xff]  ;;  %v5956_v14 = vld [vmem:[#allocation73_spill] sm:$0xff] }
 0x189   : > { %2261 = vst [vmem:[#allocation1 + $0x2] ss:$4 sm:$0xff] %v5950_v62  ;;  %v5954_v62 = vld [vmem:[#allocation29_spill] sm:$0xff] }
 0x18a   : > { %2262 = vst [vmem:[#allocation1 + $0x3] ss:$4 sm:$0xff] %v5951_v31 }
 0x18b   : > { %5952 = vst [vmem:[#allocation11_spill] sm:$0xff] %v5125_v43  ;;  %v5142_v43 = vpop.f32.mrf.mxu3 }
 0x18c   : > { %v5134_v37 = vpop.f32.mrf.mxu2  ;;  %v5136_v31 = vld.sshfl [vmem:[#allocation1 + $0x20] sm:$0xff pattern:$0x73625140]  ;;  %5960 = vst [vmem:[#allocation78_spill] sm:$0xff] %v5142_v43 }
 0x18d   : > { %5957 = vst [vmem:[#allocation57_spill] sm:$0xff] %v5134_v37 }
 0x18e   : > { %2273 = vst [vmem:[#allocation1 + $0x20] ss:$4 sm:$0xff] %v4761_v59 }
 0x18f   : > { %2169 = vmatmul.bf16.gmra.mxu0 %v5026_v63  ;;  %v1346_v56 = vpop.f32.mrf.mxu1  ;;  %v5958_v63 = vld [vmem:[#allocation68_spill] sm:$0xff]  ;;  %2275 = vst [vmem:[#allocation1 + $0x22] ss:$4 sm:$0xff] %v5959_v22  ;;  %v2220_v22 = vrot.slane %v4923_v35, 7 }
 0x190   : > { %2274 = vst [vmem:[#allocation1 + $0x21] ss:$4 sm:$0xff] %v5958_v63  ;;  %v3740_v63 = vld [vmem:[%s5618_s3 + $0x1d8] sm:$0xff] }
 0x191   : > { %v2267_v30 = vld.sshfl [vmem:[#allocation1] sm:$0xff pattern:$0x73625140]  ;;  %2805 = vmatpush.bf16.msra.mxu3 %v3740_v63 }
 0x192   : > { %2269 = vst [vmem:[#allocation1] ss:$4 sm:$0xff] %v5953_v58 }
 0x193   : > { %2270 = vst [vmem:[#allocation1 + $0x1] ss:$4 sm:$0xff] %v5954_v62  ;;  %v5180_v63 = vpop.f32.mrf.mxu3 }
 0x194   : > { %2271 = vst [vmem:[#allocation1 + $0x2] ss:$4 sm:$0xff] %v5955_v16  ;;  %v5961_v16 = vld [vmem:[#allocation70_spill] sm:$0xff]  ;;  %v1713_v59 = vpop.f32.mrf.mxu2 }
 0x195   : > { %2272 = vst [vmem:[#allocation1 + $0x3] ss:$4 sm:$0xff] %v5956_v14  ;;  %v5962_v14 = vld [vmem:[#allocation71_spill] sm:$0xff] }
 0x196   : > { %2276 = vst [vmem:[#allocation1 + $0x23] ss:$4 sm:$0xff] %v5961_v16  ;;  %v5964_v16 = vrot.slane %v5012_v46, 2 }
 0x197   : > { %2367 = vmatmul.bf16.gmra.mxu1 %v2258_v52  ;;  %v1347_v52 = vadd.f32 %v1346_v56, %v4885_v2  ;;  %v5150_v37 = vpop.f32.mrf.mxu1  ;;  %v3748_v2 = vld [vmem:[%s5618_s3 + $0x218] sm:$0xff]  ;;  %v3485_v56 = vrot.slane %v4911_v33, 9 }
 0x198   : > { %1954 = vmatmul.bf16.gmra.mxu3 %v4954_v11  ;;  %5963 = vst [vmem:[#allocation79_spill] sm:$0xff] %v5150_v37  ;;  %v2217_v11 = vrot.slane %v4913_v49, 7  ;;  %3018 = vmatpush.bf16.msra.mxu0 %v3748_v2  ;;  %v2223_v58 = vrot.slane %v5964_v16, 7 }
 0x199   : > { %v5164_v37 = vadd.f32 %v1713_v59, %v1347_v52 }
 0x19a   : > { %v5178_v59 = vsel %vm4549_vm15, %v3485_v56, %v2217_v11 }
 0x19b   : > { %v5212_v52 = vpop.f32.mrf.mxu3 }
 0x19c   : > { %v5144_v62 = vld.sshfl [vmem:[#allocation1] sm:$0xff pattern:$0x73625140]  ;;  %v5196_v16 = vpop.f32.mrf.mxu2 }
 0x19d   : > { %2279 = vst [vmem:[#allocation1] ss:$4 sm:$0xff] %v5962_v14  ;;  %v2222_v14 = vrot.slane %v2220_v22, 2 }
 0x19e   : > { %2280 = vst [vmem:[#allocation1 + $0x1] ss:$4 sm:$0xff] %v4801_v40  ;;  %v2219_v40 = vrot.slane %v2217_v11, 2 }
 0x19f   : > { %2281 = vst [vmem:[#allocation1 + $0x2] ss:$4 sm:$0xff] %v4806_v42  ;;  %2174 = vmatmul.bf16.gmra.mxu0 %v5045_v7  ;;  %v1173_v42 = vpop.f32.mrf.mxu0  ;;  %v5192_v46 = vsel %vm4549_vm15, %v2222_v14, %v2223_v58  ;;  %v3739_v58 = vld [vmem:[%s5618_s3 + $0x1d0] sm:$0xff] }
 0x1a0   : > { %2282 = vst [vmem:[#allocation1 + $0x3] ss:$4 sm:$0xff] %v4811_v45  ;;  %v1337_v7 = vadd.f32 %v5047_v61, %v1173_v42  ;;  %v5167_v45 = vld.sshfl [vmem:[#allocation1 + $0x20] sm:$0xff pattern:$0x73625140]  ;;  %v5185_v61 = vsel %vm4549_vm15, %v2219_v40, %v2220_v22  ;;  %v3747_v22 = vld [vmem:[%s5618_s3 + $0x210] sm:$0xff]  ;;  %2806 = vmatpush.bf16.msra.mxu3 %v3739_v58 }
 0x1a1   : > { %2283 = vst [vmem:[#allocation1 + $0x20] ss:$4 sm:$0xff] %v4817_v15  ;;  %3019 = vmatpush.bf16.msra.mxu0 %v3747_v22  ;;  %v5966_v58 = vld [vmem:[#allocation21_spill] sm:$0xff]  ;;  %v5967_v22 = vld [vmem:[#allocation22_spill] sm:$0xff] }
 0x1a2   : > { %v5173_v43 = vadd.f32 %v5087_v53, %v1337_v7  ;;  %2284 = vst [vmem:[#allocation1 + $0x21] ss:$4 sm:$0xff] %v4777_v3  ;;  %v1351_v53 = vpop.f32.mrf.mxu1 }
 0x1a3   : > { %2285 = vst [vmem:[#allocation1 + $0x22] ss:$4 sm:$0xff] %v4781_v8  ;;  %v1352_v40 = vadd.f32 %v1351_v53, %v4957_v18 }
 0x1a4   : > { %2286 = vst [vmem:[#allocation1 + $0x23] ss:$4 sm:$0xff] %v4787_v41  ;;  %v1718_v18 = vpop.f32.mrf.mxu2 }
 0x1a5   : > { %v5220_v2 = vadd.f32 %v1718_v18, %v1352_v40 }
 0x1a7   : > { %2372 = vmatmul.bf16.gmra.mxu1 %v2267_v30  ;;  %v5187_v42 = vld.sshfl [vmem:[#allocation1] sm:$0xff pattern:$0x73625140]  ;;  %v5206_v14 = vpop.f32.mrf.mxu0 }
 0x1a8   : > { %2289 = vst [vmem:[#allocation1] ss:$4 sm:$0xff] %v4795_v9 }
 0x1a9   : > { %2291 = vst [vmem:[#allocation1 + $0x1] ss:$4 sm:$0xff] %v5178_v59 }
 0x1aa   : > { %2293 = vst [vmem:[#allocation1 + $0x2] ss:$4 sm:$0xff] %v5185_v61  ;;  %v5222_v56 = vpop.f32.mrf.mxu1 }
 0x1ab   : > { %2295 = vst [vmem:[#allocation1 + $0x3] ss:$4 sm:$0xff] %v5192_v46  ;;  %v5201_v30 = vld.sshfl [vmem:[#allocation1 + $0x20] sm:$0xff pattern:$0x73625140] }
 0x1ac   : > { %2464 = vst [vmem:[#allocation1 + $0x20] ss:$4 sm:$0xff] %v3959_v6 }
 0x1ad   : > { %2466 = vst [vmem:[#allocation1 + $0x21] ss:$4 sm:$0xff] %v3954_v4 }
 0x1ae   : > { %2468 = vst [vmem:[#allocation1 + $0x22] ss:$4 sm:$0xff] %v4071_v23 }
 0x1af   : > { %2179 = vmatmul.bf16.gmra.mxu0 %v5062_v5  ;;  %2470 = vst [vmem:[#allocation1 + $0x23] ss:$4 sm:$0xff] %v4077_v26  ;;  %v1178_v4 = vpop.f32.mrf.mxu0  ;;  %v5230_v5 = vpop.f32.mrf.mxu2 }
 0x1b0   : > { %v1342_v6 = vadd.f32 %v5106_v13, %v1178_v4  ;;  %v280_v13 = vld [vmem:[%s3849_s28 + $0xd8] sm:$0x3f] }
 0x1b2   : > { %v5217_v11 = vld.sshfl [vmem:[#allocation1] sm:$0xff pattern:$0x73625140]  ;;  %v5233_v26 = vadd.f32 %v5127_v29, %v1342_v6 }
 0x1b3   : > { %2456 = vst [vmem:[#allocation1] ss:$4 sm:$0xff] %v4067_v20  ;;  %v5236_v20 = vpop.f32.mrf.mxu3 }
 0x1b4   : > { %2458 = vst [vmem:[#allocation1 + $0x1] ss:$4 sm:$0xff] %v4075_v25 }
 0x1b5   : > { %2460 = vst [vmem:[#allocation1 + $0x2] ss:$4 sm:$0xff] %v3945_v0 }
 0x1b6   : > { %2462 = vst [vmem:[#allocation1 + $0x3] ss:$4 sm:$0xff] %v3948_v1  ;;  %v2472_v23 = vld.sshfl [vmem:[#allocation1 + $0x20] sm:$0xff pattern:$0x73625140]  ;;  %v1356_v1 = vpop.f32.mrf.mxu1 }
 0x1b7   : > { %2377 = vmatmul.bf16.gmra.mxu1 %v5136_v31  ;;  %2477 = vst [vmem:[#allocation1 + $0x20] ss:$4 sm:$0xff] %v4201_v51  ;;  %v1357_v25 = vadd.f32 %v1356_v1, %v4994_v38  ;;  %v3738_v51 = vld [vmem:[%s5618_s3 + $0x1c8] sm:$0xff]  ;;  %v5274_v40 = vpop.f32.mrf.mxu0 }
 0x1b8   : > { %2478 = vst [vmem:[#allocation1 + $0x21] ss:$4 sm:$0xff] %v4203_v21  ;;  %2807 = vmatpush.bf16.msra.mxu3 %v3738_v51  ;;  %v3737_v21 = vld [vmem:[%s5618_s3 + $0x1c0] sm:$0xff]  ;;  %v5972_v51 = vld [vmem:[#allocation24_spill] sm:$0xff] }
 0x1b9   : > { %2479 = vst [vmem:[#allocation1 + $0x22] ss:$4 sm:$0xff] %v4206_v24 }
 0x1ba   : > { %2480 = vst [vmem:[#allocation1 + $0x23] ss:$4 sm:$0xff] %v4210_v50  ;;  %v279_v50 = vld [vmem:[%s3849_s28 + $0xd0] sm:$0xff] }
 0x1bb   : > { %v5256_v38 = vpop.f32.mrf.mxu3 }
 0x1bc   : > { %2808 = vmatpush.bf16.msra.mxu3 %v3737_v21 }
 0x1bd   : > { %v2471_v0 = vld.sshfl [vmem:[#allocation1] sm:$0xff pattern:$0x73625140] }
 0x1be   : > { %2574 = vmatmul.bf16.vlgmr.msra.gmra.mxu2 %v2471_v0  ;;  %2473 = vst [vmem:[#allocation1] ss:$4 sm:$0xff] %v4080_v27  ;;  %v1723_v27 = vpop.f32.mrf.mxu2  ;;  %v5268_v31 = vpop.f32.mrf.mxu1  ;;  %v5970_v0 = vld [vmem:[#allocation50_spill] sm:$0xff] }
 0x1bf   : > { %2474 = vst [vmem:[#allocation1 + $0x1] ss:$4 sm:$0xff] %v4083_v28  ;;  %2184 = vmatmul.bf16.gmra.mxu0 %v5075_v39  ;;  %v5253_v24 = vadd.f32 %v1723_v27, %v1357_v25  ;;  %v3792_v28 = vld [vmem:[%s5616_s1] ss:$0 sm:$0xff]  ;;  %v5971_v25 = vld [vmem:[#allocation52_spill] sm:$0xff] }
 0x1c0   : > { %2475 = vst [vmem:[#allocation1 + $0x2] ss:$4 sm:$0xff] %v4095_v36  ;;  %v311_v36 = vmul.f32 %v3792_v28, %v279_v50  ;;  %v312_v7 = vmul.f32 %v3792_v28, %v280_v13  ;;  %v3746_v50 = vld [vmem:[%s5618_s3 + $0x208] sm:$0xff] }
 0x1c1   : > { %2476 = vst [vmem:[#allocation1 + $0x3] ss:$4 sm:$0xff] %v4197_v54  ;;  %v3793_v54 = vld [vmem:[%s5617_s2] ss:$0 sm:$0xff]  ;;  %3020 = vmatpush.bf16.msra.mxu0 %v3746_v50 }
 0x1c2   : > { %v343_v29 = vadd.f32 %v3793_v54, %v311_v36  ;;  %5965 = vst [vmem:[#allocation80_spill] sm:$0xff] %v5268_v31 }
 0x1c4   : > { %v371_v53 = vmax.f32 %v343_v29, 0.0 }
 0x1c6   : > { %v399_v18 = vpack.c.bf16 %v371_v53, %v371_v53  ;;  %v1361_v1 = vpop.f32.mrf.mxu1  ;;  %v5976_v53 = vld [vmem:[#allocation28_spill] sm:$0xff] }
 0x1c7   : > { %2382 = vmatmul.bf16.gmra.mxu1 %v5144_v62  ;;  %v5272_v62 = vpop.f32.mrf.mxu3 }
 0x1c8   : > { %v2481_v39 = vld.sshfl [vmem:[#allocation1] sm:$0xff pattern:$0x73625140] }
 0x1c9   : > { %2483 = vst [vmem:[#allocation1] ss:$4 sm:$0xff] %v4212_v48  ;;  %v344_v48 = vadd.f32 %v3793_v54, %v312_v7  ;;  %v5975_v7 = vld [vmem:[#allocation26_spill] sm:$0xff] }
 0x1ca   : > { %2484 = vst [vmem:[#allocation1 + $0x1] ss:$4 sm:$0xff] %v4215_v19  ;;  %v5276_v19 = vld.sshfl [vmem:[#allocation1 + $0x20] sm:$0xff pattern:$0x73625140] }
 0x1cb   : > { %2485 = vst [vmem:[#allocation1 + $0x2] ss:$4 sm:$0xff] %v4219_v10  ;;  %v1960_v10 = vadd.f32 %v5212_v52, %v5173_v43  ;;  %v372_v4 = vmax.f32 %v344_v48, 0.0  ;;  %v5973_v43 = vld [vmem:[#allocation25_spill] sm:$0xff]  ;;  %v5294_v52 = vpop.f32.mrf.mxu2 }
 0x1cc   : > { %2486 = vst [vmem:[#allocation1 + $0x3] ss:$4 sm:$0xff] %v4221_v44  ;;  %v5968_v44 = vld [vmem:[#allocation23_spill] sm:$0xff]  ;;  %v2150_v36 = vpop.f32.mrf.mxu0 }
 0x1cd   : > { %2487 = vst [vmem:[#allocation1 + $0x20] ss:$4 sm:$0xff] %v5966_v58  ;;  %v5291_v21 = vpack.c.bf16 %v372_v4, %v372_v4  ;;  %v5303_v54 = vadd.f32 %v2150_v36, %v1960_v10 }
 0x1ce   : > { %2579 = vmatmul.bf16.gmra.mxu2 %v2472_v23  ;;  %2488 = vst [vmem:[#allocation1 + $0x21] ss:$4 sm:$0xff] %v5967_v22  ;;  %v5969_v23 = vld [vmem:[#allocation51_spill] sm:$0xff]  ;;  %v5977_v22 = vld [vmem:[#allocation45_spill] sm:$0xff] }
 0x1cf   : > { %2189 = vmatmul.bf16.gmra.mxu0 %v5095_v60  ;;  %2489 = vst [vmem:[#allocation1 + $0x22] ss:$4 sm:$0xff] %v5968_v44  ;;  %v2428_v60 = vrot.slane %v399_v18, 2  ;;  %v1925_v27 = vpop.f32.mrf.mxu3  ;;  %v2429_v29 = vrot.slane %v5291_v21, 2  ;;  %v1362_v10 = vadd.f32 %v1361_v1, %v5977_v22  ;;  %v5320_v44 = vpop.f32.mrf.mxu1  ;;  %v5979_v1 = vld [vmem:[#allocation9_spill] sm:$0xff]  ;;  %v5987_v22 = vld [vmem:[#allocation8_spill] sm:$0xff] }
 0x1d0   : > { %2490 = vst [vmem:[#allocation1 + $0x23] ss:$4 sm:$0xff] %v5969_v23  ;;  %v5300_v28 = vadd.f32 %v1925_v27, %v5164_v37  ;;  %v1962_v23 = vadd.f32 %v5256_v38, %v5233_v26  ;;  %v5983_v26 = vld [vmem:[#allocation18_spill] sm:$0xff] }
 0x1d1   : > { %5974 = vst [vmem:[#allocation21_spill] sm:$0xff] %v5294_v52  ;;  %v2433_v13 = vsel %vm453_vm1, %v399_v18, %v2428_v60  ;;  %v5311_v48 = vsel %vm449_vm0, %v399_v18, %v2428_v60  ;;  %v5326_v4 = vsel %vm449_vm0, %v5291_v21, %v2429_v29  ;;  %v5981_v60 = vld [vmem:[#allocation17_spill] sm:$0xff] }
 0x1d2   : > { %v5313_v58 = vrot.slane %v2433_v13, 2  ;;  %5978 = vst [vmem:[#allocation22_spill] sm:$0xff] %v5320_v44  ;;  %v5984_v13 = vld [vmem:[#allocation15_spill] sm:$0xff] }
 0x1d3   : > { %v5284_v6 = vld.sshfl [vmem:[#allocation1] sm:$0xff pattern:$0x73625140] }
 0x1d4   : > { %2493 = vst [vmem:[#allocation1] ss:$4 sm:$0xff] %v5970_v0  ;;  %v5335_v18 = vpop.f32.mrf.mxu0 }
 0x1d5   : > { %2494 = vst [vmem:[#allocation1 + $0x1] ss:$4 sm:$0xff] %v5971_v25  ;;  %v5980_v25 = vld [vmem:[#allocation10_spill] sm:$0xff] }
 0x1d6   : > { %2495 = vst [vmem:[#allocation1 + $0x2] ss:$4 sm:$0xff] %v5972_v51 }
 0x1d7   : > { %2387 = vmatmul.bf16.gmra.mxu1 %v5167_v45  ;;  %2496 = vst [vmem:[#allocation1 + $0x3] ss:$4 sm:$0xff] %v5973_v43  ;;  %v5305_v45 = vld.sshfl [vmem:[#allocation1 + $0x20] sm:$0xff pattern:$0x73625140]  ;;  %v1366_v36 = vpop.f32.mrf.mxu1 }
 0x1d8   : > { %2497 = vst [vmem:[#allocation1 + $0x20] ss:$4 sm:$0xff] %v5975_v7  ;;  %v5985_v7 = vld [vmem:[#allocation16_spill] sm:$0xff] }
 0x1d9   : > { %2498 = vst [vmem:[#allocation1 + $0x21] ss:$4 sm:$0xff] %v5976_v53  ;;  %v5986_v53 = vld [vmem:[#allocation7_spill] sm:$0xff] }
 0x1da   : > { %2499 = vst [vmem:[#allocation1 + $0x22] ss:$4 sm:$0xff] %v4911_v33  ;;  %v1728_v33 = vpop.f32.mrf.mxu2 }
 0x1db   : > { %2500 = vst [vmem:[#allocation1 + $0x23] ss:$4 sm:$0xff] %v4913_v49  ;;  %v5333_v49 = vadd.f32 %v1728_v33, %v1362_v10  ;;  %v5988_v10 = vld [vmem:[#allocation14_spill] sm:$0xff] }
 0x1dc   : > { %v2155_v50 = vpop.f32.mrf.mxu0  ;;  %v1367_v33 = vadd.f32 %v1366_v36, %v5988_v10  ;;  %v5995_v36 = vld [vmem:[#allocation20_spill] sm:$0xff] }
 0x1de   : > { %2584 = vmatmul.bf16.gmra.mxu2 %v2481_v39  ;;  %v5316_v37 = vld.sshfl [vmem:[#allocation1] sm:$0xff pattern:$0x73625140]  ;;  %v5330_v39 = vpop.f32.mrf.mxu3 }
 0x1df   : > { %2503 = vst [vmem:[#allocation1] ss:$4 sm:$0xff] %v4923_v35  ;;  %v3745_v35 = vld [vmem:[%s5618_s3 + $0x200] sm:$0xff] }
 0x1e0   : > { %2504 = vst [vmem:[#allocation1 + $0x1] ss:$4 sm:$0xff] %v5311_v48  ;;  %3021 = vmatpush.bf16.msra.mxu0 %v3745_v35 }
 0x1e1   : > { %2506 = vst [vmem:[#allocation1 + $0x2] ss:$4 sm:$0xff] %v5313_v58 }
 0x1e2   : > { %2507 = vst [vmem:[#allocation1 + $0x3] ss:$4 sm:$0xff] %v5326_v4  ;;  %v5340_v0 = vld.sshfl [vmem:[#allocation1 + $0x20] sm:$0xff pattern:$0x73625140]  ;;  %v5349_v51 = vpop.f32.mrf.mxu2 }
 0x1e3   : > { %2697 = vst [vmem:[#allocation1 + $0x20] ss:$4 sm:$0xff] %v5979_v1 }
 0x1e4   : > { %2699 = vst [vmem:[#allocation1 + $0x21] ss:$4 sm:$0xff] %v5980_v25  ;;  %v5990_v25 = vld [vmem:[#allocation34_spill] sm:$0xff] }
 0x1e5   : > { %2701 = vst [vmem:[#allocation1 + $0x22] ss:$4 sm:$0xff] %v5981_v60 }
 0x1e6   : > { %5982 = vst [vmem:[#allocation23_spill] sm:$0xff] %v5349_v51  ;;  %v1930_v43 = vpop.f32.mrf.mxu3 }
 0x1e7   : > { %2392 = vmatmul.bf16.gmra.mxu1 %v5187_v42  ;;  %2703 = vst [vmem:[#allocation1 + $0x23] ss:$4 sm:$0xff] %v5983_v26  ;;  %v5355_v38 = vadd.f32 %v1930_v43, %v5220_v2  ;;  %v5358_v42 = vadd.f32 %v2155_v50, %v1962_v23  ;;  %v5370_v23 = vpop.f32.mrf.mxu0  ;;  %v5991_v43 = vld [vmem:[#allocation35_spill] sm:$0xff]  ;;  %v5992_v26 = vld [vmem:[#allocation36_spill] sm:$0xff] }
 0x1e9   : > { %v5351_v27 = vld.sshfl [vmem:[#allocation1] sm:$0xff pattern:$0x73625140] }
 0x1ea   : > { %2689 = vst [vmem:[#allocation1] ss:$4 sm:$0xff] %v5984_v13  ;;  %v1733_v1 = vpop.f32.mrf.mxu2  ;;  %v1368_v13 = vpop.f32.mrf.mxu1 }
 0x1eb   : > { %2691 = vst [vmem:[#allocation1 + $0x1] ss:$4 sm:$0xff] %v5985_v7  ;;  %v5368_v60 = vadd.f32 %v1733_v1, %v1367_v33  ;;  %v5993_v7 = vld [vmem:[#allocation37_spill] sm:$0xff] }
 0x1ec   : > { %2693 = vst [vmem:[#allocation1 + $0x2] ss:$4 sm:$0xff] %v5986_v53  ;;  %v5996_v53 = vld [vmem:[#allocation32_spill] sm:$0xff]  ;;  %v5998_v33 = vld [vmem:[#allocation33_spill] sm:$0xff] }
 0x1ed   : > { %2695 = vst [vmem:[#allocation1 + $0x3] ss:$4 sm:$0xff] %v5987_v22  ;;  %v5997_v22 = vld [vmem:[#allocation76_spill] sm:$0xff] }
 0x1ee   : > { %2589 = vmatmul.bf16.gmra.mxu2 %v5276_v19  ;;  %v2705_v35 = vld.sshfl [vmem:[#allocation1 + $0x20] sm:$0xff pattern:$0x73625140]  ;;  %v5365_v2 = vpop.f32.mrf.mxu3  ;;  %v5994_v19 = vld [vmem:[#allocation19_spill] sm:$0xff]  ;;  %v1369_v10 = vadd.f32 %v1368_v13, %v5997_v22 }
 0x1ef   : > { %5989 = vst [vmem:[#allocation51_spill] sm:$0xff] %v5365_v2  ;;  %v6000_v13 = vld [vmem:[#allocation39_spill] sm:$0xff] }
 0x1f0   : > { %2710 = vst [vmem:[#allocation1 + $0x20] ss:$4 sm:$0xff] %v5990_v25 }
 0x1f1   : > { %2711 = vst [vmem:[#allocation1 + $0x21] ss:$4 sm:$0xff] %v5991_v43 }
 0x1f2   : > { %2712 = vst [vmem:[#allocation1 + $0x22] ss:$4 sm:$0xff] %v5992_v26  ;;  %v1735_v1 = vpop.f32.mrf.mxu2  ;;  %v1371_v22 = vpop.f32.mrf.mxu1 }
 0x1f3   : > { %2713 = vst [vmem:[#allocation1 + $0x23] ss:$4 sm:$0xff] %v5993_v7  ;;  %v5381_v43 = vadd.f32 %v1735_v1, %v1369_v10  ;;  %v2644_v10 = vshll.u32 %v5311_v48, 16  ;;  %v6003_v1 = vld [vmem:[#allocation43_spill] sm:$0xff] }
 0x1f4   : > { %v2704_v50 = vld.sshfl [vmem:[#allocation1] sm:$0xff pattern:$0x73625140] }
 0x1f5   : > { %2809 = vmatmul.bf16.vlgmr.msra.gmra.mxu3 %v2704_v50  ;;  %2706 = vst [vmem:[#allocation1] ss:$4 sm:$0xff] %v5994_v19  ;;  %v2160_v50 = vpop.f32.mrf.mxu0 }
 0x1f6   : > { %2707 = vst [vmem:[#allocation1 + $0x1] ss:$4 sm:$0xff] %v5995_v36  ;;  %v1935_v25 = vpop.f32.mrf.mxu3  ;;  %v5387_v7 = vadd.f32 %v2160_v50, %v5300_v28  ;;  %v5999_v36 = vld [vmem:[#allocation38_spill] sm:$0xff]  ;;  %v6004_v50 = vld [vmem:[#allocation53_spill] sm:$0xff] }
 0x1f7   : > { %2708 = vst [vmem:[#allocation1 + $0x2] ss:$4 sm:$0xff] %v5996_v53  ;;  %2397 = vmatmul.bf16.gmra.mxu1 %v5201_v30  ;;  %v5384_v26 = vadd.f32 %v1935_v25, %v5253_v24  ;;  %v6001_v30 = vld [vmem:[#allocation41_spill] sm:$0xff]  ;;  %v2641_v24 = vshrl.u32 %v5311_v48, 16  ;;  %v6002_v28 = vld [vmem:[#allocation42_spill] sm:$0xff]  ;;  %v2662_v25 = vshrl.u32 %v5326_v4, 16 }
 0x1f8   : > { %2709 = vst [vmem:[#allocation1 + $0x3] ss:$4 sm:$0xff] %v5998_v33  ;;  %v2653_v33 = vshrl.u32 %v5313_v58, 16 }
 0x1f9   : > { %v2664_v52 = vrot.slane %v2662_v25, 6 }
 0x1fa   : > { %v5394_v53 = vld.sshfl [vmem:[#allocation1 + $0x20] sm:$0xff pattern:$0x73625140] }
 0x1fb   : > { %2720 = vst [vmem:[#allocation1 + $0x20] ss:$4 sm:$0xff] %v6002_v28 }
 0x1fc   : > { %2721 = vst [vmem:[#allocation1 + $0x21] ss:$4 sm:$0xff] %v6003_v1  ;;  %v2655_v1 = vrot.slane %v2653_v33, 6 }
 0x1fd   : > { %2722 = vst [vmem:[#allocation1 + $0x22] ss:$4 sm:$0xff] %v6004_v50  ;;  %v6006_v50 = vld [vmem:[#allocation55_spill] sm:$0xff] }
 0x1fe   : > { %2594 = vmatmul.bf16.gmra.mxu2 %v5284_v6  ;;  %v2649_v6 = vshll.u32 %v5313_v58, 16  ;;  %v5426_v25 = vpop.f32.mrf.mxu3 }
 0x1ff   : > { %v2714_v19 = vld.sshfl [vmem:[#allocation1] sm:$0xff pattern:$0x73625140] }
 0x200   : > { %2716 = vst [vmem:[#allocation1] ss:$4 sm:$0xff] %v5999_v36  ;;  %v5409_v36 = vsel %vm453_vm1, %v5291_v21, %v2429_v29  ;;  %v2651_v28 = vrot.slane %v2649_v6, 7 }
 0x201   : > { %2717 = vst [vmem:[#allocation1 + $0x1] ss:$4 sm:$0xff] %v6000_v13  ;;  %v2643_v13 = vrot.slane %v2641_v24, 6  ;;  %v2640_v51 = vrot.slane %v5409_v36, 2  ;;  %v1373_v24 = vpop.f32.mrf.mxu1 }
 0x202   : > { %2718 = vst [vmem:[#allocation1 + $0x2] ss:$4 sm:$0xff] %v5917_v32  ;;  %v2658_v32 = vshll.u32 %v5326_v4, 16  ;;  %v2656_v21 = vor.u32 %v2655_v1, %v2651_v28 }
 0x203   : > { %2719 = vst [vmem:[#allocation1 + $0x3] ss:$4 sm:$0xff] %v6001_v30  ;;  %v2646_v30 = vrot.slane %v2644_v10, 7  ;;  %v2668_v6 = vshll.u32 %v2640_v51, 16 }
 0x204   : > { %v2660_v44 = vrot.slane %v2658_v32, 7  ;;  %v1738_v32 = vpop.f32.mrf.mxu2 }
 0x205   : > { %2814 = vmatmul.bf16.gmra.mxu3 %v2705_v35  ;;  %v6005_v35 = vld [vmem:[#allocation54_spill] sm:$0xff]  ;;  %v2647_v2 = vor.u32 %v2646_v30, %v2643_v13  ;;  %v2670_v13 = vrot.slane %v2668_v6, 7 }
 0x206   : > { %2723 = vst [vmem:[#allocation1 + $0x23] ss:$4 sm:$0xff] %v6005_v35  ;;  %v2665_v10 = vor.u32 %v2664_v52, %v2660_v44  ;;  %v2657_v52 = vrot.slane %v2656_v21, 2  ;;  %v6012_v21 = vld [vmem:[#allocation48_spill] sm:$0xff] }
 0x207   : > { %2402 = vmatmul.bf16.gmra.mxu1 %v5217_v11  ;;  %v6007_v11 = vld [vmem:[#allocation40_spill] sm:$0xff] }
 0x208   : > { %v1372_v29 = vadd.f32 %v1371_v22, %v6007_v11  ;;  %v5431_v22 = vpop.f32.mrf.mxu0  ;;  %v2666_v35 = vrot.slane %v2665_v10, 2  ;;  %v1940_v10 = vpop.f32.mrf.mxu3 }
 0x20a   : > { %v5414_v31 = vld.sshfl [vmem:[#allocation1] sm:$0xff pattern:$0x73625140] }
 0x20b   : > { %2726 = vst [vmem:[#allocation1] ss:$4 sm:$0xff] %v6006_v50  ;;  %v6011_v50 = vld [vmem:[#allocation46_spill] sm:$0xff] }
 0x20c   : > { %2727 = vst [vmem:[#allocation1 + $0x1] ss:$4 sm:$0xff] %v5924_v47  ;;  %v2648_v47 = vrot.slane %v2647_v2, 2  ;;  %v1374_v11 = vadd.f32 %v1373_v24, %v6011_v50  ;;  %v6018_v50 = vld [vmem:[#allocation58_spill] sm:$0xff] }
 0x20d   : > { %2728 = vst [vmem:[#allocation1 + $0x2] ss:$4 sm:$0xff] %v5925_v12  ;;  %v5424_v33 = vld.sshfl [vmem:[#allocation1 + $0x20] sm:$0xff pattern:$0x73625140]  ;;  %v5429_v12 = vadd.f32 %v1738_v32, %v1372_v29  ;;  %v1740_v29 = vpop.f32.mrf.mxu2  ;;  %v1376_v32 = vpop.f32.mrf.mxu1 }
 0x20e   : > { %2599 = vmatmul.bf16.gmra.mxu2 %v5305_v45  ;;  %2729 = vst [vmem:[#allocation1 + $0x3] ss:$4 sm:$0xff] %v5929_v17  ;;  %v6008_v45 = vld [vmem:[#allocation56_spill] sm:$0xff]  ;;  %v6009_v17 = vld [vmem:[#allocation47_spill] sm:$0xff]  ;;  %v2652_v1 = vsel %vm3996_vm8, %v2648_v47, %v2651_v28  ;;  %v5446_v6 = vadd.f32 %v1740_v29, %v1374_v11 }
 0x20f   : > { %2730 = vst [vmem:[#allocation1 + $0x20] ss:$4 sm:$0xff] %v5931_v57  ;;  %v2661_v57 = vsel %vm3996_vm8, %v2657_v52, %v2660_v44  ;;  %v6013_v47 = vld [vmem:[#allocation60_spill] sm:$0xff]  ;;  %v6014_v52 = vld [vmem:[#allocation61_spill] sm:$0xff]  ;;  %v6019_v11 = vld [vmem:[#allocation59_spill] sm:$0xff] }
 0x210   : > { %2731 = vst [vmem:[#allocation1 + $0x21] ss:$4 sm:$0xff] %v5933_v55  ;;  %v2671_v55 = vsel %vm3996_vm8, %v2666_v35, %v2670_v13  ;;  %v2165_v28 = vpop.f32.mrf.mxu0  ;;  %v6016_v35 = vld [vmem:[#allocation65_spill] sm:$0xff]  ;;  %v6017_v13 = vld [vmem:[#allocation78_spill] sm:$0xff]  ;;  %v5460_v30 = vpop.f32.mrf.mxu3  ;;  %v6021_v29 = vld [vmem:[#allocation4_spill] sm:$0xff] }
 0x211   : > { %2732 = vst [vmem:[#allocation1 + $0x22] ss:$4 sm:$0xff] %v6008_v45  ;;  %v5450_v44 = vadd.f32 %v2165_v28, %v5355_v38  ;;  %v6015_v45 = vld [vmem:[#allocation63_spill] sm:$0xff] }
 0x212   : > { %2733 = vst [vmem:[#allocation1 + $0x23] ss:$4 sm:$0xff] %v6009_v17  ;;  %v1377_v17 = vadd.f32 %v1376_v32, %v6017_v13  ;;  %v6023_v32 = vld [vmem:[#allocation64_spill] sm:$0xff] }
 0x215   : > { %2819 = vmatmul.bf16.gmra.mxu3 %v2714_v19  ;;  %v5440_v2 = vld.sshfl [vmem:[#allocation1] sm:$0xff pattern:$0x73625140]  ;;  %v1970_v19 = vadd.f32 %v1940_v10, %v5333_v49  ;;  %v1743_v49 = vpop.f32.mrf.mxu2 }
 0x216   : > { %2736 = vst [vmem:[#allocation1] ss:$4 sm:$0xff] %v6012_v21  ;;  %v1764_v38 = vadd.f32 %v1743_v49, %v1377_v17  ;;  %v6020_v21 = vld [vmem:[#allocation3_spill] sm:$0xff] }
 0x217   : > { %2738 = vst [vmem:[#allocation1 + $0x1] ss:$4 sm:$0xff] %v2652_v1 }
 0x218   : > { %2740 = vst [vmem:[#allocation1 + $0x2] ss:$4 sm:$0xff] %v2661_v57  ;;  %v5464_v57 = vpop.f32.mrf.mxu0 }
 0x219   : > { %2742 = vst [vmem:[#allocation1 + $0x3] ss:$4 sm:$0xff] %v2671_v55  ;;  %v5452_v24 = vld.sshfl [vmem:[#allocation1 + $0x20] sm:$0xff pattern:$0x73625140]  ;;  %v1378_v55 = vpop.f32.mrf.mxu1 }
 0x21a   : > { %2910 = vst [vmem:[#allocation1 + $0x20] ss:$4 sm:$0xff] %v6013_v47  ;;  %v1379_v28 = vadd.f32 %v1378_v55, %v5180_v63  ;;  %v6024_v47 = vld [vmem:[#allocation29_spill] sm:$0xff]  ;;  %v6027_v63 = vld [vmem:[#allocation67_spill] sm:$0xff] }
 0x21b   : > { %2912 = vst [vmem:[#allocation1 + $0x21] ss:$4 sm:$0xff] %v6014_v52  ;;  %v6028_v55 = vld [vmem:[#allocation27_spill] sm:$0xff] }
 0x21c   : > { %2914 = vst [vmem:[#allocation1 + $0x22] ss:$4 sm:$0xff] %v6015_v45  ;;  %v1945_v45 = vpop.f32.mrf.mxu3 }
 0x21d   : > { %2916 = vst [vmem:[#allocation1 + $0x23] ss:$4 sm:$0xff] %v6016_v35  ;;  %v1745_v52 = vpop.f32.mrf.mxu2  ;;  %v6025_v35 = vld [vmem:[#allocation72_spill] sm:$0xff]  ;;  %v1972_v17 = vadd.f32 %v1945_v45, %v5368_v60 }
 0x21e   : > { %2604 = vmatmul.bf16.gmra.mxu2 %v5316_v37  ;;  %v6022_v37 = vld [vmem:[#allocation12_spill] sm:$0xff]  ;;  %v1765_v13 = vadd.f32 %v1745_v52, %v1379_v28  ;;  %v6033_v52 = vld [vmem:[#allocation74_spill] sm:$0xff] }
 0x220   : > { %v5462_v1 = vld.sshfl [vmem:[#allocation1] sm:$0xff pattern:$0x73625140]  ;;  %v2170_v49 = vpop.f32.mrf.mxu0 }
 0x221   : > { %2902 = vst [vmem:[#allocation1] ss:$4 sm:$0xff] %v6018_v50  ;;  %v5478_v50 = vadd.f32 %v2170_v49, %v5384_v26  ;;  %v6030_v26 = vld [vmem:[#allocation70_spill] sm:$0xff] }
 0x222   : > { %2904 = vst [vmem:[#allocation1 + $0x1] ss:$4 sm:$0xff] %v6019_v11  ;;  %v6026_v11 = vld [vmem:[#allocation66_spill] sm:$0xff] }
 0x223   : > { %2906 = vst [vmem:[#allocation1 + $0x2] ss:$4 sm:$0xff] %v6020_v21  ;;  %v6029_v21 = vld [vmem:[#allocation62_spill] sm:$0xff] }
 0x224   : > { %2908 = vst [vmem:[#allocation1 + $0x3] ss:$4 sm:$0xff] %v6021_v29  ;;  %v2918_v10 = vld.sshfl [vmem:[#allocation1 + $0x20] sm:$0xff pattern:$0x73625140]  ;;  %v1947_v29 = vpop.f32.mrf.mxu3  ;;  %v6035_v49 = vld [vmem:[#allocation30_spill] sm:$0xff] }
 0x225   : > { %2824 = vmatmul.bf16.gmra.mxu3 %v5394_v53  ;;  %2923 = vst [vmem:[#allocation1 + $0x20] ss:$4 sm:$0xff] %v6022_v37  ;;  %v1973_v60 = vadd.f32 %v1947_v29, %v5381_v43 }
 0x226   : > { %2924 = vst [vmem:[#allocation1 + $0x21] ss:$4 sm:$0xff] %v6023_v32  ;;  %v6031_v32 = vld [vmem:[#allocation71_spill] sm:$0xff] }
 0x227   : > { %2925 = vst [vmem:[#allocation1 + $0x22] ss:$4 sm:$0xff] %v6024_v47  ;;  %v6032_v47 = vld [vmem:[#allocation31_spill] sm:$0xff] }
 0x228   : > { %2926 = vst [vmem:[#allocation1 + $0x23] ss:$4 sm:$0xff] %v6025_v35  ;;  %v5486_v28 = vpop.f32.mrf.mxu0 }
 0x22b   : > { %v2917_v53 = vld.sshfl [vmem:[#allocation1] sm:$0xff pattern:$0x73625140] }
 0x22c   : > { %3022 = vmatmul.bf16.vlgmr.msra.gmra.mxu0 %v2917_v53  ;;  %2919 = vst [vmem:[#allocation1] ss:$4 sm:$0xff] %v6026_v11  ;;  %v1950_v35 = vpop.f32.mrf.mxu3  ;;  %v6036_v11 = vld [vmem:[#allocation68_spill] sm:$0xff] }
 0x22d   : > { %2920 = vst [vmem:[#allocation1 + $0x1] ss:$4 sm:$0xff] %v6027_v63  ;;  %v1974_v43 = vadd.f32 %v1950_v35, %v5429_v12  ;;  %v2883_v35 = vrot.slane %v2640_v51, 7 }
 0x22e   : > { %2921 = vst [vmem:[#allocation1 + $0x2] ss:$4 sm:$0xff] %v6028_v55  ;;  %2609 = vmatmul.bf16.gmra.mxu2 %v5340_v0  ;;  %v6034_v0 = vld [vmem:[#allocation73_spill] sm:$0xff] }
 0x22f   : > { %2922 = vst [vmem:[#allocation1 + $0x3] ss:$4 sm:$0xff] %v6029_v21  ;;  %v2928_v37 = vld.sshfl [vmem:[#allocation1 + $0x20] sm:$0xff pattern:$0x73625140] }
 0x230   : > { %2933 = vst [vmem:[#allocation1 + $0x20] ss:$4 sm:$0xff] %v6030_v26  ;;  %v2175_v53 = vpop.f32.mrf.mxu0  ;;  %v6037_v55 = vld [vmem:[#allocation69_spill] sm:$0xff] }
 0x231   : > { %2934 = vst [vmem:[#allocation1 + $0x21] ss:$4 sm:$0xff] %v6031_v32  ;;  %v5497_v63 = vadd.f32 %v2175_v53, %v1970_v19  ;;  %v6038_v32 = vld [vmem:[#allocation75_spill] sm:$0xff] }
 0x232   : > { %2935 = vst [vmem:[#allocation1 + $0x22] ss:$4 sm:$0xff] %v6032_v47 }
 0x233   : > { %2936 = vst [vmem:[#allocation1 + $0x23] ss:$4 sm:$0xff] %v6033_v52 }
 0x234   : > { %v1952_v21 = vpop.f32.mrf.mxu3 }
 0x235   : > { %2829 = vmatmul.bf16.gmra.mxu3 %v5414_v31  ;;  %v1975_v31 = vadd.f32 %v1952_v21, %v5446_v6 }
 0x236   : > { %v2927_v45 = vld.sshfl [vmem:[#allocation1] sm:$0xff pattern:$0x73625140] }
 0x237   : > { %2929 = vst [vmem:[#allocation1] ss:$4 sm:$0xff] %v6034_v0 }
 0x238   : > { %2930 = vst [vmem:[#allocation1 + $0x1] ss:$4 sm:$0xff] %v6035_v49  ;;  %v5502_v29 = vpop.f32.mrf.mxu0 }
 0x239   : > { %2931 = vst [vmem:[#allocation1 + $0x2] ss:$4 sm:$0xff] %v6036_v11 }
 0x23a   : > { %2932 = vst [vmem:[#allocation1 + $0x3] ss:$4 sm:$0xff] %v6037_v55  ;;  %v2938_v6 = vld.sshfl [vmem:[#allocation1 + $0x20] sm:$0xff pattern:$0x73625140] }
 0x23b   : > { %2943 = vst [vmem:[#allocation1 + $0x20] ss:$4 sm:$0xff] %v4787_v41 }
 0x23c   : > { %3027 = vmatmul.bf16.gmra.mxu0 %v2918_v10  ;;  %v1955_v12 = vpop.f32.mrf.mxu3  ;;  %2944 = vst [vmem:[#allocation1 + $0x21] ss:$4 sm:$0xff] %v4795_v9 }
 0x23d   : > { %v1976_v19 = vadd.f32 %v1955_v12, %v1764_v38  ;;  %2945 = vst [vmem:[#allocation1 + $0x22] ss:$4 sm:$0xff] %v5178_v59  ;;  %v6040_v12 = vld [vmem:[#allocation2_spill] sm:$0xff] }
 0x23e   : > { %2614 = vmatmul.bf16.gmra.mxu2 %v5351_v27  ;;  %2946 = vst [vmem:[#allocation1 + $0x23] ss:$4 sm:$0xff] %v5185_v61 }
 0x240   : > { %v2180_v10 = vpop.f32.mrf.mxu0 }
 0x241   : > { %v2937_v26 = vld.sshfl [vmem:[#allocation1] sm:$0xff pattern:$0x73625140]  ;;  %v5509_v27 = vadd.f32 %v2180_v10, %v1972_v17  ;;  %v2575_v52 = vpop.f32.mrf.mxu2 }
 0x242   : > { %2939 = vst [vmem:[#allocation1] ss:$4 sm:$0xff] %v6038_v32 }
 0x243   : > { %2940 = vst [vmem:[#allocation1 + $0x1] ss:$4 sm:$0xff] %v4817_v15 }
 0x244   : > { %2941 = vst [vmem:[#allocation1 + $0x2] ss:$4 sm:$0xff] %v4777_v3  ;;  %v1957_v47 = vpop.f32.mrf.mxu3 }
 0x245   : > { %2834 = vmatmul.bf16.gmra.mxu3 %v5424_v33  ;;  %2942 = vst [vmem:[#allocation1 + $0x3] ss:$4 sm:$0xff] %v4781_v8  ;;  %v1977_v15 = vadd.f32 %v1957_v47, %v1765_v13  ;;  %v2948_v55 = vld.sshfl [vmem:[#allocation1 + $0x20] sm:$0xff pattern:$0x73625140] }
 0x248   : > { %v2182_v3 = vpop.f32.mrf.mxu0 }
 0x249   : > { %v5515_v33 = vadd.f32 %v2182_v3, %v1973_v60 }
 0x24c   : > { %3032 = vmatmul.bf16.gmra.mxu0 %v2927_v45  ;;  %v2947_v17 = vld.sshfl [vmem:[#allocation1] sm:$0xff pattern:$0x73625140]  ;;  %v3630_v45 = vrot.slane %v5311_v48, 9  ;;  %v2577_v48 = vpop.f32.mrf.mxu2 }
 0x24d   : > { %2949 = vst [vmem:[#allocation1] ss:$4 sm:$0xff] %v5192_v46  ;;  %v2880_v46 = vrot.slane %v5326_v4, 7 }
 0x250   : > { %v2185_v8 = vpop.f32.mrf.mxu0 }
 0x251   : > { %v5518_v38 = vadd.f32 %v2185_v8, %v1974_v43 }
 0x254   : > { %v2580_v36 = vpop.f32.mrf.mxu2 }
 0x255   : > { %2839 = vmatmul.bf16.gmra.mxu3 %v5440_v2  ;;  %v2363_v2 = vpop.f32.mrf.mxu1 }
 0x256   : > { %v2408_v10 = vadd.f32 %v2363_v2, %v5303_v54 }
 0x258   : > { %v2187_v41 = vpop.f32.mrf.mxu0 }
 0x259   : > { %v5521_v9 = vadd.f32 %v2187_v41, %v1975_v31 }
 0x25c   : > { %3037 = vmatmul.bf16.gmra.mxu0 %v2928_v37  ;;  %v2877_v37 = vrot.slane %v5313_v58, 7  ;;  %v2582_v31 = vpop.f32.mrf.mxu2 }
 0x25d   : > { %v2365_v4 = vpop.f32.mrf.mxu1 }
 0x25e   : > { %v2879_v0 = vrot.slane %v2877_v37, 2  ;;  %v2878_v43 = vsel %vm4549_vm15, %v3630_v45, %v2877_v37  ;;  %v6041_v45 = vld [vmem:[#allocation11_spill] sm:$0xff] }
 0x25f   : > { %2951 = vst [vmem:[#allocation1 + $0x1] ss:$4 sm:$0xff] %v2878_v43  ;;  %v1344_v54 = vadd.f32 %v6041_v45, %v5274_v40 }
 0x260   : > { %v2190_v59 = vpop.f32.mrf.mxu0 }
 0x261   : > { %v5524_v13 = vadd.f32 %v2190_v59, %v1976_v19 }
 0x264   : > { %v2585_v8 = vpop.f32.mrf.mxu2 }
 0x265   : > { %2844 = vmatmul.bf16.gmra.mxu3 %v5452_v24  ;;  %v2882_v24 = vrot.slane %v2880_v46, 2  ;;  %v2368_v11 = vpop.f32.mrf.mxu1 }
 0x267   : > { %v2884_v58 = vsel %vm4549_vm15, %v2882_v24, %v2883_v35  ;;  %v6042_v24 = vld [vmem:[#allocation57_spill] sm:$0xff] }
 0x268   : > { %v2192_v61 = vpop.f32.mrf.mxu0  ;;  %2955 = vst [vmem:[#allocation1 + $0x3] ss:$4 sm:$0xff] %v2884_v58  ;;  %v1751_v35 = vadd.f32 %v6042_v24, %v1344_v54 }
 0x269   : > { %v5526_v60 = vadd.f32 %v2192_v61, %v1977_v15 }
 0x26c   : > { %3042 = vmatmul.bf16.gmra.mxu0 %v2937_v26  ;;  %v6039_v26 = vld [vmem:[#allocation49_spill] sm:$0xff] }
 0x26d   : > { %v2370_v21 = vpop.f32.mrf.mxu1  ;;  %v1339_v32 = vadd.f32 %v6039_v26, %v5206_v14  ;;  %v1963_v26 = vadd.f32 %v5272_v62, %v1751_v35  ;;  %v6044_v62 = vld [vmem:[#allocation79_spill] sm:$0xff] }
 0x26f   : > { %v1749_v19 = vadd.f32 %v6040_v12, %v1339_v32  ;;  %v2198_v32 = vadd.f32 %v5370_v23, %v1963_v26 }
 0x271   : > { %v1961_v15 = vadd.f32 %v5236_v20, %v1749_v19 }
 0x273   : > { %v2196_v59 = vadd.f32 %v5335_v18, %v1961_v15  ;;  %v2410_v18 = vadd.f32 %v2368_v11, %v5358_v42 }
 0x275   : > { %2849 = vmatmul.bf16.gmra.mxu3 %v5462_v1  ;;  %v2881_v1 = vsel %vm4549_vm15, %v2879_v0, %v2880_v46  ;;  %v2373_v47 = vpop.f32.mrf.mxu1  ;;  %v2409_v46 = vadd.f32 %v2365_v4, %v2196_v59 }
 0x276   : > { %2953 = vst [vmem:[#allocation1 + $0x2] ss:$4 sm:$0xff] %v2881_v1 }
 0x277   : > { %v2621_v14 = vadd.f32 %v2577_v48, %v2409_v46  ;;  %v2412_v46 = vadd.f32 %v2373_v47, %v5387_v7 }
 0x278   : > { %v2810_v49 = vpop.f32.mrf.mxu3 }
 0x279   : > { %v2624_v54 = vadd.f32 %v2585_v8, %v2412_v46 }
 0x27c   : > { %3047 = vmatmul.bf16.gmra.mxu0 %v2938_v6  ;;  %v2620_v6 = vadd.f32 %v2575_v52, %v2408_v10  ;;  %v2411_v10 = vadd.f32 %v2370_v21, %v2198_v32 }
 0x27d   : > { %v2956_v41 = vld.sshfl [vmem:[#allocation1] sm:$0xff pattern:$0x73625140]  ;;  %v2375_v52 = vpop.f32.mrf.mxu1 }
 0x27e   : > { %v2855_v3 = vadd.f32 %v2810_v49, %v2620_v6  ;;  %v2587_v49 = vpop.f32.mrf.mxu2  ;;  %v2623_v15 = vadd.f32 %v2582_v31, %v2411_v10  ;;  %v6046_v10 = vld [vmem:[#allocation51_spill] sm:$0xff] }
 0x280   : > { %v2812_v53 = vpop.f32.mrf.mxu3 }
 0x281   : > { %v2856_v2 = vadd.f32 %v2812_v53, %v2621_v14 }
 0x285   : > { %v2378_v19 = vpop.f32.mrf.mxu1 }
 0x286   : > { %v2590_v11 = vpop.f32.mrf.mxu2 }
 0x288   : > { %v2815_v51 = vpop.f32.mrf.mxu3 }
 0x28c   : > { %3052 = vmatmul.bf16.gmra.mxu0 %v2947_v17 }
 0x28d   : > { %v2380_v21 = vpop.f32.mrf.mxu1 }
 0x28e   : > { %v2592_v31 = vpop.f32.mrf.mxu2 }
 0x290   : > { %v2817_v34 = vpop.f32.mrf.mxu3 }
 0x296   : > { %v2595_v8 = vpop.f32.mrf.mxu2 }
 0x298   : > { %v2820_v37 = vpop.f32.mrf.mxu3 }
 0x29c   : > { %3057 = vmatmul.bf16.gmra.mxu0 %v2948_v55  ;;  %v2622_v55 = vadd.f32 %v2580_v36, %v2410_v18 }
 0x29e   : > { %v2857_v40 = vadd.f32 %v2815_v51, %v2622_v55  ;;  %v2383_v55 = vpop.f32.mrf.mxu1 }
 0x2a0   : > { %v2822_v4 = vpop.f32.mrf.mxu3 }
 0x2a9   : > { %v3023_v17 = vpop.f32.mrf.mxu0 }
 0x2aa   : > { %v3068_v61 = vadd.f32 %v3023_v17, %v2855_v3  ;;  %v2825_v17 = vpop.f32.mrf.mxu3 }
 0x2ac   : > { %3086 = vst [vmem:[%s3854_s7] sm:$0xff] %v3068_v61  ;;  %3062 = vmatmul.bf16.gmra.mxu0 %v2956_v41  ;;  %v3131_v43 = vmul.f32 %v3068_v61, %v3068_v61  ;;  %v2858_v41 = vadd.f32 %v2817_v34, %v2623_v15  ;;  %v2859_v34 = vadd.f32 %v2820_v37, %v2624_v54  ;;  %v6049_v54 = vld [vmem:[#allocation21_spill] sm:$0xff] }
 0x2b1   : > { %v3025_v0 = vpop.f32.mrf.mxu0 }
 0x2b2   : > { %v3069_v20 = vadd.f32 %v3025_v0, %v2856_v2 }
 0x2b4   : > { %3087 = vst [vmem:[%s3854_s7 + $0x8] sm:$0xff] %v3069_v20  ;;  %v3105_v1 = vadd.f32 %v3069_v20, %v3068_v61  ;;  %v3132_v58 = vmul.f32 %v3069_v20, %v3069_v20  ;;  %v6043_v61 = vld [vmem:[#allocation44_spill] sm:$0xff]  ;;  %v2827_v20 = vpop.f32.mrf.mxu3 }
 0x2b5   : > { %v1349_v51 = vadd.f32 %v6044_v62, %v6043_v61 }
 0x2b6   : > { %v3149_v48 = vadd.f32 %v3132_v58, %v3131_v43 }
 0x2b7   : > { %v1753_v45 = vadd.f32 %v5196_v16, %v1349_v51 }
 0x2b9   : > { %v3028_v53 = vpop.f32.mrf.mxu0  ;;  %v1965_v0 = vadd.f32 %v5330_v39, %v1753_v45  ;;  %v6045_v39 = vld [vmem:[#allocation13_spill] sm:$0xff] }
 0x2ba   : > { %v3070_v12 = vadd.f32 %v3028_v53, %v2857_v40  ;;  %v1354_v37 = vadd.f32 %v5222_v56, %v6045_v39  ;;  %v2597_v56 = vpop.f32.mrf.mxu2  ;;  %v6050_v39 = vld [vmem:[#allocation6_spill] sm:$0xff] }
 0x2bb   : > { %v2200_v35 = vadd.f32 %v5431_v22, %v1965_v0  ;;  %v2414_v22 = vadd.f32 %v2378_v19, %v5450_v44 }
 0x2bc   : > { %3088 = vst [vmem:[%s3854_s7 + $0x10] sm:$0xff] %v3070_v12  ;;  %v3106_v6 = vadd.f32 %v3105_v1, %v3070_v12  ;;  %v3133_v42 = vmul.f32 %v3070_v12, %v3070_v12  ;;  %v2830_v40 = vpop.f32.mrf.mxu3  ;;  %v1755_v32 = vadd.f32 %v5230_v5, %v1354_v37  ;;  %v6051_v37 = vld [vmem:[#allocation22_spill] sm:$0xff] }
 0x2bd   : > { %v2413_v7 = vadd.f32 %v2375_v52, %v2200_v35  ;;  %v2626_v12 = vadd.f32 %v2590_v11, %v2414_v22  ;;  %v1364_v22 = vadd.f32 %v6051_v37, %v6050_v39 }
 0x2be   : > { %v3150_v3 = vadd.f32 %v3149_v48, %v3133_v42  ;;  %v2385_v42 = vpop.f32.mrf.mxu1 }
 0x2bf   : > { %v2625_v1 = vadd.f32 %v2587_v49, %v2413_v7 }
 0x2c1   : > { %v3030_v36 = vpop.f32.mrf.mxu0  ;;  %v2860_v16 = vadd.f32 %v2822_v4, %v2625_v1  ;;  %v2861_v4 = vadd.f32 %v2825_v17, %v2626_v12  ;;  %v6048_v17 = vld [vmem:[#allocation80_spill] sm:$0xff] }
 0x2c2   : > { %v3071_v59 = vadd.f32 %v3030_v36, %v2858_v41  ;;  %v2600_v45 = vpop.f32.mrf.mxu2 }
 0x2c4   : > { %3089 = vst [vmem:[%s3854_s7 + $0x18] sm:$0xff] %v3071_v59  ;;  %v3107_v23 = vadd.f32 %v3106_v6, %v3071_v59  ;;  %v3134_v14 = vmul.f32 %v3071_v59, %v3071_v59  ;;  %v1967_v6 = vadd.f32 %v6046_v10, %v1755_v32  ;;  %v2832_v59 = vpop.f32.mrf.mxu3 }
 0x2c6   : > { %v3151_v2 = vadd.f32 %v3150_v3, %v3134_v14  ;;  %v2202_v3 = vadd.f32 %v5464_v57, %v1967_v6  ;;  %v2388_v46 = vpop.f32.mrf.mxu1  ;;  %v2416_v57 = vadd.f32 %v2383_v55, %v5478_v50 }
 0x2c8   : > { %v2415_v36 = vadd.f32 %v2380_v21, %v2202_v3 }
 0x2c9   : > { %v3033_v24 = vpop.f32.mrf.mxu0 }
 0x2ca   : > { %v3072_v18 = vadd.f32 %v3033_v24, %v2859_v34  ;;  %v2627_v61 = vadd.f32 %v2592_v31, %v2415_v36 }
 0x2cc   : > { %3090 = vst [vmem:[%s3854_s7 + $0x20] sm:$0xff] %v3072_v18  ;;  %v3108_v47 = vadd.f32 %v3107_v23, %v3072_v18  ;;  %v3135_v43 = vmul.f32 %v3072_v18, %v3072_v18  ;;  %v2862_v5 = vadd.f32 %v2827_v20, %v2627_v61  ;;  %v6047_v23 = vld [vmem:[#allocation77_spill] sm:$0xff]  ;;  %v2835_v0 = vpop.f32.mrf.mxu3 }
 0x2cd   : > { %v1359_v14 = vadd.f32 %v6048_v17, %v6047_v23 }
 0x2ce   : > { %v3152_v58 = vadd.f32 %v3151_v2, %v3135_v43  ;;  %v2628_v2 = vadd.f32 %v2595_v8, %v2416_v57  ;;  %v2602_v8 = vpop.f32.mrf.mxu2 }
 0x2cf   : > { %v1757_v21 = vadd.f32 %v6049_v54, %v1359_v14 }
 0x2d0   : > { %v2863_v31 = vadd.f32 %v2830_v40, %v2628_v2 }
 0x2d1   : > { %v3035_v48 = vpop.f32.mrf.mxu0  ;;  %v1969_v34 = vadd.f32 %v5426_v25, %v1757_v21 }
 0x2d2   : > { %v3073_v26 = vadd.f32 %v3035_v48, %v2860_v16 }
 0x2d3   : > { %v2204_v35 = vadd.f32 %v5486_v28, %v1969_v34  ;;  %v2418_v28 = vadd.f32 %v2388_v46, %v5497_v63 }
 0x2d4   : > { %3091 = vst [vmem:[%s3854_s7 + $0x28] sm:$0xff] %v3073_v26  ;;  %v3109_v53 = vadd.f32 %v3108_v47, %v3073_v26  ;;  %v3136_v52 = vmul.f32 %v3073_v26, %v3073_v26  ;;  %v2837_v26 = vpop.f32.mrf.mxu3 }
 0x2d5   : > { %v2417_v47 = vadd.f32 %v2385_v42, %v2204_v35  ;;  %v2630_v32 = vadd.f32 %v2600_v45, %v2418_v28 }
 0x2d6   : > { %v3153_v49 = vadd.f32 %v3152_v58, %v3136_v52  ;;  %v2390_v58 = vpop.f32.mrf.mxu1 }
 0x2d7   : > { %v2629_v55 = vadd.f32 %v2597_v56, %v2417_v47  ;;  %v2865_v10 = vadd.f32 %v2835_v0, %v2630_v32 }
 0x2d9   : > { %v3038_v15 = vpop.f32.mrf.mxu0  ;;  %v2864_v48 = vadd.f32 %v2832_v59, %v2629_v55 }
 0x2da   : > { %v3074_v41 = vadd.f32 %v3038_v15, %v2861_v4  ;;  %v2605_v4 = vpop.f32.mrf.mxu2 }
 0x2dc   : > { %3092 = vst [vmem:[%s3854_s7 + $0x30] sm:$0xff] %v3074_v41  ;;  %v3110_v44 = vadd.f32 %v3109_v53, %v3074_v41  ;;  %v3137_v19 = vmul.f32 %v3074_v41, %v3074_v41  ;;  %v6052_v53 = vld [vmem:[#allocation23_spill] sm:$0xff]  ;;  %v2840_v56 = vpop.f32.mrf.mxu3 }
 0x2dd   : > { %v1759_v52 = vadd.f32 %v6052_v53, %v1364_v22 }
 0x2de   : > { %v3154_v62 = vadd.f32 %v3153_v49, %v3137_v19  ;;  %v2393_v12 = vpop.f32.mrf.mxu1 }
 0x2df   : > { %v1971_v49 = vadd.f32 %v5460_v30, %v1759_v52  ;;  %v2420_v46 = vadd.f32 %v2393_v12, %v5509_v27 }
 0x2e1   : > { %v3040_v11 = vpop.f32.mrf.mxu0  ;;  %v2206_v15 = vadd.f32 %v5502_v29, %v1971_v49  ;;  %v2632_v23 = vadd.f32 %v2605_v4, %v2420_v46 }
 0x2e2   : > { %v3075_v51 = vadd.f32 %v3040_v11, %v2862_v5 }
 0x2e3   : > { %v2419_v36 = vadd.f32 %v2390_v58, %v2206_v15  ;;  %v2867_v17 = vadd.f32 %v2840_v56, %v2632_v23 }
 0x2e4   : > { %3093 = vst [vmem:[%s3854_s7 + $0x38] sm:$0xff] %v3075_v51  ;;  %v3138_v24 = vmul.f32 %v3075_v51, %v3075_v51  ;;  %v3111_v18 = vadd.f32 %v3110_v44, %v3075_v51  ;;  %v2607_v51 = vpop.f32.mrf.mxu2  ;;  %v2842_v29 = vpop.f32.mrf.mxu3 }
 0x2e5   : > { %v2631_v59 = vadd.f32 %v2602_v8, %v2419_v36 }
 0x2e6   : > { %v3155_v43 = vadd.f32 %v3154_v62, %v3138_v24  ;;  %v2395_v5 = vpop.f32.mrf.mxu1 }
 0x2e7   : > { %v2866_v62 = vadd.f32 %v2837_v26, %v2631_v59  ;;  %v2421_v2 = vadd.f32 %v2395_v5, %v5515_v33 }
 0x2e9   : > { %v3043_v20 = vpop.f32.mrf.mxu0 }
 0x2ea   : > { %v3076_v7 = vadd.f32 %v3043_v20, %v2863_v31  ;;  %v2633_v20 = vadd.f32 %v2607_v51, %v2421_v2  ;;  %v3104_v2 = vld [vmem:[%s5620_s5] sm:$0x1] }
 0x2ec   : > { %3094 = vst [vmem:[%s3854_s7 + $0x40] sm:$0xff] %v3076_v7  ;;  %v3112_v50 = vadd.f32 %v3111_v18, %v3076_v7  ;;  %v3139_v1 = vmul.f32 %v3076_v7, %v3076_v7  ;;  %v2610_v24 = vpop.f32.mrf.mxu2  ;;  %v2845_v27 = vpop.f32.mrf.mxu3  ;;  %v2868_v18 = vadd.f32 %v2842_v29, %v2633_v20 }
 0x2ee   : > { %v3156_v16 = vadd.f32 %v3155_v43, %v3139_v1  ;;  %v2398_v21 = vpop.f32.mrf.mxu1 }
 0x2ef   : > { %v2422_v43 = vadd.f32 %v2398_v21, %v5518_v38 }
 0x2f1   : > { %v3045_v25 = vpop.f32.mrf.mxu0  ;;  %v2634_v55 = vadd.f32 %v2610_v24, %v2422_v43 }
 0x2f2   : > { %v3077_v40 = vadd.f32 %v3045_v25, %v2864_v48 }
 0x2f3   : > { %v2869_v8 = vadd.f32 %v2845_v27, %v2634_v55 }
 0x2f4   : > { %3095 = vst [vmem:[%s3854_s7 + $0x48] sm:$0xff] %v3077_v40  ;;  %v3140_v6 = vmul.f32 %v3077_v40, %v3077_v40  ;;  %v3113_v3 = vadd.f32 %v3112_v50, %v3077_v40  ;;  %v2847_v48 = vpop.f32.mrf.mxu3 }
 0x2f6   : > { %v3157_v63 = vadd.f32 %v3156_v16, %v3140_v6  ;;  %v2400_v58 = vpop.f32.mrf.mxu1  ;;  %v2612_v16 = vpop.f32.mrf.mxu2 }
 0x2f7   : > { %v2423_v40 = vadd.f32 %v2400_v58, %v5521_v9 }
 0x2f9   : > { %v3048_v42 = vpop.f32.mrf.mxu0  ;;  %v2635_v22 = vadd.f32 %v2612_v16, %v2423_v40 }
 0x2fa   : > { %v3078_v41 = vadd.f32 %v3048_v42, %v2865_v10 }
 0x2fb   : > { %v2870_v53 = vadd.f32 %v2847_v48, %v2635_v22 }
 0x2fc   : > { %3096 = vst [vmem:[%s3854_s7 + $0x50] sm:$0xff] %v3078_v41  ;;  %v3114_v44 = vadd.f32 %v3113_v3, %v3078_v41  ;;  %v3141_v19 = vmul.f32 %v3078_v41, %v3078_v41  ;;  %v2850_v49 = vpop.f32.mrf.mxu3 }
 0x2fe   : > { %v3158_v61 = vadd.f32 %v3157_v63, %v3141_v19  ;;  %v2403_v38 = vpop.f32.mrf.mxu1  ;;  %v2615_v52 = vpop.f32.mrf.mxu2 }
 0x2ff   : > { %v2424_v10 = vadd.f32 %v2403_v38, %v5524_v13 }
 0x301   : > { %v3050_v30 = vpop.f32.mrf.mxu0  ;;  %v2636_v42 = vadd.f32 %v2615_v52, %v2424_v10 }
 0x302   : > { %v3079_v11 = vadd.f32 %v3050_v30, %v2866_v62 }
 0x303   : > { %v2871_v9 = vadd.f32 %v2850_v49, %v2636_v42 }
 0x304   : > { %3097 = vst [vmem:[%s3854_s7 + $0x58] sm:$0xff] %v3079_v11  ;;  %v3142_v14 = vmul.f32 %v3079_v11, %v3079_v11  ;;  %v3115_v45 = vadd.f32 %v3114_v44, %v3079_v11  ;;  %v2852_v59 = vpop.f32.mrf.mxu3 }
 0x306   : > { %v3159_v0 = vadd.f32 %v3158_v61, %v3142_v14  ;;  %v2405_v3 = vpop.f32.mrf.mxu1  ;;  %v2617_v36 = vpop.f32.mrf.mxu2 }
 0x307   : > { %v2425_v63 = vadd.f32 %v2405_v3, %v5526_v60 }
 0x309   : > { %v3053_v57 = vpop.f32.mrf.mxu0  ;;  %v2637_v61 = vadd.f32 %v2617_v36, %v2425_v63 }
 0x30a   : > { %v3080_v54 = vadd.f32 %v3053_v57, %v2867_v17 }
 0x30b   : > { %v2872_v13 = vadd.f32 %v2852_v59, %v2637_v61 }
 0x30c   : > { %3098 = vst [vmem:[%s3854_s7 + $0x60] sm:$0xff] %v3080_v54  ;;  %v3116_v34 = vadd.f32 %v3115_v45, %v3080_v54  ;;  %v3143_v31 = vmul.f32 %v3080_v54, %v3080_v54 }
 0x30e   : > { %v3160_v35 = vadd.f32 %v3159_v0, %v3143_v31  ;;  %v3130_v31 = vld [vmem:[%s5621_s6] sm:$0x1] }
 0x311   : > { %v3055_v7 = vpop.f32.mrf.mxu0 }
 0x312   : > { %v3081_v47 = vadd.f32 %v3055_v7, %v2868_v18 }
 0x314   : > { %3099 = vst [vmem:[%s3854_s7 + $0x68] sm:$0xff] %v3081_v47  ;;  %v3117_v50 = vadd.f32 %v3116_v34, %v3081_v47  ;;  %v3144_v1 = vmul.f32 %v3081_v47, %v3081_v47 }
 0x316   : > { %v3161_v33 = vadd.f32 %v3160_v35, %v3144_v1 }
 0x319   : > { %v3058_v26 = vpop.f32.mrf.mxu0 }
 0x31a   : > { %v3082_v25 = vadd.f32 %v3058_v26, %v2869_v8 }
 0x31c   : > { %3100 = vst [vmem:[%s3854_s7 + $0x70] sm:$0xff] %v3082_v25  ;;  %v3118_v39 = vadd.f32 %v3117_v50, %v3082_v25  ;;  %v3145_v37 = vmul.f32 %v3082_v25, %v3082_v25 }
 0x31e   : > { %v3162_v28 = vadd.f32 %v3161_v33, %v3145_v37 }
 0x321   : > { %v3060_v32 = vpop.f32.mrf.mxu0 }
 0x322   : > { %v3083_v12 = vadd.f32 %v3060_v32, %v2870_v53 }
 0x324   : > { %3101 = vst [vmem:[%s3854_s7 + $0x78] sm:$0xff] %v3083_v12  ;;  %v3119_v6 = vadd.f32 %v3118_v39, %v3083_v12  ;;  %v3146_v4 = vmul.f32 %v3083_v12, %v3083_v12 }
 0x326   : > { %v3163_v15 = vadd.f32 %v3162_v28, %v3146_v4 }
 0x329   : > { %v3063_v41 = vpop.f32.mrf.mxu0 }
 0x32a   : > { %v3084_v56 = vadd.f32 %v3063_v41, %v2871_v9 }
 0x32c   : > { %3102 = vst [vmem:[%s3854_s7 + $0x80] sm:$0xff] %v3084_v56  ;;  %v3120_v44 = vadd.f32 %v3119_v6, %v3084_v56  ;;  %v3147_v19 = vmul.f32 %v3084_v56, %v3084_v56 }
 0x32e   : > { %v3164_v62 = vadd.f32 %v3163_v15, %v3147_v19 }
 0x331   : > { %v3065_v5 = vpop.f32.mrf.mxu0 }
 0x332   : > { %v3085_v30 = vadd.f32 %v3065_v5, %v2872_v13 }
 0x334   : > { %3103 = vst [vmem:[%s3854_s7 + $0x88] sm:$0xff] %v3085_v30  ;;  %v3121_v11 = vadd.f32 %v3120_v44, %v3085_v30  ;;  %v3148_v51 = vmul.f32 %v3085_v30, %v3085_v30 }
 0x336   : > { %v3122_v46 = vrot.slane %v3121_v11, 4  ;;  %v3165_v29 = vadd.f32 %v3164_v62, %v3148_v51 }
 0x338   : > { %v3123_v23 = vadd.f32 %v3122_v46, %v3121_v11  ;;  %v3166_v17 = vrot.slane %v3165_v29, 4 }
 0x33a   : > { %v3124_v14 = vrot.slane %v3123_v23, 2  ;;  %v3167_v57 = vadd.f32 %v3166_v17, %v3165_v29 }
 0x33c   : > { %v3125_v45 = vadd.f32 %v3124_v14, %v3123_v23  ;;  %v3168_v60 = vrot.slane %v3167_v57, 2 }
 0x33e   : > { %v3126_v54 = vrot.slane %v3125_v45, 1  ;;  %v3169_v21 = vadd.f32 %v3168_v60, %v3167_v57 }
 0x340   : > { %v3127_v0 = vadd.f32 %v3126_v54, %v3125_v45  ;;  %v3170_v34 = vrot.slane %v3169_v21, 1 }
 0x342   : > { %v3128_v24 = vadd.f32 %v3127_v0, %v3104_v2  ;;  %v3171_v20 = vadd.f32 %v3170_v34, %v3169_v21 }
 0x344   : > { %3129 = vst [vmem:[%s5620_s5] sm:$0x1] %v3128_v24  ;;  %v3172_v35 = vadd.f32 %v3171_v20, %v3130_v31 }
 0x346   : > { %3173 = vst [vmem:[%s5621_s6] sm:$0x1] %v3172_v35 }
 0x347 PF: > { %s17_s21 = sadd.s32 1, %s3800_s21  }
 0x348   : > { %p14_p5 = scmp.ge.s32.totalorder %s17_s21, 4  }
 0x34a   :  { %16 = sbr.rel (!%p14_p5) target bundleno = 1 (0x1), region = 157 }

// kernel: con2d_forward.3
= control target key start
LH: loop header
LB: loop body
LE: loop exit
PB: predicated region body
PF: predicated region fallthrough
CT: control target
= control target key end

     0   :  { %s4778_s15 = smov 0   ;;  %s8588_s0 = inlined_call_operand.vmem [shape: f32[2,16,16,4], index: 0, kind: input, shape index: {}]   ;;  %s8589_s1 = inlined_call_operand.vmem [shape: bf16[9,4,128], index: 1, kind: input, shape index: {}]   ;;  %s8590_s2 = inlined_call_operand.vmem [shape: f32[2,196,128], index: 2, kind: output, shape index: {0}]   ;;  %s8591_s3 = inlined_call_operand.vmem [shape: f32[1,128], index: 3, kind: output, shape index: {1}]   ;;  %s8592_s4 = inlined_call_operand.vmem [shape: f32[1,128], index: 4, kind: output, shape index: {2}]  }
   0x1 LB: > { %s4482_s16 = sadd.s32 4294967295, %s4750_s15   ;;  %p4486_p0 = scmp.ge.s32.totalorder %s4750_s15, 1  ;;  %s4750_s15 = sphi %s4778_s15, %s15_s15  }
   0x2   : > { %p157_p1 = scmp.lt.s32.totalorder %s4750_s15, 3 }
   0x4   : > { %p158_p2 = pnand %p4486_p0, %p157_p1 }
   0x6   : > { %161 = sbr.rel (%p158_p2) target bundleno = 2537 (0x9e9), region = 28 }
   0xb   : > { %p183_p3 = scmp.lt.s32.totalorder %s4482_s16, 1  ;;  %p4490_p4 = scmp.ne.s32.totalorder %s4482_s16, 0 }
   0xd   : > { %s184_s17 = scalar_select %p183_p3, %s4482_s16, 1 }
   0xe   : > { %197 = sbr.rel (%p4490_p4) target bundleno = 22 (0x16), region = 32 }
   0xf   : > { %s4730_s18 = sshll.u32 %s184_s17, 8  ;;  %s4734_s19 = smul.u32 200, %s184_s17 }
  0x10   : > { %s4789_s22 = scalar_lea.vmem %s8588_s0, %s4730_s18 }
  0x11   : > { %s4794_s25 = scalar_lea.vmem %s8590_s2, %s4734_s19 }
  0x13   : > { %v4752_v0 = vmov 0.0  }
  0x14   : > { %198 = vst [vmem:[%s8591_s3] sm:$0x1] %v4752_v0 }
  0x15   : > { %199 = vst [vmem:[%s8592_s4] sm:$0x1] %v4752_v0 }
  0x16 PF: > { %v4589_v1 = vld [vmem:[%s8589_s1 + $0x2] sm:$0x3]  ;;  %vm8593_vm0 = vcmask 1041408   ;;  %v201_v4 = vld [vmem:[%s4789_s22 + $0x8] sm:$0xff]  ;;  %v202_v7 = vld [vmem:[%s4789_s22 + $0x10] sm:$0xff]  ;;  %vm324_vm1 = vcmask 1041409  }
  0x17   : > { %v1693_v2 = vsel %vm8593_vm0, %v4589_v1, 0  ;;  %v200_v3 = vld [vmem:[%s4789_s22] sm:$0xff]  ;;  %v4810_v6 = vpack.c.bf16 %v201_v4, %v201_v4  ;;  %v4814_v9 = vpack.c.bf16 %v202_v7, %v202_v7  ;;  %vm328_vm2 = vcmask 1042434   ;;  %v203_v25 = vld [vmem:[%s4789_s22 + $0x18] sm:$0xff] }
  0x18   : > { %4731 = vmatpush.bf16.msra.mxu1 %v1693_v2  ;;  %4732 = vmatpush.bf16.msra.mxu2 %v1693_v2  ;;  %v4808_v5 = vpack.c.bf16 %v200_v3, %v200_v3  ;;  %vm332_vm3 = vcmask 1043459   ;;  %vm320_vm4 = vcmask 1040384   ;;  %vm661_vm5 = vsmask.f32 256  ;;  %v204_v30 = vld [vmem:[%s4789_s22 + $0x20] sm:$0xff]  ;;  %v205_v3 = vld [vmem:[%s4789_s22 + $0x28] sm:$0xff] }
  0x19   : > { %4733 = vmatpush.bf16.msra.mxu3 %v1693_v2  ;;  %1702 = vmatpush.bf16.msra.mxu0 %v1693_v2  ;;  %9020 = vst [vmem:[#allocation3_spill] sm:$0xff] %v4810_v6  ;;  %v293_v10 = vrot.slane %v4810_v6, 3  ;;  %v294_v14 = vrot.slane %v4814_v9, 3  ;;  %vm662_vm6 = vsmask.f32 1284  ;;  %v4858_v35 = vpack.c.bf16 %v203_v25, %v203_v25 }
  0x1a   : > { %9019 = vst [vmem:[#allocation2_spill] sm:$0xff] %v4808_v5  ;;  %v292_v8 = vrot.slane %v4808_v5, 3  ;;  %vm663_vm7 = vmor %vm661_vm5, %vm662_vm6  ;;  %vm664_vm8 = vsmask.f32 2312  ;;  %vm666_vm9 = vsmask.f32 3340  ;;  %v4871_v42 = vpack.c.bf16 %v204_v30, %v204_v30 }
  0x1b   : > { %9021 = vst [vmem:[#allocation4_spill] sm:$0xff] %v4814_v9  ;;  %v339_v15 = vsel %vm324_vm1, %v4810_v6, %v293_v10  ;;  %v342_v16 = vsel %vm328_vm2, %v4810_v6, %v293_v10  ;;  %v4836_v19 = vsel %vm320_vm4, %v4810_v6, %v293_v10  ;;  %v619_v20 = vsel %vm332_vm3, %v4810_v6, %v293_v10  ;;  %vm665_vm10 = vmor %vm663_vm7, %vm664_vm8 }
  0x1c   : > { %v325_v11 = vsel %vm324_vm1, %v4808_v5, %v292_v8  ;;  %v329_v12 = vsel %vm328_vm2, %v4808_v5, %v292_v8  ;;  %v333_v13 = vsel %vm332_vm3, %v4808_v5, %v292_v8  ;;  %v4830_v17 = vsel %vm320_vm4, %v4808_v5, %v292_v8  ;;  %vm667_vm13 = vmor %vm665_vm10, %vm666_vm9  ;;  %9022 = vst [vmem:[#allocation5_spill] sm:$0xff] %v4858_v35 }
  0x1d   : > { %v4832_v18 = vrot.slane %v325_v11, 1  ;;  %v4840_v21 = vrot.slane %v329_v12, 2  ;;  %v4842_v22 = vrot.slane %v333_v13, 3  ;;  %v4844_v23 = vrot.slane %v339_v15, 1  ;;  %9025 = vst [vmem:[#allocation8_spill] sm:$0xff] %v4871_v42 }
  0x1e   : > { %v4846_v24 = vrot.slane %v342_v16, 2  ;;  %v348_v26 = vsel %vm324_vm1, %v4814_v9, %v294_v14  ;;  %v621_v27 = vrot.slane %v619_v20, 3  ;;  %vm668_vm11 = vsmask.f32 4368  ;;  %v206_v20 = vld [vmem:[%s4789_s22 + $0x30] sm:$0xff] }
  0x1f   : > { %vm670_vm12 = vsmask.f32 5396  ;;  %vm672_vm14 = vsmask.f32 6424  ;;  %vm674_vm15 = vsmask.f32 7452  ;;  %vm669_vm0 = vmor %vm667_vm13, %vm668_vm11  ;;  %v4866_v39 = vsel %vm320_vm4, %v4814_v9, %v294_v14 }
  0x20   : > { %v676_v28 = vshrl.u32 %v4830_v17, 16  ;;  %v681_v29 = vshll.u32 %v4832_v18, 16  ;;  %v684_v31 = vshrl.u32 %v4832_v18, 16  ;;  %v689_v32 = vshll.u32 %v4840_v21, 16  ;;  %vm671_vm5 = vmor %vm669_vm0, %vm670_vm12  ;;  %9024 = vst [vmem:[#allocation7_spill] sm:$0xff] %v4866_v39 }
  0x21   : > { %v692_v33 = vshrl.u32 %v4840_v21, 16  ;;  %v697_v34 = vshll.u32 %v4842_v22, 16  ;;  %v4860_v36 = vrot.slane %v348_v26, 1  ;;  %v700_v37 = vshrl.u32 %v4842_v22, 16  ;;  %vm673_vm6 = vmor %vm671_vm5, %vm672_vm14 }
  0x22   : > { %v704_v38 = vshll.u32 %v4836_v19, 16  ;;  %v707_v40 = vshrl.u32 %v4836_v19, 16  ;;  %v712_v41 = vshll.u32 %v4844_v23, 16  ;;  %vm4874_vm7 = vmor %vm673_vm6, %vm674_vm15  ;;  %v9026_v43 = vmov 0 }
  0x23   : > { %9023 = vst [vmem:[#allocation6_spill] sm:$0xff] %v4860_v36  ;;  %v9027_v43 = vsel %vm4874_vm7, 4294967295, %v9026_v43  ;;  %v715_v44 = vshrl.u32 %v4844_v23, 16  ;;  %v720_v45 = vshll.u32 %v4846_v24, 16  ;;  %v723_v46 = vshrl.u32 %v4846_v24, 16 }
  0x24   : > { %9028 = vst [vmem:[#allocation9_spill] sm:$0xff] %v9027_v43  ;;  %v683_v47 = vsel %vm4874_vm7, %v676_v28, %v681_v29  ;;  %v691_v48 = vsel %vm4874_vm7, %v684_v31, %v689_v32  ;;  %v699_v49 = vsel %vm4874_vm7, %v692_v33, %v697_v34  ;;  %v728_v50 = vshll.u32 %v621_v27, 16 }
  0x25   : > { %v295_v51 = vrot.slane %v4858_v35, 3  ;;  %v706_v52 = vsel %vm4874_vm7, %v700_v37, %v704_v38  ;;  %v731_v53 = vshrl.u32 %v4866_v39, 16  ;;  %v736_v54 = vshll.u32 %v4860_v36, 16  ;;  %1449 = vst [vmem:[#allocation1] ss:$9 sm:$0xff] %v683_v47 }
  0x26   : > { %v351_v55 = vsel %vm328_vm2, %v4814_v9, %v294_v14  ;;  %v714_v56 = vsel %vm4874_vm7, %v707_v40, %v712_v41  ;;  %1452 = vst [vmem:[#allocation1 + $0x1] ss:$9 sm:$0xff] %v691_v48  ;;  %v354_v57 = vsel %vm332_vm3, %v4814_v9, %v294_v14  ;;  %v722_v58 = vsel %vm4874_vm7, %v715_v44, %v720_v45 }
  0x27   : > { %1455 = vst [vmem:[#allocation1 + $0x2] ss:$9 sm:$0xff] %v699_v49  ;;  %v296_v59 = vrot.slane %v4871_v42, 3  ;;  %v730_v60 = vsel %vm4874_vm7, %v723_v46, %v728_v50  ;;  %v4903_v61 = vrot.slane %v351_v55, 2  ;;  %v360_v62 = vsel %vm324_vm1, %v4858_v35, %v295_v51 }
  0x28   : > { %1458 = vst [vmem:[#allocation1 + $0x3] ss:$9 sm:$0xff] %v706_v52  ;;  %v4909_v63 = vsel %vm4874_vm7, %v731_v53, %v736_v54  ;;  %v4911_v0 = vrot.slane %v354_v57, 3  ;;  %v363_v1 = vsel %vm328_vm2, %v4858_v35, %v295_v51  ;;  %v622_v2 = vsel %vm332_vm3, %v4858_v35, %v295_v51 }
  0x29   : > { %9029 = vst [vmem:[#allocation10_spill] sm:$0xff] %v4903_v61  ;;  %v4920_v4 = vsel %vm320_vm4, %v4858_v35, %v295_v51  ;;  %v4922_v7 = vrot.slane %v360_v62, 1  ;;  %v369_v8 = vsel %vm324_vm1, %v4871_v42, %v296_v59  ;;  %v4927_v10 = vrot.slane %v363_v1, 2 }
  0x2a   : > { %9030 = vst [vmem:[#allocation11_spill] sm:$0xff] %v4909_v63  ;;  %v372_v11 = vsel %vm328_vm2, %v4871_v42, %v296_v59  ;;  %v739_v12 = vshrl.u32 %v4860_v36, 16  ;;  %v744_v13 = vshll.u32 %v4903_v61, 16  ;;  %v624_v14 = vrot.slane %v622_v2, 3  ;;  %v207_v2 = vld [vmem:[%s4789_s22 + $0x38] sm:$0xff] }
  0x2b   : > { %1461 = vst [vmem:[#allocation1 + $0x4] ss:$9 sm:$0xff] %v714_v56  ;;  %v747_v15 = vshrl.u32 %v4903_v61, 16  ;;  %v752_v16 = vshll.u32 %v4911_v0, 16  ;;  %v4936_v25 = vpack.c.bf16 %v205_v3, %v205_v3  ;;  %v4938_v26 = vrot.slane %v369_v8, 1 }
  0x2c   : > { %9031 = vst [vmem:[#allocation12_spill] sm:$0xff] %v4911_v0  ;;  %v755_v27 = vshrl.u32 %v4911_v0, 16  ;;  %v759_v28 = vshll.u32 %v4920_v4, 16  ;;  %v4944_v29 = vsel %vm320_vm4, %v4871_v42, %v296_v59  ;;  %v4946_v30 = vrot.slane %v372_v11, 2 }
  0x2d   : > { %1464 = vst [vmem:[#allocation1 + $0x5] ss:$9 sm:$0xff] %v722_v58  ;;  %v762_v31 = vshrl.u32 %v4920_v4, 16  ;;  %v767_v32 = vshll.u32 %v4922_v7, 16  ;;  %v4952_v33 = vsel %vm4874_vm7, %v739_v12, %v744_v13  ;;  %v770_v34 = vshrl.u32 %v4922_v7, 16 }
  0x2e   : > { %1467 = vst [vmem:[#allocation1 + $0x6] ss:$9 sm:$0xff] %v730_v60  ;;  %v775_v37 = vshll.u32 %v4927_v10, 16  ;;  %v4956_v38 = vpack.c.bf16 %v206_v20, %v206_v20  ;;  %v4960_v40 = vsel %vm4874_vm7, %v747_v15, %v752_v16  ;;  %v778_v41 = vshrl.u32 %v4927_v10, 16 }
  0x2f   : > { %9032 = vst [vmem:[#allocation13_spill] sm:$0xff] %v4920_v4  ;;  %v783_v44 = vshll.u32 %v624_v14, 16  ;;  %v297_v45 = vrot.slane %v4936_v25, 3  ;;  %v4966_v46 = vsel %vm4874_vm7, %v755_v27, %v759_v28  ;;  %v786_v47 = vshrl.u32 %v4944_v29, 16  ;;  %v208_v27 = vld [vmem:[%s4789_s22 + $0x40] sm:$0xff] }
  0x30   : > { %9033 = vst [vmem:[#allocation14_spill] sm:$0xff] %v4922_v7  ;;  %v791_v48 = vshll.u32 %v4938_v26, 16  ;;  %v4974_v50 = vsel %vm4874_vm7, %v762_v31, %v767_v32  ;;  %v794_v51 = vshrl.u32 %v4938_v26, 16  ;;  %v799_v52 = vshll.u32 %v4946_v30, 16 }
  0x31   : > { %1470 = vst [vmem:[#allocation1 + $0x7] ss:$9 sm:$0xff] %v4909_v63  ;;  %v375_v53 = vsel %vm332_vm3, %v4871_v42, %v296_v59  ;;  %v4983_v54 = vsel %vm4874_vm7, %v770_v34, %v775_v37  ;;  %v298_v55 = vrot.slane %v4956_v38, 3  ;;  %v4989_v56 = vsel %vm4874_vm7, %v778_v41, %v783_v44  ;;  %v213_v42 = vld [vmem:[%s4789_s22 + $0x68] sm:$0xff] }
  0x32   : > { %9034 = vst [vmem:[#allocation15_spill] sm:$0xff] %v4927_v10  ;;  %v381_v57 = vsel %vm324_vm1, %v4936_v25, %v297_v45  ;;  %v4996_v58 = vsel %vm4874_vm7, %v786_v47, %v791_v48  ;;  %v4999_v59 = vrot.slane %v375_v53, 3  ;;  %v384_v60 = vsel %vm328_vm2, %v4936_v25, %v297_v45 }
  0x33   : > { %9035 = vst [vmem:[#allocation16_spill] sm:$0xff] %v4936_v25  ;;  %v5005_v62 = vsel %vm4874_vm7, %v794_v51, %v799_v52  ;;  %v625_v1 = vsel %vm332_vm3, %v4936_v25, %v297_v45  ;;  %v5014_v3 = vsel %vm320_vm4, %v4936_v25, %v297_v45  ;;  %v5016_v8 = vrot.slane %v381_v57, 1 }
  0x34   : > { %9036 = vst [vmem:[#allocation17_spill] sm:$0xff] %v4938_v26  ;;  %v390_v11 = vsel %vm324_vm1, %v4956_v38, %v298_v55  ;;  %v5021_v12 = vrot.slane %v384_v60, 2  ;;  %v393_v13 = vsel %vm328_vm2, %v4956_v38, %v298_v55  ;;  %v396_v14 = vsel %vm332_vm3, %v4956_v38, %v298_v55 }
  0x35   : > { %9037 = vst [vmem:[#allocation18_spill] sm:$0xff] %v4944_v29  ;;  %v627_v15 = vrot.slane %v625_v1, 3  ;;  %v802_v16 = vshrl.u32 %v4946_v30, 16  ;;  %v807_v20 = vshll.u32 %v4999_v59, 16  ;;  %v5031_v28 = vpack.c.bf16 %v207_v2, %v207_v2 }
  0x36   : > { %9038 = vst [vmem:[#allocation19_spill] sm:$0xff] %v4946_v30  ;;  %v5033_v31 = vrot.slane %v390_v11, 1  ;;  %v810_v32 = vshrl.u32 %v4999_v59, 16  ;;  %v814_v34 = vshll.u32 %v5014_v3, 16  ;;  %v5039_v37 = vsel %vm320_vm4, %v4956_v38, %v298_v55 }
  0x37   : > { %9039 = vst [vmem:[#allocation20_spill] sm:$0xff] %v4952_v33  ;;  %v5041_v41 = vrot.slane %v393_v13, 2  ;;  %v817_v44 = vshrl.u32 %v5014_v3, 16  ;;  %v822_v45 = vshll.u32 %v5016_v8, 16  ;;  %v5045_v47 = vrot.slane %v396_v14, 3 }
  0x38   : > { %9040 = vst [vmem:[#allocation21_spill] sm:$0xff] %v4956_v38  ;;  %v4970_v49 = vld [vmem:[#allocation1] sm:$0xff]  ;;  %v825_v48 = vshrl.u32 %v5016_v8, 16  ;;  %v830_v51 = vshll.u32 %v5021_v12, 16  ;;  %v5049_v52 = vpack.c.bf16 %v208_v27, %v208_v27  ;;  %v5053_v53 = vsel %vm4874_vm7, %v802_v16, %v807_v20 }
  0x39   : > { %9041 = vst [vmem:[#allocation22_spill] sm:$0xff] %v4960_v40  ;;  %v833_v55 = vshrl.u32 %v5021_v12, 16  ;;  %v838_v57 = vshll.u32 %v627_v15, 16  ;;  %v299_v60 = vrot.slane %v5031_v28, 3  ;;  %v5059_v1 = vsel %vm4874_vm7, %v810_v32, %v814_v34  ;;  %v209_v15 = vld [vmem:[%s4789_s22 + $0x48] sm:$0xff] }
  0x3a   : > { %9042 = vst [vmem:[#allocation23_spill] sm:$0xff] %v4966_v46  ;;  %v841_v2 = vshrl.u32 %v5039_v37, 16  ;;  %v846_v11 = vshll.u32 %v5033_v31, 16  ;;  %v5065_v13 = vsel %vm4874_vm7, %v817_v44, %v822_v45  ;;  %v849_v14 = vshrl.u32 %v5033_v31, 16 }
  0x3b   : > { %9043 = vst [vmem:[#allocation24_spill] sm:$0xff] %v4974_v50  ;;  %v854_v16 = vshll.u32 %v5041_v41, 16  ;;  %v5074_v27 = vsel %vm4874_vm7, %v825_v48, %v830_v51  ;;  %v857_v32 = vshrl.u32 %v5041_v41, 16  ;;  %v862_v34 = vshll.u32 %v5045_v47, 16 }
  0x3c   : > { %1473 = vst [vmem:[#allocation1] ss:$9 sm:$0xff] %v4952_v33  ;;  %v300_v44 = vrot.slane %v5049_v52, 3  ;;  %v5082_v45 = vsel %vm4874_vm7, %v833_v55, %v838_v57  ;;  %v5089_v48 = vsel %vm4874_vm7, %v841_v2, %v846_v11  ;;  %v5092_v51 = vpack.c.bf16 %v209_v15, %v209_v15 }
  0x3d   : > { %9044 = vst [vmem:[#allocation25_spill] sm:$0xff] %v4983_v54  ;;  %v5098_v55 = vsel %vm4874_vm7, %v849_v14, %v854_v16  ;;  %v628_v57 = vsel %vm332_vm3, %v5031_v28, %v299_v60  ;;  %v5105_v2 = vsel %vm4874_vm7, %v857_v32, %v862_v34  ;;  %v5110_v11 = vsel %vm320_vm4, %v5031_v28, %v299_v60  ;;  %v210_v34 = vld [vmem:[%s4789_s22 + $0x50] sm:$0xff] }
  0x3e   : > { %1475 = vst [vmem:[#allocation1 + $0x1] ss:$9 sm:$0xff] %v4960_v40  ;;  %v411_v14 = vsel %vm324_vm1, %v5049_v52, %v300_v44  ;;  %v301_v32 = vrot.slane %v5092_v51, 3  ;;  %vm1664_vm0 = vcmask 31744   ;;  %vm9137_vm8 = vcmask 1041408  }
  0x3f   : > { %9045 = vst [vmem:[#allocation26_spill] sm:$0xff] %v4989_v56  ;;  %4590 = vmatmul.msk.bf16.vlgmr.msra.gmra.mxu0 %vm1664_vm0, %v4970_v49  ;;  %vm9609_vm9 = vmmov %vm9137_vm8 }
  0x40   : > { %1477 = vst [vmem:[#allocation1 + $0x2] ss:$9 sm:$0xff] %v4966_v46  ;;  %vm9669_vm10 = vmmov %vm9137_vm8 }
  0x41   : > { %9046 = vst [vmem:[#allocation27_spill] sm:$0xff] %v4996_v58  ;;  %vm9670_vm11 = vmmov %vm9137_vm8 }
  0x42   : > { %1479 = vst [vmem:[#allocation1 + $0x3] ss:$9 sm:$0xff] %v4974_v50  ;;  %v5148_v50 = vsel %vm320_vm4, %v5092_v51, %v301_v32  ;;  %vm9671_vm12 = vmmov %vm9137_vm8 }
  0x43   : > { %9047 = vst [vmem:[#allocation28_spill] sm:$0xff] %v4999_v59  ;;  %vm9855_vm13 = vmmov %vm9137_vm8 }
  0x44   : > { %9048 = vst [vmem:[#allocation29_spill] sm:$0xff] %v5005_v62 }
  0x45   : > { %1481 = vst [vmem:[#allocation1 + $0x4] ss:$9 sm:$0xff] %v4983_v54  ;;  %v5144_v54 = vpack.c.bf16 %v210_v34, %v210_v34 }
  0x46   : > { %1483 = vst [vmem:[#allocation1 + $0x5] ss:$9 sm:$0xff] %v4989_v56  ;;  %v211_v56 = vld [vmem:[%s4789_s22 + $0x58] sm:$0xff] }
  0x47   : > { %9049 = vst [vmem:[#allocation30_spill] sm:$0xff] %v5014_v3 }
  0x48   : > { %9050 = vst [vmem:[#allocation31_spill] sm:$0xff] %v5016_v8 }
  0x49   : > { %1485 = vst [vmem:[#allocation1 + $0x6] ss:$9 sm:$0xff] %v4996_v58 }
  0x4a   : > { %9051 = vst [vmem:[#allocation32_spill] sm:$0xff] %v5021_v12 }
  0x4b   : > { %1487 = vst [vmem:[#allocation1 + $0x7] ss:$9 sm:$0xff] %v5005_v62  ;;  %v402_v62 = vsel %vm324_vm1, %v5031_v28, %v299_v60 }
  0x4c   : > { %9052 = vst [vmem:[#allocation33_spill] sm:$0xff] %v5031_v28  ;;  %v5112_v15 = vrot.slane %v402_v62, 1  ;;  %v630_v62 = vrot.slane %v628_v57, 3 }
  0x4d   : > { %9053 = vst [vmem:[#allocation34_spill] sm:$0xff] %v5033_v31 }
  0x4e   : > { %9054 = vst [vmem:[#allocation35_spill] sm:$0xff] %v5039_v37  ;;  %v877_v58 = vshll.u32 %v5112_v15, 16 }
  0x4f   : > { %9055 = vst [vmem:[#allocation36_spill] sm:$0xff] %v5041_v41 }
  0x50   : > { %9056 = vst [vmem:[#allocation37_spill] sm:$0xff] %v5045_v47 }
  0x51   : > { %9057 = vst [vmem:[#allocation38_spill] sm:$0xff] %v5049_v52 }
  0x52   : > { %9058 = vst [vmem:[#allocation39_spill] sm:$0xff] %v5053_v53  ;;  %v5069_v20 = vld [vmem:[#allocation1] sm:$0xff] }
  0x53   : > { %9059 = vst [vmem:[#allocation40_spill] sm:$0xff] %v5059_v1  ;;  %4591 = vmatmul.msk.bf16.gmra.mxu0 %vm1664_vm0, %v5069_v20 }
  0x54   : > { %9060 = vst [vmem:[#allocation41_spill] sm:$0xff] %v5065_v13 }
  0x55   : > { %9061 = vst [vmem:[#allocation42_spill] sm:$0xff] %v5074_v27 }
  0x56   : > { %1490 = vst [vmem:[#allocation1] ss:$9 sm:$0xff] %v5053_v53  ;;  %v405_v53 = vsel %vm328_vm2, %v5031_v28, %v299_v60  ;;  %v417_v60 = vsel %vm332_vm3, %v5049_v52, %v300_v44  ;;  %v426_v28 = vsel %vm328_vm2, %v5092_v51, %v301_v32 }
  0x57   : > { %9062 = vst [vmem:[#allocation43_spill] sm:$0xff] %v5082_v45  ;;  %v5117_v16 = vrot.slane %v405_v53, 2  ;;  %v865_v53 = vshrl.u32 %v5045_v47, 16  ;;  %v5139_v57 = vrot.slane %v417_v60, 3 }
  0x58   : > { %1492 = vst [vmem:[#allocation1 + $0x1] ss:$9 sm:$0xff] %v5059_v1  ;;  %v872_v1 = vshrl.u32 %v5110_v11, 16 }
  0x59   : > { %9063 = vst [vmem:[#allocation44_spill] sm:$0xff] %v5089_v48  ;;  %v920_v49 = vshrl.u32 %v5139_v57, 16 }
  0x5a   : > { %1494 = vst [vmem:[#allocation1 + $0x2] ss:$9 sm:$0xff] %v5065_v13  ;;  %v5133_v13 = vsel %vm320_vm4, %v5049_v52, %v300_v44  ;;  %v5159_v34 = vsel %vm4874_vm7, %v872_v1, %v877_v58  ;;  %v302_v58 = vrot.slane %v5144_v54, 3 }
  0x5b   : > { %9064 = vst [vmem:[#allocation45_spill] sm:$0xff] %v5092_v51  ;;  %v896_v60 = vshrl.u32 %v5133_v13, 16 }
  0x5c   : > { %9065 = vst [vmem:[#allocation46_spill] sm:$0xff] %v5098_v55 }
  0x5d   : > { %1496 = vst [vmem:[#allocation1 + $0x3] ss:$9 sm:$0xff] %v5074_v27  ;;  %v414_v27 = vsel %vm328_vm2, %v5049_v52, %v300_v44  ;;  %v893_v44 = vshll.u32 %v630_v62, 16  ;;  %v5165_v62 = vpack.c.bf16 %v211_v56, %v211_v56  ;;  %v917_v52 = vshll.u32 %v5139_v57, 16 }
  0x5e   : > { %9066 = vst [vmem:[#allocation47_spill] sm:$0xff] %v5105_v2  ;;  %v924_v56 = vshll.u32 %v5148_v50, 16 }
  0x5f   : > { %1498 = vst [vmem:[#allocation1 + $0x4] ss:$9 sm:$0xff] %v5082_v45  ;;  %v5127_v45 = vrot.slane %v411_v14, 1  ;;  %v885_v14 = vshll.u32 %v5117_v16, 16 }
  0x60   : > { %9067 = vst [vmem:[#allocation48_spill] sm:$0xff] %v5110_v11 }
  0x61   : > { %9068 = vst [vmem:[#allocation49_spill] sm:$0xff] %v5112_v15  ;;  %v901_v40 = vshll.u32 %v5127_v45, 16  ;;  %v904_v33 = vshrl.u32 %v5127_v45, 16 }
  0x62   : > { %1500 = vst [vmem:[#allocation1 + $0x5] ss:$9 sm:$0xff] %v5089_v48  ;;  %v869_v48 = vshll.u32 %v5110_v11, 16 }
  0x63   : > { %9069 = vst [vmem:[#allocation50_spill] sm:$0xff] %v5117_v16 }
  0x64   : > { %1502 = vst [vmem:[#allocation1 + $0x6] ss:$9 sm:$0xff] %v5098_v55  ;;  %v5135_v55 = vrot.slane %v414_v27, 2  ;;  %v888_v27 = vshrl.u32 %v5117_v16, 16  ;;  %v5153_v46 = vsel %vm4874_vm7, %v865_v53, %v869_v48 }
  0x65   : > { %1504 = vst [vmem:[#allocation1 + $0x7] ss:$9 sm:$0xff] %v5105_v2  ;;  %v880_v2 = vshrl.u32 %v5112_v15, 16 }
  0x66   : > { %9070 = vst [vmem:[#allocation51_spill] sm:$0xff] %v5127_v45  ;;  %v909_v63 = vshll.u32 %v5135_v55, 16  ;;  %v912_v53 = vshrl.u32 %v5135_v55, 16  ;;  %v5178_v1 = vsel %vm4874_vm7, %v888_v27, %v893_v44  ;;  %v631_v27 = vsel %vm332_vm3, %v5092_v51, %v301_v32 }
  0x67   : > { %9071 = vst [vmem:[#allocation52_spill] sm:$0xff] %v5133_v13  ;;  %v5169_v48 = vsel %vm4874_vm7, %v880_v2, %v885_v14  ;;  %v423_v2 = vsel %vm324_vm1, %v5092_v51, %v301_v32  ;;  %v5187_v14 = vsel %vm4874_vm7, %v896_v60, %v901_v40  ;;  %v432_v32 = vsel %vm324_vm1, %v5144_v54, %v302_v58 }
  0x68   : > { %9072 = vst [vmem:[#allocation53_spill] sm:$0xff] %v5135_v55  ;;  %v5196_v44 = vsel %vm4874_vm7, %v904_v33, %v909_v63  ;;  %v5202_v40 = vsel %vm4874_vm7, %v912_v53, %v917_v52  ;;  %v5205_v60 = vrot.slane %v423_v2, 1  ;;  %v435_v63 = vsel %vm328_vm2, %v5144_v54, %v302_v58 }
  0x69   : > { %9073 = vst [vmem:[#allocation54_spill] sm:$0xff] %v5139_v57  ;;  %v5213_v33 = vsel %vm4874_vm7, %v920_v49, %v924_v56  ;;  %v438_v52 = vsel %vm332_vm3, %v5144_v54, %v302_v58  ;;  %v633_v53 = vrot.slane %v631_v27, 3  ;;  %v5224_v2 = vsel %vm320_vm4, %v5144_v54, %v302_v58 }
  0x6a   : > { %9074 = vst [vmem:[#allocation55_spill] sm:$0xff] %v5144_v54  ;;  %v5228_v49 = vrot.slane %v435_v63, 2  ;;  %v5232_v56 = vrot.slane %v438_v52, 3  ;;  %v935_v58 = vshrl.u32 %v5205_v60, 16  ;;  %v951_v54 = vshrl.u32 %v5224_v2, 16 }
  0x6b   : > { %9075 = vst [vmem:[#allocation56_spill] sm:$0xff] %v5148_v50 }
  0x6c   : > { %9076 = vst [vmem:[#allocation57_spill] sm:$0xff] %v5153_v46  ;;  %v5173_v38 = vld [vmem:[#allocation1] sm:$0xff]  ;;  %v967_v35 = vshrl.u32 %v5228_v49, 16  ;;  %v972_v5 = vshll.u32 %v5232_v56, 16  ;;  %v975_v6 = vshrl.u32 %v5232_v56, 16 }
  0x6d   : > { %9077 = vst [vmem:[#allocation58_spill] sm:$0xff] %v5159_v34  ;;  %4592 = vmatmul.msk.bf16.gmra.mxu0 %vm1664_vm0, %v5173_v38 }
  0x6e   : > { %9078 = vst [vmem:[#allocation59_spill] sm:$0xff] %v5165_v62  ;;  %v5293_v20 = vsel %vm4874_vm7, %v967_v35, %v972_v5 }
  0x6f   : > { %9079 = vst [vmem:[#allocation60_spill] sm:$0xff] %v5169_v48 }
  0x70   : > { %9080 = vst [vmem:[#allocation61_spill] sm:$0xff] %v5178_v1 }
  0x71   : > { %1507 = vst [vmem:[#allocation1] ss:$9 sm:$0xff] %v5153_v46  ;;  %v303_v46 = vrot.slane %v5165_v62, 3 }
  0x72   : > { %9081 = vst [vmem:[#allocation62_spill] sm:$0xff] %v5187_v14 }
  0x73   : > { %1509 = vst [vmem:[#allocation1 + $0x1] ss:$9 sm:$0xff] %v5159_v34  ;;  %v444_v27 = vsel %vm324_vm1, %v5165_v62, %v303_v46  ;;  %v5245_v52 = vsel %vm320_vm4, %v5165_v62, %v303_v46 }
  0x74   : > { %9082 = vst [vmem:[#allocation63_spill] sm:$0xff] %v5196_v44 }
  0x75   : > { %1511 = vst [vmem:[#allocation1 + $0x2] ss:$9 sm:$0xff] %v5169_v48  ;;  %v5216_v48 = vrot.slane %v426_v28, 2  ;;  %v212_v28 = vld [vmem:[%s4789_s22 + $0x60] sm:$0xff] }
  0x76   : > { %9083 = vst [vmem:[#allocation64_spill] sm:$0xff] %v5202_v40  ;;  %v5241_v34 = vpack.c.bf16 %v212_v28, %v212_v28 }
  0x77   : > { %1513 = vst [vmem:[#allocation1 + $0x3] ss:$9 sm:$0xff] %v5178_v1  ;;  %v5226_v1 = vrot.slane %v432_v32, 1  ;;  %v940_v32 = vshll.u32 %v5216_v48, 16  ;;  %v943_v63 = vshrl.u32 %v5216_v48, 16 }
  0x78   : > { %9084 = vst [vmem:[#allocation65_spill] sm:$0xff] %v5205_v60 }
  0x79   : > { %9085 = vst [vmem:[#allocation66_spill] sm:$0xff] %v5213_v33  ;;  %v956_v51 = vshll.u32 %v5226_v1, 16  ;;  %v959_v9 = vshrl.u32 %v5226_v1, 16  ;;  %v5260_v28 = vsel %vm4874_vm7, %v935_v58, %v940_v32  ;;  %v982_v58 = vshrl.u32 %v5245_v52, 16 }
  0x7a   : > { %1515 = vst [vmem:[#allocation1 + $0x4] ss:$9 sm:$0xff] %v5187_v14  ;;  %v948_v14 = vshll.u32 %v633_v53, 16  ;;  %v964_v53 = vshll.u32 %v5228_v49, 16 }
  0x7b   : > { %9086 = vst [vmem:[#allocation67_spill] sm:$0xff] %v5216_v48 }
  0x7c   : > { %1517 = vst [vmem:[#allocation1 + $0x5] ss:$9 sm:$0xff] %v5196_v44  ;;  %v927_v44 = vshrl.u32 %v5148_v50, 16 }
  0x7d   : > { %1519 = vst [vmem:[#allocation1 + $0x6] ss:$9 sm:$0xff] %v5202_v40  ;;  %v932_v40 = vshll.u32 %v5205_v60, 16 }
  0x7e   : > { %9087 = vst [vmem:[#allocation68_spill] sm:$0xff] %v5224_v2  ;;  %v304_v2 = vrot.slane %v5241_v34, 3 }
  0x7f   : > { %9088 = vst [vmem:[#allocation69_spill] sm:$0xff] %v5226_v1  ;;  %v5254_v25 = vsel %vm4874_vm7, %v927_v44, %v932_v40  ;;  %v979_v44 = vshll.u32 %v5245_v52, 16  ;;  %v5272_v1 = vpack.c.bf16 %v213_v42, %v213_v42  ;;  %v447_v42 = vsel %vm328_vm2, %v5165_v62, %v303_v46 }
  0x80   : > { %9089 = vst [vmem:[#allocation70_spill] sm:$0xff] %v5228_v49  ;;  %v5311_v35 = vrot.slane %v447_v42, 2 }
  0x81   : > { %1521 = vst [vmem:[#allocation1 + $0x7] ss:$9 sm:$0xff] %v5213_v33  ;;  %v5247_v33 = vrot.slane %v444_v27, 1  ;;  %v5264_v27 = vsel %vm4874_vm7, %v943_v63, %v948_v14  ;;  %v5279_v14 = vsel %vm4874_vm7, %v951_v54, %v956_v51  ;;  %v5286_v63 = vsel %vm4874_vm7, %v959_v9, %v964_v53 }
  0x82   : > { %9090 = vst [vmem:[#allocation71_spill] sm:$0xff] %v5232_v56  ;;  %v634_v54 = vsel %vm332_vm3, %v5165_v62, %v303_v46  ;;  %v5300_v51 = vsel %vm4874_vm7, %v975_v6, %v979_v44  ;;  %v305_v9 = vrot.slane %v5272_v1, 3  ;;  %v453_v53 = vsel %vm324_vm1, %v5241_v34, %v304_v2 }
  0x83   : > { %9091 = vst [vmem:[#allocation72_spill] sm:$0xff] %v5241_v34  ;;  %v987_v32 = vshll.u32 %v5247_v33, 16  ;;  %v456_v6 = vsel %vm328_vm2, %v5241_v34, %v304_v2  ;;  %v459_v46 = vsel %vm332_vm3, %v5241_v34, %v304_v2  ;;  %v636_v44 = vrot.slane %v634_v54, 3 }
  0x84   : > { %9092 = vst [vmem:[#allocation73_spill] sm:$0xff] %v5245_v52  ;;  %v5327_v42 = vrot.slane %v456_v6, 2  ;;  %v468_v54 = vsel %vm328_vm2, %v5272_v1, %v305_v9  ;;  %v5343_v6 = vsel %vm320_vm4, %v5272_v1, %v305_v9 }
  0x85   : > { %9093 = vst [vmem:[#allocation74_spill] sm:$0xff] %v5247_v33  ;;  %v5308_v5 = vsel %vm4874_vm7, %v982_v58, %v987_v32  ;;  %v214_v58 = vld [vmem:[%s4789_s22 + $0x70] sm:$0xff]  ;;  %v5325_v32 = vsel %vm320_vm4, %v5241_v34, %v304_v2  ;;  %v5349_v62 = vrot.slane %v468_v54, 2 }
  0x86   : > { %9094 = vst [vmem:[#allocation75_spill] sm:$0xff] %v5254_v25  ;;  %v5339_v2 = vpack.c.bf16 %v214_v58, %v214_v58  ;;  %v1019_v52 = vshll.u32 %v5327_v42, 16  ;;  %v1022_v58 = vshrl.u32 %v5327_v42, 16 }
  0x87   : > { %9095 = vst [vmem:[#allocation76_spill] sm:$0xff] %v5260_v28 }
  0x88   : > { %9096 = vst [vmem:[#allocation77_spill] sm:$0xff] %v5264_v27  ;;  %v5270_v40 = vld [vmem:[#allocation1] sm:$0xff]  ;;  %v306_v56 = vrot.slane %v5339_v2, 3 }
  0x89   : > { %9097 = vst [vmem:[#allocation78_spill] sm:$0xff] %v5272_v1  ;;  %4593 = vmatmul.msk.bf16.gmra.mxu0 %vm1664_vm0, %v5270_v40 }
  0x8a   : > { %9098 = vst [vmem:[#allocation79_spill] sm:$0xff] %v5279_v14 }
  0x8b   : > { %1524 = vst [vmem:[#allocation1] ss:$9 sm:$0xff] %v5254_v25 }
  0x8c   : > { %9099 = vst [vmem:[#allocation80_spill] sm:$0xff] %v5286_v63 }
  0x8d   : > { %1526 = vst [vmem:[#allocation1 + $0x1] ss:$9 sm:$0xff] %v5260_v28  ;;  %v1003_v28 = vshll.u32 %v636_v44, 16 }
  0x8e   : > { %9100 = vst [vmem:[#allocation81_spill] sm:$0xff] %v5293_v20 }
  0x8f   : > { %1528 = vst [vmem:[#allocation1 + $0x2] ss:$9 sm:$0xff] %v5264_v27  ;;  %v215_v27 = vld [vmem:[%s4789_s22 + $0x78] sm:$0xff] }
  0x90   : > { %9101 = vst [vmem:[#allocation82_spill] sm:$0xff] %v5300_v51 }
  0x91   : > { %1530 = vst [vmem:[#allocation1 + $0x3] ss:$9 sm:$0xff] %v5279_v14  ;;  %v5319_v14 = vrot.slane %v453_v53, 1  ;;  %v990_v53 = vshrl.u32 %v5247_v33, 16 }
  0x92   : > { %9102 = vst [vmem:[#allocation83_spill] sm:$0xff] %v5308_v5 }
  0x93   : > { %1532 = vst [vmem:[#allocation1 + $0x4] ss:$9 sm:$0xff] %v5286_v63  ;;  %v5331_v63 = vrot.slane %v459_v46, 3  ;;  %v1006_v46 = vshrl.u32 %v5325_v32, 16  ;;  %v1011_v34 = vshll.u32 %v5319_v14, 16  ;;  %v1014_v33 = vshrl.u32 %v5319_v14, 16 }
  0x94   : > { %9103 = vst [vmem:[#allocation84_spill] sm:$0xff] %v5311_v35 }
  0x95   : > { %1534 = vst [vmem:[#allocation1 + $0x5] ss:$9 sm:$0xff] %v5293_v20  ;;  %v465_v20 = vsel %vm324_vm1, %v5272_v1, %v305_v9  ;;  %v1030_v54 = vshrl.u32 %v5331_v63, 16  ;;  %v5370_v49 = vsel %vm4874_vm7, %v1006_v46, %v1011_v34  ;;  %v474_v46 = vsel %vm324_vm1, %v5339_v2, %v306_v56 }
  0x96   : > { %1536 = vst [vmem:[#allocation1 + $0x6] ss:$9 sm:$0xff] %v5300_v51  ;;  %v995_v51 = vshll.u32 %v5311_v35, 16  ;;  %v5345_v25 = vrot.slane %v465_v20, 1  ;;  %v1027_v20 = vshll.u32 %v5331_v63, 16 }
  0x97   : > { %9104 = vst [vmem:[#allocation85_spill] sm:$0xff] %v5319_v14  ;;  %v1034_v14 = vshll.u32 %v5343_v6, 16 }
  0x98   : > { %1538 = vst [vmem:[#allocation1 + $0x7] ss:$9 sm:$0xff] %v5308_v5  ;;  %v998_v5 = vshrl.u32 %v5311_v35, 16  ;;  %v5353_v35 = vpack.c.bf16 %v215_v27, %v215_v27  ;;  %v5357_v44 = vsel %vm4874_vm7, %v990_v53, %v995_v51  ;;  %v1037_v51 = vshrl.u32 %v5343_v6, 16 }
  0x99   : > { %9105 = vst [vmem:[#allocation86_spill] sm:$0xff] %v5325_v32  ;;  %v1042_v53 = vshll.u32 %v5345_v25, 16  ;;  %v5387_v34 = vsel %vm4874_vm7, %v1022_v58, %v1027_v20  ;;  %v477_v58 = vsel %vm328_vm2, %v5339_v2, %v306_v56 }
  0x9a   : > { %9106 = vst [vmem:[#allocation87_spill] sm:$0xff] %v5327_v42  ;;  %v5363_v32 = vsel %vm4874_vm7, %v998_v5, %v1003_v28  ;;  %v5377_v28 = vsel %vm4874_vm7, %v1014_v33, %v1019_v52  ;;  %v1045_v5 = vshrl.u32 %v5345_v25, 16  ;;  %v307_v42 = vrot.slane %v5353_v35, 3 }
  0x9b   : > { %9107 = vst [vmem:[#allocation88_spill] sm:$0xff] %v5331_v63  ;;  %v1050_v63 = vshll.u32 %v5349_v62, 16  ;;  %v637_v33 = vsel %vm332_vm3, %v5272_v1, %v305_v9  ;;  %v5394_v52 = vsel %vm4874_vm7, %v1030_v54, %v1034_v14  ;;  %v5401_v38 = vsel %vm4874_vm7, %v1037_v51, %v1042_v53  ;;  %v216_v51 = vld [vmem:[%s4789_s22 + $0x80] sm:$0xff]  ;;  %v218_v1 = vld [vmem:[%s4789_s22 + $0x90] sm:$0xff] }
  0x9c   : > { %9108 = vst [vmem:[#allocation89_spill] sm:$0xff] %v5339_v2  ;;  %v480_v9 = vsel %vm332_vm3, %v5339_v2, %v306_v56  ;;  %v486_v20 = vsel %vm324_vm1, %v5353_v35, %v307_v42  ;;  %v639_v54 = vrot.slane %v637_v33, 3  ;;  %v5422_v53 = vsel %vm320_vm4, %v5339_v2, %v306_v56  ;;  %v217_v56 = vld [vmem:[%s4789_s22 + $0x88] sm:$0xff] }
  0x9d   : > { %9109 = vst [vmem:[#allocation90_spill] sm:$0xff] %v5343_v6  ;;  %v5410_v14 = vsel %vm4874_vm7, %v1045_v5, %v1050_v63  ;;  %v5424_v63 = vrot.slane %v477_v58, 2  ;;  %v5426_v5 = vrot.slane %v480_v9, 3  ;;  %v5431_v33 = vrot.slane %v486_v20, 1 }
  0x9e   : > { %9110 = vst [vmem:[#allocation91_spill] sm:$0xff] %v5345_v25  ;;  %v5441_v58 = vsel %vm320_vm4, %v5353_v35, %v307_v42  ;;  %v5451_v2 = vpack.c.bf16 %v217_v56, %v217_v56 }
  0x9f   : > { %9111 = vst [vmem:[#allocation92_spill] sm:$0xff] %v5349_v62  ;;  %v1539_v27 = vld [vmem:[#allocation1] sm:$0xff] }
  0xa0   : > { %9112 = vst [vmem:[#allocation93_spill] sm:$0xff] %v5353_v35  ;;  %4594 = vmatmul.msk.bf16.vlgmr.msra.gmra.mxu1 %vm1664_vm0, %v1539_v27  ;;  %v5416_v27 = vrot.slane %v474_v46, 1  ;;  %v640_v46 = vsel %vm332_vm3, %v5353_v35, %v307_v42  ;;  %v309_v25 = vrot.slane %v5451_v2, 3 }
  0xa1   : > { %9113 = vst [vmem:[#allocation94_spill] sm:$0xff] %v5357_v44 }
  0xa2   : > { %9114 = vst [vmem:[#allocation95_spill] sm:$0xff] %v5363_v32  ;;  %v1066_v20 = vshll.u32 %v5416_v27, 16 }
  0xa3   : > { %9115 = vst [vmem:[#allocation96_spill] sm:$0xff] %v5370_v49 }
  0xa4   : > { %9116 = vst [vmem:[#allocation97_spill] sm:$0xff] %v5377_v28 }
  0xa5   : > { %1541 = vst [vmem:[#allocation1] ss:$9 sm:$0xff] %v5357_v44  ;;  %v1082_v44 = vshll.u32 %v5426_v5, 16 }
  0xa6   : > { %9117 = vst [vmem:[#allocation98_spill] sm:$0xff] %v5387_v34 }
  0xa7   : > { %1543 = vst [vmem:[#allocation1 + $0x1] ss:$9 sm:$0xff] %v5363_v32  ;;  %v1074_v32 = vshll.u32 %v5424_v63, 16 }
  0xa8   : > { %9118 = vst [vmem:[#allocation99_spill] sm:$0xff] %v5394_v52 }
  0xa9   : > { %1545 = vst [vmem:[#allocation1 + $0x2] ss:$9 sm:$0xff] %v5370_v49  ;;  %v1069_v49 = vshrl.u32 %v5416_v27, 16 }
  0xaa   : > { %9119 = vst [vmem:[#allocation100_spill] sm:$0xff] %v5401_v38 }
  0xab   : > { %1547 = vst [vmem:[#allocation1 + $0x3] ss:$9 sm:$0xff] %v5377_v28  ;;  %v5437_v28 = vpack.c.bf16 %v216_v51, %v216_v51  ;;  %v642_v51 = vrot.slane %v640_v46, 3  ;;  %v1097_v46 = vshll.u32 %v5431_v33, 16 }
  0xac   : > { %9120 = vst [vmem:[#allocation101_spill] sm:$0xff] %v5410_v14 }
  0xad   : > { %1549 = vst [vmem:[#allocation1 + $0x4] ss:$9 sm:$0xff] %v5387_v34  ;;  %v489_v34 = vsel %vm328_vm2, %v5353_v35, %v307_v42  ;;  %v1089_v35 = vshll.u32 %v5441_v58, 16 }
  0xae   : > { %1551 = vst [vmem:[#allocation1 + $0x5] ss:$9 sm:$0xff] %v5394_v52  ;;  %v1058_v52 = vshll.u32 %v639_v54, 16  ;;  %v5443_v9 = vrot.slane %v489_v34, 2  ;;  %v1077_v54 = vshrl.u32 %v5424_v63, 16  ;;  %v1085_v34 = vshrl.u32 %v5426_v5, 16 }
  0xaf   : > { %9121 = vst [vmem:[#allocation102_spill] sm:$0xff] %v5416_v27  ;;  %v308_v27 = vrot.slane %v5437_v28, 3 }
  0xb0   : > { %1553 = vst [vmem:[#allocation1 + $0x6] ss:$9 sm:$0xff] %v5401_v38  ;;  %v1053_v38 = vshrl.u32 %v5349_v62, 16  ;;  %v1105_v62 = vshll.u32 %v5443_v9, 16 }
  0xb1   : > { %9122 = vst [vmem:[#allocation103_spill] sm:$0xff] %v5422_v53  ;;  %v501_v40 = vsel %vm332_vm3, %v5437_v28, %v308_v27 }
  0xb2   : > { %9123 = vst [vmem:[#allocation104_spill] sm:$0xff] %v5424_v63  ;;  %v5455_v42 = vsel %vm4874_vm7, %v1053_v38, %v1058_v52  ;;  %v1092_v63 = vshrl.u32 %v5441_v58, 16  ;;  %v5469_v52 = vsel %vm4874_vm7, %v1069_v49, %v1074_v32  ;;  %v5473_v38 = vsel %vm4874_vm7, %v1077_v54, %v1082_v44  ;;  %v618_v44 = vld [vmem:[%s8589_s1] sm:$0x3] }
  0xb3   : > { %9124 = vst [vmem:[#allocation105_spill] sm:$0xff] %v5426_v5  ;;  %v1100_v5 = vshrl.u32 %v5431_v33, 16  ;;  %v5485_v49 = vsel %vm4874_vm7, %v1085_v34, %v1089_v35  ;;  %v495_v32 = vsel %vm324_vm1, %v5437_v28, %v308_v27  ;;  %v498_v35 = vsel %vm328_vm2, %v5437_v28, %v308_v27 }
  0xb4   : > { %1555 = vst [vmem:[#allocation1 + $0x7] ss:$9 sm:$0xff] %v5410_v14  ;;  %v1061_v14 = vshrl.u32 %v5422_v53, 16  ;;  %v1913_v54 = vsel %vm9137_vm8, %v618_v44, 0  ;;  %v643_v44 = vsel %vm332_vm3, %v5451_v2, %v309_v25 }
  0xb5   : > { %9125 = vst [vmem:[#allocation106_spill] sm:$0xff] %v5431_v33  ;;  %1922 = vmatpush.bf16.msrb.mxu1 %v1913_v54 }
  0xb6   : > { %9126 = vst [vmem:[#allocation107_spill] sm:$0xff] %v5437_v28  ;;  %v5463_v53 = vsel %vm4874_vm7, %v1061_v14, %v1066_v20  ;;  %v1108_v14 = vshrl.u32 %v5443_v9, 16  ;;  %v1113_v20 = vshll.u32 %v642_v51, 16  ;;  %v5505_v51 = vsel %vm4874_vm7, %v1100_v5, %v1105_v62 }
  0xb7   : > { %9127 = vst [vmem:[#allocation108_spill] sm:$0xff] %v5441_v58  ;;  %v5479_v58 = vpack.c.bf16 %v218_v1, %v218_v1  ;;  %v5497_v1 = vsel %vm4874_vm7, %v1092_v63, %v1097_v46  ;;  %v5516_v46 = vrot.slane %v495_v32, 1  ;;  %v507_v62 = vsel %vm324_vm1, %v5451_v2, %v309_v25 }
  0xb8   : > { %9128 = vst [vmem:[#allocation109_spill] sm:$0xff] %v5443_v9  ;;  %v5512_v63 = vsel %vm4874_vm7, %v1108_v14, %v1113_v20  ;;  %v5523_v5 = vsel %vm320_vm4, %v5437_v28, %v308_v27  ;;  %v5528_v14 = vrot.slane %v501_v40, 3  ;;  %v510_v20 = vsel %vm328_vm2, %v5451_v2, %v309_v25 }
  0xb9   : > { %9129 = vst [vmem:[#allocation110_spill] sm:$0xff] %v5451_v2  ;;  %v310_v34 = vrot.slane %v5479_v58, 3  ;;  %v5533_v32 = vrot.slane %v507_v62, 1  ;;  %v5539_v27 = vsel %vm320_vm4, %v5451_v2, %v309_v25  ;;  %v1116_v54 = vshrl.u32 %v5523_v5, 16  ;;  %v220_v2 = vld [vmem:[%s4789_s22 + $0xa0] sm:$0xff] }
  0xba   : > { %9130 = vst [vmem:[#allocation111_spill] sm:$0xff] %v5455_v42  ;;  %v1121_v40 = vshll.u32 %v5516_v46, 16  ;;  %v1124_v62 = vshrl.u32 %v5516_v46, 16  ;;  %v1137_v25 = vshll.u32 %v5528_v14, 16  ;;  %v5580_v33 = vpack.c.bf16 %v220_v2, %v220_v2  ;;  %v9249_v43 = vld [vmem:[#allocation105_spill] sm:$0xff] }
  0xbb   : > { %9131 = vst [vmem:[#allocation112_spill] sm:$0xff] %v5463_v53  ;;  %v1556_v56 = vld [vmem:[#allocation1] sm:$0xff]  ;;  %v519_v2 = vsel %vm328_vm2, %v5479_v58, %v310_v34 }
  0xbc   : > { %9132 = vst [vmem:[#allocation113_spill] sm:$0xff] %v5469_v52  ;;  %4595 = vmatmul.msk.bf16.gmra.mxu1 %vm1664_vm0, %v1556_v56  ;;  %v5525_v56 = vrot.slane %v498_v35, 2  ;;  %v516_v35 = vsel %vm324_vm1, %v5479_v58, %v310_v34 }
  0xbd   : > { %9133 = vst [vmem:[#allocation114_spill] sm:$0xff] %v5473_v38 }
  0xbe   : > { %1558 = vst [vmem:[#allocation1] ss:$9 sm:$0xff] %v5455_v42  ;;  %v1144_v42 = vshll.u32 %v5539_v27, 16 }
  0xbf   : > { %9134 = vst [vmem:[#allocation115_spill] sm:$0xff] %v5479_v58 }
  0xc0   : > { %9135 = vst [vmem:[#allocation116_spill] sm:$0xff] %v5485_v49 }
  0xc1   : > { %1560 = vst [vmem:[#allocation1 + $0x1] ss:$9 sm:$0xff] %v5463_v53  ;;  %v1140_v53 = vshrl.u32 %v5528_v14, 16 }
  0xc2   : > { %9136 = vst [vmem:[#allocation117_spill] sm:$0xff] %v5497_v1 }
  0xc3   : > { %1562 = vst [vmem:[#allocation1 + $0x2] ss:$9 sm:$0xff] %v5469_v52  ;;  %v5552_v52 = vrot.slane %v516_v35, 1  ;;  %v1152_v35 = vshll.u32 %v5533_v32, 16 }
  0xc4   : > { %9138 = vst [vmem:[#allocation118_spill] sm:$0xff] %v5505_v51 }
  0xc5   : > { %1564 = vst [vmem:[#allocation1 + $0x3] ss:$9 sm:$0xff] %v5473_v38  ;;  %v1132_v38 = vshrl.u32 %v5525_v56, 16 }
  0xc6   : > { %9139 = vst [vmem:[#allocation119_spill] sm:$0xff] %v5512_v63 }
  0xc7   : > { %1566 = vst [vmem:[#allocation1 + $0x4] ss:$9 sm:$0xff] %v5485_v49  ;;  %v645_v49 = vrot.slane %v643_v44, 3  ;;  %v5565_v44 = vsel %vm4874_vm7, %v1116_v54, %v1121_v40  ;;  %v5577_v9 = vsel %vm4874_vm7, %v1132_v38, %v1137_v25 }
  0xc8   : > { %9140 = vst [vmem:[#allocation120_spill] sm:$0xff] %v5516_v46  ;;  %v1155_v46 = vshrl.u32 %v5533_v32, 16 }
  0xc9   : > { %1568 = vst [vmem:[#allocation1 + $0x5] ss:$9 sm:$0xff] %v5497_v1  ;;  %v5546_v1 = vrot.slane %v510_v20, 2  ;;  %v5561_v20 = vsel %vm320_vm4, %v5479_v58, %v310_v34  ;;  %v1168_v40 = vshll.u32 %v645_v49, 16 }
  0xca   : > { %9141 = vst [vmem:[#allocation121_spill] sm:$0xff] %v5523_v5 }
  0xcb   : > { %9142 = vst [vmem:[#allocation122_spill] sm:$0xff] %v5525_v56  ;;  %v1163_v54 = vshrl.u32 %v5546_v1, 16 }
  0xcc   : > { %1570 = vst [vmem:[#allocation1 + $0x6] ss:$9 sm:$0xff] %v5505_v51  ;;  %v219_v51 = vld [vmem:[%s4789_s22 + $0x98] sm:$0xff] }
  0xcd   : > { %9143 = vst [vmem:[#allocation123_spill] sm:$0xff] %v5528_v14  ;;  %v5557_v28 = vpack.c.bf16 %v219_v51, %v219_v51  ;;  %v1160_v51 = vshll.u32 %v5546_v1, 16  ;;  %v5607_v49 = vsel %vm4874_vm7, %v1163_v54, %v1168_v40  ;;  %v221_v54 = vld [vmem:[%s4789_s22 + $0xa8] sm:$0xff] }
  0xce   : > { %1572 = vst [vmem:[#allocation1 + $0x7] ss:$9 sm:$0xff] %v5512_v63  ;;  %v1129_v63 = vshll.u32 %v5525_v56, 16  ;;  %v1147_v56 = vshrl.u32 %v5539_v27, 16 }
  0xcf   : > { %9144 = vst [vmem:[#allocation124_spill] sm:$0xff] %v5533_v32  ;;  %v311_v32 = vrot.slane %v5557_v28, 3 }
  0xd0   : > { %9145 = vst [vmem:[#allocation125_spill] sm:$0xff] %v5539_v27  ;;  %v5571_v14 = vsel %vm4874_vm7, %v1124_v62, %v1129_v63  ;;  %v5584_v27 = vsel %vm4874_vm7, %v1140_v53, %v1144_v42  ;;  %v1171_v63 = vshrl.u32 %v5561_v20, 16  ;;  %v1176_v62 = vshll.u32 %v5552_v52, 16 }
  0xd1   : > { %9146 = vst [vmem:[#allocation126_spill] sm:$0xff] %v5546_v1  ;;  %v5592_v38 = vsel %vm4874_vm7, %v1147_v56, %v1152_v35  ;;  %v5600_v53 = vsel %vm4874_vm7, %v1155_v46, %v1160_v51  ;;  %v522_v42 = vsel %vm332_vm3, %v5479_v58, %v310_v34  ;;  %v312_v56 = vrot.slane %v5580_v33, 3 }
  0xd2   : > { %9147 = vst [vmem:[#allocation127_spill] sm:$0xff] %v5552_v52  ;;  %v5616_v46 = vrot.slane %v519_v2, 2  ;;  %v528_v25 = vsel %vm324_vm1, %v5557_v28, %v311_v32  ;;  %v5621_v34 = vrot.slane %v522_v42, 3  ;;  %v531_v35 = vsel %vm328_vm2, %v5557_v28, %v311_v32 }
  0xd3   : > { %9148 = vst [vmem:[#allocation128_spill] sm:$0xff] %v5557_v28  ;;  %v646_v51 = vsel %vm332_vm3, %v5557_v28, %v311_v32  ;;  %v5632_v40 = vsel %vm320_vm4, %v5557_v28, %v311_v32  ;;  %v5638_v2 = vrot.slane %v531_v35, 2  ;;  %v540_v42 = vsel %vm328_vm2, %v5580_v33, %v312_v56 }
  0xd4   : > { %9149 = vst [vmem:[#allocation129_spill] sm:$0xff] %v5561_v20  ;;  %v1192_v32 = vshll.u32 %v5621_v34, 16  ;;  %v1195_v35 = vshrl.u32 %v5621_v34, 16  ;;  %v5657_v28 = vrot.slane %v540_v42, 2 }
  0xd5   : > { %9150 = vst [vmem:[#allocation130_spill] sm:$0xff] %v5565_v44  ;;  %v1573_v5 = vld [vmem:[#allocation1] sm:$0xff]  ;;  %v1218_v42 = vshrl.u32 %v5638_v2, 16 }
  0xd6   : > { %9151 = vst [vmem:[#allocation131_spill] sm:$0xff] %v5571_v14  ;;  %4596 = vmatmul.msk.bf16.gmra.mxu1 %vm1664_vm0, %v1573_v5  ;;  %v5613_v5 = vsel %vm4874_vm7, %v1171_v63, %v1176_v62  ;;  %v5634_v63 = vrot.slane %v528_v25, 1  ;;  %v537_v62 = vsel %vm324_vm1, %v5580_v33, %v312_v56  ;;  %v5647_v25 = vpack.c.bf16 %v221_v54, %v221_v54 }
  0xd7   : > { %9152 = vst [vmem:[#allocation132_spill] sm:$0xff] %v5577_v9 }
  0xd8   : > { %9153 = vst [vmem:[#allocation133_spill] sm:$0xff] %v5580_v33  ;;  %v1207_v58 = vshll.u32 %v5634_v63, 16  ;;  %v313_v1 = vrot.slane %v5647_v25, 3 }
  0xd9   : > { %9154 = vst [vmem:[#allocation134_spill] sm:$0xff] %v5584_v27 }
  0xda   : > { %1575 = vst [vmem:[#allocation1] ss:$9 sm:$0xff] %v5565_v44  ;;  %v5655_v44 = vsel %vm320_vm4, %v5580_v33, %v312_v56 }
  0xdb   : > { %9155 = vst [vmem:[#allocation135_spill] sm:$0xff] %v5592_v38 }
  0xdc   : > { %1577 = vst [vmem:[#allocation1 + $0x1] ss:$9 sm:$0xff] %v5571_v14  ;;  %v1199_v14 = vshll.u32 %v5632_v40, 16 }
  0xdd   : > { %9156 = vst [vmem:[#allocation136_spill] sm:$0xff] %v5600_v53 }
  0xde   : > { %1579 = vst [vmem:[#allocation1 + $0x2] ss:$9 sm:$0xff] %v5577_v9  ;;  %v5649_v9 = vrot.slane %v537_v62, 1  ;;  %v1210_v62 = vshrl.u32 %v5634_v63, 16 }
  0xdf   : > { %9157 = vst [vmem:[#allocation137_spill] sm:$0xff] %v5607_v49 }
  0xe0   : > { %1581 = vst [vmem:[#allocation1 + $0x3] ss:$9 sm:$0xff] %v5584_v27  ;;  %v222_v27 = vld [vmem:[%s4789_s22 + $0xb0] sm:$0xff] }
  0xe1   : > { %9158 = vst [vmem:[#allocation138_spill] sm:$0xff] %v5613_v5 }
  0xe2   : > { %1583 = vst [vmem:[#allocation1 + $0x4] ss:$9 sm:$0xff] %v5592_v38  ;;  %v1187_v38 = vshrl.u32 %v5616_v46, 16 }
  0xe3   : > { %9159 = vst [vmem:[#allocation139_spill] sm:$0xff] %v5616_v46 }
  0xe4   : > { %1585 = vst [vmem:[#allocation1 + $0x5] ss:$9 sm:$0xff] %v5600_v53  ;;  %v1184_v53 = vshll.u32 %v5616_v46, 16  ;;  %v5667_v46 = vpack.c.bf16 %v222_v27, %v222_v27 }
  0xe5   : > { %9160 = vst [vmem:[#allocation140_spill] sm:$0xff] %v5621_v34  ;;  %v1215_v34 = vshll.u32 %v5638_v2, 16 }
  0xe6   : > { %1587 = vst [vmem:[#allocation1 + $0x6] ss:$9 sm:$0xff] %v5607_v49  ;;  %v1179_v49 = vshrl.u32 %v5552_v52, 16  ;;  %v5671_v52 = vsel %vm4874_vm7, %v1187_v38, %v1192_v32  ;;  %v1234_v38 = vshrl.u32 %v5649_v9, 16  ;;  %v1239_v32 = vshll.u32 %v5657_v28, 16 }
  0xe7   : > { %1589 = vst [vmem:[#allocation1 + $0x7] ss:$9 sm:$0xff] %v5613_v5  ;;  %v648_v5 = vrot.slane %v646_v51, 3  ;;  %v1202_v51 = vshrl.u32 %v5632_v40, 16 }
  0xe8   : > { %9161 = vst [vmem:[#allocation141_spill] sm:$0xff] %v5632_v40  ;;  %v5663_v54 = vsel %vm4874_vm7, %v1179_v49, %v1184_v53  ;;  %v5677_v53 = vsel %vm4874_vm7, %v1195_v35, %v1199_v14  ;;  %v1226_v49 = vshrl.u32 %v5655_v44, 16  ;;  %v5692_v14 = vsel %vm4874_vm7, %v1210_v62, %v1215_v34 }
  0xe9   : > { %9162 = vst [vmem:[#allocation142_spill] sm:$0xff] %v5634_v63  ;;  %v1223_v20 = vshll.u32 %v648_v5, 16  ;;  %v1231_v63 = vshll.u32 %v5649_v9, 16  ;;  %v5683_v27 = vsel %vm4874_vm7, %v1202_v51, %v1207_v58  ;;  %v543_v5 = vsel %vm332_vm3, %v5580_v33, %v312_v56 }
  0xea   : > { %9163 = vst [vmem:[#allocation143_spill] sm:$0xff] %v5638_v2  ;;  %v314_v35 = vrot.slane %v5667_v46, 3  ;;  %v549_v56 = vsel %vm324_vm1, %v5647_v25, %v313_v1  ;;  %v5709_v34 = vrot.slane %v543_v5, 3  ;;  %v552_v62 = vsel %vm328_vm2, %v5647_v25, %v313_v1 }
  0xeb   : > { %9164 = vst [vmem:[#allocation144_spill] sm:$0xff] %v5647_v25  ;;  %v5698_v58 = vsel %vm4874_vm7, %v1218_v42, %v1223_v20  ;;  %v5706_v51 = vsel %vm4874_vm7, %v1226_v49, %v1231_v63  ;;  %v5715_v20 = vsel %vm4874_vm7, %v1234_v38, %v1239_v32  ;;  %v223_v63 = vld [vmem:[%s4789_s22 + $0xb8] sm:$0xff]  ;;  %v5724_v42 = vsel %vm320_vm4, %v5647_v25, %v313_v1 }
  0xec   : > { %9165 = vst [vmem:[#allocation145_spill] sm:$0xff] %v5649_v9  ;;  %v5726_v49 = vrot.slane %v549_v56, 1  ;;  %v558_v5 = vsel %vm324_vm1, %v5667_v46, %v314_v35  ;;  %v5731_v38 = vrot.slane %v552_v62, 2  ;;  %v561_v32 = vsel %vm328_vm2, %v5667_v46, %v314_v35 }
  0xed   : > { %9166 = vst [vmem:[#allocation146_spill] sm:$0xff] %v5655_v44  ;;  %v1247_v56 = vshll.u32 %v5709_v34, 16  ;;  %v1250_v62 = vshrl.u32 %v5709_v34, 16 }
  0xee   : > { %9167 = vst [vmem:[#allocation147_spill] sm:$0xff] %v5657_v28  ;;  %v1590_v40 = vld [vmem:[#allocation1] sm:$0xff] }
  0xef   : > { %9168 = vst [vmem:[#allocation148_spill] sm:$0xff] %v5663_v54  ;;  %4597 = vmatmul.msk.bf16.gmra.mxu1 %vm1664_vm0, %v1590_v40  ;;  %v649_v40 = vsel %vm332_vm3, %v5647_v25, %v313_v1  ;;  %v1242_v1 = vshrl.u32 %v5657_v28, 16  ;;  %v1262_v25 = vshll.u32 %v5726_v49, 16 }
  0xf0   : > { %9169 = vst [vmem:[#allocation149_spill] sm:$0xff] %v5667_v46 }
  0xf1   : > { %9170 = vst [vmem:[#allocation150_spill] sm:$0xff] %v5671_v52 }
  0xf2   : > { %9171 = vst [vmem:[#allocation151_spill] sm:$0xff] %v5677_v53 }
  0xf3   : > { %9172 = vst [vmem:[#allocation152_spill] sm:$0xff] %v5683_v27 }
  0xf4   : > { %1592 = vst [vmem:[#allocation1] ss:$9 sm:$0xff] %v5663_v54  ;;  %v5751_v54 = vrot.slane %v561_v32, 2 }
  0xf5   : > { %9173 = vst [vmem:[#allocation153_spill] sm:$0xff] %v5692_v14 }
  0xf6   : > { %1594 = vst [vmem:[#allocation1 + $0x1] ss:$9 sm:$0xff] %v5671_v52  ;;  %v5743_v52 = vrot.slane %v558_v5, 1  ;;  %v1270_v5 = vshll.u32 %v5731_v38, 16 }
  0xf7   : > { %9174 = vst [vmem:[#allocation154_spill] sm:$0xff] %v5698_v58 }
  0xf8   : > { %1596 = vst [vmem:[#allocation1 + $0x2] ss:$9 sm:$0xff] %v5677_v53  ;;  %v5741_v53 = vpack.c.bf16 %v223_v63, %v223_v63  ;;  %v1265_v63 = vshrl.u32 %v5726_v49, 16 }
  0xf9   : > { %9175 = vst [vmem:[#allocation155_spill] sm:$0xff] %v5706_v51 }
  0xfa   : > { %1598 = vst [vmem:[#allocation1 + $0x3] ss:$9 sm:$0xff] %v5683_v27  ;;  %v224_v27 = vld [vmem:[%s4789_s22 + $0xc0] sm:$0xff] }
  0xfb   : > { %9176 = vst [vmem:[#allocation156_spill] sm:$0xff] %v5709_v34  ;;  %v5759_v28 = vpack.c.bf16 %v224_v27, %v224_v27  ;;  %v5763_v34 = vsel %vm4874_vm7, %v1242_v1, %v1247_v56  ;;  %v1289_v1 = vshrl.u32 %v5743_v52, 16  ;;  %v1294_v56 = vshll.u32 %v5751_v54, 16 }
  0xfc   : > { %9177 = vst [vmem:[#allocation157_spill] sm:$0xff] %v5715_v20 }
  0xfd   : > { %1600 = vst [vmem:[#allocation1 + $0x4] ss:$9 sm:$0xff] %v5692_v14  ;;  %v651_v14 = vrot.slane %v649_v40, 3  ;;  %v1257_v40 = vshrl.u32 %v5724_v42, 16 }
  0xfe   : > { %1602 = vst [vmem:[#allocation1 + $0x5] ss:$9 sm:$0xff] %v5698_v58  ;;  %v564_v58 = vsel %vm332_vm3, %v5667_v46, %v314_v35 }
  0xff   : > { %9178 = vst [vmem:[#allocation158_spill] sm:$0xff] %v5724_v42  ;;  %v5755_v33 = vrot.slane %v564_v58, 3  ;;  %v1278_v32 = vshll.u32 %v651_v14, 16  ;;  %v5775_v27 = vsel %vm4874_vm7, %v1257_v40, %v1262_v25  ;;  %v5781_v14 = vsel %vm4874_vm7, %v1265_v63, %v1270_v5 }
 0x100   : > { %9179 = vst [vmem:[#allocation159_spill] sm:$0xff] %v5726_v49  ;;  %v316_v25 = vrot.slane %v5759_v28, 3 }
 0x101   : > { %1604 = vst [vmem:[#allocation1 + $0x6] ss:$9 sm:$0xff] %v5706_v51  ;;  %v1254_v51 = vshll.u32 %v5724_v42, 16  ;;  %v1286_v42 = vshll.u32 %v5743_v52, 16 }
 0x102   : > { %9180 = vst [vmem:[#allocation160_spill] sm:$0xff] %v5731_v38 }
 0x103   : > { %1606 = vst [vmem:[#allocation1 + $0x7] ss:$9 sm:$0xff] %v5715_v20  ;;  %v5749_v20 = vsel %vm320_vm4, %v5667_v46, %v314_v35  ;;  %v1273_v35 = vshrl.u32 %v5731_v38, 16  ;;  %v315_v46 = vrot.slane %v5741_v53, 3  ;;  %v5769_v58 = vsel %vm4874_vm7, %v1250_v62, %v1254_v51 }
 0x104   : > { %9181 = vst [vmem:[#allocation161_spill] sm:$0xff] %v5741_v53  ;;  %v1281_v49 = vshrl.u32 %v5749_v20, 16  ;;  %v1297_v51 = vshrl.u32 %v5751_v54, 16  ;;  %v1302_v62 = vshll.u32 %v5755_v33, 16 }
 0x105   : > { %9182 = vst [vmem:[#allocation162_spill] sm:$0xff] %v5743_v52  ;;  %v5791_v40 = vsel %vm4874_vm7, %v1273_v35, %v1278_v32  ;;  %v570_v63 = vsel %vm324_vm1, %v5741_v53, %v315_v46  ;;  %v652_v32 = vsel %vm332_vm3, %v5741_v53, %v315_v46 }
 0x106   : > { %9183 = vst [vmem:[#allocation163_spill] sm:$0xff] %v5749_v20  ;;  %v225_v20 = vld [vmem:[%s4789_s22 + $0xc8] sm:$0xff]  ;;  %v5798_v5 = vsel %vm4874_vm7, %v1281_v49, %v1286_v42  ;;  %v5814_v42 = vsel %vm4874_vm7, %v1297_v51, %v1302_v62  ;;  %v5819_v49 = vsel %vm320_vm4, %v5741_v53, %v315_v46  ;;  %v585_v51 = vsel %vm332_vm3, %v5759_v28, %v316_v25  ;;  %v226_v62 = vld [vmem:[%s4789_s22 + $0xd0] sm:$0xff] }
 0x107   : > { %9184 = vst [vmem:[#allocation164_spill] sm:$0xff] %v5751_v54  ;;  %v5808_v35 = vpack.c.bf16 %v225_v20, %v225_v20  ;;  %v227_v54 = vld [vmem:[%s4789_s22 + $0xd8] sm:$0xff] }
 0x108   : > { %9185 = vst [vmem:[#allocation165_spill] sm:$0xff] %v5755_v33 }
 0x109   : > { %9186 = vst [vmem:[#allocation166_spill] sm:$0xff] %v5759_v28 }
 0x10a   : > { %9187 = vst [vmem:[#allocation167_spill] sm:$0xff] %v5763_v34  ;;  %v1607_v38 = vld [vmem:[#allocation1] sm:$0xff] }
 0x10b   : > { %9188 = vst [vmem:[#allocation168_spill] sm:$0xff] %v5769_v58  ;;  %4598 = vmatmul.msk.bf16.vlgmr.msra.gmra.mxu2 %vm1664_vm0, %v1607_v38  ;;  %v573_v38 = vsel %vm328_vm2, %v5741_v53, %v315_v46  ;;  %v654_v46 = vrot.slane %v652_v32, 3 }
 0x10c   : > { %9189 = vst [vmem:[#allocation169_spill] sm:$0xff] %v5775_v27  ;;  %v5826_v20 = vrot.slane %v573_v38, 2  ;;  %v1305_v38 = vshrl.u32 %v5755_v33, 16  ;;  %v5853_v33 = vpack.c.bf16 %v226_v62, %v226_v62 }
 0x10d   : > { %9190 = vst [vmem:[#allocation170_spill] sm:$0xff] %v5781_v14  ;;  %v1333_v9 = vshll.u32 %v654_v46, 16 }
 0x10e   : > { %1609 = vst [vmem:[#allocation1] ss:$9 sm:$0xff] %v5763_v34  ;;  %v5805_v34 = vsel %vm4874_vm7, %v1289_v1, %v1294_v56  ;;  %v5821_v1 = vrot.slane %v570_v63, 1  ;;  %v579_v56 = vsel %vm324_vm1, %v5759_v28, %v316_v25  ;;  %v317_v63 = vrot.slane %v5808_v35, 3 }
 0x10f   : > { %9191 = vst [vmem:[#allocation171_spill] sm:$0xff] %v5791_v40  ;;  %v1328_v52 = vshrl.u32 %v5826_v20, 16  ;;  %v318_v44 = vrot.slane %v5853_v33, 3 }
 0x110   : > { %1611 = vst [vmem:[#allocation1 + $0x1] ss:$9 sm:$0xff] %v5769_v58  ;;  %v1312_v58 = vshrl.u32 %v5819_v49, 16  ;;  %v1317_v32 = vshll.u32 %v5821_v1, 16  ;;  %v1320_v53 = vshrl.u32 %v5821_v1, 16 }
 0x111   : > { %9192 = vst [vmem:[#allocation172_spill] sm:$0xff] %v5798_v5 }
 0x112   : > { %1613 = vst [vmem:[#allocation1 + $0x2] ss:$9 sm:$0xff] %v5775_v27  ;;  %v5842_v27 = vsel %vm320_vm4, %v5759_v28, %v316_v25 }
 0x113   : > { %9193 = vst [vmem:[#allocation173_spill] sm:$0xff] %v5805_v34 }
 0x114   : > { %1615 = vst [vmem:[#allocation1 + $0x3] ss:$9 sm:$0xff] %v5781_v14  ;;  %v582_v14 = vsel %vm328_vm2, %v5759_v28, %v316_v25 }
 0x115   : > { %9194 = vst [vmem:[#allocation174_spill] sm:$0xff] %v5808_v35 }
 0x116   : > { %9195 = vst [vmem:[#allocation175_spill] sm:$0xff] %v5814_v42 }
 0x117   : > { %1617 = vst [vmem:[#allocation1 + $0x4] ss:$9 sm:$0xff] %v5791_v40  ;;  %v5836_v40 = vrot.slane %v579_v56, 1  ;;  %v1325_v56 = vshll.u32 %v5826_v20, 16 }
 0x118   : > { %9196 = vst [vmem:[#allocation176_spill] sm:$0xff] %v5819_v49 }
 0x119   : > { %9197 = vst [vmem:[#allocation177_spill] sm:$0xff] %v5821_v1  ;;  %v1341_v28 = vshll.u32 %v5836_v40, 16  ;;  %v5868_v1 = vsel %vm4874_vm7, %v1312_v58, %v1317_v32  ;;  %v1344_v62 = vshrl.u32 %v5836_v40, 16  ;;  %v5883_v58 = vsel %vm4874_vm7, %v1328_v52, %v1333_v9 }
 0x11a   : > { %1619 = vst [vmem:[#allocation1 + $0x5] ss:$9 sm:$0xff] %v5798_v5  ;;  %v1309_v5 = vshll.u32 %v5819_v49, 16  ;;  %v5876_v49 = vsel %vm4874_vm7, %v1320_v53, %v1325_v56  ;;  %v591_v53 = vsel %vm324_vm1, %v5808_v35, %v317_v63  ;;  %v594_v9 = vsel %vm328_vm2, %v5808_v35, %v317_v63 }
 0x11b   : > { %9198 = vst [vmem:[#allocation178_spill] sm:$0xff] %v5826_v20  ;;  %v5872_v20 = vpack.c.bf16 %v227_v54, %v227_v54 }
 0x11c   : > { %1621 = vst [vmem:[#allocation1 + $0x6] ss:$9 sm:$0xff] %v5805_v34  ;;  %v5844_v34 = vrot.slane %v582_v14, 2  ;;  %v5858_v14 = vsel %vm320_vm4, %v5808_v35, %v317_v63  ;;  %v5862_v25 = vsel %vm4874_vm7, %v1305_v38, %v1309_v5 }
 0x11d   : > { %1623 = vst [vmem:[#allocation1 + $0x7] ss:$9 sm:$0xff] %v5814_v42  ;;  %v5848_v42 = vrot.slane %v585_v51, 3  ;;  %v1336_v51 = vshrl.u32 %v5842_v27, 16  ;;  %v1364_v54 = vshll.u32 %v5858_v14, 16 }
 0x11e   : > { %9199 = vst [vmem:[#allocation179_spill] sm:$0xff] %v5836_v40  ;;  %v1349_v46 = vshll.u32 %v5844_v34, 16  ;;  %v1352_v5 = vshrl.u32 %v5844_v34, 16 }
 0x11f   : > { %9200 = vst [vmem:[#allocation180_spill] sm:$0xff] %v5842_v27  ;;  %v1357_v38 = vshll.u32 %v5848_v42, 16  ;;  %v1360_v32 = vshrl.u32 %v5848_v42, 16  ;;  %v5893_v56 = vsel %vm4874_vm7, %v1336_v51, %v1341_v28  ;;  %v319_v28 = vrot.slane %v5872_v20, 3 }
 0x120   : > { %9201 = vst [vmem:[#allocation181_spill] sm:$0xff] %v5844_v34  ;;  %v5900_v52 = vsel %vm4874_vm7, %v1344_v62, %v1349_v46  ;;  %v5911_v51 = vrot.slane %v591_v53, 1  ;;  %v603_v46 = vsel %vm328_vm2, %v5853_v33, %v318_v44  ;;  %v5930_v53 = vsel %vm320_vm4, %v5853_v33, %v318_v44 }
 0x121   : > { %9202 = vst [vmem:[#allocation182_spill] sm:$0xff] %v5848_v42  ;;  %v5917_v62 = vsel %vm4874_vm7, %v1360_v32, %v1364_v54  ;;  %v5935_v54 = vrot.slane %v603_v46, 2  ;;  %v5948_v46 = vsel %vm320_vm4, %v5872_v20, %v319_v28 }
 0x122   : > { %9203 = vst [vmem:[#allocation183_spill] sm:$0xff] %v5853_v33 }
 0x123   : > { %9204 = vst [vmem:[#allocation184_spill] sm:$0xff] %v5858_v14 }
 0x124   : > { %9205 = vst [vmem:[#allocation185_spill] sm:$0xff] %v5862_v25  ;;  %v1624_v27 = vld [vmem:[#allocation1] sm:$0xff] }
 0x125   : > { %9206 = vst [vmem:[#allocation186_spill] sm:$0xff] %v5868_v1  ;;  %4599 = vmatmul.msk.bf16.vlgmr.msra.gmra.mxu3 %vm1664_vm0, %v1624_v27  ;;  %v655_v27 = vsel %vm332_vm3, %v5808_v35, %v317_v63  ;;  %v5920_v63 = vrot.slane %v594_v9, 2  ;;  %v612_v9 = vsel %vm324_vm1, %v5872_v20, %v319_v28 }
 0x126   : > { %9207 = vst [vmem:[#allocation187_spill] sm:$0xff] %v5872_v20 }
 0x127   : > { %9208 = vst [vmem:[#allocation188_spill] sm:$0xff] %v5876_v49 }
 0x128   : > { %9209 = vst [vmem:[#allocation189_spill] sm:$0xff] %v5883_v58 }
 0x129   : > { %1626 = vst [vmem:[#allocation1] ss:$9 sm:$0xff] %v5862_v25  ;;  %v5907_v25 = vsel %vm4874_vm7, %v1352_v5, %v1357_v38  ;;  %v606_v5 = vsel %vm332_vm3, %v5853_v33, %v318_v44  ;;  %v657_v38 = vrot.slane %v655_v27, 3 }
 0x12a   : > { %9210 = vst [vmem:[#allocation190_spill] sm:$0xff] %v5893_v56  ;;  %v5941_v27 = vrot.slane %v606_v5, 3 }
 0x12b   : > { %1628 = vst [vmem:[#allocation1 + $0x1] ss:$9 sm:$0xff] %v5868_v1  ;;  %v600_v1 = vsel %vm324_vm1, %v5853_v33, %v318_v44  ;;  %v1380_v44 = vshll.u32 %v5920_v63, 16 }
 0x12c   : > { %9211 = vst [vmem:[#allocation191_spill] sm:$0xff] %v5900_v52  ;;  %v5932_v32 = vrot.slane %v600_v1, 1  ;;  %v1383_v1 = vshrl.u32 %v5920_v63, 16 }
 0x12d   : > { %1630 = vst [vmem:[#allocation1 + $0x2] ss:$9 sm:$0xff] %v5876_v49  ;;  %v1391_v49 = vshrl.u32 %v5930_v53, 16 }
 0x12e   : > { %9212 = vst [vmem:[#allocation192_spill] sm:$0xff] %v5907_v25  ;;  %v1396_v33 = vshll.u32 %v5932_v32, 16  ;;  %v1399_v35 = vshrl.u32 %v5932_v32, 16 }
 0x12f   : > { %1632 = vst [vmem:[#allocation1 + $0x3] ss:$9 sm:$0xff] %v5883_v58  ;;  %v1388_v58 = vshll.u32 %v657_v38, 16 }
 0x130   : > { %9213 = vst [vmem:[#allocation193_spill] sm:$0xff] %v5911_v51 }
 0x131   : > { %9214 = vst [vmem:[#allocation194_spill] sm:$0xff] %v5917_v62 }
 0x132   : > { %1634 = vst [vmem:[#allocation1 + $0x4] ss:$9 sm:$0xff] %v5893_v56  ;;  %v1372_v56 = vshll.u32 %v5911_v51, 16 }
 0x133   : > { %9215 = vst [vmem:[#allocation195_spill] sm:$0xff] %v5920_v63  ;;  %v1407_v63 = vshrl.u32 %v5935_v54, 16 }
 0x134   : > { %1636 = vst [vmem:[#allocation1 + $0x5] ss:$9 sm:$0xff] %v5900_v52  ;;  %v1367_v52 = vshrl.u32 %v5858_v14, 16  ;;  %v1415_v14 = vshrl.u32 %v5941_v27, 16 }
 0x135   : > { %1638 = vst [vmem:[#allocation1 + $0x6] ss:$9 sm:$0xff] %v5907_v25  ;;  %v1375_v25 = vshrl.u32 %v5911_v51, 16  ;;  %v1404_v51 = vshll.u32 %v5935_v54, 16 }
 0x136   : > { %9216 = vst [vmem:[#allocation196_spill] sm:$0xff] %v5930_v53  ;;  %v5956_v5 = vsel %vm4874_vm7, %v1367_v52, %v1372_v56  ;;  %v5968_v53 = vsel %vm4874_vm7, %v1383_v1, %v1388_v58  ;;  %v1419_v56 = vshll.u32 %v5948_v46, 16 }
 0x137   : > { %9217 = vst [vmem:[#allocation197_spill] sm:$0xff] %v5932_v32  ;;  %v5962_v38 = vsel %vm4874_vm7, %v1375_v25, %v1380_v44  ;;  %v5974_v32 = vsel %vm4874_vm7, %v1391_v49, %v1396_v33  ;;  %v1422_v25 = vshrl.u32 %v5948_v46, 16  ;;  %v5983_v58 = vsel %vm4874_vm7, %v1399_v35, %v1404_v51 }
 0x138   : > { %1640 = vst [vmem:[#allocation1 + $0x7] ss:$9 sm:$0xff] %v5917_v62  ;;  %v5950_v62 = vrot.slane %v612_v9, 1  ;;  %v1412_v9 = vshll.u32 %v5941_v27, 16  ;;  %v658_v33 = vsel %vm332_vm3, %v5872_v20, %v319_v28  ;;  %v5996_v1 = vsel %vm4874_vm7, %v1415_v14, %v1419_v56 }
 0x139   : > { %9218 = vst [vmem:[#allocation198_spill] sm:$0xff] %v5935_v54  ;;  %v615_v54 = vsel %vm328_vm2, %v5872_v20, %v319_v28  ;;  %v660_v28 = vrot.slane %v658_v33, 3 }
 0x13a   : > { %9219 = vst [vmem:[#allocation199_spill] sm:$0xff] %v5941_v27  ;;  %v1427_v44 = vshll.u32 %v5950_v62, 16  ;;  %v5991_v49 = vsel %vm4874_vm7, %v1407_v63, %v1412_v9  ;;  %v5999_v35 = vrot.slane %v615_v54, 2  ;;  %v1430_v14 = vshrl.u32 %v5950_v62, 16 }
 0x13b   : > { %9220 = vst [vmem:[#allocation200_spill] sm:$0xff] %v5948_v46  ;;  %v1443_v9 = vshll.u32 %v660_v28, 16  ;;  %v9237_v28 = vld [vmem:[#allocation73_spill] sm:$0xff] }
 0x13c   : > { %9221 = vst [vmem:[#allocation201_spill] sm:$0xff] %v5950_v62  ;;  %v6003_v51 = vsel %vm4874_vm7, %v1422_v25, %v1427_v44  ;;  %v1435_v63 = vshll.u32 %v5999_v35, 16  ;;  %v1438_v54 = vshrl.u32 %v5999_v35, 16 }
 0x13d   : > { %9222 = vst [vmem:[#allocation202_spill] sm:$0xff] %v5956_v5 }
 0x13e   : > { %9223 = vst [vmem:[#allocation203_spill] sm:$0xff] %v5962_v38  ;;  %v6014_v56 = vsel %vm4874_vm7, %v1430_v14, %v1435_v63  ;;  %v9238_v63 = vld [vmem:[#allocation74_spill] sm:$0xff] }
 0x13f   : > { %9224 = vst [vmem:[#allocation204_spill] sm:$0xff] %v5968_v53  ;;  %v1641_v52 = vld [vmem:[#allocation1] sm:$0xff] }
 0x140   : > { %9225 = vst [vmem:[#allocation205_spill] sm:$0xff] %v5974_v32  ;;  %4600 = vmatmul.msk.bf16.gmra.mxu3 %vm1664_vm0, %v1641_v52  ;;  %v6018_v52 = vsel %vm4874_vm7, %v1438_v54, %v1443_v9  ;;  %v9239_v54 = vld [vmem:[#allocation84_spill] sm:$0xff]  ;;  %v9240_v9 = vld [vmem:[#allocation86_spill] sm:$0xff] }
 0x141   : > { %1643 = vst [vmem:[#allocation1] ss:$9 sm:$0xff] %v5956_v5  ;;  %v9256_v5 = vld [vmem:[#allocation123_spill] sm:$0xff] }
 0x142   : > { %9226 = vst [vmem:[#allocation206_spill] sm:$0xff] %v5983_v58 }
 0x143   : > { %1645 = vst [vmem:[#allocation1 + $0x1] ss:$9 sm:$0xff] %v5962_v38  ;;  %v9255_v38 = vld [vmem:[#allocation122_spill] sm:$0xff] }
 0x144   : > { %9227 = vst [vmem:[#allocation207_spill] sm:$0xff] %v5991_v49 }
 0x145   : > { %1647 = vst [vmem:[#allocation1 + $0x2] ss:$9 sm:$0xff] %v5968_v53  ;;  %v9254_v53 = vld [vmem:[#allocation120_spill] sm:$0xff] }
 0x146   : > { %9228 = vst [vmem:[#allocation208_spill] sm:$0xff] %v5996_v1 }
 0x147   : > { %1649 = vst [vmem:[#allocation1 + $0x3] ss:$9 sm:$0xff] %v5974_v32  ;;  %v9253_v32 = vld [vmem:[#allocation121_spill] sm:$0xff] }
 0x148   : > { %9229 = vst [vmem:[#allocation209_spill] sm:$0xff] %v5999_v35 }
 0x149   : > { %9230 = vst [vmem:[#allocation210_spill] sm:$0xff] %v6003_v51 }
 0x14a   : > { %1651 = vst [vmem:[#allocation1 + $0x4] ss:$9 sm:$0xff] %v5983_v58 }
 0x14b   : > { %1653 = vst [vmem:[#allocation1 + $0x5] ss:$9 sm:$0xff] %v5991_v49  ;;  %v9252_v49 = vld [vmem:[#allocation109_spill] sm:$0xff] }
 0x14c   : > { %1655 = vst [vmem:[#allocation1 + $0x6] ss:$9 sm:$0xff] %v5996_v1  ;;  %v9250_v1 = vld [vmem:[#allocation108_spill] sm:$0xff] }
 0x14d   : > { %1657 = vst [vmem:[#allocation1 + $0x7] ss:$9 sm:$0xff] %v6003_v51  ;;  %v9248_v51 = vld [vmem:[#allocation104_spill] sm:$0xff] }
 0x14e   : > { %9231 = vst [vmem:[#allocation211_spill] sm:$0xff] %v6014_v56 }
 0x14f   : > { %9232 = vst [vmem:[#allocation212_spill] sm:$0xff] %v6018_v52 }
 0x154   : > { %v1658_v25 = vld [vmem:[#allocation1] sm:$0xff] }
 0x155   : > { %1660 = vst [vmem:[#allocation1] ss:$9 sm:$0xff] %v6014_v56  ;;  %4601 = vmatmul.msk.bf16.gmra.mxu3 %vm1664_vm0, %v1658_v25  ;;  %v9241_v25 = vld [vmem:[#allocation85_spill] sm:$0xff]  ;;  %v9247_v56 = vld [vmem:[#allocation102_spill] sm:$0xff] }
 0x156   : > { %1662 = vst [vmem:[#allocation1 + $0x1] ss:$9 sm:$0xff] %v6018_v52  ;;  %v9246_v52 = vld [vmem:[#allocation103_spill] sm:$0xff] }
 0x15d   : > { %v1663_v44 = vld [vmem:[#allocation1] sm:$0xff] }
 0x15e   : > { %1768 = vst [vmem:[#allocation1] ss:$9 sm:$0xff] %v4830_v17 }
 0x15f   : > { %1770 = vst [vmem:[#allocation1 + $0x1] ss:$9 sm:$0xff] %v4832_v18 }
 0x160   : > { %1772 = vst [vmem:[#allocation1 + $0x2] ss:$9 sm:$0xff] %v4840_v21  ;;  %v9233_v21 = vld [vmem:[#allocation68_spill] sm:$0xff] }
 0x161   : > { %1774 = vst [vmem:[#allocation1 + $0x3] ss:$9 sm:$0xff] %v4842_v22  ;;  %v9234_v22 = vld [vmem:[#allocation69_spill] sm:$0xff] }
 0x162   : > { %1776 = vst [vmem:[#allocation1 + $0x4] ss:$9 sm:$0xff] %v4836_v19 }
 0x163   : > { %1778 = vst [vmem:[#allocation1 + $0x5] ss:$9 sm:$0xff] %v4844_v23  ;;  %v9235_v23 = vld [vmem:[#allocation70_spill] sm:$0xff] }
 0x164   : > { %1780 = vst [vmem:[#allocation1 + $0x6] ss:$9 sm:$0xff] %v4846_v24  ;;  %v9236_v24 = vld [vmem:[#allocation71_spill] sm:$0xff] }
 0x165   : > { %1782 = vst [vmem:[#allocation1 + $0x7] ss:$9 sm:$0xff] %v4866_v39  ;;  %4602 = vmatmul.msk.bf16.gmra.mxu3 %vm1664_vm0, %v1663_v44  ;;  %v9242_v44 = vld [vmem:[#allocation87_spill] sm:$0xff] }
 0x16c   : > { %v1783_v33 = vld [vmem:[#allocation1] sm:$0xff] }
 0x16d   : > { %1784 = vst [vmem:[#allocation1] ss:$9 sm:$0xff] %v4860_v36  ;;  %4603 = vmatmul.msk.bf16.vlgmr.msrb.gmra.mxu1 %vm1664_vm0, %v1783_v33  ;;  %v9243_v33 = vld [vmem:[#allocation88_spill] sm:$0xff] }
 0x16e   : > { %1785 = vst [vmem:[#allocation1 + $0x1] ss:$9 sm:$0xff] %v4903_v61 }
 0x16f   : > { %1786 = vst [vmem:[#allocation1 + $0x2] ss:$9 sm:$0xff] %v4911_v0  ;;  %v9313_v0 = vld [vmem:[#allocation110_spill] sm:$0xff] }
 0x170   : > { %1787 = vst [vmem:[#allocation1 + $0x3] ss:$9 sm:$0xff] %v4920_v4  ;;  %v9312_v4 = vld [vmem:[#allocation107_spill] sm:$0xff] }
 0x171   : > { %1788 = vst [vmem:[#allocation1 + $0x4] ss:$9 sm:$0xff] %v4922_v7 }
 0x172   : > { %1789 = vst [vmem:[#allocation1 + $0x5] ss:$9 sm:$0xff] %v4927_v10 }
 0x173   : > { %1790 = vst [vmem:[#allocation1 + $0x6] ss:$9 sm:$0xff] %v4944_v29 }
 0x174   : > { %1791 = vst [vmem:[#allocation1 + $0x7] ss:$9 sm:$0xff] %v4938_v26 }
 0x17b   : > { %v1792_v17 = vld [vmem:[#allocation1] sm:$0xff] }
 0x17c   : > { %1793 = vst [vmem:[#allocation1] ss:$9 sm:$0xff] %v4946_v30 }
 0x17d   : > { %1794 = vst [vmem:[#allocation1 + $0x1] ss:$9 sm:$0xff] %v4999_v59  ;;  %4604 = vmatmul.msk.bf16.gmra.mxu1 %vm1664_vm0, %v1792_v17  ;;  %v9244_v17 = vld [vmem:[#allocation91_spill] sm:$0xff]  ;;  %v9307_v59 = vld [vmem:[#allocation93_spill] sm:$0xff] }
 0x17e   : > { %1795 = vst [vmem:[#allocation1 + $0x2] ss:$9 sm:$0xff] %v5014_v3  ;;  %v9306_v3 = vld [vmem:[#allocation89_spill] sm:$0xff] }
 0x17f   : > { %1796 = vst [vmem:[#allocation1 + $0x3] ss:$9 sm:$0xff] %v5016_v8 }
 0x180   : > { %1797 = vst [vmem:[#allocation1 + $0x4] ss:$9 sm:$0xff] %v5021_v12 }
 0x181   : > { %1798 = vst [vmem:[#allocation1 + $0x5] ss:$9 sm:$0xff] %v5039_v37 }
 0x182   : > { %1799 = vst [vmem:[#allocation1 + $0x6] ss:$9 sm:$0xff] %v5033_v31 }
 0x183   : > { %1800 = vst [vmem:[#allocation1 + $0x7] ss:$9 sm:$0xff] %v5041_v41 }
 0x18a   : > { %v1801_v18 = vld [vmem:[#allocation1] sm:$0xff] }
 0x18b   : > { %1802 = vst [vmem:[#allocation1] ss:$9 sm:$0xff] %v5045_v47 }
 0x18c   : > { %1803 = vst [vmem:[#allocation1 + $0x1] ss:$9 sm:$0xff] %v5110_v11  ;;  %v9305_v11 = vld [vmem:[#allocation78_spill] sm:$0xff] }
 0x18d   : > { %1804 = vst [vmem:[#allocation1 + $0x2] ss:$9 sm:$0xff] %v5112_v15  ;;  %4605 = vmatmul.msk.bf16.gmra.mxu1 %vm1664_vm0, %v1801_v18  ;;  %v9304_v15 = vld [vmem:[#allocation72_spill] sm:$0xff] }
 0x18e   : > { %1805 = vst [vmem:[#allocation1 + $0x3] ss:$9 sm:$0xff] %v5117_v16 }
 0x18f   : > { %1806 = vst [vmem:[#allocation1 + $0x4] ss:$9 sm:$0xff] %v5133_v13 }
 0x190   : > { %1807 = vst [vmem:[#allocation1 + $0x5] ss:$9 sm:$0xff] %v5127_v45 }
 0x191   : > { %1808 = vst [vmem:[#allocation1 + $0x6] ss:$9 sm:$0xff] %v5135_v55 }
 0x192   : > { %1809 = vst [vmem:[#allocation1 + $0x7] ss:$9 sm:$0xff] %v5139_v57 }
 0x199   : > { %v1810_v19 = vld [vmem:[#allocation1] sm:$0xff] }
 0x19a   : > { %1811 = vst [vmem:[#allocation1] ss:$9 sm:$0xff] %v5148_v50  ;;  %v9303_v50 = vld [vmem:[#allocation55_spill] sm:$0xff] }
 0x19b   : > { %1812 = vst [vmem:[#allocation1 + $0x1] ss:$9 sm:$0xff] %v5205_v60 }
 0x19c   : > { %1813 = vst [vmem:[#allocation1 + $0x2] ss:$9 sm:$0xff] %v5216_v48 }
 0x19d   : > { %1814 = vst [vmem:[#allocation1 + $0x3] ss:$9 sm:$0xff] %v9233_v21  ;;  %4606 = vmatmul.msk.bf16.gmra.mxu1 %vm1664_vm0, %v1810_v19  ;;  %v9245_v19 = vld [vmem:[#allocation92_spill] sm:$0xff]  ;;  %v9302_v21 = vld [vmem:[#allocation59_spill] sm:$0xff] }
 0x19e   : > { %1815 = vst [vmem:[#allocation1 + $0x4] ss:$9 sm:$0xff] %v9234_v22 }
 0x19f   : > { %1816 = vst [vmem:[#allocation1 + $0x5] ss:$9 sm:$0xff] %v9235_v23 }
 0x1a0   : > { %1817 = vst [vmem:[#allocation1 + $0x6] ss:$9 sm:$0xff] %v9236_v24 }
 0x1a1   : > { %1818 = vst [vmem:[#allocation1 + $0x7] ss:$9 sm:$0xff] %v9237_v28  ;;  %v9301_v28 = vld [vmem:[#allocation38_spill] sm:$0xff] }
 0x1a8   : > { %v1819_v14 = vld [vmem:[#allocation1] sm:$0xff] }
 0x1a9   : > { %1820 = vst [vmem:[#allocation1] ss:$9 sm:$0xff] %v9238_v63 }
 0x1aa   : > { %1821 = vst [vmem:[#allocation1 + $0x1] ss:$9 sm:$0xff] %v9239_v54 }
 0x1ab   : > { %1822 = vst [vmem:[#allocation1 + $0x2] ss:$9 sm:$0xff] %v9240_v9  ;;  %v9300_v9 = vld [vmem:[#allocation45_spill] sm:$0xff] }
 0x1ac   : > { %1823 = vst [vmem:[#allocation1 + $0x3] ss:$9 sm:$0xff] %v9241_v25 }
 0x1ad   : > { %1824 = vst [vmem:[#allocation1 + $0x4] ss:$9 sm:$0xff] %v9242_v44  ;;  %4607 = vmatmul.msk.bf16.gmra.mxu1 %vm1664_vm0, %v1819_v14  ;;  %v9251_v14 = vld [vmem:[#allocation106_spill] sm:$0xff] }
 0x1ae   : > { %1825 = vst [vmem:[#allocation1 + $0x5] ss:$9 sm:$0xff] %v9243_v33 }
 0x1af   : > { %1826 = vst [vmem:[#allocation1 + $0x6] ss:$9 sm:$0xff] %v5343_v6  ;;  %v9299_v6 = vld [vmem:[#allocation21_spill] sm:$0xff] }
 0x1b0   : > { %1827 = vst [vmem:[#allocation1 + $0x7] ss:$9 sm:$0xff] %v9244_v17 }
 0x1b7   : > { %v1828_v18 = vld [vmem:[#allocation1] sm:$0xff] }
 0x1b8   : > { %1829 = vst [vmem:[#allocation1] ss:$9 sm:$0xff] %v9245_v19 }
 0x1b9   : > { %1830 = vst [vmem:[#allocation1 + $0x1] ss:$9 sm:$0xff] %v9246_v52  ;;  %v9298_v52 = vld [vmem:[#allocation33_spill] sm:$0xff] }
 0x1ba   : > { %1831 = vst [vmem:[#allocation1 + $0x2] ss:$9 sm:$0xff] %v9247_v56 }
 0x1bb   : > { %1832 = vst [vmem:[#allocation1 + $0x3] ss:$9 sm:$0xff] %v9248_v51  ;;  %v9257_v51 = vld [vmem:[#allocation125_spill] sm:$0xff] }
 0x1bc   : > { %1833 = vst [vmem:[#allocation1 + $0x4] ss:$9 sm:$0xff] %v9249_v43  ;;  %v9258_v43 = vld [vmem:[#allocation124_spill] sm:$0xff] }
 0x1bd   : > { %1834 = vst [vmem:[#allocation1 + $0x5] ss:$9 sm:$0xff] %v9250_v1  ;;  %4608 = vmatmul.msk.bf16.gmra.mxu1 %vm1664_vm0, %v1828_v18  ;;  %v9259_v1 = vld [vmem:[#allocation126_spill] sm:$0xff]  ;;  %v9260_v18 = vld [vmem:[#allocation129_spill] sm:$0xff] }
 0x1be   : > { %1835 = vst [vmem:[#allocation1 + $0x6] ss:$9 sm:$0xff] %v9251_v14  ;;  %v9261_v14 = vld [vmem:[#allocation127_spill] sm:$0xff] }
 0x1bf   : > { %1836 = vst [vmem:[#allocation1 + $0x7] ss:$9 sm:$0xff] %v9252_v49 }
 0x1c6   : > { %v1837_v58 = vld [vmem:[#allocation1] sm:$0xff] }
 0x1c7   : > { %1838 = vst [vmem:[#allocation1] ss:$9 sm:$0xff] %v9253_v32  ;;  %v9262_v32 = vld [vmem:[#allocation139_spill] sm:$0xff] }
 0x1c8   : > { %1839 = vst [vmem:[#allocation1 + $0x1] ss:$9 sm:$0xff] %v9254_v53  ;;  %v9263_v53 = vld [vmem:[#allocation140_spill] sm:$0xff] }
 0x1c9   : > { %1840 = vst [vmem:[#allocation1 + $0x2] ss:$9 sm:$0xff] %v9255_v38  ;;  %v9264_v38 = vld [vmem:[#allocation141_spill] sm:$0xff] }
 0x1ca   : > { %1841 = vst [vmem:[#allocation1 + $0x3] ss:$9 sm:$0xff] %v9256_v5  ;;  %v9265_v5 = vld [vmem:[#allocation142_spill] sm:$0xff] }
 0x1cb   : > { %1842 = vst [vmem:[#allocation1 + $0x4] ss:$9 sm:$0xff] %v9257_v51 }
 0x1cc   : > { %1843 = vst [vmem:[#allocation1 + $0x5] ss:$9 sm:$0xff] %v9258_v43  ;;  %v9266_v43 = vld [vmem:[#allocation146_spill] sm:$0xff] }
 0x1cd   : > { %1844 = vst [vmem:[#allocation1 + $0x6] ss:$9 sm:$0xff] %v9259_v1  ;;  %4609 = vmatmul.msk.bf16.gmra.mxu1 %vm1664_vm0, %v1837_v58  ;;  %v9267_v1 = vld [vmem:[#allocation145_spill] sm:$0xff] }
 0x1ce   : > { %1845 = vst [vmem:[#allocation1 + $0x7] ss:$9 sm:$0xff] %v9260_v18  ;;  %v9269_v18 = vld [vmem:[#allocation147_spill] sm:$0xff] }
 0x1d5   : > { %v1846_v49 = vld [vmem:[#allocation1] sm:$0xff] }
 0x1d6   : > { %1847 = vst [vmem:[#allocation1] ss:$9 sm:$0xff] %v9261_v14  ;;  %v9270_v14 = vld [vmem:[#allocation156_spill] sm:$0xff] }
 0x1d7   : > { %1848 = vst [vmem:[#allocation1 + $0x1] ss:$9 sm:$0xff] %v9262_v32  ;;  %v9271_v32 = vld [vmem:[#allocation158_spill] sm:$0xff] }
 0x1d8   : > { %1849 = vst [vmem:[#allocation1 + $0x2] ss:$9 sm:$0xff] %v9263_v53  ;;  %v9272_v53 = vld [vmem:[#allocation159_spill] sm:$0xff] }
 0x1d9   : > { %1850 = vst [vmem:[#allocation1 + $0x3] ss:$9 sm:$0xff] %v9264_v38  ;;  %v9273_v38 = vld [vmem:[#allocation160_spill] sm:$0xff] }
 0x1da   : > { %1851 = vst [vmem:[#allocation1 + $0x4] ss:$9 sm:$0xff] %v9265_v5  ;;  %v9274_v5 = vld [vmem:[#allocation163_spill] sm:$0xff] }
 0x1db   : > { %1852 = vst [vmem:[#allocation1 + $0x5] ss:$9 sm:$0xff] %v5638_v2  ;;  %v9275_v2 = vld [vmem:[#allocation162_spill] sm:$0xff] }
 0x1dc   : > { %1853 = vst [vmem:[#allocation1 + $0x6] ss:$9 sm:$0xff] %v9266_v43  ;;  %v9276_v43 = vld [vmem:[#allocation164_spill] sm:$0xff] }
 0x1dd   : > { %1854 = vst [vmem:[#allocation1 + $0x7] ss:$9 sm:$0xff] %v9267_v1  ;;  %4610 = vmatmul.msk.bf16.gmra.mxu1 %vm1664_vm0, %v1846_v49  ;;  %v9278_v49 = vld [vmem:[#allocation165_spill] sm:$0xff] }
 0x1e4   : > { %v6104_v58 = vld [vmem:[#allocation1] sm:$0xff] }
 0x1e5   : > { %9268 = vst [vmem:[#allocation213_spill] sm:$0xff] %v6104_v58  ;;  %v9279_v58 = vld [vmem:[#allocation176_spill] sm:$0xff] }
 0x1e6   : > { %1856 = vst [vmem:[#allocation1] ss:$9 sm:$0xff] %v9269_v18  ;;  %v9280_v18 = vld [vmem:[#allocation177_spill] sm:$0xff] }
 0x1e7   : > { %1857 = vst [vmem:[#allocation1 + $0x1] ss:$9 sm:$0xff] %v9270_v14  ;;  %v9281_v14 = vld [vmem:[#allocation178_spill] sm:$0xff] }
 0x1e8   : > { %1858 = vst [vmem:[#allocation1 + $0x2] ss:$9 sm:$0xff] %v9271_v32  ;;  %v9282_v32 = vld [vmem:[#allocation180_spill] sm:$0xff] }
 0x1e9   : > { %1859 = vst [vmem:[#allocation1 + $0x3] ss:$9 sm:$0xff] %v9272_v53 }
 0x1ea   : > { %1860 = vst [vmem:[#allocation1 + $0x4] ss:$9 sm:$0xff] %v9273_v38  ;;  %v9297_v38 = vld [vmem:[#allocation8_spill] sm:$0xff] }
 0x1eb   : > { %1861 = vst [vmem:[#allocation1 + $0x5] ss:$9 sm:$0xff] %v9274_v5 }
 0x1ec   : > { %1862 = vst [vmem:[#allocation1 + $0x6] ss:$9 sm:$0xff] %v9275_v2 }
 0x1ed   : > { %1863 = vst [vmem:[#allocation1 + $0x7] ss:$9 sm:$0xff] %v9276_v43  ;;  %v9284_v43 = vld [vmem:[#allocation184_spill] sm:$0xff] }
 0x1f4   : > { %v6114_v1 = vld [vmem:[#allocation1] sm:$0xff] }
 0x1f5   : > { %9277 = vst [vmem:[#allocation214_spill] sm:$0xff] %v6114_v1  ;;  %v9285_v1 = vld [vmem:[#allocation193_spill] sm:$0xff] }
 0x1f6   : > { %1865 = vst [vmem:[#allocation1] ss:$9 sm:$0xff] %v9278_v49  ;;  %v9286_v49 = vld [vmem:[#allocation195_spill] sm:$0xff] }
 0x1f7   : > { %1866 = vst [vmem:[#allocation1 + $0x1] ss:$9 sm:$0xff] %v9279_v58  ;;  %v9287_v58 = vld [vmem:[#allocation196_spill] sm:$0xff] }
 0x1f8   : > { %1867 = vst [vmem:[#allocation1 + $0x2] ss:$9 sm:$0xff] %v9280_v18  ;;  %v9288_v18 = vld [vmem:[#allocation197_spill] sm:$0xff] }
 0x1f9   : > { %1868 = vst [vmem:[#allocation1 + $0x3] ss:$9 sm:$0xff] %v9281_v14  ;;  %v9289_v14 = vld [vmem:[#allocation198_spill] sm:$0xff] }
 0x1fa   : > { %1869 = vst [vmem:[#allocation1 + $0x4] ss:$9 sm:$0xff] %v9282_v32 }
 0x1fb   : > { %1870 = vst [vmem:[#allocation1 + $0x5] ss:$9 sm:$0xff] %v5836_v40  ;;  %v9296_v40 = vld [vmem:[#allocation16_spill] sm:$0xff] }
 0x1fc   : > { %1871 = vst [vmem:[#allocation1 + $0x6] ss:$9 sm:$0xff] %v5844_v34 }
 0x1fd   : > { %1872 = vst [vmem:[#allocation1 + $0x7] ss:$9 sm:$0xff] %v5848_v42 }
 0x204   : > { %v6124_v2 = vld [vmem:[#allocation1] sm:$0xff] }
 0x205   : > { %9283 = vst [vmem:[#allocation215_spill] sm:$0xff] %v6124_v2  ;;  %v9291_v2 = vld [vmem:[#allocation3_spill] sm:$0xff] }
 0x206   : > { %1874 = vst [vmem:[#allocation1] ss:$9 sm:$0xff] %v9284_v43 }
 0x207   : > { %1875 = vst [vmem:[#allocation1 + $0x1] ss:$9 sm:$0xff] %v9285_v1 }
 0x208   : > { %1876 = vst [vmem:[#allocation1 + $0x2] ss:$9 sm:$0xff] %v9286_v49  ;;  %v9293_v49 = vld [vmem:[#allocation2_spill] sm:$0xff] }
 0x209   : > { %1877 = vst [vmem:[#allocation1 + $0x3] ss:$9 sm:$0xff] %v9287_v58 }
 0x20a   : > { %1878 = vst [vmem:[#allocation1 + $0x4] ss:$9 sm:$0xff] %v9288_v18 }
 0x20b   : > { %1879 = vst [vmem:[#allocation1 + $0x5] ss:$9 sm:$0xff] %v9289_v14 }
 0x20c   : > { %1880 = vst [vmem:[#allocation1 + $0x6] ss:$9 sm:$0xff] %v5941_v27 }
 0x20d   : > { %1881 = vst [vmem:[#allocation1 + $0x7] ss:$9 sm:$0xff] %v5948_v46  ;;  %v9294_v46 = vld [vmem:[#allocation5_spill] sm:$0xff] }
 0x214   : > { %v6134_v34 = vld [vmem:[#allocation1] sm:$0xff] }
 0x215   : > { %9290 = vst [vmem:[#allocation216_spill] sm:$0xff] %v6134_v34 }
 0x216   : > { %1883 = vst [vmem:[#allocation1] ss:$9 sm:$0xff] %v5950_v62 }
 0x217   : > { %1884 = vst [vmem:[#allocation1 + $0x1] ss:$9 sm:$0xff] %v5999_v35 }
 0x218   : > { %1989 = vst [vmem:[#allocation1 + $0x20] sm:$0xff] %v9291_v2  ;;  %v9295_v2 = vld [vmem:[#allocation4_spill] sm:$0xff] }
 0x21e   : > { %v6139_v1 = vld [vmem:[#allocation1] sm:$0xff] }
 0x21f   : > { %9292 = vst [vmem:[#allocation3_spill] sm:$0xff] %v6139_v1  ;;  %v6142_v58 = vld [vmem:[#allocation1 + $0x20] ss:$4 sm:$0xff]  ;;  %v6144_v18 = vld [vmem:[#allocation1 + $0x21] ss:$4 sm:$0xff] }
 0x220   : > { %1988 = vst [vmem:[#allocation1] sm:$0xff] %v9293_v49  ;;  %v6146_v14 = vld [vmem:[#allocation1 + $0x22] ss:$4 sm:$0xff]  ;;  %v6148_v27 = vld [vmem:[#allocation1 + $0x23] ss:$4 sm:$0xff] }
 0x221   : > { %2005 = vst [vmem:[#allocation1 + $0x20] sm:$0xff] %v9294_v46 }
 0x227   : > { %v6151_v34 = vld [vmem:[#allocation1 + $0x1] ss:$4 sm:$0xff]  ;;  %v6153_v62 = vld [vmem:[#allocation1 + $0x2] ss:$4 sm:$0xff]  ;;  %v6155_v35 = vld [vmem:[#allocation1 + $0x3] ss:$4 sm:$0xff] }
 0x228   : > { %2004 = vst [vmem:[#allocation1] sm:$0xff] %v9295_v2  ;;  %v6158_v1 = vld [vmem:[#allocation1 + $0x20] ss:$4 sm:$0xff]  ;;  %v6160_v49 = vld [vmem:[#allocation1 + $0x21] ss:$4 sm:$0xff] }
 0x229   : > { %v6162_v43 = vld [vmem:[#allocation1 + $0x22] ss:$4 sm:$0xff]  ;;  %v6164_v42 = vld [vmem:[#allocation1 + $0x23] ss:$4 sm:$0xff] }
 0x22a   : > { %2014 = vst [vmem:[#allocation1 + $0x20] sm:$0xff] %v9296_v40 }
 0x22f   : > { %v6167_v32 = vld [vmem:[#allocation1 + $0x1] ss:$4 sm:$0xff]  ;;  %v6169_v46 = vld [vmem:[#allocation1 + $0x2] ss:$4 sm:$0xff]  ;;  %v6171_v5 = vld [vmem:[#allocation1 + $0x3] ss:$4 sm:$0xff] }
 0x230   : > { %2013 = vst [vmem:[#allocation1] sm:$0xff] %v9297_v38 }
 0x231   : > { %v6174_v53 = vld [vmem:[#allocation1 + $0x20] ss:$4 sm:$0xff]  ;;  %v6176_v2 = vld [vmem:[#allocation1 + $0x21] ss:$4 sm:$0xff]  ;;  %v6178_v51 = vld [vmem:[#allocation1 + $0x22] ss:$4 sm:$0xff] }
 0x232   : > { %v6180_v56 = vld [vmem:[#allocation1 + $0x23] ss:$4 sm:$0xff] }
 0x233   : > { %2023 = vst [vmem:[#allocation1 + $0x20] sm:$0xff] %v9298_v52 }
 0x237   : > { %v6183_v19 = vld [vmem:[#allocation1 + $0x1] ss:$4 sm:$0xff]  ;;  %v6185_v40 = vld [vmem:[#allocation1 + $0x2] ss:$4 sm:$0xff]  ;;  %v6187_v17 = vld [vmem:[#allocation1 + $0x3] ss:$4 sm:$0xff] }
 0x238   : > { %2022 = vst [vmem:[#allocation1] sm:$0xff] %v9299_v6 }
 0x23a   : > { %v6190_v33 = vld [vmem:[#allocation1 + $0x20] ss:$4 sm:$0xff]  ;;  %v6192_v38 = vld [vmem:[#allocation1 + $0x21] ss:$4 sm:$0xff]  ;;  %v6194_v44 = vld [vmem:[#allocation1 + $0x22] ss:$4 sm:$0xff] }
 0x23b   : > { %v6196_v25 = vld [vmem:[#allocation1 + $0x23] ss:$4 sm:$0xff] }
 0x23c   : > { %2032 = vst [vmem:[#allocation1 + $0x20] sm:$0xff] %v9300_v9 }
 0x23f   : > { %v6199_v54 = vld [vmem:[#allocation1 + $0x1] ss:$4 sm:$0xff]  ;;  %v6201_v52 = vld [vmem:[#allocation1 + $0x2] ss:$4 sm:$0xff]  ;;  %v6203_v63 = vld [vmem:[#allocation1 + $0x3] ss:$4 sm:$0xff] }
 0x240   : > { %2031 = vst [vmem:[#allocation1] sm:$0xff] %v9301_v28 }
 0x243   : > { %v6206_v24 = vld [vmem:[#allocation1 + $0x20] ss:$4 sm:$0xff]  ;;  %v6208_v6 = vld [vmem:[#allocation1 + $0x21] ss:$4 sm:$0xff]  ;;  %v6210_v23 = vld [vmem:[#allocation1 + $0x22] ss:$4 sm:$0xff] }
 0x244   : > { %v6212_v22 = vld [vmem:[#allocation1 + $0x23] ss:$4 sm:$0xff] }
 0x245   : > { %2041 = vst [vmem:[#allocation1 + $0x20] sm:$0xff] %v9302_v21 }
 0x247   : > { %v6215_v48 = vld [vmem:[#allocation1 + $0x1] ss:$4 sm:$0xff]  ;;  %v6217_v9 = vld [vmem:[#allocation1 + $0x2] ss:$4 sm:$0xff]  ;;  %v6219_v60 = vld [vmem:[#allocation1 + $0x3] ss:$4 sm:$0xff] }
 0x248   : > { %2040 = vst [vmem:[#allocation1] sm:$0xff] %v9303_v50 }
 0x24c   : > { %v6222_v57 = vld [vmem:[#allocation1 + $0x20] ss:$4 sm:$0xff]  ;;  %v6224_v28 = vld [vmem:[#allocation1 + $0x21] ss:$4 sm:$0xff]  ;;  %v6226_v55 = vld [vmem:[#allocation1 + $0x22] ss:$4 sm:$0xff] }
 0x24d   : > { %v6228_v45 = vld [vmem:[#allocation1 + $0x23] ss:$4 sm:$0xff] }
 0x24e   : > { %2050 = vst [vmem:[#allocation1 + $0x20] sm:$0xff] %v9305_v11 }
 0x24f   : > { %v6230_v13 = vld [vmem:[#allocation1 + $0x1] ss:$4 sm:$0xff]  ;;  %v6232_v16 = vld [vmem:[#allocation1 + $0x2] ss:$4 sm:$0xff]  ;;  %v6234_v21 = vld [vmem:[#allocation1 + $0x3] ss:$4 sm:$0xff] }
 0x250   : > { %2049 = vst [vmem:[#allocation1] sm:$0xff] %v9304_v15 }
 0x255   : > { %v6244_v31 = vld [vmem:[#allocation1 + $0x20] ss:$4 sm:$0xff]  ;;  %v6246_v37 = vld [vmem:[#allocation1 + $0x21] ss:$4 sm:$0xff]  ;;  %v6248_v12 = vld [vmem:[#allocation1 + $0x22] ss:$4 sm:$0xff] }
 0x256   : > { %v6250_v8 = vld [vmem:[#allocation1 + $0x23] ss:$4 sm:$0xff] }
 0x257   : > { %v6238_v47 = vld [vmem:[#allocation1 + $0x1] ss:$4 sm:$0xff]  ;;  %v6240_v50 = vld [vmem:[#allocation1 + $0x2] ss:$4 sm:$0xff]  ;;  %v6242_v41 = vld [vmem:[#allocation1 + $0x3] ss:$4 sm:$0xff] }
 0x258   : > { %2058 = vst [vmem:[#allocation1] sm:$0xff] %v9306_v3 }
 0x259   : > { %2059 = vst [vmem:[#allocation1 + $0x20] sm:$0xff] %v9307_v59 }
 0x25f   : > { %v6254_v15 = vld [vmem:[#allocation1 + $0x1] ss:$4 sm:$0xff]  ;;  %v6256_v11 = vld [vmem:[#allocation1 + $0x2] ss:$4 sm:$0xff]  ;;  %v6258_v30 = vld [vmem:[#allocation1 + $0x3] ss:$4 sm:$0xff] }
 0x260   : > { %v6260_v26 = vld [vmem:[#allocation1 + $0x20] ss:$4 sm:$0xff]  ;;  %v6262_v29 = vld [vmem:[#allocation1 + $0x21] ss:$4 sm:$0xff]  ;;  %v6264_v10 = vld [vmem:[#allocation1 + $0x22] ss:$4 sm:$0xff] }
 0x261   : > { %9308 = vst [vmem:[#allocation2_spill] sm:$0xff] %v6260_v26  ;;  %v6266_v7 = vld [vmem:[#allocation1 + $0x23] ss:$4 sm:$0xff] }
 0x262   : > { %9309 = vst [vmem:[#allocation217_spill] sm:$0xff] %v6262_v29 }
 0x263   : > { %9310 = vst [vmem:[#allocation218_spill] sm:$0xff] %v6264_v10  ;;  %v9321_v10 = vld [vmem:[#allocation115_spill] sm:$0xff] }
 0x264   : > { %9311 = vst [vmem:[#allocation219_spill] sm:$0xff] %v6266_v7  ;;  %v9322_v7 = vld [vmem:[#allocation128_spill] sm:$0xff] }
 0x265   : > { %2067 = vst [vmem:[#allocation1] sm:$0xff] %v9312_v4 }
 0x266   : > { %2068 = vst [vmem:[#allocation1 + $0x20] sm:$0xff] %v9313_v0 }
 0x26c   : > { %v6270_v3 = vld [vmem:[#allocation1 + $0x1] ss:$4 sm:$0xff]  ;;  %v6272_v59 = vld [vmem:[#allocation1 + $0x2] ss:$4 sm:$0xff]  ;;  %v6274_v61 = vld [vmem:[#allocation1 + $0x3] ss:$4 sm:$0xff] }
 0x26d   : > { %9314 = vst [vmem:[#allocation220_spill] sm:$0xff] %v6270_v3  ;;  %v6276_v36 = vld [vmem:[#allocation1 + $0x20] ss:$4 sm:$0xff]  ;;  %v6278_v39 = vld [vmem:[#allocation1 + $0x21] ss:$4 sm:$0xff] }
 0x26e   : > { %9315 = vst [vmem:[#allocation221_spill] sm:$0xff] %v6272_v59  ;;  %v6280_v26 = vld [vmem:[#allocation1 + $0x22] ss:$4 sm:$0xff]  ;;  %v6282_v29 = vld [vmem:[#allocation1 + $0x23] ss:$4 sm:$0xff] }
 0x26f   : > { %9316 = vst [vmem:[#allocation222_spill] sm:$0xff] %v6274_v61 }
 0x270   : > { %9317 = vst [vmem:[#allocation223_spill] sm:$0xff] %v6276_v36 }
 0x271   : > { %9318 = vst [vmem:[#allocation224_spill] sm:$0xff] %v6278_v39 }
 0x272   : > { %9319 = vst [vmem:[#allocation225_spill] sm:$0xff] %v6280_v26  ;;  %v9330_v26 = vld [vmem:[#allocation133_spill] sm:$0xff] }
 0x273   : > { %9320 = vst [vmem:[#allocation226_spill] sm:$0xff] %v6282_v29  ;;  %v9331_v29 = vld [vmem:[#allocation144_spill] sm:$0xff] }
 0x274   : > { %2076 = vst [vmem:[#allocation1] sm:$0xff] %v9321_v10 }
 0x275   : > { %2077 = vst [vmem:[#allocation1 + $0x20] sm:$0xff] %v9322_v7 }
 0x27b   : > { %v6286_v4 = vld [vmem:[#allocation1 + $0x1] ss:$4 sm:$0xff]  ;;  %v6288_v0 = vld [vmem:[#allocation1 + $0x2] ss:$4 sm:$0xff]  ;;  %v6290_v3 = vld [vmem:[#allocation1 + $0x3] ss:$4 sm:$0xff] }
 0x27c   : > { %9323 = vst [vmem:[#allocation227_spill] sm:$0xff] %v6286_v4  ;;  %v6292_v59 = vld [vmem:[#allocation1 + $0x20] ss:$4 sm:$0xff]  ;;  %v6294_v61 = vld [vmem:[#allocation1 + $0x21] ss:$4 sm:$0xff] }
 0x27d   : > { %9324 = vst [vmem:[#allocation228_spill] sm:$0xff] %v6288_v0  ;;  %v6296_v36 = vld [vmem:[#allocation1 + $0x22] ss:$4 sm:$0xff]  ;;  %v6298_v39 = vld [vmem:[#allocation1 + $0x23] ss:$4 sm:$0xff] }
 0x27e   : > { %9325 = vst [vmem:[#allocation229_spill] sm:$0xff] %v6290_v3 }
 0x27f   : > { %9326 = vst [vmem:[#allocation230_spill] sm:$0xff] %v6292_v59 }
 0x280   : > { %9327 = vst [vmem:[#allocation231_spill] sm:$0xff] %v6294_v61 }
 0x281   : > { %9328 = vst [vmem:[#allocation232_spill] sm:$0xff] %v6296_v36  ;;  %v9339_v36 = vld [vmem:[#allocation149_spill] sm:$0xff] }
 0x282   : > { %9329 = vst [vmem:[#allocation233_spill] sm:$0xff] %v6298_v39  ;;  %v9340_v39 = vld [vmem:[#allocation161_spill] sm:$0xff] }
 0x283   : > { %2085 = vst [vmem:[#allocation1] sm:$0xff] %v9330_v26 }
 0x284   : > { %2086 = vst [vmem:[#allocation1 + $0x20] sm:$0xff] %v9331_v29 }
 0x28a   : > { %v6302_v10 = vld [vmem:[#allocation1 + $0x1] ss:$4 sm:$0xff]  ;;  %v6304_v7 = vld [vmem:[#allocation1 + $0x2] ss:$4 sm:$0xff]  ;;  %v6306_v4 = vld [vmem:[#allocation1 + $0x3] ss:$4 sm:$0xff] }
 0x28b   : > { %9332 = vst [vmem:[#allocation234_spill] sm:$0xff] %v6302_v10  ;;  %v6308_v0 = vld [vmem:[#allocation1 + $0x20] ss:$4 sm:$0xff]  ;;  %v6310_v3 = vld [vmem:[#allocation1 + $0x21] ss:$4 sm:$0xff] }
 0x28c   : > { %9333 = vst [vmem:[#allocation235_spill] sm:$0xff] %v6304_v7  ;;  %v6312_v59 = vld [vmem:[#allocation1 + $0x22] ss:$4 sm:$0xff]  ;;  %v6314_v61 = vld [vmem:[#allocation1 + $0x23] ss:$4 sm:$0xff] }
 0x28d   : > { %9334 = vst [vmem:[#allocation236_spill] sm:$0xff] %v6306_v4 }
 0x28e   : > { %9335 = vst [vmem:[#allocation237_spill] sm:$0xff] %v6308_v0 }
 0x28f   : > { %9336 = vst [vmem:[#allocation238_spill] sm:$0xff] %v6310_v3 }
 0x290   : > { %9337 = vst [vmem:[#allocation239_spill] sm:$0xff] %v6312_v59  ;;  %v9347_v59 = vld [vmem:[#allocation166_spill] sm:$0xff] }
 0x291   : > { %9338 = vst [vmem:[#allocation240_spill] sm:$0xff] %v6314_v61  ;;  %v9348_v61 = vld [vmem:[#allocation174_spill] sm:$0xff] }
 0x292   : > { %2094 = vst [vmem:[#allocation1] sm:$0xff] %v9339_v36 }
 0x293   : > { %2095 = vst [vmem:[#allocation1 + $0x20] sm:$0xff] %v9340_v39 }
 0x299   : > { %v6318_v26 = vld [vmem:[#allocation1 + $0x1] ss:$4 sm:$0xff]  ;;  %v6320_v29 = vld [vmem:[#allocation1 + $0x2] ss:$4 sm:$0xff]  ;;  %v6322_v10 = vld [vmem:[#allocation1 + $0x3] ss:$4 sm:$0xff] }
 0x29a   : > { %9341 = vst [vmem:[#allocation241_spill] sm:$0xff] %v6318_v26  ;;  %v6324_v7 = vld [vmem:[#allocation1 + $0x20] ss:$4 sm:$0xff]  ;;  %v6326_v4 = vld [vmem:[#allocation1 + $0x21] ss:$4 sm:$0xff] }
 0x29b   : > { %9342 = vst [vmem:[#allocation242_spill] sm:$0xff] %v6320_v29  ;;  %v6328_v0 = vld [vmem:[#allocation1 + $0x22] ss:$4 sm:$0xff]  ;;  %v6330_v3 = vld [vmem:[#allocation1 + $0x23] ss:$4 sm:$0xff] }
 0x29c   : > { %9343 = vst [vmem:[#allocation243_spill] sm:$0xff] %v6322_v10 }
 0x29d   : > { %9344 = vst [vmem:[#allocation244_spill] sm:$0xff] %v6324_v7 }
 0x29e   : > { %9345 = vst [vmem:[#allocation245_spill] sm:$0xff] %v6326_v4 }
 0x29f   : > { %9346 = vst [vmem:[#allocation246_spill] sm:$0xff] %v6328_v0  ;;  %v9354_v0 = vld [vmem:[#allocation183_spill] sm:$0xff] }
 0x2a0   : > { %2103 = vst [vmem:[#allocation1] sm:$0xff] %v9347_v59 }
 0x2a1   : > { %2104 = vst [vmem:[#allocation1 + $0x20] sm:$0xff] %v9348_v61 }
 0x2a7   : > { %v6334_v36 = vld [vmem:[#allocation1 + $0x1] ss:$4 sm:$0xff]  ;;  %v6336_v39 = vld [vmem:[#allocation1 + $0x2] ss:$4 sm:$0xff]  ;;  %v6338_v26 = vld [vmem:[#allocation1 + $0x3] ss:$4 sm:$0xff] }
 0x2a8   : > { %9349 = vst [vmem:[#allocation247_spill] sm:$0xff] %v6334_v36  ;;  %v6340_v29 = vld [vmem:[#allocation1 + $0x20] ss:$4 sm:$0xff]  ;;  %v6342_v10 = vld [vmem:[#allocation1 + $0x21] ss:$4 sm:$0xff] }
 0x2a9   : > { %9350 = vst [vmem:[#allocation248_spill] sm:$0xff] %v6336_v39  ;;  %v6344_v7 = vld [vmem:[#allocation1 + $0x22] ss:$4 sm:$0xff]  ;;  %v6346_v4 = vld [vmem:[#allocation1 + $0x23] ss:$4 sm:$0xff] }
 0x2aa   : > { %9351 = vst [vmem:[#allocation249_spill] sm:$0xff] %v6338_v26 }
 0x2ab   : > { %9352 = vst [vmem:[#allocation250_spill] sm:$0xff] %v6340_v29 }
 0x2ac   : > { %9353 = vst [vmem:[#allocation251_spill] sm:$0xff] %v6342_v10 }
 0x2ad   : > { %2112 = vst [vmem:[#allocation1] sm:$0xff] %v9354_v0 }
 0x2ae   : > { %2113 = vst [vmem:[#allocation1 + $0x20] sm:$0xff] %v5872_v20 }
 0x2b4   : > { %v6350_v59 = vld [vmem:[#allocation1 + $0x1] ss:$4 sm:$0xff]  ;;  %v6352_v61 = vld [vmem:[#allocation1 + $0x2] ss:$4 sm:$0xff]  ;;  %v6354_v36 = vld [vmem:[#allocation1 + $0x3] ss:$4 sm:$0xff] }
 0x2b5   : > { %v6356_v39 = vld [vmem:[#allocation1 + $0x20] ss:$4 sm:$0xff]  ;;  %v6358_v26 = vld [vmem:[#allocation1 + $0x21] ss:$4 sm:$0xff]  ;;  %v6360_v29 = vld [vmem:[#allocation1 + $0x22] ss:$4 sm:$0xff] }
 0x2b6   : > { %v6362_v10 = vld [vmem:[#allocation1 + $0x23] ss:$4 sm:$0xff]  ;;  %2131 = vst [vmem:[#allocation1 + $0x4] ss:$9 sm:$0xff] %v6144_v18 }
 0x2b7   : > { %2123 = vst [vmem:[#allocation1] ss:$9 sm:$0xff] %v6151_v34  ;;  %v9402_v18 = vld [vmem:[#allocation19_spill] sm:$0xff] }
 0x2b8   : > { %2125 = vst [vmem:[#allocation1 + $0x1] ss:$9 sm:$0xff] %v6153_v62  ;;  %v9370_v62 = vld [vmem:[#allocation231_spill] sm:$0xff] }
 0x2b9   : > { %2127 = vst [vmem:[#allocation1 + $0x2] ss:$9 sm:$0xff] %v6155_v35  ;;  %v9377_v35 = vld [vmem:[#allocation238_spill] sm:$0xff] }
 0x2ba   : > { %2129 = vst [vmem:[#allocation1 + $0x3] ss:$9 sm:$0xff] %v6142_v58  ;;  %v9403_v58 = vld [vmem:[#allocation28_spill] sm:$0xff] }
 0x2bb   : > { %2133 = vst [vmem:[#allocation1 + $0x5] ss:$9 sm:$0xff] %v6146_v14  ;;  %v9400_v14 = vld [vmem:[#allocation18_spill] sm:$0xff] }
 0x2bc   : > { %2135 = vst [vmem:[#allocation1 + $0x6] ss:$9 sm:$0xff] %v6148_v27  ;;  %v9373_v27 = vld [vmem:[#allocation234_spill] sm:$0xff] }
 0x2bd   : > { %2137 = vst [vmem:[#allocation1 + $0x7] ss:$9 sm:$0xff] %v6167_v32  ;;  %v9372_v32 = vld [vmem:[#allocation233_spill] sm:$0xff] }
 0x2c4   : > { %v6372_v0 = vld [vmem:[#allocation1] sm:$0xff] }
 0x2c5   : > { %2139 = vst [vmem:[#allocation1] ss:$9 sm:$0xff] %v6169_v46  ;;  %v9374_v46 = vld [vmem:[#allocation235_spill] sm:$0xff] }
 0x2c6   : > { %2140 = vst [vmem:[#allocation1 + $0x1] ss:$9 sm:$0xff] %v6171_v5 }
 0x2c7   : > { %2141 = vst [vmem:[#allocation1 + $0x2] ss:$9 sm:$0xff] %v6158_v1  ;;  %v9376_v1 = vld [vmem:[#allocation237_spill] sm:$0xff] }
 0x2c8   : > { %2142 = vst [vmem:[#allocation1 + $0x3] ss:$9 sm:$0xff] %v6160_v49  ;;  %v9405_v49 = vld [vmem:[#allocation31_spill] sm:$0xff] }
 0x2c9   : > { %2143 = vst [vmem:[#allocation1 + $0x4] ss:$9 sm:$0xff] %v6162_v43 }
 0x2ca   : > { %2144 = vst [vmem:[#allocation1 + $0x5] ss:$9 sm:$0xff] %v6164_v42  ;;  %v9369_v42 = vld [vmem:[#allocation230_spill] sm:$0xff] }
 0x2cb   : > { %2145 = vst [vmem:[#allocation1 + $0x6] ss:$9 sm:$0xff] %v6183_v19 }
 0x2cc   : > { %2146 = vst [vmem:[#allocation1 + $0x7] ss:$9 sm:$0xff] %v6185_v40 }
 0x2d3   : > { %v6382_v34 = vld [vmem:[#allocation1] sm:$0xff] }
 0x2d4   : > { %2148 = vst [vmem:[#allocation1] ss:$9 sm:$0xff] %v6187_v17  ;;  %v9390_v17 = vld [vmem:[#allocation251_spill] sm:$0xff] }
 0x2d5   : > { %2149 = vst [vmem:[#allocation1 + $0x1] ss:$9 sm:$0xff] %v6174_v53  ;;  %v9371_v53 = vld [vmem:[#allocation232_spill] sm:$0xff] }
 0x2d6   : > { %2150 = vst [vmem:[#allocation1 + $0x2] ss:$9 sm:$0xff] %v6176_v2  ;;  %v9404_v2 = vld [vmem:[#allocation30_spill] sm:$0xff] }
 0x2d7   : > { %2151 = vst [vmem:[#allocation1 + $0x3] ss:$9 sm:$0xff] %v6178_v51  ;;  %v9378_v51 = vld [vmem:[#allocation239_spill] sm:$0xff] }
 0x2d8   : > { %2152 = vst [vmem:[#allocation1 + $0x4] ss:$9 sm:$0xff] %v6180_v56  ;;  %v9379_v56 = vld [vmem:[#allocation240_spill] sm:$0xff] }
 0x2d9   : > { %2153 = vst [vmem:[#allocation1 + $0x5] ss:$9 sm:$0xff] %v6199_v54  ;;  %v9386_v54 = vld [vmem:[#allocation247_spill] sm:$0xff] }
 0x2da   : > { %2154 = vst [vmem:[#allocation1 + $0x6] ss:$9 sm:$0xff] %v6201_v52  ;;  %v9380_v52 = vld [vmem:[#allocation241_spill] sm:$0xff] }
 0x2db   : > { %2155 = vst [vmem:[#allocation1 + $0x7] ss:$9 sm:$0xff] %v6203_v63  ;;  %v9385_v63 = vld [vmem:[#allocation246_spill] sm:$0xff] }
 0x2e2   : > { %v6392_v43 = vld [vmem:[#allocation1] sm:$0xff] }
 0x2e3   : > { %2157 = vst [vmem:[#allocation1] ss:$9 sm:$0xff] %v6190_v33 }
 0x2e4   : > { %2158 = vst [vmem:[#allocation1 + $0x1] ss:$9 sm:$0xff] %v6192_v38  ;;  %v9375_v38 = vld [vmem:[#allocation236_spill] sm:$0xff] }
 0x2e5   : > { %2159 = vst [vmem:[#allocation1 + $0x2] ss:$9 sm:$0xff] %v6194_v44  ;;  %v9389_v44 = vld [vmem:[#allocation250_spill] sm:$0xff] }
 0x2e6   : > { %2160 = vst [vmem:[#allocation1 + $0x3] ss:$9 sm:$0xff] %v6196_v25  ;;  %v9388_v25 = vld [vmem:[#allocation249_spill] sm:$0xff] }
 0x2e7   : > { %2161 = vst [vmem:[#allocation1 + $0x4] ss:$9 sm:$0xff] %v6215_v48 }
 0x2e8   : > { %2162 = vst [vmem:[#allocation1 + $0x5] ss:$9 sm:$0xff] %v6217_v9  ;;  %v9387_v9 = vld [vmem:[#allocation248_spill] sm:$0xff] }
 0x2e9   : > { %2163 = vst [vmem:[#allocation1 + $0x6] ss:$9 sm:$0xff] %v6219_v60  ;;  %v9367_v60 = vld [vmem:[#allocation228_spill] sm:$0xff] }
 0x2ea   : > { %2164 = vst [vmem:[#allocation1 + $0x7] ss:$9 sm:$0xff] %v6206_v24  ;;  %v9383_v24 = vld [vmem:[#allocation244_spill] sm:$0xff] }
 0x2f1   : > { %v6402_v40 = vld [vmem:[#allocation1] sm:$0xff] }
 0x2f2   : > { %2166 = vst [vmem:[#allocation1] ss:$9 sm:$0xff] %v6208_v6  ;;  %v9368_v6 = vld [vmem:[#allocation229_spill] sm:$0xff] }
 0x2f3   : > { %2167 = vst [vmem:[#allocation1 + $0x1] ss:$9 sm:$0xff] %v6210_v23 }
 0x2f4   : > { %2168 = vst [vmem:[#allocation1 + $0x2] ss:$9 sm:$0xff] %v6212_v22  ;;  %v9382_v22 = vld [vmem:[#allocation243_spill] sm:$0xff] }
 0x2f5   : > { %2169 = vst [vmem:[#allocation1 + $0x3] ss:$9 sm:$0xff] %v6230_v13 }
 0x2f6   : > { %2170 = vst [vmem:[#allocation1 + $0x4] ss:$9 sm:$0xff] %v6232_v16  ;;  %v9366_v16 = vld [vmem:[#allocation227_spill] sm:$0xff] }
 0x2f7   : > { %2171 = vst [vmem:[#allocation1 + $0x5] ss:$9 sm:$0xff] %v6234_v21  ;;  %v9381_v21 = vld [vmem:[#allocation242_spill] sm:$0xff] }
 0x2f8   : > { %2172 = vst [vmem:[#allocation1 + $0x6] ss:$9 sm:$0xff] %v6222_v57 }
 0x2f9   : > { %2173 = vst [vmem:[#allocation1 + $0x7] ss:$9 sm:$0xff] %v6224_v28  ;;  %v9384_v28 = vld [vmem:[#allocation245_spill] sm:$0xff] }
 0x300   : > { %v6412_v48 = vld [vmem:[#allocation1] sm:$0xff] }
 0x301   : > { %2175 = vst [vmem:[#allocation1] ss:$9 sm:$0xff] %v6226_v55  ;;  %v9362_v55 = vld [vmem:[#allocation223_spill] sm:$0xff] }
 0x302   : > { %2176 = vst [vmem:[#allocation1 + $0x1] ss:$9 sm:$0xff] %v6228_v45  ;;  %v9360_v45 = vld [vmem:[#allocation221_spill] sm:$0xff] }
 0x303   : > { %2177 = vst [vmem:[#allocation1 + $0x2] ss:$9 sm:$0xff] %v6238_v47  ;;  %v9355_v47 = vld [vmem:[#allocation2_spill] sm:$0xff] }
 0x304   : > { %2178 = vst [vmem:[#allocation1 + $0x3] ss:$9 sm:$0xff] %v6240_v50  ;;  %v9356_v50 = vld [vmem:[#allocation217_spill] sm:$0xff] }
 0x305   : > { %2179 = vst [vmem:[#allocation1 + $0x4] ss:$9 sm:$0xff] %v6242_v41  ;;  %v9357_v41 = vld [vmem:[#allocation218_spill] sm:$0xff] }
 0x306   : > { %2180 = vst [vmem:[#allocation1 + $0x5] ss:$9 sm:$0xff] %v6244_v31  ;;  %v9358_v31 = vld [vmem:[#allocation219_spill] sm:$0xff] }
 0x307   : > { %2181 = vst [vmem:[#allocation1 + $0x6] ss:$9 sm:$0xff] %v6246_v37 }
 0x308   : > { %2182 = vst [vmem:[#allocation1 + $0x7] ss:$9 sm:$0xff] %v6248_v12  ;;  %v9359_v12 = vld [vmem:[#allocation220_spill] sm:$0xff] }
 0x30f   : > { %v6422_v13 = vld [vmem:[#allocation1] sm:$0xff] }
 0x310   : > { %2184 = vst [vmem:[#allocation1] ss:$9 sm:$0xff] %v6250_v8  ;;  %v9361_v8 = vld [vmem:[#allocation222_spill] sm:$0xff] }
 0x311   : > { %2185 = vst [vmem:[#allocation1 + $0x1] ss:$9 sm:$0xff] %v6254_v15  ;;  %v9365_v15 = vld [vmem:[#allocation226_spill] sm:$0xff] }
 0x312   : > { %2186 = vst [vmem:[#allocation1 + $0x2] ss:$9 sm:$0xff] %v6256_v11  ;;  %v9363_v11 = vld [vmem:[#allocation224_spill] sm:$0xff] }
 0x313   : > { %2187 = vst [vmem:[#allocation1 + $0x3] ss:$9 sm:$0xff] %v6258_v30  ;;  %v9364_v30 = vld [vmem:[#allocation225_spill] sm:$0xff] }
 0x314   : > { %2188 = vst [vmem:[#allocation1 + $0x4] ss:$9 sm:$0xff] %v9355_v47  ;;  %v9406_v47 = vld [vmem:[#allocation32_spill] sm:$0xff] }
 0x315   : > { %2189 = vst [vmem:[#allocation1 + $0x5] ss:$9 sm:$0xff] %v9356_v50  ;;  %v9407_v50 = vld [vmem:[#allocation35_spill] sm:$0xff] }
 0x316   : > { %2190 = vst [vmem:[#allocation1 + $0x6] ss:$9 sm:$0xff] %v9357_v41  ;;  %v9408_v41 = vld [vmem:[#allocation34_spill] sm:$0xff] }
 0x317   : > { %2191 = vst [vmem:[#allocation1 + $0x7] ss:$9 sm:$0xff] %v9358_v31 }
 0x31e   : > { %v6432_v37 = vld [vmem:[#allocation1] sm:$0xff] }
 0x31f   : > { %2193 = vst [vmem:[#allocation1] ss:$9 sm:$0xff] %v9359_v12  ;;  %v9409_v12 = vld [vmem:[#allocation36_spill] sm:$0xff] }
 0x320   : > { %2194 = vst [vmem:[#allocation1 + $0x1] ss:$9 sm:$0xff] %v9360_v45  ;;  %v9410_v45 = vld [vmem:[#allocation37_spill] sm:$0xff] }
 0x321   : > { %2195 = vst [vmem:[#allocation1 + $0x2] ss:$9 sm:$0xff] %v9361_v8  ;;  %v9411_v8 = vld [vmem:[#allocation48_spill] sm:$0xff] }
 0x322   : > { %2196 = vst [vmem:[#allocation1 + $0x3] ss:$9 sm:$0xff] %v9362_v55  ;;  %v9412_v55 = vld [vmem:[#allocation49_spill] sm:$0xff] }
 0x323   : > { %2197 = vst [vmem:[#allocation1 + $0x4] ss:$9 sm:$0xff] %v9363_v11  ;;  %v9413_v11 = vld [vmem:[#allocation50_spill] sm:$0xff] }
 0x324   : > { %2198 = vst [vmem:[#allocation1 + $0x5] ss:$9 sm:$0xff] %v9364_v30  ;;  %v9414_v30 = vld [vmem:[#allocation52_spill] sm:$0xff] }
 0x325   : > { %2199 = vst [vmem:[#allocation1 + $0x6] ss:$9 sm:$0xff] %v9365_v15  ;;  %v9415_v15 = vld [vmem:[#allocation51_spill] sm:$0xff] }
 0x326   : > { %2200 = vst [vmem:[#allocation1 + $0x7] ss:$9 sm:$0xff] %v9366_v16  ;;  %v9416_v16 = vld [vmem:[#allocation53_spill] sm:$0xff] }
 0x32d   : > { %v6442_v57 = vld [vmem:[#allocation1] sm:$0xff] }
 0x32e   : > { %2202 = vst [vmem:[#allocation1] ss:$9 sm:$0xff] %v9367_v60 }
 0x32f   : > { %2203 = vst [vmem:[#allocation1 + $0x1] ss:$9 sm:$0xff] %v9368_v6  ;;  %v9417_v6 = vld [vmem:[#allocation54_spill] sm:$0xff] }
 0x330   : > { %2204 = vst [vmem:[#allocation1 + $0x2] ss:$9 sm:$0xff] %v9369_v42  ;;  %v9418_v42 = vld [vmem:[#allocation56_spill] sm:$0xff] }
 0x331   : > { %2205 = vst [vmem:[#allocation1 + $0x3] ss:$9 sm:$0xff] %v9370_v62  ;;  %v9419_v62 = vld [vmem:[#allocation65_spill] sm:$0xff] }
 0x332   : > { %2206 = vst [vmem:[#allocation1 + $0x4] ss:$9 sm:$0xff] %v9371_v53  ;;  %v9420_v53 = vld [vmem:[#allocation67_spill] sm:$0xff] }
 0x333   : > { %2207 = vst [vmem:[#allocation1 + $0x5] ss:$9 sm:$0xff] %v9372_v32  ;;  %v9421_v32 = vld [vmem:[#allocation68_spill] sm:$0xff] }
 0x334   : > { %2208 = vst [vmem:[#allocation1 + $0x6] ss:$9 sm:$0xff] %v9373_v27  ;;  %v9422_v27 = vld [vmem:[#allocation69_spill] sm:$0xff] }
 0x335   : > { %2209 = vst [vmem:[#allocation1 + $0x7] ss:$9 sm:$0xff] %v9374_v46  ;;  %v9423_v46 = vld [vmem:[#allocation70_spill] sm:$0xff] }
 0x33c   : > { %v6452_v5 = vld [vmem:[#allocation1] sm:$0xff] }
 0x33d   : > { %2211 = vst [vmem:[#allocation1] ss:$9 sm:$0xff] %v9375_v38  ;;  %v9424_v38 = vld [vmem:[#allocation71_spill] sm:$0xff] }
 0x33e   : > { %2212 = vst [vmem:[#allocation1 + $0x1] ss:$9 sm:$0xff] %v9376_v1 }
 0x33f   : > { %2213 = vst [vmem:[#allocation1 + $0x2] ss:$9 sm:$0xff] %v9377_v35  ;;  %v9425_v35 = vld [vmem:[#allocation73_spill] sm:$0xff] }
 0x340   : > { %2214 = vst [vmem:[#allocation1 + $0x3] ss:$9 sm:$0xff] %v9378_v51  ;;  %v9426_v51 = vld [vmem:[#allocation74_spill] sm:$0xff] }
 0x341   : > { %2215 = vst [vmem:[#allocation1 + $0x4] ss:$9 sm:$0xff] %v9379_v56  ;;  %v9427_v56 = vld [vmem:[#allocation84_spill] sm:$0xff] }
 0x342   : > { %2216 = vst [vmem:[#allocation1 + $0x5] ss:$9 sm:$0xff] %v9380_v52  ;;  %v9428_v52 = vld [vmem:[#allocation86_spill] sm:$0xff] }
 0x343   : > { %2217 = vst [vmem:[#allocation1 + $0x6] ss:$9 sm:$0xff] %v9381_v21  ;;  %v9429_v21 = vld [vmem:[#allocation85_spill] sm:$0xff] }
 0x344   : > { %2218 = vst [vmem:[#allocation1 + $0x7] ss:$9 sm:$0xff] %v9382_v22  ;;  %v9430_v22 = vld [vmem:[#allocation87_spill] sm:$0xff] }
 0x34b   : > { %v6462_v23 = vld [vmem:[#allocation1] sm:$0xff] }
 0x34c   : > { %2220 = vst [vmem:[#allocation1] ss:$9 sm:$0xff] %v9383_v24  ;;  %v9431_v24 = vld [vmem:[#allocation88_spill] sm:$0xff] }
 0x34d   : > { %2221 = vst [vmem:[#allocation1 + $0x1] ss:$9 sm:$0xff] %v9384_v28  ;;  %v9432_v28 = vld [vmem:[#allocation90_spill] sm:$0xff] }
 0x34e   : > { %2222 = vst [vmem:[#allocation1 + $0x2] ss:$9 sm:$0xff] %v9385_v63 }
 0x34f   : > { %2223 = vst [vmem:[#allocation1 + $0x3] ss:$9 sm:$0xff] %v6330_v3 }
 0x350   : > { %2224 = vst [vmem:[#allocation1 + $0x4] ss:$9 sm:$0xff] %v9386_v54  ;;  %v9433_v54 = vld [vmem:[#allocation91_spill] sm:$0xff] }
 0x351   : > { %2225 = vst [vmem:[#allocation1 + $0x5] ss:$9 sm:$0xff] %v9387_v9  ;;  %v9434_v9 = vld [vmem:[#allocation92_spill] sm:$0xff] }
 0x352   : > { %2226 = vst [vmem:[#allocation1 + $0x6] ss:$9 sm:$0xff] %v9388_v25  ;;  %v9435_v25 = vld [vmem:[#allocation103_spill] sm:$0xff] }
 0x353   : > { %2227 = vst [vmem:[#allocation1 + $0x7] ss:$9 sm:$0xff] %v9389_v44  ;;  %v9436_v44 = vld [vmem:[#allocation102_spill] sm:$0xff] }
 0x35a   : > { %v6472_v33 = vld [vmem:[#allocation1] sm:$0xff] }
 0x35b   : > { %2229 = vst [vmem:[#allocation1] ss:$9 sm:$0xff] %v9390_v17  ;;  %v9437_v17 = vld [vmem:[#allocation104_spill] sm:$0xff] }
 0x35c   : > { %2230 = vst [vmem:[#allocation1 + $0x1] ss:$9 sm:$0xff] %v6344_v7  ;;  %v9393_v7 = vld [vmem:[#allocation7_spill] sm:$0xff] }
 0x35d   : > { %2231 = vst [vmem:[#allocation1 + $0x2] ss:$9 sm:$0xff] %v6346_v4  ;;  %v9394_v4 = vld [vmem:[#allocation6_spill] sm:$0xff] }
 0x35e   : > { %2232 = vst [vmem:[#allocation1 + $0x3] ss:$9 sm:$0xff] %v6350_v59  ;;  %v9395_v59 = vld [vmem:[#allocation10_spill] sm:$0xff] }
 0x35f   : > { %2233 = vst [vmem:[#allocation1 + $0x4] ss:$9 sm:$0xff] %v6352_v61  ;;  %v9396_v61 = vld [vmem:[#allocation12_spill] sm:$0xff] }
 0x360   : > { %2234 = vst [vmem:[#allocation1 + $0x5] ss:$9 sm:$0xff] %v6354_v36  ;;  %v9397_v36 = vld [vmem:[#allocation13_spill] sm:$0xff] }
 0x361   : > { %2235 = vst [vmem:[#allocation1 + $0x6] ss:$9 sm:$0xff] %v6356_v39  ;;  %v9398_v39 = vld [vmem:[#allocation14_spill] sm:$0xff] }
 0x362   : > { %2236 = vst [vmem:[#allocation1 + $0x7] ss:$9 sm:$0xff] %v6358_v26  ;;  %v9399_v26 = vld [vmem:[#allocation15_spill] sm:$0xff] }
 0x369   : > { %v6482_v3 = vld [vmem:[#allocation1] sm:$0xff] }
 0x36a   : > { %9391 = vst [vmem:[#allocation2_spill] sm:$0xff] %v6482_v3  ;;  %v9460_v3 = vld [vmem:[#allocation147_spill] sm:$0xff] }
 0x36b   : > { %2238 = vst [vmem:[#allocation1] ss:$9 sm:$0xff] %v6360_v29 }
 0x36c   : > { %2239 = vst [vmem:[#allocation1 + $0x1] ss:$9 sm:$0xff] %v6362_v10  ;;  %v9401_v10 = vld [vmem:[#allocation17_spill] sm:$0xff] }
 0x373   : > { %v6486_v19 = vld [vmem:[#allocation1] sm:$0xff] }
 0x374   : > { %9392 = vst [vmem:[#allocation217_spill] sm:$0xff] %v6486_v19  ;;  %v9444_v19 = vld [vmem:[#allocation122_spill] sm:$0xff] }
 0x375   : > { %2395 = vst [vmem:[#allocation1] ss:$9 sm:$0xff] %v9393_v7  ;;  %v9438_v7 = vld [vmem:[#allocation105_spill] sm:$0xff] }
 0x376   : > { %2397 = vst [vmem:[#allocation1 + $0x1] ss:$9 sm:$0xff] %v9394_v4  ;;  %v9439_v4 = vld [vmem:[#allocation108_spill] sm:$0xff] }
 0x377   : > { %2399 = vst [vmem:[#allocation1 + $0x2] ss:$9 sm:$0xff] %v9395_v59  ;;  %v9440_v59 = vld [vmem:[#allocation106_spill] sm:$0xff] }
 0x378   : > { %2401 = vst [vmem:[#allocation1 + $0x3] ss:$9 sm:$0xff] %v9396_v61 }
 0x379   : > { %2403 = vst [vmem:[#allocation1 + $0x4] ss:$9 sm:$0xff] %v9397_v36  ;;  %v9441_v36 = vld [vmem:[#allocation109_spill] sm:$0xff] }
 0x37a   : > { %2405 = vst [vmem:[#allocation1 + $0x5] ss:$9 sm:$0xff] %v9398_v39  ;;  %v9442_v39 = vld [vmem:[#allocation121_spill] sm:$0xff] }
 0x37b   : > { %2407 = vst [vmem:[#allocation1 + $0x6] ss:$9 sm:$0xff] %v9399_v26  ;;  %v9443_v26 = vld [vmem:[#allocation120_spill] sm:$0xff] }
 0x37c   : > { %2409 = vst [vmem:[#allocation1 + $0x7] ss:$9 sm:$0xff] %v9400_v14 }
 0x383   : > { %v6496_v29 = vld [vmem:[#allocation1] sm:$0xff] }
 0x384   : > { %2411 = vst [vmem:[#allocation1] ss:$9 sm:$0xff] %v9401_v10  ;;  %v9636_v10 = vld [vmem:[#allocation78_spill] sm:$0xff] }
 0x385   : > { %2412 = vst [vmem:[#allocation1 + $0x1] ss:$9 sm:$0xff] %v9402_v18  ;;  %v9635_v18 = vld [vmem:[#allocation55_spill] sm:$0xff] }
 0x386   : > { %2413 = vst [vmem:[#allocation1 + $0x2] ss:$9 sm:$0xff] %v9403_v58 }
 0x387   : > { %2414 = vst [vmem:[#allocation1 + $0x3] ss:$9 sm:$0xff] %v9404_v2 }
 0x388   : > { %2415 = vst [vmem:[#allocation1 + $0x4] ss:$9 sm:$0xff] %v9405_v49 }
 0x389   : > { %2416 = vst [vmem:[#allocation1 + $0x5] ss:$9 sm:$0xff] %v9406_v47 }
 0x38a   : > { %2417 = vst [vmem:[#allocation1 + $0x6] ss:$9 sm:$0xff] %v9407_v50 }
 0x38b   : > { %2418 = vst [vmem:[#allocation1 + $0x7] ss:$9 sm:$0xff] %v9408_v41 }
 0x392   : > { %v6506_v31 = vld [vmem:[#allocation1] sm:$0xff] }
 0x393   : > { %2420 = vst [vmem:[#allocation1] ss:$9 sm:$0xff] %v9409_v12 }
 0x394   : > { %2421 = vst [vmem:[#allocation1 + $0x1] ss:$9 sm:$0xff] %v9410_v45 }
 0x395   : > { %2422 = vst [vmem:[#allocation1 + $0x2] ss:$9 sm:$0xff] %v9411_v8 }
 0x396   : > { %2423 = vst [vmem:[#allocation1 + $0x3] ss:$9 sm:$0xff] %v9412_v55  ;;  %v9603_v55 = vld [vmem:[#allocation214_spill] sm:$0xff] }
 0x397   : > { %2424 = vst [vmem:[#allocation1 + $0x4] ss:$9 sm:$0xff] %v9413_v11  ;;  %v9601_v11 = vld [vmem:[#allocation211_spill] sm:$0xff] }
 0x398   : > { %2425 = vst [vmem:[#allocation1 + $0x5] ss:$9 sm:$0xff] %v9414_v30  ;;  %v9599_v30 = vld [vmem:[#allocation210_spill] sm:$0xff] }
 0x399   : > { %2426 = vst [vmem:[#allocation1 + $0x6] ss:$9 sm:$0xff] %v9415_v15  ;;  %v9576_v15 = vld [vmem:[#allocation185_spill] sm:$0xff] }
 0x39a   : > { %2427 = vst [vmem:[#allocation1 + $0x7] ss:$9 sm:$0xff] %v9416_v16  ;;  %v9567_v16 = vld [vmem:[#allocation167_spill] sm:$0xff] }
 0x3a1   : > { %v6516_v60 = vld [vmem:[#allocation1] sm:$0xff] }
 0x3a2   : > { %2429 = vst [vmem:[#allocation1] ss:$9 sm:$0xff] %v9417_v6  ;;  %v9558_v6 = vld [vmem:[#allocation148_spill] sm:$0xff] }
 0x3a3   : > { %2430 = vst [vmem:[#allocation1 + $0x1] ss:$9 sm:$0xff] %v9418_v42  ;;  %v9549_v42 = vld [vmem:[#allocation130_spill] sm:$0xff] }
 0x3a4   : > { %2431 = vst [vmem:[#allocation1 + $0x2] ss:$9 sm:$0xff] %v9419_v62  ;;  %v9541_v62 = vld [vmem:[#allocation111_spill] sm:$0xff] }
 0x3a5   : > { %2432 = vst [vmem:[#allocation1 + $0x3] ss:$9 sm:$0xff] %v9420_v53  ;;  %v9533_v53 = vld [vmem:[#allocation94_spill] sm:$0xff] }
 0x3a6   : > { %2433 = vst [vmem:[#allocation1 + $0x4] ss:$9 sm:$0xff] %v9421_v32  ;;  %v9525_v32 = vld [vmem:[#allocation75_spill] sm:$0xff] }
 0x3a7   : > { %2434 = vst [vmem:[#allocation1 + $0x5] ss:$9 sm:$0xff] %v9422_v27  ;;  %v9517_v27 = vld [vmem:[#allocation57_spill] sm:$0xff] }
 0x3a8   : > { %2435 = vst [vmem:[#allocation1 + $0x6] ss:$9 sm:$0xff] %v9423_v46  ;;  %v9508_v46 = vld [vmem:[#allocation29_spill] sm:$0xff] }
 0x3a9   : > { %2436 = vst [vmem:[#allocation1 + $0x7] ss:$9 sm:$0xff] %v9424_v38 }
 0x3b0   : > { %v6526_v1 = vld [vmem:[#allocation1] sm:$0xff] }
 0x3b1   : > { %2438 = vst [vmem:[#allocation1] ss:$9 sm:$0xff] %v9425_v35  ;;  %v9506_v35 = vld [vmem:[#allocation26_spill] sm:$0xff] }
 0x3b2   : > { %2439 = vst [vmem:[#allocation1 + $0x1] ss:$9 sm:$0xff] %v9426_v51  ;;  %v9503_v51 = vld [vmem:[#allocation23_spill] sm:$0xff] }
 0x3b3   : > { %2440 = vst [vmem:[#allocation1 + $0x2] ss:$9 sm:$0xff] %v9427_v56  ;;  %v9502_v56 = vld [vmem:[#allocation22_spill] sm:$0xff] }
 0x3b4   : > { %2441 = vst [vmem:[#allocation1 + $0x3] ss:$9 sm:$0xff] %v9428_v52  ;;  %v9501_v52 = vld [vmem:[#allocation20_spill] sm:$0xff] }
 0x3b5   : > { %2442 = vst [vmem:[#allocation1 + $0x4] ss:$9 sm:$0xff] %v9429_v21  ;;  %v9494_v21 = vld [vmem:[#allocation209_spill] sm:$0xff] }
 0x3b6   : > { %2443 = vst [vmem:[#allocation1 + $0x5] ss:$9 sm:$0xff] %v9430_v22 }
 0x3b7   : > { %2444 = vst [vmem:[#allocation1 + $0x6] ss:$9 sm:$0xff] %v9431_v24  ;;  %v9492_v24 = vld [vmem:[#allocation201_spill] sm:$0xff] }
 0x3b8   : > { %2445 = vst [vmem:[#allocation1 + $0x7] ss:$9 sm:$0xff] %v9432_v28 }
 0x3bf   : > { %v6536_v63 = vld [vmem:[#allocation1] sm:$0xff] }
 0x3c0   : > { %2447 = vst [vmem:[#allocation1] ss:$9 sm:$0xff] %v9433_v54  ;;  %v9478_v54 = vld [vmem:[#allocation184_spill] sm:$0xff] }
 0x3c1   : > { %2448 = vst [vmem:[#allocation1 + $0x1] ss:$9 sm:$0xff] %v9434_v9  ;;  %v9451_v9 = vld [vmem:[#allocation127_spill] sm:$0xff] }
 0x3c2   : > { %2449 = vst [vmem:[#allocation1 + $0x2] ss:$9 sm:$0xff] %v9435_v25  ;;  %v9445_v25 = vld [vmem:[#allocation123_spill] sm:$0xff] }
 0x3c3   : > { %2450 = vst [vmem:[#allocation1 + $0x3] ss:$9 sm:$0xff] %v9436_v44  ;;  %v9446_v44 = vld [vmem:[#allocation125_spill] sm:$0xff] }
 0x3c4   : > { %2451 = vst [vmem:[#allocation1 + $0x4] ss:$9 sm:$0xff] %v9437_v17  ;;  %v9447_v17 = vld [vmem:[#allocation124_spill] sm:$0xff] }
 0x3c5   : > { %2452 = vst [vmem:[#allocation1 + $0x5] ss:$9 sm:$0xff] %v9438_v7  ;;  %v9448_v7 = vld [vmem:[#allocation126_spill] sm:$0xff] }
 0x3c6   : > { %2453 = vst [vmem:[#allocation1 + $0x6] ss:$9 sm:$0xff] %v9439_v4 }
 0x3c7   : > { %2454 = vst [vmem:[#allocation1 + $0x7] ss:$9 sm:$0xff] %v9440_v59  ;;  %v9450_v59 = vld [vmem:[#allocation129_spill] sm:$0xff] }
 0x3ce   : > { %v6546_v61 = vld [vmem:[#allocation1] sm:$0xff] }
 0x3cf   : > { %2456 = vst [vmem:[#allocation1] ss:$9 sm:$0xff] %v9441_v36  ;;  %v9452_v36 = vld [vmem:[#allocation139_spill] sm:$0xff] }
 0x3d0   : > { %2457 = vst [vmem:[#allocation1 + $0x1] ss:$9 sm:$0xff] %v9442_v39  ;;  %v9453_v39 = vld [vmem:[#allocation140_spill] sm:$0xff] }
 0x3d1   : > { %2458 = vst [vmem:[#allocation1 + $0x2] ss:$9 sm:$0xff] %v9443_v26  ;;  %v9454_v26 = vld [vmem:[#allocation141_spill] sm:$0xff] }
 0x3d2   : > { %2459 = vst [vmem:[#allocation1 + $0x3] ss:$9 sm:$0xff] %v9444_v19  ;;  %v9455_v19 = vld [vmem:[#allocation142_spill] sm:$0xff] }
 0x3d3   : > { %2460 = vst [vmem:[#allocation1 + $0x4] ss:$9 sm:$0xff] %v9445_v25  ;;  %v9456_v25 = vld [vmem:[#allocation143_spill] sm:$0xff] }
 0x3d4   : > { %2461 = vst [vmem:[#allocation1 + $0x5] ss:$9 sm:$0xff] %v9446_v44  ;;  %v9457_v44 = vld [vmem:[#allocation146_spill] sm:$0xff] }
 0x3d5   : > { %2462 = vst [vmem:[#allocation1 + $0x6] ss:$9 sm:$0xff] %v9447_v17 }
 0x3d6   : > { %2463 = vst [vmem:[#allocation1 + $0x7] ss:$9 sm:$0xff] %v9448_v7  ;;  %v9459_v7 = vld [vmem:[#allocation145_spill] sm:$0xff] }
 0x3dd   : > { %v6556_v4 = vld [vmem:[#allocation1] sm:$0xff] }
 0x3de   : > { %9449 = vst [vmem:[#allocation218_spill] sm:$0xff] %v6556_v4 }
 0x3df   : > { %2465 = vst [vmem:[#allocation1] ss:$9 sm:$0xff] %v9450_v59  ;;  %v9461_v59 = vld [vmem:[#allocation156_spill] sm:$0xff] }
 0x3e0   : > { %2466 = vst [vmem:[#allocation1 + $0x1] ss:$9 sm:$0xff] %v9451_v9  ;;  %v9462_v9 = vld [vmem:[#allocation158_spill] sm:$0xff] }
 0x3e1   : > { %2467 = vst [vmem:[#allocation1 + $0x2] ss:$9 sm:$0xff] %v9452_v36  ;;  %v9463_v36 = vld [vmem:[#allocation159_spill] sm:$0xff] }
 0x3e2   : > { %2468 = vst [vmem:[#allocation1 + $0x3] ss:$9 sm:$0xff] %v9453_v39  ;;  %v9468_v39 = vld [vmem:[#allocation164_spill] sm:$0xff] }
 0x3e3   : > { %2469 = vst [vmem:[#allocation1 + $0x4] ss:$9 sm:$0xff] %v9454_v26  ;;  %v9464_v26 = vld [vmem:[#allocation160_spill] sm:$0xff] }
 0x3e4   : > { %2470 = vst [vmem:[#allocation1 + $0x5] ss:$9 sm:$0xff] %v9455_v19  ;;  %v9465_v19 = vld [vmem:[#allocation163_spill] sm:$0xff] }
 0x3e5   : > { %2471 = vst [vmem:[#allocation1 + $0x6] ss:$9 sm:$0xff] %v9456_v25  ;;  %v9466_v25 = vld [vmem:[#allocation162_spill] sm:$0xff] }
 0x3e6   : > { %2472 = vst [vmem:[#allocation1 + $0x7] ss:$9 sm:$0xff] %v9457_v44 }
 0x3ed   : > { %v6566_v17 = vld [vmem:[#allocation1] sm:$0xff] }
 0x3ee   : > { %9458 = vst [vmem:[#allocation219_spill] sm:$0xff] %v6566_v17 }
 0x3ef   : > { %2474 = vst [vmem:[#allocation1] ss:$9 sm:$0xff] %v9459_v7  ;;  %v9469_v7 = vld [vmem:[#allocation165_spill] sm:$0xff] }
 0x3f0   : > { %2475 = vst [vmem:[#allocation1 + $0x1] ss:$9 sm:$0xff] %v9460_v3  ;;  %v9470_v3 = vld [vmem:[#allocation176_spill] sm:$0xff] }
 0x3f1   : > { %2476 = vst [vmem:[#allocation1 + $0x2] ss:$9 sm:$0xff] %v9461_v59  ;;  %v9471_v59 = vld [vmem:[#allocation177_spill] sm:$0xff] }
 0x3f2   : > { %2477 = vst [vmem:[#allocation1 + $0x3] ss:$9 sm:$0xff] %v9462_v9  ;;  %v9472_v9 = vld [vmem:[#allocation178_spill] sm:$0xff] }
 0x3f3   : > { %2478 = vst [vmem:[#allocation1 + $0x4] ss:$9 sm:$0xff] %v9463_v36  ;;  %v9473_v36 = vld [vmem:[#allocation180_spill] sm:$0xff] }
 0x3f4   : > { %2479 = vst [vmem:[#allocation1 + $0x5] ss:$9 sm:$0xff] %v9464_v26  ;;  %v9474_v26 = vld [vmem:[#allocation179_spill] sm:$0xff] }
 0x3f5   : > { %2480 = vst [vmem:[#allocation1 + $0x6] ss:$9 sm:$0xff] %v9465_v19  ;;  %v9475_v19 = vld [vmem:[#allocation181_spill] sm:$0xff] }
 0x3f6   : > { %2481 = vst [vmem:[#allocation1 + $0x7] ss:$9 sm:$0xff] %v9466_v25 }
 0x3fd   : > { %v6576_v44 = vld [vmem:[#allocation1] sm:$0xff] }
 0x3fe   : > { %9467 = vst [vmem:[#allocation220_spill] sm:$0xff] %v6576_v44  ;;  %v9477_v44 = vld [vmem:[#allocation182_spill] sm:$0xff] }
 0x3ff   : > { %2483 = vst [vmem:[#allocation1] ss:$9 sm:$0xff] %v9468_v39  ;;  %v228_v39 = vld [vmem:[%s4789_s22 + $0xe0] sm:$0xff] }
 0x400   : > { %2484 = vst [vmem:[#allocation1 + $0x1] ss:$9 sm:$0xff] %v9469_v7  ;;  %v9479_v7 = vld [vmem:[#allocation193_spill] sm:$0xff] }
 0x401   : > { %2485 = vst [vmem:[#allocation1 + $0x2] ss:$9 sm:$0xff] %v9470_v3  ;;  %v9480_v3 = vld [vmem:[#allocation195_spill] sm:$0xff] }
 0x402   : > { %2486 = vst [vmem:[#allocation1 + $0x3] ss:$9 sm:$0xff] %v9471_v59  ;;  %v6593_v59 = vpack.c.bf16 %v228_v39, %v228_v39 }
 0x403   : > { %2487 = vst [vmem:[#allocation1 + $0x4] ss:$9 sm:$0xff] %v9472_v9  ;;  %v9482_v9 = vld [vmem:[#allocation196_spill] sm:$0xff] }
 0x404   : > { %2488 = vst [vmem:[#allocation1 + $0x5] ss:$9 sm:$0xff] %v9473_v36  ;;  %v9483_v36 = vld [vmem:[#allocation197_spill] sm:$0xff] }
 0x405   : > { %2489 = vst [vmem:[#allocation1 + $0x6] ss:$9 sm:$0xff] %v9474_v26  ;;  %v9484_v26 = vld [vmem:[#allocation198_spill] sm:$0xff] }
 0x406   : > { %2490 = vst [vmem:[#allocation1 + $0x7] ss:$9 sm:$0xff] %v9475_v19  ;;  %v9485_v19 = vld [vmem:[#allocation199_spill] sm:$0xff] }
 0x407   : > { %9481 = vst [vmem:[#allocation222_spill] sm:$0xff] %v6593_v59 }
 0x40d   : > { %v6586_v25 = vld [vmem:[#allocation1] sm:$0xff] }
 0x40e   : > { %9476 = vst [vmem:[#allocation221_spill] sm:$0xff] %v6586_v25  ;;  %v229_v25 = vld [vmem:[%s4789_s22 + $0xe8] sm:$0xff] }
 0x40f   : > { %2492 = vst [vmem:[#allocation1] ss:$9 sm:$0xff] %v9477_v44  ;;  %v2370_v44 = vrot.slane %v6593_v59, 3  ;;  %v6601_v28 = vpack.c.bf16 %v229_v25, %v229_v25 }
 0x410   : > { %2493 = vst [vmem:[#allocation1 + $0x1] ss:$9 sm:$0xff] %v9478_v54 }
 0x411   : > { %2494 = vst [vmem:[#allocation1 + $0x2] ss:$9 sm:$0xff] %v9479_v7  ;;  %v2375_v7 = vsel %vm324_vm1, %v6593_v59, %v2370_v44  ;;  %v2378_v39 = vsel %vm328_vm2, %v6593_v59, %v2370_v44 }
 0x412   : > { %2495 = vst [vmem:[#allocation1 + $0x3] ss:$9 sm:$0xff] %v9480_v3  ;;  %v6618_v25 = vrot.slane %v2375_v7, 1  ;;  %v6621_v54 = vrot.slane %v2378_v39, 2 }
 0x413   : > { %2496 = vst [vmem:[#allocation1 + $0x4] ss:$9 sm:$0xff] %v9482_v9  ;;  %v2381_v9 = vsel %vm332_vm3, %v6593_v59, %v2370_v44 }
 0x414   : > { %2497 = vst [vmem:[#allocation1 + $0x5] ss:$9 sm:$0xff] %v9483_v36  ;;  %v9490_v36 = vld [vmem:[#allocation200_spill] sm:$0xff]  ;;  %v6624_v22 = vrot.slane %v2381_v9, 3 }
 0x415   : > { %2498 = vst [vmem:[#allocation1 + $0x6] ss:$9 sm:$0xff] %v9484_v26  ;;  %v6612_v26 = vrot.slane %v6601_v28, 3 }
 0x416   : > { %2499 = vst [vmem:[#allocation1 + $0x7] ss:$9 sm:$0xff] %v9485_v19  ;;  %v6616_v19 = vsel %vm320_vm4, %v6593_v59, %v2370_v44 }
 0x417   : > { %9486 = vst [vmem:[#allocation223_spill] sm:$0xff] %v6601_v28  ;;  %v2387_v9 = vsel %vm324_vm1, %v6601_v28, %v6612_v26  ;;  %v2390_v44 = vsel %vm328_vm2, %v6601_v28, %v6612_v26 }
 0x418   : > { %9488 = vst [vmem:[#allocation225_spill] sm:$0xff] %v6616_v19  ;;  %v6643_v7 = vrot.slane %v2387_v9, 1  ;;  %v6645_v39 = vrot.slane %v2390_v44, 2  ;;  %v9504_v9 = vld [vmem:[#allocation24_spill] sm:$0xff]  ;;  %v9505_v44 = vld [vmem:[#allocation25_spill] sm:$0xff] }
 0x419   : > { %9489 = vst [vmem:[#allocation226_spill] sm:$0xff] %v6618_v25 }
 0x41a   : > { %9491 = vst [vmem:[#allocation227_spill] sm:$0xff] %v6621_v54 }
 0x41b   : > { %9493 = vst [vmem:[#allocation228_spill] sm:$0xff] %v6624_v22 }
 0x41c   : > { %9496 = vst [vmem:[#allocation230_spill] sm:$0xff] %v6643_v7 }
 0x41d   : > { %v6609_v3 = vld [vmem:[#allocation1] sm:$0xff]  ;;  %9497 = vst [vmem:[#allocation231_spill] sm:$0xff] %v6645_v39 }
 0x41e   : > { %9487 = vst [vmem:[#allocation224_spill] sm:$0xff] %v6609_v3  ;;  %v6631_v3 = vsel %vm320_vm4, %v6601_v28, %v6612_v26 }
 0x41f   : > { %2501 = vst [vmem:[#allocation1] ss:$9 sm:$0xff] %v9490_v36  ;;  %v9500_v36 = vld [vmem:[#allocation11_spill] sm:$0xff] }
 0x420   : > { %2502 = vst [vmem:[#allocation1 + $0x1] ss:$9 sm:$0xff] %v9492_v24 }
 0x421   : > { %2503 = vst [vmem:[#allocation1 + $0x2] ss:$9 sm:$0xff] %v9494_v21 }
 0x422   : > { %2504 = vst [vmem:[#allocation1 + $0x3] ss:$9 sm:$0xff] %v6616_v19 }
 0x423   : > { %9495 = vst [vmem:[#allocation229_spill] sm:$0xff] %v6631_v3 }
 0x424   : > { %2506 = vst [vmem:[#allocation1 + $0x4] ss:$9 sm:$0xff] %v6618_v25 }
 0x425   : > { %2508 = vst [vmem:[#allocation1 + $0x5] ss:$9 sm:$0xff] %v6621_v54 }
 0x426   : > { %2510 = vst [vmem:[#allocation1 + $0x6] ss:$9 sm:$0xff] %v6624_v22 }
 0x427   : > { %2511 = vst [vmem:[#allocation1 + $0x7] ss:$9 sm:$0xff] %v6631_v3 }
 0x42e   : > { %v6647_v21 = vld [vmem:[#allocation1] sm:$0xff] }
 0x42f   : > { %9498 = vst [vmem:[#allocation232_spill] sm:$0xff] %v6647_v21  ;;  %v9507_v21 = vld [vmem:[#allocation27_spill] sm:$0xff] }
 0x430   : > { %2514 = vst [vmem:[#allocation1] ss:$9 sm:$0xff] %v6643_v7 }
 0x431   : > { %2516 = vst [vmem:[#allocation1 + $0x1] ss:$9 sm:$0xff] %v6645_v39 }
 0x438   : > { %v6651_v24 = vld [vmem:[#allocation1] sm:$0xff] }
 0x439   : > { %9499 = vst [vmem:[#allocation233_spill] sm:$0xff] %v6651_v24  ;;  %v9509_v24 = vld [vmem:[#allocation39_spill] sm:$0xff] }
 0x43a   : > { %2700 = vst [vmem:[#allocation1] ss:$9 sm:$0xff] %v9500_v36  ;;  %v9510_v36 = vld [vmem:[#allocation40_spill] sm:$0xff] }
 0x43b   : > { %2702 = vst [vmem:[#allocation1 + $0x1] ss:$9 sm:$0xff] %v9501_v52  ;;  %v9511_v52 = vld [vmem:[#allocation41_spill] sm:$0xff] }
 0x43c   : > { %2704 = vst [vmem:[#allocation1 + $0x2] ss:$9 sm:$0xff] %v9502_v56  ;;  %v9512_v56 = vld [vmem:[#allocation42_spill] sm:$0xff] }
 0x43d   : > { %2706 = vst [vmem:[#allocation1 + $0x3] ss:$9 sm:$0xff] %v9503_v51  ;;  %v9513_v51 = vld [vmem:[#allocation43_spill] sm:$0xff] }
 0x43e   : > { %2708 = vst [vmem:[#allocation1 + $0x4] ss:$9 sm:$0xff] %v9504_v9  ;;  %v9514_v9 = vld [vmem:[#allocation44_spill] sm:$0xff] }
 0x43f   : > { %2710 = vst [vmem:[#allocation1 + $0x5] ss:$9 sm:$0xff] %v9505_v44  ;;  %v9515_v44 = vld [vmem:[#allocation46_spill] sm:$0xff] }
 0x440   : > { %2712 = vst [vmem:[#allocation1 + $0x6] ss:$9 sm:$0xff] %v9506_v35 }
 0x441   : > { %2714 = vst [vmem:[#allocation1 + $0x7] ss:$9 sm:$0xff] %v9507_v21  ;;  %v9516_v21 = vld [vmem:[#allocation47_spill] sm:$0xff] }
 0x448   : > { %v6661_v38 = vld [vmem:[#allocation1] sm:$0xff] }
 0x449   : > { %2716 = vst [vmem:[#allocation1] ss:$9 sm:$0xff] %v9508_v46  ;;  %v9518_v46 = vld [vmem:[#allocation58_spill] sm:$0xff] }
 0x44a   : > { %2717 = vst [vmem:[#allocation1 + $0x1] ss:$9 sm:$0xff] %v9509_v24  ;;  %v9519_v24 = vld [vmem:[#allocation60_spill] sm:$0xff] }
 0x44b   : > { %2718 = vst [vmem:[#allocation1 + $0x2] ss:$9 sm:$0xff] %v9510_v36  ;;  %v9520_v36 = vld [vmem:[#allocation61_spill] sm:$0xff] }
 0x44c   : > { %2719 = vst [vmem:[#allocation1 + $0x3] ss:$9 sm:$0xff] %v9511_v52  ;;  %v9521_v52 = vld [vmem:[#allocation62_spill] sm:$0xff] }
 0x44d   : > { %2720 = vst [vmem:[#allocation1 + $0x4] ss:$9 sm:$0xff] %v9512_v56  ;;  %v9522_v56 = vld [vmem:[#allocation63_spill] sm:$0xff] }
 0x44e   : > { %2721 = vst [vmem:[#allocation1 + $0x5] ss:$9 sm:$0xff] %v9513_v51  ;;  %v9523_v51 = vld [vmem:[#allocation64_spill] sm:$0xff] }
 0x44f   : > { %2722 = vst [vmem:[#allocation1 + $0x6] ss:$9 sm:$0xff] %v9514_v9 }
 0x450   : > { %2723 = vst [vmem:[#allocation1 + $0x7] ss:$9 sm:$0xff] %v9515_v44  ;;  %v9524_v44 = vld [vmem:[#allocation66_spill] sm:$0xff] }
 0x457   : > { %v6671_v35 = vld [vmem:[#allocation1] sm:$0xff] }
 0x458   : > { %2725 = vst [vmem:[#allocation1] ss:$9 sm:$0xff] %v9516_v21  ;;  %v9526_v21 = vld [vmem:[#allocation76_spill] sm:$0xff] }
 0x459   : > { %2726 = vst [vmem:[#allocation1 + $0x1] ss:$9 sm:$0xff] %v9517_v27  ;;  %v9527_v27 = vld [vmem:[#allocation77_spill] sm:$0xff] }
 0x45a   : > { %2727 = vst [vmem:[#allocation1 + $0x2] ss:$9 sm:$0xff] %v9518_v46  ;;  %v9528_v46 = vld [vmem:[#allocation79_spill] sm:$0xff] }
 0x45b   : > { %2728 = vst [vmem:[#allocation1 + $0x3] ss:$9 sm:$0xff] %v9519_v24  ;;  %v9529_v24 = vld [vmem:[#allocation80_spill] sm:$0xff] }
 0x45c   : > { %2729 = vst [vmem:[#allocation1 + $0x4] ss:$9 sm:$0xff] %v9520_v36  ;;  %v9530_v36 = vld [vmem:[#allocation81_spill] sm:$0xff] }
 0x45d   : > { %2730 = vst [vmem:[#allocation1 + $0x5] ss:$9 sm:$0xff] %v9521_v52  ;;  %v9531_v52 = vld [vmem:[#allocation82_spill] sm:$0xff] }
 0x45e   : > { %2731 = vst [vmem:[#allocation1 + $0x6] ss:$9 sm:$0xff] %v9522_v56 }
 0x45f   : > { %2732 = vst [vmem:[#allocation1 + $0x7] ss:$9 sm:$0xff] %v9523_v51  ;;  %v9532_v51 = vld [vmem:[#allocation83_spill] sm:$0xff] }
 0x466   : > { %v6681_v9 = vld [vmem:[#allocation1] sm:$0xff] }
 0x467   : > { %2734 = vst [vmem:[#allocation1] ss:$9 sm:$0xff] %v9524_v44  ;;  %v9534_v44 = vld [vmem:[#allocation95_spill] sm:$0xff] }
 0x468   : > { %2735 = vst [vmem:[#allocation1 + $0x1] ss:$9 sm:$0xff] %v9525_v32  ;;  %v9535_v32 = vld [vmem:[#allocation96_spill] sm:$0xff] }
 0x469   : > { %2736 = vst [vmem:[#allocation1 + $0x2] ss:$9 sm:$0xff] %v9526_v21  ;;  %v9536_v21 = vld [vmem:[#allocation97_spill] sm:$0xff] }
 0x46a   : > { %2737 = vst [vmem:[#allocation1 + $0x3] ss:$9 sm:$0xff] %v9527_v27  ;;  %v9537_v27 = vld [vmem:[#allocation98_spill] sm:$0xff] }
 0x46b   : > { %2738 = vst [vmem:[#allocation1 + $0x4] ss:$9 sm:$0xff] %v9528_v46  ;;  %v9538_v46 = vld [vmem:[#allocation99_spill] sm:$0xff] }
 0x46c   : > { %2739 = vst [vmem:[#allocation1 + $0x5] ss:$9 sm:$0xff] %v9529_v24  ;;  %v9539_v24 = vld [vmem:[#allocation100_spill] sm:$0xff] }
 0x46d   : > { %2740 = vst [vmem:[#allocation1 + $0x6] ss:$9 sm:$0xff] %v9530_v36 }
 0x46e   : > { %2741 = vst [vmem:[#allocation1 + $0x7] ss:$9 sm:$0xff] %v9531_v52  ;;  %v9540_v52 = vld [vmem:[#allocation101_spill] sm:$0xff] }
 0x475   : > { %v6691_v56 = vld [vmem:[#allocation1] sm:$0xff] }
 0x476   : > { %2743 = vst [vmem:[#allocation1] ss:$9 sm:$0xff] %v9532_v51  ;;  %v9542_v51 = vld [vmem:[#allocation112_spill] sm:$0xff] }
 0x477   : > { %2744 = vst [vmem:[#allocation1 + $0x1] ss:$9 sm:$0xff] %v9533_v53  ;;  %v9543_v53 = vld [vmem:[#allocation113_spill] sm:$0xff] }
 0x478   : > { %2745 = vst [vmem:[#allocation1 + $0x2] ss:$9 sm:$0xff] %v9534_v44  ;;  %v9544_v44 = vld [vmem:[#allocation114_spill] sm:$0xff] }
 0x479   : > { %2746 = vst [vmem:[#allocation1 + $0x3] ss:$9 sm:$0xff] %v9535_v32  ;;  %v9545_v32 = vld [vmem:[#allocation116_spill] sm:$0xff] }
 0x47a   : > { %2747 = vst [vmem:[#allocation1 + $0x4] ss:$9 sm:$0xff] %v9536_v21  ;;  %v9546_v21 = vld [vmem:[#allocation117_spill] sm:$0xff] }
 0x47b   : > { %2748 = vst [vmem:[#allocation1 + $0x5] ss:$9 sm:$0xff] %v9537_v27  ;;  %v9547_v27 = vld [vmem:[#allocation118_spill] sm:$0xff] }
 0x47c   : > { %2749 = vst [vmem:[#allocation1 + $0x6] ss:$9 sm:$0xff] %v9538_v46 }
 0x47d   : > { %2750 = vst [vmem:[#allocation1 + $0x7] ss:$9 sm:$0xff] %v9539_v24  ;;  %v9548_v24 = vld [vmem:[#allocation119_spill] sm:$0xff] }
 0x484   : > { %v6701_v36 = vld [vmem:[#allocation1] sm:$0xff] }
 0x485   : > { %2752 = vst [vmem:[#allocation1] ss:$9 sm:$0xff] %v9540_v52  ;;  %v9550_v52 = vld [vmem:[#allocation131_spill] sm:$0xff] }
 0x486   : > { %2753 = vst [vmem:[#allocation1 + $0x1] ss:$9 sm:$0xff] %v9541_v62  ;;  %v9551_v62 = vld [vmem:[#allocation132_spill] sm:$0xff] }
 0x487   : > { %2754 = vst [vmem:[#allocation1 + $0x2] ss:$9 sm:$0xff] %v9542_v51  ;;  %v9552_v51 = vld [vmem:[#allocation134_spill] sm:$0xff] }
 0x488   : > { %2755 = vst [vmem:[#allocation1 + $0x3] ss:$9 sm:$0xff] %v9543_v53  ;;  %v9553_v53 = vld [vmem:[#allocation135_spill] sm:$0xff] }
 0x489   : > { %2756 = vst [vmem:[#allocation1 + $0x4] ss:$9 sm:$0xff] %v9544_v44  ;;  %v9554_v44 = vld [vmem:[#allocation136_spill] sm:$0xff] }
 0x48a   : > { %2757 = vst [vmem:[#allocation1 + $0x5] ss:$9 sm:$0xff] %v9545_v32  ;;  %v9555_v32 = vld [vmem:[#allocation137_spill] sm:$0xff] }
 0x48b   : > { %2758 = vst [vmem:[#allocation1 + $0x6] ss:$9 sm:$0xff] %v9546_v21 }
 0x48c   : > { %2759 = vst [vmem:[#allocation1 + $0x7] ss:$9 sm:$0xff] %v9547_v27  ;;  %v9557_v27 = vld [vmem:[#allocation138_spill] sm:$0xff] }
 0x493   : > { %v6711_v46 = vld [vmem:[#allocation1] sm:$0xff] }
 0x494   : > { %2761 = vst [vmem:[#allocation1] ss:$9 sm:$0xff] %v9548_v24  ;;  %v9559_v24 = vld [vmem:[#allocation150_spill] sm:$0xff] }
 0x495   : > { %2762 = vst [vmem:[#allocation1 + $0x1] ss:$9 sm:$0xff] %v9549_v42  ;;  %v9560_v42 = vld [vmem:[#allocation151_spill] sm:$0xff] }
 0x496   : > { %2763 = vst [vmem:[#allocation1 + $0x2] ss:$9 sm:$0xff] %v9550_v52  ;;  %v9561_v52 = vld [vmem:[#allocation152_spill] sm:$0xff] }
 0x497   : > { %2764 = vst [vmem:[#allocation1 + $0x3] ss:$9 sm:$0xff] %v9551_v62  ;;  %v9562_v62 = vld [vmem:[#allocation153_spill] sm:$0xff] }
 0x498   : > { %2765 = vst [vmem:[#allocation1 + $0x4] ss:$9 sm:$0xff] %v9552_v51  ;;  %v9563_v51 = vld [vmem:[#allocation154_spill] sm:$0xff] }
 0x499   : > { %2766 = vst [vmem:[#allocation1 + $0x5] ss:$9 sm:$0xff] %v9553_v53  ;;  %v9564_v53 = vld [vmem:[#allocation155_spill] sm:$0xff] }
 0x49a   : > { %2767 = vst [vmem:[#allocation1 + $0x6] ss:$9 sm:$0xff] %v9554_v44 }
 0x49b   : > { %2768 = vst [vmem:[#allocation1 + $0x7] ss:$9 sm:$0xff] %v9555_v32  ;;  %v9566_v32 = vld [vmem:[#allocation157_spill] sm:$0xff] }
 0x4a2   : > { %v6721_v21 = vld [vmem:[#allocation1] sm:$0xff] }
 0x4a3   : > { %9556 = vst [vmem:[#allocation234_spill] sm:$0xff] %v6721_v21 }
 0x4a4   : > { %2770 = vst [vmem:[#allocation1] ss:$9 sm:$0xff] %v9557_v27  ;;  %v9568_v27 = vld [vmem:[#allocation168_spill] sm:$0xff] }
 0x4a5   : > { %2771 = vst [vmem:[#allocation1 + $0x1] ss:$9 sm:$0xff] %v9558_v6  ;;  %v9569_v6 = vld [vmem:[#allocation169_spill] sm:$0xff] }
 0x4a6   : > { %2772 = vst [vmem:[#allocation1 + $0x2] ss:$9 sm:$0xff] %v9559_v24  ;;  %v9570_v24 = vld [vmem:[#allocation170_spill] sm:$0xff] }
 0x4a7   : > { %2773 = vst [vmem:[#allocation1 + $0x3] ss:$9 sm:$0xff] %v9560_v42  ;;  %v9571_v42 = vld [vmem:[#allocation171_spill] sm:$0xff] }
 0x4a8   : > { %2774 = vst [vmem:[#allocation1 + $0x4] ss:$9 sm:$0xff] %v9561_v52  ;;  %v9572_v52 = vld [vmem:[#allocation172_spill] sm:$0xff] }
 0x4a9   : > { %2775 = vst [vmem:[#allocation1 + $0x5] ss:$9 sm:$0xff] %v9562_v62  ;;  %v9573_v62 = vld [vmem:[#allocation173_spill] sm:$0xff] }
 0x4aa   : > { %2776 = vst [vmem:[#allocation1 + $0x6] ss:$9 sm:$0xff] %v9563_v51 }
 0x4ab   : > { %2777 = vst [vmem:[#allocation1 + $0x7] ss:$9 sm:$0xff] %v9564_v53  ;;  %v9575_v53 = vld [vmem:[#allocation175_spill] sm:$0xff] }
 0x4b2   : > { %v6731_v44 = vld [vmem:[#allocation1] sm:$0xff] }
 0x4b3   : > { %9565 = vst [vmem:[#allocation235_spill] sm:$0xff] %v6731_v44 }
 0x4b4   : > { %2779 = vst [vmem:[#allocation1] ss:$9 sm:$0xff] %v9566_v32  ;;  %v9577_v32 = vld [vmem:[#allocation186_spill] sm:$0xff] }
 0x4b5   : > { %2780 = vst [vmem:[#allocation1 + $0x1] ss:$9 sm:$0xff] %v9567_v16  ;;  %v9578_v16 = vld [vmem:[#allocation188_spill] sm:$0xff] }
 0x4b6   : > { %2781 = vst [vmem:[#allocation1 + $0x2] ss:$9 sm:$0xff] %v9568_v27  ;;  %v9579_v27 = vld [vmem:[#allocation189_spill] sm:$0xff] }
 0x4b7   : > { %2782 = vst [vmem:[#allocation1 + $0x3] ss:$9 sm:$0xff] %v9569_v6  ;;  %v9580_v6 = vld [vmem:[#allocation190_spill] sm:$0xff] }
 0x4b8   : > { %2783 = vst [vmem:[#allocation1 + $0x4] ss:$9 sm:$0xff] %v9570_v24  ;;  %v9581_v24 = vld [vmem:[#allocation191_spill] sm:$0xff] }
 0x4b9   : > { %2784 = vst [vmem:[#allocation1 + $0x5] ss:$9 sm:$0xff] %v9571_v42  ;;  %v9582_v42 = vld [vmem:[#allocation192_spill] sm:$0xff] }
 0x4ba   : > { %2785 = vst [vmem:[#allocation1 + $0x6] ss:$9 sm:$0xff] %v9572_v52  ;;  %v6751_v52 = vpop.f32.mrf.mxu1 }
 0x4bb   : > { %2786 = vst [vmem:[#allocation1 + $0x7] ss:$9 sm:$0xff] %v9573_v62 }
 0x4bc   : > { %9583 = vst [vmem:[#allocation237_spill] sm:$0xff] %v6751_v52  ;;  %v9593_v52 = vld [vmem:[#allocation207_spill] sm:$0xff] }
 0x4c2   : > { %v6741_v51 = vld [vmem:[#allocation1] sm:$0xff] }
 0x4c3   : > { %9574 = vst [vmem:[#allocation236_spill] sm:$0xff] %v6741_v51  ;;  %v9585_v51 = vld [vmem:[#allocation194_spill] sm:$0xff] }
 0x4c4   : > { %2788 = vst [vmem:[#allocation1] ss:$9 sm:$0xff] %v9575_v53  ;;  %v6756_v53 = vpop.f32.mrf.mxu1 }
 0x4c5   : > { %2789 = vst [vmem:[#allocation1 + $0x1] ss:$9 sm:$0xff] %v9576_v15  ;;  %v9587_v15 = vld [vmem:[#allocation213_spill] sm:$0xff] }
 0x4c6   : > { %2790 = vst [vmem:[#allocation1 + $0x2] ss:$9 sm:$0xff] %v9577_v32  ;;  %4611 = vmatmul.msk.bf16.gmra.mxu1 %vm1664_vm0, %v9587_v15  ;;  %v9594_v32 = vld [vmem:[#allocation208_spill] sm:$0xff]  ;;  %v2652_v15 = vshll.u32 %v6618_v25, 16 }
 0x4c7   : > { %2791 = vst [vmem:[#allocation1 + $0x3] ss:$9 sm:$0xff] %v9578_v16  ;;  %v9588_v16 = vld [vmem:[#allocation202_spill] sm:$0xff] }
 0x4c8   : > { %2792 = vst [vmem:[#allocation1 + $0x4] ss:$9 sm:$0xff] %v9579_v27  ;;  %v9589_v27 = vld [vmem:[#allocation203_spill] sm:$0xff] }
 0x4c9   : > { %2793 = vst [vmem:[#allocation1 + $0x5] ss:$9 sm:$0xff] %v9580_v6  ;;  %v9590_v6 = vld [vmem:[#allocation204_spill] sm:$0xff] }
 0x4ca   : > { %2794 = vst [vmem:[#allocation1 + $0x6] ss:$9 sm:$0xff] %v9581_v24  ;;  %v9591_v24 = vld [vmem:[#allocation205_spill] sm:$0xff] }
 0x4cb   : > { %2795 = vst [vmem:[#allocation1 + $0x7] ss:$9 sm:$0xff] %v9582_v42  ;;  %v9592_v42 = vld [vmem:[#allocation206_spill] sm:$0xff] }
 0x4cc   : > { %9586 = vst [vmem:[#allocation239_spill] sm:$0xff] %v6756_v53  ;;  %v2648_v53 = vshrl.u32 %v6616_v19, 16  ;;  %v2676_v19 = vshrl.u32 %v6631_v3, 16 }
 0x4d2   : > { %v6753_v62 = vld [vmem:[#allocation1] sm:$0xff] }
 0x4d3   : > { %9584 = vst [vmem:[#allocation238_spill] sm:$0xff] %v6753_v62 }
 0x4d4   : > { %2797 = vst [vmem:[#allocation1] ss:$9 sm:$0xff] %v9585_v51  ;;  %v6767_v51 = vpop.f32.mrf.mxu1 }
 0x4d5   : > { %2798 = vst [vmem:[#allocation1 + $0x1] ss:$9 sm:$0xff] %v9588_v16  ;;  %v2655_v16 = vshrl.u32 %v6618_v25, 16  ;;  %v2680_v25 = vshll.u32 %v6643_v7, 16 }
 0x4d6   : > { %2799 = vst [vmem:[#allocation1 + $0x2] ss:$9 sm:$0xff] %v9589_v27  ;;  %v2659_v27 = vshll.u32 %v6621_v54, 16 }
 0x4d7   : > { %2800 = vst [vmem:[#allocation1 + $0x3] ss:$9 sm:$0xff] %v9590_v6  ;;  %v2662_v6 = vshrl.u32 %v6621_v54, 16 }
 0x4d8   : > { %2801 = vst [vmem:[#allocation1 + $0x4] ss:$9 sm:$0xff] %v9591_v24  ;;  %v2666_v24 = vshll.u32 %v6624_v22, 16  ;;  %v6788_v54 = vsel %vm4874_vm7, %v2655_v16, %v2659_v27  ;;  %v6810_v27 = vsel %vm4874_vm7, %v2676_v19, %v2680_v25  ;;  %v4616_v19 = vld [vmem:[%s8589_s1 + $0x4] sm:$0x3] }
 0x4d9   : > { %2802 = vst [vmem:[#allocation1 + $0x5] ss:$9 sm:$0xff] %v9592_v42  ;;  %v2669_v42 = vshrl.u32 %v6624_v22, 16  ;;  %v2268_v25 = vsel %vm9609_vm9, %v4616_v19, 0 }
 0x4da   : > { %2803 = vst [vmem:[#allocation1 + $0x6] ss:$9 sm:$0xff] %v9593_v52  ;;  %v2673_v52 = vshll.u32 %v6631_v3, 16  ;;  %2277 = vmatpush.bf16.msrb.mxu2 %v2268_v25  ;;  %v9615_v25 = vld [vmem:[#allocation215_spill] sm:$0xff] }
 0x4db   : > { %2804 = vst [vmem:[#allocation1 + $0x7] ss:$9 sm:$0xff] %v9594_v32 }
 0x4dc   : > { %9595 = vst [vmem:[#allocation240_spill] sm:$0xff] %v6767_v51  ;;  %v6781_v51 = vsel %vm4874_vm7, %v2648_v53, %v2652_v15  ;;  %v6791_v22 = vpop.f32.mrf.mxu1  ;;  %4612 = vmatmul.msk.bf16.gmra.mxu1 %vm1664_vm0, %v9603_v55  ;;  %v2645_v53 = vsel %vm332_vm3, %v6601_v28, %v6612_v26  ;;  %v6800_v15 = vsel %vm4874_vm7, %v2662_v6, %v2666_v24  ;;  %v2683_v6 = vshrl.u32 %v6643_v7, 16 }
 0x4dd   : > { %9598 = vst [vmem:[#allocation242_spill] sm:$0xff] %v6781_v51  ;;  %v6805_v16 = vsel %vm4874_vm7, %v2669_v42, %v2673_v52  ;;  %v2647_v55 = vrot.slane %v2645_v53, 3  ;;  %v2687_v42 = vshll.u32 %v6645_v39, 16  ;;  %v2690_v24 = vshrl.u32 %v6645_v39, 16  ;;  %4617 = vmatmul.msk.bf16.vlgmr.msrb.gmra.mxu2 %vm1664_vm0, %v6372_v0 }
 0x4de   : > { %9600 = vst [vmem:[#allocation243_spill] sm:$0xff] %v6788_v54 }
 0x4df   : > { %9602 = vst [vmem:[#allocation244_spill] sm:$0xff] %v6791_v22  ;;  %v2695_v26 = vshll.u32 %v2647_v55, 16  ;;  %v6827_v53 = vsel %vm4874_vm7, %v2683_v6, %v2687_v42  ;;  %v9613_v55 = vld [vmem:[#allocation5_spill] sm:$0xff] }
 0x4e0   : > { %9604 = vst [vmem:[#allocation245_spill] sm:$0xff] %v6800_v15 }
 0x4e1   : > { %9606 = vst [vmem:[#allocation246_spill] sm:$0xff] %v6805_v16  ;;  %v6831_v22 = vsel %vm4874_vm7, %v2690_v24, %v2695_v26 }
 0x4e2   : > { %v6777_v62 = vld [vmem:[#allocation1] sm:$0xff]  ;;  %9607 = vst [vmem:[#allocation247_spill] sm:$0xff] %v6810_v27 }
 0x4e3   : > { %9596 = vst [vmem:[#allocation241_spill] sm:$0xff] %v6777_v62 }
 0x4e4   : > { %2806 = vst [vmem:[#allocation1] ss:$9 sm:$0xff] %v9599_v30  ;;  %v9605_v30 = vld [vmem:[#allocation212_spill] sm:$0xff]  ;;  %v6819_v52 = vpop.f32.mrf.mxu1 }
 0x4e5   : > { %2807 = vst [vmem:[#allocation1 + $0x1] ss:$9 sm:$0xff] %v9601_v11 }
 0x4e6   : > { %2808 = vst [vmem:[#allocation1 + $0x2] ss:$9 sm:$0xff] %v9605_v30 }
 0x4e7   : > { %2810 = vst [vmem:[#allocation1 + $0x3] ss:$9 sm:$0xff] %v6781_v51  ;;  %v9623_v51 = vld [vmem:[#allocation33_spill] sm:$0xff] }
 0x4e8   : > { %2812 = vst [vmem:[#allocation1 + $0x4] ss:$9 sm:$0xff] %v6788_v54 }
 0x4e9   : > { %2814 = vst [vmem:[#allocation1 + $0x5] ss:$9 sm:$0xff] %v6800_v15 }
 0x4ea   : > { %2816 = vst [vmem:[#allocation1 + $0x6] ss:$9 sm:$0xff] %v6805_v16 }
 0x4eb   : > { %2818 = vst [vmem:[#allocation1 + $0x7] ss:$9 sm:$0xff] %v6810_v27 }
 0x4ec   : > { %9608 = vst [vmem:[#allocation248_spill] sm:$0xff] %v6819_v52  ;;  %v6840_v19 = vpop.f32.mrf.mxu1  ;;  %4613 = vmatmul.msk.bf16.gmra.mxu1 %vm1664_vm0, %v9615_v25 }
 0x4ed   : > { %9610 = vst [vmem:[#allocation249_spill] sm:$0xff] %v6827_v53  ;;  %4618 = vmatmul.msk.bf16.gmra.mxu2 %vm1664_vm0, %v6382_v34  ;;  %v9622_v34 = vld [vmem:[#allocation8_spill] sm:$0xff] }
 0x4ee   : > { %9611 = vst [vmem:[#allocation250_spill] sm:$0xff] %v6831_v22 }
 0x4ef   : > { %9614 = vst [vmem:[#allocation7_spill] sm:$0xff] %v6840_v19 }
 0x4f2   : > { %v6833_v27 = vld [vmem:[#allocation1] sm:$0xff] }
 0x4f3   : > { %9612 = vst [vmem:[#allocation251_spill] sm:$0xff] %v6833_v27  ;;  %v9625_v27 = vld [vmem:[#allocation21_spill] sm:$0xff] }
 0x4f4   : > { %2821 = vst [vmem:[#allocation1] ss:$9 sm:$0xff] %v6827_v53  ;;  %v6854_v52 = vpop.f32.mrf.mxu1 }
 0x4f5   : > { %2823 = vst [vmem:[#allocation1 + $0x1] ss:$9 sm:$0xff] %v6831_v22  ;;  %v9618_v22 = vld [vmem:[#allocation4_spill] sm:$0xff] }
 0x4f6   : > { %2953 = vst [vmem:[#allocation1 + $0x20] sm:$0xff] %v9613_v55  ;;  %v9619_v55 = vld [vmem:[#allocation16_spill] sm:$0xff] }
 0x4f7   : > { %9617 = vst [vmem:[#allocation10_spill] sm:$0xff] %v6854_v52 }
 0x4fc   : > { %v6844_v6 = vld [vmem:[#allocation1] sm:$0xff]  ;;  %v6872_v52 = vpop.f32.mrf.mxu1 }
 0x4fd   : > { %9616 = vst [vmem:[#allocation6_spill] sm:$0xff] %v6844_v6  ;;  %v6846_v42 = vld [vmem:[#allocation1 + $0x20] ss:$4 sm:$0xff]  ;;  %v6848_v24 = vld [vmem:[#allocation1 + $0x21] ss:$4 sm:$0xff]  ;;  %4619 = vmatmul.msk.bf16.gmra.mxu2 %vm1664_vm0, %v6392_v43 }
 0x4fe   : > { %v6850_v26 = vld [vmem:[#allocation1 + $0x22] ss:$4 sm:$0xff]  ;;  %v6852_v0 = vld [vmem:[#allocation1 + $0x23] ss:$4 sm:$0xff]  ;;  %2952 = vst [vmem:[#allocation1] sm:$0xff] %v9618_v22 }
 0x4ff   : > { %2969 = vst [vmem:[#allocation1 + $0x20] sm:$0xff] %v9619_v55  ;;  %v9621_v22 = vld [vmem:[#allocation216_spill] sm:$0xff]  ;;  %v9629_v43 = vld [vmem:[#allocation38_spill] sm:$0xff] }
 0x500   : > { %9620 = vst [vmem:[#allocation12_spill] sm:$0xff] %v6872_v52  ;;  %4614 = vmatmul.msk.bf16.gmra.mxu1 %vm1664_vm0, %v9621_v22 }
 0x504   : > { %v6880_v30 = vpop.f32.mrf.mxu1 }
 0x505   : > { %v6860_v25 = vld [vmem:[#allocation1 + $0x1] ss:$4 sm:$0xff]  ;;  %v6862_v19 = vld [vmem:[#allocation1 + $0x2] ss:$4 sm:$0xff]  ;;  %v6864_v53 = vld [vmem:[#allocation1 + $0x3] ss:$4 sm:$0xff] }
 0x506   : > { %v6866_v16 = vld [vmem:[#allocation1 + $0x20] ss:$4 sm:$0xff]  ;;  %v6868_v15 = vld [vmem:[#allocation1 + $0x21] ss:$4 sm:$0xff]  ;;  %v6870_v54 = vld [vmem:[#allocation1 + $0x22] ss:$4 sm:$0xff] }
 0x507   : > { %v6876_v55 = vld [vmem:[#allocation1 + $0x23] ss:$4 sm:$0xff]  ;;  %2968 = vst [vmem:[#allocation1] sm:$0xff] %v9622_v34 }
 0x508   : > { %2978 = vst [vmem:[#allocation1 + $0x20] sm:$0xff] %v9623_v51  ;;  %v9626_v34 = vld [vmem:[#allocation45_spill] sm:$0xff] }
 0x509   : > { %9624 = vst [vmem:[#allocation13_spill] sm:$0xff] %v6880_v30  ;;  %v9628_v30 = vld [vmem:[#allocation3_spill] sm:$0xff] }
 0x50c   : > { %v6900_v51 = vpop.f32.mrf.mxu1 }
 0x50d   : > { %9627 = vst [vmem:[#allocation14_spill] sm:$0xff] %v6900_v51  ;;  %v9630_v51 = vld [vmem:[#allocation59_spill] sm:$0xff]  ;;  %4620 = vmatmul.msk.bf16.gmra.mxu2 %vm1664_vm0, %v6402_v40 }
 0x50e   : > { %v6882_v11 = vld [vmem:[#allocation1 + $0x1] ss:$4 sm:$0xff]  ;;  %v6884_v6 = vld [vmem:[#allocation1 + $0x2] ss:$4 sm:$0xff]  ;;  %v6886_v39 = vld [vmem:[#allocation1 + $0x3] ss:$4 sm:$0xff] }
 0x50f   : > { %v6888_v7 = vld [vmem:[#allocation1 + $0x20] ss:$4 sm:$0xff]  ;;  %v6890_v52 = vld [vmem:[#allocation1 + $0x21] ss:$4 sm:$0xff]  ;;  %v6892_v3 = vld [vmem:[#allocation1 + $0x22] ss:$4 sm:$0xff] }
 0x510   : > { %v6894_v22 = vld [vmem:[#allocation1 + $0x23] ss:$4 sm:$0xff]  ;;  %2977 = vst [vmem:[#allocation1] sm:$0xff] %v9625_v27  ;;  %4615 = vmatmul.msk.bf16.gmra.mxu1 %vm1664_vm0, %v9628_v30 }
 0x511   : > { %2987 = vst [vmem:[#allocation1 + $0x20] sm:$0xff] %v9626_v34 }
 0x517   : > { %v6904_v32 = vld [vmem:[#allocation1 + $0x1] ss:$4 sm:$0xff]  ;;  %v6906_v62 = vld [vmem:[#allocation1 + $0x2] ss:$4 sm:$0xff]  ;;  %v6908_v8 = vld [vmem:[#allocation1 + $0x3] ss:$4 sm:$0xff] }
 0x518   : > { %v6910_v45 = vld [vmem:[#allocation1 + $0x20] ss:$4 sm:$0xff]  ;;  %v6912_v12 = vld [vmem:[#allocation1 + $0x21] ss:$4 sm:$0xff]  ;;  %v6914_v27 = vld [vmem:[#allocation1 + $0x22] ss:$4 sm:$0xff] }
 0x519   : > { %v6916_v34 = vld [vmem:[#allocation1 + $0x23] ss:$4 sm:$0xff]  ;;  %2986 = vst [vmem:[#allocation1] sm:$0xff] %v9629_v43 }
 0x51a   : > { %2996 = vst [vmem:[#allocation1 + $0x20] sm:$0xff] %v9630_v51 }
 0x51d   : > { %4621 = vmatmul.msk.bf16.gmra.mxu2 %vm1664_vm0, %v6412_v48  ;;  %v9658_v48 = vld [vmem:[#allocation107_spill] sm:$0xff] }
 0x520   : > { %v6920_v41 = vld [vmem:[#allocation1 + $0x1] ss:$4 sm:$0xff]  ;;  %v6922_v30 = vld [vmem:[#allocation1 + $0x2] ss:$4 sm:$0xff]  ;;  %v6924_v50 = vld [vmem:[#allocation1 + $0x3] ss:$4 sm:$0xff] }
 0x521   : > { %v6926_v47 = vld [vmem:[#allocation1 + $0x20] ss:$4 sm:$0xff]  ;;  %v6928_v49 = vld [vmem:[#allocation1 + $0x21] ss:$4 sm:$0xff]  ;;  %v6930_v2 = vld [vmem:[#allocation1 + $0x22] ss:$4 sm:$0xff] }
 0x522   : > { %9631 = vst [vmem:[#allocation15_spill] sm:$0xff] %v6926_v47  ;;  %v6932_v58 = vld [vmem:[#allocation1 + $0x23] ss:$4 sm:$0xff] }
 0x523   : > { %9632 = vst [vmem:[#allocation11_spill] sm:$0xff] %v6928_v49 }
 0x524   : > { %9633 = vst [vmem:[#allocation20_spill] sm:$0xff] %v6930_v2 }
 0x525   : > { %9634 = vst [vmem:[#allocation22_spill] sm:$0xff] %v6932_v58 }
 0x526   : > { %2995 = vst [vmem:[#allocation1] sm:$0xff] %v9635_v18  ;;  %v9641_v18 = vld [vmem:[#allocation72_spill] sm:$0xff] }
 0x527   : > { %3005 = vst [vmem:[#allocation1 + $0x20] sm:$0xff] %v9636_v10  ;;  %v9642_v10 = vld [vmem:[#allocation93_spill] sm:$0xff] }
 0x52d   : > { %v6938_v51 = vld [vmem:[#allocation1 + $0x1] ss:$4 sm:$0xff]  ;;  %v6940_v43 = vld [vmem:[#allocation1 + $0x2] ss:$4 sm:$0xff]  ;;  %v6942_v14 = vld [vmem:[#allocation1 + $0x3] ss:$4 sm:$0xff]  ;;  %4622 = vmatmul.msk.bf16.gmra.mxu2 %vm1664_vm0, %v6422_v13 }
 0x52e   : > { %v6944_v44 = vld [vmem:[#allocation1 + $0x20] ss:$4 sm:$0xff]  ;;  %v6946_v17 = vld [vmem:[#allocation1 + $0x21] ss:$4 sm:$0xff]  ;;  %v6948_v2 = vld [vmem:[#allocation1 + $0x22] ss:$4 sm:$0xff] }
 0x52f   : > { %9637 = vst [vmem:[#allocation23_spill] sm:$0xff] %v6944_v44  ;;  %v6950_v58 = vld [vmem:[#allocation1 + $0x23] ss:$4 sm:$0xff] }
 0x530   : > { %9638 = vst [vmem:[#allocation24_spill] sm:$0xff] %v6946_v17  ;;  %v4630_v13 = vld [vmem:[%s8589_s1 + $0x6] sm:$0x3] }
 0x531   : > { %9639 = vst [vmem:[#allocation25_spill] sm:$0xff] %v6948_v2 }
 0x532   : > { %9640 = vst [vmem:[#allocation26_spill] sm:$0xff] %v6950_v58 }
 0x533   : > { %3004 = vst [vmem:[#allocation1] sm:$0xff] %v9641_v18  ;;  %v9649_v18 = vld [vmem:[#allocation89_spill] sm:$0xff] }
 0x534   : > { %3014 = vst [vmem:[#allocation1 + $0x20] sm:$0xff] %v9642_v10  ;;  %v9650_v10 = vld [vmem:[#allocation110_spill] sm:$0xff] }
 0x53a   : > { %v6954_v49 = vld [vmem:[#allocation1 + $0x1] ss:$4 sm:$0xff]  ;;  %v6956_v40 = vld [vmem:[#allocation1 + $0x2] ss:$4 sm:$0xff]  ;;  %v6958_v21 = vld [vmem:[#allocation1 + $0x3] ss:$4 sm:$0xff] }
 0x53b   : > { %9643 = vst [vmem:[#allocation213_spill] sm:$0xff] %v6956_v40  ;;  %v6960_v4 = vld [vmem:[#allocation1 + $0x20] ss:$4 sm:$0xff]  ;;  %v6962_v47 = vld [vmem:[#allocation1 + $0x21] ss:$4 sm:$0xff] }
 0x53c   : > { %9644 = vst [vmem:[#allocation214_spill] sm:$0xff] %v6958_v21  ;;  %v6964_v44 = vld [vmem:[#allocation1 + $0x22] ss:$4 sm:$0xff]  ;;  %v6968_v58 = vld [vmem:[#allocation1 + $0x23] ss:$4 sm:$0xff] }
 0x53d   : > { %9645 = vst [vmem:[#allocation5_spill] sm:$0xff] %v6960_v4  ;;  %4623 = vmatmul.msk.bf16.gmra.mxu2 %vm1664_vm0, %v6432_v37 }
 0x53e   : > { %9646 = vst [vmem:[#allocation215_spill] sm:$0xff] %v6962_v47 }
 0x53f   : > { %9647 = vst [vmem:[#allocation4_spill] sm:$0xff] %v6964_v44 }
 0x540   : > { %9648 = vst [vmem:[#allocation216_spill] sm:$0xff] %v6968_v58  ;;  %v9659_v58 = vld [vmem:[#allocation128_spill] sm:$0xff] }
 0x541   : > { %3013 = vst [vmem:[#allocation1] sm:$0xff] %v9649_v18 }
 0x542   : > { %3023 = vst [vmem:[#allocation1 + $0x20] sm:$0xff] %v9650_v10 }
 0x548   : > { %v6972_v2 = vld [vmem:[#allocation1 + $0x1] ss:$4 sm:$0xff]  ;;  %v6974_v17 = vld [vmem:[#allocation1 + $0x2] ss:$4 sm:$0xff]  ;;  %v6976_v21 = vld [vmem:[#allocation1 + $0x3] ss:$4 sm:$0xff] }
 0x549   : > { %9651 = vst [vmem:[#allocation3_spill] sm:$0xff] %v6972_v2  ;;  %v6978_v4 = vld [vmem:[#allocation1 + $0x20] ss:$4 sm:$0xff]  ;;  %v6980_v47 = vld [vmem:[#allocation1 + $0x21] ss:$4 sm:$0xff] }
 0x54a   : > { %9652 = vst [vmem:[#allocation252_spill] sm:$0xff] %v6974_v17  ;;  %v6982_v44 = vld [vmem:[#allocation1 + $0x22] ss:$4 sm:$0xff]  ;;  %v6984_v40 = vld [vmem:[#allocation1 + $0x23] ss:$4 sm:$0xff] }
 0x54b   : > { %9653 = vst [vmem:[#allocation253_spill] sm:$0xff] %v6976_v21 }
 0x54c   : > { %9654 = vst [vmem:[#allocation254_spill] sm:$0xff] %v6978_v4 }
 0x54d   : > { %9655 = vst [vmem:[#allocation255_spill] sm:$0xff] %v6980_v47  ;;  %4624 = vmatmul.msk.bf16.gmra.mxu2 %vm1664_vm0, %v6442_v57 }
 0x54e   : > { %9656 = vst [vmem:[#allocation256_spill] sm:$0xff] %v6982_v44 }
 0x54f   : > { %9657 = vst [vmem:[#allocation257_spill] sm:$0xff] %v6984_v40 }
 0x550   : > { %3022 = vst [vmem:[#allocation1] sm:$0xff] %v9658_v48  ;;  %v9667_v48 = vld [vmem:[#allocation115_spill] sm:$0xff] }
 0x551   : > { %3032 = vst [vmem:[#allocation1 + $0x20] sm:$0xff] %v9659_v58  ;;  %v9668_v58 = vld [vmem:[#allocation144_spill] sm:$0xff] }
 0x557   : > { %v6990_v10 = vld [vmem:[#allocation1 + $0x1] ss:$4 sm:$0xff]  ;;  %v6992_v18 = vld [vmem:[#allocation1 + $0x2] ss:$4 sm:$0xff]  ;;  %v6994_v21 = vld [vmem:[#allocation1 + $0x3] ss:$4 sm:$0xff] }
 0x558   : > { %9660 = vst [vmem:[#allocation258_spill] sm:$0xff] %v6990_v10  ;;  %v6996_v4 = vld [vmem:[#allocation1 + $0x20] ss:$4 sm:$0xff]  ;;  %v6998_v47 = vld [vmem:[#allocation1 + $0x21] ss:$4 sm:$0xff] }
 0x559   : > { %9661 = vst [vmem:[#allocation259_spill] sm:$0xff] %v6992_v18  ;;  %v7000_v44 = vld [vmem:[#allocation1 + $0x22] ss:$4 sm:$0xff]  ;;  %v7002_v40 = vld [vmem:[#allocation1 + $0x23] ss:$4 sm:$0xff] }
 0x55a   : > { %9662 = vst [vmem:[#allocation260_spill] sm:$0xff] %v6994_v21  ;;  %v4651_v21 = vld [vmem:[%s8589_s1 + $0x8] sm:$0x3] }
 0x55b   : > { %9663 = vst [vmem:[#allocation261_spill] sm:$0xff] %v6996_v4 }
 0x55c   : > { %9664 = vst [vmem:[#allocation262_spill] sm:$0xff] %v6998_v47  ;;  %v4665_v47 = vld [vmem:[%s8589_s1 + $0xa] sm:$0x3] }
 0x55d   : > { %9665 = vst [vmem:[#allocation263_spill] sm:$0xff] %v7000_v44  ;;  %v2545_v44 = vsel %vm9669_vm10, %v4630_v13, 0  ;;  %4625 = vmatmul.msk.bf16.gmra.mxu2 %vm1664_vm0, %v6452_v5 }
 0x55e   : > { %9666 = vst [vmem:[#allocation264_spill] sm:$0xff] %v7002_v40  ;;  %v2852_v40 = vsel %vm9670_vm11, %v4651_v21, 0  ;;  %2554 = vmatpush.bf16.msrb.mxu3 %v2545_v44  ;;  %v9676_v21 = vld [vmem:[#allocation133_spill] sm:$0xff] }
 0x55f   : > { %3031 = vst [vmem:[#allocation1] sm:$0xff] %v9667_v48  ;;  %v3232_v48 = vsel %vm9671_vm12, %v4665_v47, 0  ;;  %2861 = vmatpush.bf16.msrb.mxu0 %v2852_v40  ;;  %v9677_v47 = vld [vmem:[#allocation161_spill] sm:$0xff] }
 0x560   : > { %3041 = vst [vmem:[#allocation1 + $0x20] sm:$0xff] %v9668_v58  ;;  %3241 = vmatpush.bf16.msra.mxu1 %v3232_v48 }
 0x561   : > { %4631 = vmatmul.msk.bf16.vlgmr.msrb.gmra.mxu3 %vm1664_vm0, %v6496_v29  ;;  %v9682_v29 = vld [vmem:[#allocation149_spill] sm:$0xff] }
 0x562   : > { %4652 = vmatmul.msk.bf16.vlgmr.msrb.gmra.mxu0 %vm1664_vm0, %v6661_v38  ;;  %v9683_v38 = vld [vmem:[#allocation174_spill] sm:$0xff] }
 0x566   : > { %v7018_v58 = vld [vmem:[#allocation1 + $0x1] ss:$4 sm:$0xff]  ;;  %v7020_v4 = vld [vmem:[#allocation1 + $0x2] ss:$4 sm:$0xff]  ;;  %v7022_v18 = vld [vmem:[#allocation1 + $0x3] ss:$4 sm:$0xff] }
 0x567   : > { %v7024_v10 = vld [vmem:[#allocation1 + $0x20] ss:$4 sm:$0xff]  ;;  %v7026_v17 = vld [vmem:[#allocation1 + $0x21] ss:$4 sm:$0xff]  ;;  %v7028_v2 = vld [vmem:[#allocation1 + $0x22] ss:$4 sm:$0xff] }
 0x568   : > { %9672 = vst [vmem:[#allocation265_spill] sm:$0xff] %v7024_v10  ;;  %v7030_v13 = vld [vmem:[#allocation1 + $0x23] ss:$4 sm:$0xff] }
 0x569   : > { %9673 = vst [vmem:[#allocation266_spill] sm:$0xff] %v7026_v17 }
 0x56a   : > { %9674 = vst [vmem:[#allocation267_spill] sm:$0xff] %v7028_v2 }
 0x56b   : > { %9675 = vst [vmem:[#allocation268_spill] sm:$0xff] %v7030_v13 }
 0x56c   : > { %3040 = vst [vmem:[#allocation1] sm:$0xff] %v9676_v21 }
 0x56d   : > { %3050 = vst [vmem:[#allocation1 + $0x20] sm:$0xff] %v9677_v47  ;;  %4626 = vmatmul.msk.bf16.gmra.mxu2 %vm1664_vm0, %v6462_v23 }
 0x571   : > { %4632 = vmatmul.msk.bf16.gmra.mxu3 %vm1664_vm0, %v6506_v31 }
 0x572   : > { %4653 = vmatmul.msk.bf16.gmra.mxu0 %vm1664_vm0, %v6671_v35 }
 0x573   : > { %v7040_v44 = vld [vmem:[#allocation1 + $0x1] ss:$4 sm:$0xff]  ;;  %v7042_v40 = vld [vmem:[#allocation1 + $0x2] ss:$4 sm:$0xff]  ;;  %v7044_v48 = vld [vmem:[#allocation1 + $0x3] ss:$4 sm:$0xff] }
 0x574   : > { %9678 = vst [vmem:[#allocation269_spill] sm:$0xff] %v7042_v40  ;;  %v7046_v13 = vld [vmem:[#allocation1 + $0x20] ss:$4 sm:$0xff]  ;;  %v7048_v21 = vld [vmem:[#allocation1 + $0x21] ss:$4 sm:$0xff] }
 0x575   : > { %9679 = vst [vmem:[#allocation270_spill] sm:$0xff] %v7044_v48  ;;  %v7050_v47 = vld [vmem:[#allocation1 + $0x22] ss:$4 sm:$0xff]  ;;  %v7052_v2 = vld [vmem:[#allocation1 + $0x23] ss:$4 sm:$0xff] }
 0x576   : > { %9680 = vst [vmem:[#allocation271_spill] sm:$0xff] %v7046_v13 }
 0x577   : > { %9681 = vst [vmem:[#allocation272_spill] sm:$0xff] %v7052_v2 }
 0x578   : > { %3049 = vst [vmem:[#allocation1] sm:$0xff] %v9682_v29 }
 0x579   : > { %3059 = vst [vmem:[#allocation1 + $0x20] sm:$0xff] %v9683_v38  ;;  %v9688_v38 = vld [vmem:[#allocation166_spill] sm:$0xff] }
 0x57d   : > { %4627 = vmatmul.msk.bf16.gmra.mxu2 %vm1664_vm0, %v6472_v33 }
 0x57f   : > { %v7056_v17 = vld [vmem:[#allocation1 + $0x1] ss:$4 sm:$0xff]  ;;  %v7058_v37 = vld [vmem:[#allocation1 + $0x2] ss:$4 sm:$0xff]  ;;  %v7060_v10 = vld [vmem:[#allocation1 + $0x3] ss:$4 sm:$0xff] }
 0x580   : > { %v7062_v40 = vld [vmem:[#allocation1 + $0x20] ss:$4 sm:$0xff]  ;;  %v7064_v48 = vld [vmem:[#allocation1 + $0x21] ss:$4 sm:$0xff]  ;;  %v7066_v13 = vld [vmem:[#allocation1 + $0x22] ss:$4 sm:$0xff] }
 0x581   : > { %9684 = vst [vmem:[#allocation273_spill] sm:$0xff] %v7062_v40  ;;  %v7072_v29 = vld [vmem:[#allocation1 + $0x23] ss:$4 sm:$0xff]  ;;  %4633 = vmatmul.msk.bf16.gmra.mxu3 %vm1664_vm0, %v6516_v60 }
 0x582   : > { %9685 = vst [vmem:[#allocation274_spill] sm:$0xff] %v7064_v48  ;;  %4654 = vmatmul.msk.bf16.gmra.mxu0 %vm1664_vm0, %v6681_v9 }
 0x583   : > { %9686 = vst [vmem:[#allocation275_spill] sm:$0xff] %v7066_v13 }
 0x584   : > { %9687 = vst [vmem:[#allocation276_spill] sm:$0xff] %v7072_v29 }
 0x585   : > { %3058 = vst [vmem:[#allocation1] sm:$0xff] %v9688_v38  ;;  %v9693_v38 = vld [vmem:[#allocation183_spill] sm:$0xff] }
 0x586   : > { %3068 = vst [vmem:[#allocation1 + $0x20] sm:$0xff] %v5872_v20 }
 0x58c   : > { %v7078_v40 = vld [vmem:[#allocation1 + $0x1] ss:$4 sm:$0xff]  ;;  %v7080_v48 = vld [vmem:[#allocation1 + $0x2] ss:$4 sm:$0xff]  ;;  %v7082_v13 = vld [vmem:[#allocation1 + $0x3] ss:$4 sm:$0xff] }
 0x58d   : > { %v7084_v2 = vld [vmem:[#allocation1 + $0x20] ss:$4 sm:$0xff]  ;;  %v7086_v31 = vld [vmem:[#allocation1 + $0x21] ss:$4 sm:$0xff]  ;;  %v7088_v35 = vld [vmem:[#allocation1 + $0x22] ss:$4 sm:$0xff] }
 0x58e   : > { %9689 = vst [vmem:[#allocation277_spill] sm:$0xff] %v7084_v2  ;;  %v7090_v29 = vld [vmem:[#allocation1 + $0x23] ss:$4 sm:$0xff] }
 0x58f   : > { %9690 = vst [vmem:[#allocation278_spill] sm:$0xff] %v7086_v31 }
 0x590   : > { %9691 = vst [vmem:[#allocation279_spill] sm:$0xff] %v7088_v35  ;;  %v7105_v35 = vpop.f32.mrf.mxu1 }
 0x591   : > { %9692 = vst [vmem:[#allocation280_spill] sm:$0xff] %v7090_v29  ;;  %4634 = vmatmul.msk.bf16.gmra.mxu3 %vm1664_vm0, %v6526_v1  ;;  %v9706_v1 = vld [vmem:[#allocation22_spill] sm:$0xff] }
 0x592   : > { %3067 = vst [vmem:[#allocation1] sm:$0xff] %v9693_v38  ;;  %4655 = vmatmul.msk.bf16.gmra.mxu0 %vm1664_vm0, %v6691_v56 }
 0x593   : > { %3077 = vst [vmem:[#allocation1 + $0x20] sm:$0xff] %v6601_v28 }
 0x594   : > { %9695 = vst [vmem:[#allocation282_spill] sm:$0xff] %v7105_v35  ;;  %v9873_v35 = vld [vmem:[#allocation232_spill] sm:$0xff] }
 0x598   : > { %v7126_v5 = vpop.f32.mrf.mxu1 }
 0x599   : > { %v7098_v57 = vld [vmem:[#allocation1 + $0x1] ss:$4 sm:$0xff]  ;;  %v7100_v20 = vld [vmem:[#allocation1 + $0x2] ss:$4 sm:$0xff]  ;;  %v7102_v2 = vld [vmem:[#allocation1 + $0x3] ss:$4 sm:$0xff] }
 0x59a   : > { %9694 = vst [vmem:[#allocation281_spill] sm:$0xff] %v7102_v2  ;;  %v7109_v28 = vld [vmem:[#allocation1 + $0x20] ss:$4 sm:$0xff]  ;;  %v7111_v38 = vld [vmem:[#allocation1 + $0x21] ss:$4 sm:$0xff] }
 0x59b   : > { %3076 = vst [vmem:[#allocation1] sm:$0xff] %v6593_v59  ;;  %v7113_v60 = vld [vmem:[#allocation1 + $0x22] ss:$4 sm:$0xff]  ;;  %v7115_v9 = vld [vmem:[#allocation1 + $0x23] ss:$4 sm:$0xff] }
 0x59c   : > { %9696 = vst [vmem:[#allocation283_spill] sm:$0xff] %v7126_v5 }
 0x5a1   : > { %4635 = vmatmul.msk.bf16.gmra.mxu3 %vm1664_vm0, %v6536_v63 }
 0x5a2   : > { %v7117_v29 = vld [vmem:[#allocation1 + $0x1] ss:$4 sm:$0xff]  ;;  %v7119_v31 = vld [vmem:[#allocation1 + $0x2] ss:$4 sm:$0xff]  ;;  %v7121_v2 = vld [vmem:[#allocation1 + $0x3] ss:$4 sm:$0xff]  ;;  %4656 = vmatmul.msk.bf16.gmra.mxu0 %vm1664_vm0, %v6701_v36 }
 0x5a3   : > { %3087 = vst [vmem:[#allocation1] ss:$9 sm:$0xff] %v6860_v25  ;;  %v9713_v36 = vld [vmem:[#allocation235_spill] sm:$0xff]  ;;  %v9725_v25 = vld [vmem:[#allocation260_spill] sm:$0xff] }
 0x5a4   : > { %3089 = vst [vmem:[#allocation1 + $0x1] ss:$9 sm:$0xff] %v6862_v19 }
 0x5a5   : > { %3091 = vst [vmem:[#allocation1 + $0x2] ss:$9 sm:$0xff] %v6864_v53  ;;  %v7139_v53 = vpop.f32.mrf.mxu1 }
 0x5a6   : > { %3093 = vst [vmem:[#allocation1 + $0x3] ss:$9 sm:$0xff] %v6846_v42  ;;  %v9721_v42 = vld [vmem:[#allocation4_spill] sm:$0xff] }
 0x5a7   : > { %3095 = vst [vmem:[#allocation1 + $0x4] ss:$9 sm:$0xff] %v6848_v24 }
 0x5a8   : > { %3097 = vst [vmem:[#allocation1 + $0x5] ss:$9 sm:$0xff] %v6850_v26  ;;  %v9722_v26 = vld [vmem:[#allocation216_spill] sm:$0xff] }
 0x5a9   : > { %3099 = vst [vmem:[#allocation1 + $0x6] ss:$9 sm:$0xff] %v6852_v0  ;;  %v9723_v0 = vld [vmem:[#allocation258_spill] sm:$0xff] }
 0x5aa   : > { %3101 = vst [vmem:[#allocation1 + $0x7] ss:$9 sm:$0xff] %v6882_v11 }
 0x5ab   : > { %9697 = vst [vmem:[#allocation284_spill] sm:$0xff] %v7139_v53  ;;  %v9870_v53 = vld [vmem:[#allocation228_spill] sm:$0xff] }
 0x5ad   : > { %v7154_v23 = vpop.f32.mrf.mxu1 }
 0x5ae   : > { %9698 = vst [vmem:[#allocation285_spill] sm:$0xff] %v7154_v23 }
 0x5b1   : > { %v3102_v19 = vld [vmem:[#allocation1] sm:$0xff]  ;;  %4636 = vmatmul.msk.bf16.gmra.mxu3 %vm1664_vm0, %v6546_v61  ;;  %v9710_v61 = vld [vmem:[#allocation23_spill] sm:$0xff] }
 0x5b2   : > { %3103 = vst [vmem:[#allocation1] ss:$9 sm:$0xff] %v6884_v6  ;;  %4666 = vmatmul.msk.bf16.vlgmr.msra.gmra.mxu1 %vm1664_vm0, %v3102_v19  ;;  %4657 = vmatmul.msk.bf16.gmra.mxu0 %vm1664_vm0, %v6711_v46  ;;  %v9705_v46 = vld [vmem:[#allocation20_spill] sm:$0xff]  ;;  %v9720_v6 = vld [vmem:[#allocation215_spill] sm:$0xff] }
 0x5b3   : > { %3104 = vst [vmem:[#allocation1 + $0x1] ss:$9 sm:$0xff] %v6886_v39  ;;  %v9712_v39 = vld [vmem:[#allocation219_spill] sm:$0xff] }
 0x5b4   : > { %3105 = vst [vmem:[#allocation1 + $0x2] ss:$9 sm:$0xff] %v6866_v16  ;;  %v9717_v16 = vld [vmem:[#allocation252_spill] sm:$0xff] }
 0x5b5   : > { %3106 = vst [vmem:[#allocation1 + $0x3] ss:$9 sm:$0xff] %v6868_v15  ;;  %v9716_v15 = vld [vmem:[#allocation3_spill] sm:$0xff] }
 0x5b6   : > { %3107 = vst [vmem:[#allocation1 + $0x4] ss:$9 sm:$0xff] %v6870_v54  ;;  %v9709_v54 = vld [vmem:[#allocation214_spill] sm:$0xff] }
 0x5b7   : > { %3108 = vst [vmem:[#allocation1 + $0x5] ss:$9 sm:$0xff] %v6876_v55  ;;  %v9724_v55 = vld [vmem:[#allocation259_spill] sm:$0xff] }
 0x5b8   : > { %3109 = vst [vmem:[#allocation1 + $0x6] ss:$9 sm:$0xff] %v6904_v32  ;;  %v9704_v32 = vld [vmem:[#allocation11_spill] sm:$0xff] }
 0x5b9   : > { %3110 = vst [vmem:[#allocation1 + $0x7] ss:$9 sm:$0xff] %v6906_v62  ;;  %v7162_v62 = vpop.f32.mrf.mxu1 }
 0x5ba   : > { %9699 = vst [vmem:[#allocation286_spill] sm:$0xff] %v7162_v62  ;;  %v9866_v62 = vld [vmem:[#allocation226_spill] sm:$0xff] }
 0x5c0   : > { %v3111_v11 = vld [vmem:[#allocation1] sm:$0xff] }
 0x5c1   : > { %3112 = vst [vmem:[#allocation1] ss:$9 sm:$0xff] %v6908_v8  ;;  %v7173_v33 = vpop.f32.mrf.mxu1 }
 0x5c2   : > { %3113 = vst [vmem:[#allocation1 + $0x1] ss:$9 sm:$0xff] %v6888_v7  ;;  %4667 = vmatmul.msk.bf16.gmra.mxu1 %vm1664_vm0, %v3111_v11  ;;  %v9711_v7 = vld [vmem:[#allocation24_spill] sm:$0xff]  ;;  %v9730_v11 = vld [vmem:[#allocation261_spill] sm:$0xff] }
 0x5c3   : > { %3114 = vst [vmem:[#allocation1 + $0x2] ss:$9 sm:$0xff] %v6890_v52  ;;  %v9719_v52 = vld [vmem:[#allocation5_spill] sm:$0xff] }
 0x5c4   : > { %3115 = vst [vmem:[#allocation1 + $0x3] ss:$9 sm:$0xff] %v6892_v3  ;;  %v9701_v3 = vld [vmem:[#allocation15_spill] sm:$0xff] }
 0x5c5   : > { %3116 = vst [vmem:[#allocation1 + $0x4] ss:$9 sm:$0xff] %v6894_v22  ;;  %v9727_v22 = vld [vmem:[#allocation255_spill] sm:$0xff] }
 0x5c6   : > { %3117 = vst [vmem:[#allocation1 + $0x5] ss:$9 sm:$0xff] %v6920_v41  ;;  %v9702_v41 = vld [vmem:[#allocation218_spill] sm:$0xff] }
 0x5c7   : > { %3118 = vst [vmem:[#allocation1 + $0x6] ss:$9 sm:$0xff] %v6922_v30  ;;  %4637 = vmatmul.msk.bf16.gmra.mxu3 %vm1664_vm0, %v9702_v41  ;;  %v9729_v30 = vld [vmem:[#allocation257_spill] sm:$0xff]  ;;  %v9733_v41 = vld [vmem:[#allocation264_spill] sm:$0xff] }
 0x5c8   : > { %3119 = vst [vmem:[#allocation1 + $0x7] ss:$9 sm:$0xff] %v6924_v50 }
 0x5c9   : > { %9700 = vst [vmem:[#allocation287_spill] sm:$0xff] %v7173_v33  ;;  %v7184_v50 = vpop.f32.mrf.mxu1 }
 0x5cf   : > { %v3120_v8 = vld [vmem:[#allocation1] sm:$0xff] }
 0x5d0   : > { %3121 = vst [vmem:[#allocation1] ss:$9 sm:$0xff] %v6910_v45 }
 0x5d1   : > { %3122 = vst [vmem:[#allocation1 + $0x1] ss:$9 sm:$0xff] %v6912_v12  ;;  %v9703_v12 = vld [vmem:[#allocation234_spill] sm:$0xff]  ;;  %v7193_v63 = vpop.f32.mrf.mxu1 }
 0x5d2   : > { %3123 = vst [vmem:[#allocation1 + $0x2] ss:$9 sm:$0xff] %v6914_v27  ;;  %4668 = vmatmul.msk.bf16.gmra.mxu1 %vm1664_vm0, %v3120_v8  ;;  %4658 = vmatmul.msk.bf16.gmra.mxu0 %vm1664_vm0, %v9703_v12  ;;  %v9718_v27 = vld [vmem:[#allocation253_spill] sm:$0xff]  ;;  %v9731_v8 = vld [vmem:[#allocation262_spill] sm:$0xff] }
 0x5d3   : > { %3124 = vst [vmem:[#allocation1 + $0x3] ss:$9 sm:$0xff] %v6916_v34  ;;  %v9726_v34 = vld [vmem:[#allocation254_spill] sm:$0xff] }
 0x5d4   : > { %3125 = vst [vmem:[#allocation1 + $0x4] ss:$9 sm:$0xff] %v6938_v51  ;;  %v9714_v51 = vld [vmem:[#allocation25_spill] sm:$0xff] }
 0x5d5   : > { %3126 = vst [vmem:[#allocation1 + $0x5] ss:$9 sm:$0xff] %v6940_v43  ;;  %v9728_v43 = vld [vmem:[#allocation256_spill] sm:$0xff] }
 0x5d6   : > { %3127 = vst [vmem:[#allocation1 + $0x6] ss:$9 sm:$0xff] %v6942_v14  ;;  %v9708_v14 = vld [vmem:[#allocation213_spill] sm:$0xff] }
 0x5d7   : > { %3128 = vst [vmem:[#allocation1 + $0x7] ss:$9 sm:$0xff] %v9701_v3  ;;  %4638 = vmatmul.msk.bf16.gmra.mxu3 %vm1664_vm0, %v9712_v39  ;;  %v9732_v3 = vld [vmem:[#allocation263_spill] sm:$0xff]  ;;  %v9751_v39 = vld [vmem:[#allocation18_spill] sm:$0xff] }
 0x5d8   : > { %9707 = vst [vmem:[#allocation15_spill] sm:$0xff] %v7193_v63  ;;  %v9865_v63 = vld [vmem:[#allocation225_spill] sm:$0xff] }
 0x5de   : > { %v3129_v45 = vld [vmem:[#allocation1] sm:$0xff] }
 0x5df   : > { %3130 = vst [vmem:[#allocation1] ss:$9 sm:$0xff] %v9704_v32  ;;  %v9735_v32 = vld [vmem:[#allocation270_spill] sm:$0xff] }
 0x5e0   : > { %3131 = vst [vmem:[#allocation1 + $0x1] ss:$9 sm:$0xff] %v9705_v46  ;;  %v9739_v46 = vld [vmem:[#allocation268_spill] sm:$0xff] }
 0x5e1   : > { %3132 = vst [vmem:[#allocation1 + $0x2] ss:$9 sm:$0xff] %v9706_v1 }
 0x5e2   : > { %3133 = vst [vmem:[#allocation1 + $0x3] ss:$9 sm:$0xff] %v6954_v49  ;;  %4669 = vmatmul.msk.bf16.gmra.mxu1 %vm1664_vm0, %v3129_v45  ;;  %4659 = vmatmul.msk.bf16.gmra.mxu0 %vm1664_vm0, %v9713_v36  ;;  %v9715_v49 = vld [vmem:[#allocation26_spill] sm:$0xff]  ;;  %v9734_v45 = vld [vmem:[#allocation269_spill] sm:$0xff] }
 0x5e3   : > { %3134 = vst [vmem:[#allocation1 + $0x4] ss:$9 sm:$0xff] %v9708_v14  ;;  %v9741_v14 = vld [vmem:[#allocation272_spill] sm:$0xff]  ;;  %v9752_v36 = vld [vmem:[#allocation17_spill] sm:$0xff] }
 0x5e4   : > { %3135 = vst [vmem:[#allocation1 + $0x5] ss:$9 sm:$0xff] %v9709_v54  ;;  %v9743_v54 = vld [vmem:[#allocation274_spill] sm:$0xff] }
 0x5e5   : > { %3136 = vst [vmem:[#allocation1 + $0x6] ss:$9 sm:$0xff] %v9710_v61  ;;  %v9745_v61 = vld [vmem:[#allocation276_spill] sm:$0xff] }
 0x5e6   : > { %3137 = vst [vmem:[#allocation1 + $0x7] ss:$9 sm:$0xff] %v9711_v7  ;;  %v9750_v7 = vld [vmem:[#allocation280_spill] sm:$0xff] }
 0x5ed   : > { %v7205_v56 = vld [vmem:[#allocation1] sm:$0xff] }
 0x5ee   : > { %3139 = vst [vmem:[#allocation1] ss:$9 sm:$0xff] %v9714_v51  ;;  %v9758_v51 = vld [vmem:[#allocation35_spill] sm:$0xff] }
 0x5ef   : > { %3140 = vst [vmem:[#allocation1 + $0x1] ss:$9 sm:$0xff] %v9715_v49  ;;  %v9760_v49 = vld [vmem:[#allocation36_spill] sm:$0xff] }
 0x5f0   : > { %3141 = vst [vmem:[#allocation1 + $0x2] ss:$9 sm:$0xff] %v9716_v15  ;;  %v9761_v15 = vld [vmem:[#allocation37_spill] sm:$0xff] }
 0x5f1   : > { %3142 = vst [vmem:[#allocation1 + $0x3] ss:$9 sm:$0xff] %v9717_v16  ;;  %v9762_v16 = vld [vmem:[#allocation48_spill] sm:$0xff] }
 0x5f2   : > { %3143 = vst [vmem:[#allocation1 + $0x4] ss:$9 sm:$0xff] %v9718_v27  ;;  %v9763_v27 = vld [vmem:[#allocation49_spill] sm:$0xff] }
 0x5f3   : > { %3144 = vst [vmem:[#allocation1 + $0x5] ss:$9 sm:$0xff] %v9719_v52  ;;  %v9764_v52 = vld [vmem:[#allocation50_spill] sm:$0xff] }
 0x5f4   : > { %3145 = vst [vmem:[#allocation1 + $0x6] ss:$9 sm:$0xff] %v9720_v6  ;;  %v9765_v6 = vld [vmem:[#allocation52_spill] sm:$0xff] }
 0x5f5   : > { %3146 = vst [vmem:[#allocation1 + $0x7] ss:$9 sm:$0xff] %v9721_v42  ;;  %v9766_v42 = vld [vmem:[#allocation51_spill] sm:$0xff] }
 0x5fc   : > { %v7215_v24 = vld [vmem:[#allocation1] sm:$0xff] }
 0x5fd   : > { %3148 = vst [vmem:[#allocation1] ss:$9 sm:$0xff] %v9722_v26 }
 0x5fe   : > { %3149 = vst [vmem:[#allocation1 + $0x1] ss:$9 sm:$0xff] %v9723_v0  ;;  %v9767_v0 = vld [vmem:[#allocation53_spill] sm:$0xff] }
 0x5ff   : > { %3150 = vst [vmem:[#allocation1 + $0x2] ss:$9 sm:$0xff] %v9724_v55  ;;  %v9768_v55 = vld [vmem:[#allocation54_spill] sm:$0xff] }
 0x600   : > { %3151 = vst [vmem:[#allocation1 + $0x3] ss:$9 sm:$0xff] %v9725_v25  ;;  %v9769_v25 = vld [vmem:[#allocation56_spill] sm:$0xff] }
 0x601   : > { %3152 = vst [vmem:[#allocation1 + $0x4] ss:$9 sm:$0xff] %v9726_v34  ;;  %v9770_v34 = vld [vmem:[#allocation65_spill] sm:$0xff] }
 0x602   : > { %3153 = vst [vmem:[#allocation1 + $0x5] ss:$9 sm:$0xff] %v9727_v22  ;;  %v9771_v22 = vld [vmem:[#allocation67_spill] sm:$0xff] }
 0x603   : > { %3154 = vst [vmem:[#allocation1 + $0x6] ss:$9 sm:$0xff] %v9728_v43  ;;  %v9772_v43 = vld [vmem:[#allocation68_spill] sm:$0xff] }
 0x604   : > { %3155 = vst [vmem:[#allocation1 + $0x7] ss:$9 sm:$0xff] %v9729_v30  ;;  %v9773_v30 = vld [vmem:[#allocation69_spill] sm:$0xff] }
 0x60b   : > { %v7225_v19 = vld [vmem:[#allocation1] sm:$0xff] }
 0x60c   : > { %3157 = vst [vmem:[#allocation1] ss:$9 sm:$0xff] %v7018_v58  ;;  %v9736_v58 = vld [vmem:[#allocation265_spill] sm:$0xff] }
 0x60d   : > { %3158 = vst [vmem:[#allocation1 + $0x1] ss:$9 sm:$0xff] %v7020_v4  ;;  %v9737_v4 = vld [vmem:[#allocation266_spill] sm:$0xff] }
 0x60e   : > { %3159 = vst [vmem:[#allocation1 + $0x2] ss:$9 sm:$0xff] %v7022_v18  ;;  %v9738_v18 = vld [vmem:[#allocation267_spill] sm:$0xff] }
 0x60f   : > { %3160 = vst [vmem:[#allocation1 + $0x3] ss:$9 sm:$0xff] %v9730_v11  ;;  %v9774_v11 = vld [vmem:[#allocation70_spill] sm:$0xff] }
 0x610   : > { %3161 = vst [vmem:[#allocation1 + $0x4] ss:$9 sm:$0xff] %v9731_v8  ;;  %v7309_v8 = vpop.f32.mrf.mxu1 }
 0x611   : > { %3162 = vst [vmem:[#allocation1 + $0x5] ss:$9 sm:$0xff] %v9732_v3 }
 0x612   : > { %3163 = vst [vmem:[#allocation1 + $0x6] ss:$9 sm:$0xff] %v9733_v41  ;;  %v9776_v41 = vld [vmem:[#allocation71_spill] sm:$0xff] }
 0x613   : > { %3164 = vst [vmem:[#allocation1 + $0x7] ss:$9 sm:$0xff] %v7040_v44  ;;  %v9740_v44 = vld [vmem:[#allocation271_spill] sm:$0xff] }
 0x614   : > { %9775 = vst [vmem:[#allocation218_spill] sm:$0xff] %v7309_v8 }
 0x61a   : > { %v7235_v12 = vld [vmem:[#allocation1] sm:$0xff] }
 0x61b   : > { %3166 = vst [vmem:[#allocation1] ss:$9 sm:$0xff] %v9734_v45  ;;  %v9777_v45 = vld [vmem:[#allocation73_spill] sm:$0xff] }
 0x61c   : > { %3167 = vst [vmem:[#allocation1 + $0x1] ss:$9 sm:$0xff] %v9735_v32  ;;  %v9778_v32 = vld [vmem:[#allocation74_spill] sm:$0xff] }
 0x61d   : > { %3168 = vst [vmem:[#allocation1 + $0x2] ss:$9 sm:$0xff] %v9736_v58  ;;  %v9779_v58 = vld [vmem:[#allocation84_spill] sm:$0xff] }
 0x61e   : > { %3169 = vst [vmem:[#allocation1 + $0x3] ss:$9 sm:$0xff] %v9737_v4  ;;  %v9780_v4 = vld [vmem:[#allocation86_spill] sm:$0xff] }
 0x61f   : > { %3170 = vst [vmem:[#allocation1 + $0x4] ss:$9 sm:$0xff] %v9738_v18  ;;  %v9781_v18 = vld [vmem:[#allocation85_spill] sm:$0xff] }
 0x620   : > { %3171 = vst [vmem:[#allocation1 + $0x5] ss:$9 sm:$0xff] %v9739_v46  ;;  %v9782_v46 = vld [vmem:[#allocation87_spill] sm:$0xff] }
 0x621   : > { %3172 = vst [vmem:[#allocation1 + $0x6] ss:$9 sm:$0xff] %v7056_v17 }
 0x622   : > { %3173 = vst [vmem:[#allocation1 + $0x7] ss:$9 sm:$0xff] %v7058_v37  ;;  %v9742_v37 = vld [vmem:[#allocation273_spill] sm:$0xff] }
 0x629   : > { %v7245_v1 = vld [vmem:[#allocation1] sm:$0xff] }
 0x62a   : > { %3175 = vst [vmem:[#allocation1] ss:$9 sm:$0xff] %v7060_v10  ;;  %v9744_v10 = vld [vmem:[#allocation275_spill] sm:$0xff] }
 0x62b   : > { %3176 = vst [vmem:[#allocation1 + $0x1] ss:$9 sm:$0xff] %v9740_v44  ;;  %v9783_v44 = vld [vmem:[#allocation88_spill] sm:$0xff] }
 0x62c   : > { %3177 = vst [vmem:[#allocation1 + $0x2] ss:$9 sm:$0xff] %v7048_v21  ;;  %v9746_v21 = vld [vmem:[#allocation281_spill] sm:$0xff] }
 0x62d   : > { %3178 = vst [vmem:[#allocation1 + $0x3] ss:$9 sm:$0xff] %v7050_v47  ;;  %v9747_v47 = vld [vmem:[#allocation277_spill] sm:$0xff] }
 0x62e   : > { %3179 = vst [vmem:[#allocation1 + $0x4] ss:$9 sm:$0xff] %v9741_v14  ;;  %v7321_v14 = vpop.f32.mrf.mxu2 }
 0x62f   : > { %3180 = vst [vmem:[#allocation1 + $0x5] ss:$9 sm:$0xff] %v7078_v40 }
 0x630   : > { %3181 = vst [vmem:[#allocation1 + $0x6] ss:$9 sm:$0xff] %v7080_v48  ;;  %v9749_v48 = vld [vmem:[#allocation279_spill] sm:$0xff] }
 0x631   : > { %3182 = vst [vmem:[#allocation1 + $0x7] ss:$9 sm:$0xff] %v7082_v13  ;;  %v9748_v13 = vld [vmem:[#allocation278_spill] sm:$0xff] }
 0x638   : > { %v7255_v17 = vld [vmem:[#allocation1] sm:$0xff] }
 0x639   : > { %3184 = vst [vmem:[#allocation1] ss:$9 sm:$0xff] %v9742_v37  ;;  %v7323_v37 = vpop.f32.mrf.mxu1  ;;  %4670 = vmatmul.msk.bf16.gmra.mxu1 %vm1664_vm0, %v7205_v56  ;;  %v9792_v56 = vld [vmem:[#allocation104_spill] sm:$0xff] }
 0x63a   : > { %3185 = vst [vmem:[#allocation1 + $0x1] ss:$9 sm:$0xff] %v9743_v54 }
 0x63b   : > { %3186 = vst [vmem:[#allocation1 + $0x2] ss:$9 sm:$0xff] %v9744_v10  ;;  %v9785_v10 = vld [vmem:[#allocation90_spill] sm:$0xff] }
 0x63c   : > { %3187 = vst [vmem:[#allocation1 + $0x3] ss:$9 sm:$0xff] %v9745_v61  ;;  %v9786_v61 = vld [vmem:[#allocation91_spill] sm:$0xff] }
 0x63d   : > { %3188 = vst [vmem:[#allocation1 + $0x4] ss:$9 sm:$0xff] %v7098_v57 }
 0x63e   : > { %3189 = vst [vmem:[#allocation1 + $0x5] ss:$9 sm:$0xff] %v7100_v20 }
 0x63f   : > { %3190 = vst [vmem:[#allocation1 + $0x6] ss:$9 sm:$0xff] %v9746_v21  ;;  %v7331_v21 = vpop.f32.mrf.mxu2 }
 0x640   : > { %3191 = vst [vmem:[#allocation1 + $0x7] ss:$9 sm:$0xff] %v9747_v47 }
 0x641   : > { %9784 = vst [vmem:[#allocation234_spill] sm:$0xff] %v7323_v37  ;;  %v7333_v47 = vpop.f32.mrf.mxu1 }
 0x642   : > { %9787 = vst [vmem:[#allocation11_spill] sm:$0xff] %v7333_v47  ;;  %v9862_v47 = vld [vmem:[#allocation200_spill] sm:$0xff] }
 0x647   : > { %v7265_v40 = vld [vmem:[#allocation1] sm:$0xff] }
 0x648   : > { %3193 = vst [vmem:[#allocation1] ss:$9 sm:$0xff] %v9748_v13  ;;  %v9788_v13 = vld [vmem:[#allocation2_spill] sm:$0xff] }
 0x649   : > { %3194 = vst [vmem:[#allocation1 + $0x1] ss:$9 sm:$0xff] %v9749_v48  ;;  %4628 = vmatmul.msk.bf16.gmra.mxu2 %vm1664_vm0, %v9788_v13  ;;  %v9789_v48 = vld [vmem:[#allocation92_spill] sm:$0xff]  ;;  %v9821_v13 = vld [vmem:[#allocation147_spill] sm:$0xff] }
 0x64a   : > { %3195 = vst [vmem:[#allocation1 + $0x2] ss:$9 sm:$0xff] %v9750_v7  ;;  %v9790_v7 = vld [vmem:[#allocation103_spill] sm:$0xff] }
 0x64b   : > { %3196 = vst [vmem:[#allocation1 + $0x3] ss:$9 sm:$0xff] %v7117_v29  ;;  %v9753_v29 = vld [vmem:[#allocation19_spill] sm:$0xff] }
 0x64c   : > { %3197 = vst [vmem:[#allocation1 + $0x4] ss:$9 sm:$0xff] %v7119_v31  ;;  %v9754_v31 = vld [vmem:[#allocation28_spill] sm:$0xff] }
 0x64d   : > { %3198 = vst [vmem:[#allocation1 + $0x5] ss:$9 sm:$0xff] %v7121_v2  ;;  %v9755_v2 = vld [vmem:[#allocation30_spill] sm:$0xff] }
 0x64e   : > { %3199 = vst [vmem:[#allocation1 + $0x6] ss:$9 sm:$0xff] %v7109_v28  ;;  %v9756_v28 = vld [vmem:[#allocation31_spill] sm:$0xff] }
 0x64f   : > { %3200 = vst [vmem:[#allocation1 + $0x7] ss:$9 sm:$0xff] %v7111_v38  ;;  %v9757_v38 = vld [vmem:[#allocation32_spill] sm:$0xff] }
 0x656   : > { %v7275_v20 = vld [vmem:[#allocation1] sm:$0xff] }
 0x657   : > { %3202 = vst [vmem:[#allocation1] ss:$9 sm:$0xff] %v7113_v60 }
 0x658   : > { %3203 = vst [vmem:[#allocation1 + $0x1] ss:$9 sm:$0xff] %v7115_v9  ;;  %v9759_v9 = vld [vmem:[#allocation34_spill] sm:$0xff] }
 0x65f   : > { %v7279_v57 = vld [vmem:[#allocation1] sm:$0xff] }
 0x660   : > { %3359 = vst [vmem:[#allocation1] ss:$9 sm:$0xff] %v9751_v39  ;;  %v9791_v39 = vld [vmem:[#allocation102_spill] sm:$0xff] }
 0x661   : > { %3361 = vst [vmem:[#allocation1 + $0x1] ss:$9 sm:$0xff] %v9752_v36  ;;  %v9793_v36 = vld [vmem:[#allocation105_spill] sm:$0xff] }
 0x662   : > { %3363 = vst [vmem:[#allocation1 + $0x2] ss:$9 sm:$0xff] %v9753_v29  ;;  %v9794_v29 = vld [vmem:[#allocation108_spill] sm:$0xff] }
 0x663   : > { %3365 = vst [vmem:[#allocation1 + $0x3] ss:$9 sm:$0xff] %v9754_v31  ;;  %v7343_v31 = vpop.f32.mrf.mxu1  ;;  %4671 = vmatmul.msk.bf16.gmra.mxu1 %vm1664_vm0, %v7215_v24  ;;  %v9805_v24 = vld [vmem:[#allocation123_spill] sm:$0xff] }
 0x664   : > { %3367 = vst [vmem:[#allocation1 + $0x4] ss:$9 sm:$0xff] %v9755_v2  ;;  %v7345_v2 = vpop.f32.mrf.mxu2 }
 0x665   : > { %3369 = vst [vmem:[#allocation1 + $0x5] ss:$9 sm:$0xff] %v9756_v28 }
 0x666   : > { %3371 = vst [vmem:[#allocation1 + $0x6] ss:$9 sm:$0xff] %v9757_v38  ;;  %v9797_v38 = vld [vmem:[#allocation106_spill] sm:$0xff] }
 0x667   : > { %3373 = vst [vmem:[#allocation1 + $0x7] ss:$9 sm:$0xff] %v9758_v51  ;;  %v9798_v51 = vld [vmem:[#allocation109_spill] sm:$0xff] }
 0x668   : > { %9795 = vst [vmem:[#allocation20_spill] sm:$0xff] %v7343_v31 }
 0x669   : > { %9796 = vst [vmem:[#allocation22_spill] sm:$0xff] %v7345_v2  ;;  %v10007_v2 = vld [vmem:[#allocation188_spill] sm:$0xff] }
 0x66e   : > { %v7289_v60 = vld [vmem:[#allocation1] sm:$0xff] }
 0x66f   : > { %3375 = vst [vmem:[#allocation1] ss:$9 sm:$0xff] %v9759_v9  ;;  %v9799_v9 = vld [vmem:[#allocation121_spill] sm:$0xff] }
 0x670   : > { %3376 = vst [vmem:[#allocation1 + $0x1] ss:$9 sm:$0xff] %v9760_v49  ;;  %v7354_v49 = vpop.f32.mrf.mxu1 }
 0x671   : > { %3377 = vst [vmem:[#allocation1 + $0x2] ss:$9 sm:$0xff] %v9761_v15  ;;  %v7356_v15 = vpop.f32.mrf.mxu2 }
 0x672   : > { %3378 = vst [vmem:[#allocation1 + $0x3] ss:$9 sm:$0xff] %v9762_v16  ;;  %v9802_v16 = vld [vmem:[#allocation217_spill] sm:$0xff] }
 0x673   : > { %3379 = vst [vmem:[#allocation1 + $0x4] ss:$9 sm:$0xff] %v9763_v27  ;;  %4629 = vmatmul.msk.bf16.gmra.mxu2 %vm1664_vm0, %v9802_v16  ;;  %v9803_v27 = vld [vmem:[#allocation120_spill] sm:$0xff] }
 0x674   : > { %3380 = vst [vmem:[#allocation1 + $0x5] ss:$9 sm:$0xff] %v9764_v52  ;;  %v9804_v52 = vld [vmem:[#allocation122_spill] sm:$0xff] }
 0x675   : > { %3381 = vst [vmem:[#allocation1 + $0x6] ss:$9 sm:$0xff] %v9765_v6  ;;  %v9806_v6 = vld [vmem:[#allocation125_spill] sm:$0xff] }
 0x676   : > { %3382 = vst [vmem:[#allocation1 + $0x7] ss:$9 sm:$0xff] %v9766_v42  ;;  %v9807_v42 = vld [vmem:[#allocation124_spill] sm:$0xff] }
 0x677   : > { %9800 = vst [vmem:[#allocation213_spill] sm:$0xff] %v7354_v49 }
 0x678   : > { %9801 = vst [vmem:[#allocation214_spill] sm:$0xff] %v7356_v15  ;;  %v9940_v15 = vld [vmem:[#allocation99_spill] sm:$0xff] }
 0x67d   : > { %v7299_v26 = vld [vmem:[#allocation1] sm:$0xff] }
 0x67e   : > { %3384 = vst [vmem:[#allocation1] ss:$9 sm:$0xff] %v9767_v0  ;;  %v7365_v0 = vpop.f32.mrf.mxu1  ;;  %4672 = vmatmul.msk.bf16.gmra.mxu1 %vm1664_vm0, %v7225_v19  ;;  %v9817_v19 = vld [vmem:[#allocation143_spill] sm:$0xff] }
 0x67f   : > { %3385 = vst [vmem:[#allocation1 + $0x1] ss:$9 sm:$0xff] %v9768_v55  ;;  %v7367_v55 = vpop.f32.mrf.mxu2 }
 0x680   : > { %3386 = vst [vmem:[#allocation1 + $0x2] ss:$9 sm:$0xff] %v9769_v25 }
 0x681   : > { %3387 = vst [vmem:[#allocation1 + $0x3] ss:$9 sm:$0xff] %v9770_v34  ;;  %v9809_v34 = vld [vmem:[#allocation126_spill] sm:$0xff] }
 0x682   : > { %3388 = vst [vmem:[#allocation1 + $0x4] ss:$9 sm:$0xff] %v9771_v22  ;;  %v9810_v22 = vld [vmem:[#allocation129_spill] sm:$0xff] }
 0x683   : > { %3389 = vst [vmem:[#allocation1 + $0x5] ss:$9 sm:$0xff] %v9772_v43  ;;  %v9811_v43 = vld [vmem:[#allocation127_spill] sm:$0xff] }
 0x684   : > { %3390 = vst [vmem:[#allocation1 + $0x6] ss:$9 sm:$0xff] %v9773_v30  ;;  %v9812_v30 = vld [vmem:[#allocation139_spill] sm:$0xff] }
 0x685   : > { %3391 = vst [vmem:[#allocation1 + $0x7] ss:$9 sm:$0xff] %v9774_v11 }
 0x686   : > { %9808 = vst [vmem:[#allocation23_spill] sm:$0xff] %v7367_v55  ;;  %v7377_v11 = vpop.f32.mrf.mxu1 }
 0x68c   : > { %v7311_v3 = vld [vmem:[#allocation1] sm:$0xff] }
 0x68d   : > { %3393 = vst [vmem:[#allocation1] ss:$9 sm:$0xff] %v9776_v41  ;;  %v7379_v41 = vpop.f32.mrf.mxu2 }
 0x68e   : > { %3394 = vst [vmem:[#allocation1 + $0x1] ss:$9 sm:$0xff] %v9777_v45  ;;  %v9814_v45 = vld [vmem:[#allocation140_spill] sm:$0xff] }
 0x68f   : > { %3395 = vst [vmem:[#allocation1 + $0x2] ss:$9 sm:$0xff] %v9778_v32  ;;  %v9815_v32 = vld [vmem:[#allocation141_spill] sm:$0xff] }
 0x690   : > { %3396 = vst [vmem:[#allocation1 + $0x3] ss:$9 sm:$0xff] %v9779_v58  ;;  %v9816_v58 = vld [vmem:[#allocation142_spill] sm:$0xff] }
 0x691   : > { %3397 = vst [vmem:[#allocation1 + $0x4] ss:$9 sm:$0xff] %v9780_v4  ;;  %v7385_v4 = vpop.f32.mrf.mxu1  ;;  %4673 = vmatmul.msk.bf16.gmra.mxu1 %vm1664_vm0, %v7235_v12  ;;  %v9825_v12 = vld [vmem:[#allocation159_spill] sm:$0xff] }
 0x692   : > { %3398 = vst [vmem:[#allocation1 + $0x5] ss:$9 sm:$0xff] %v9781_v18 }
 0x693   : > { %3399 = vst [vmem:[#allocation1 + $0x6] ss:$9 sm:$0xff] %v9782_v46 }
 0x694   : > { %3400 = vst [vmem:[#allocation1 + $0x7] ss:$9 sm:$0xff] %v9783_v44  ;;  %v9819_v44 = vld [vmem:[#allocation146_spill] sm:$0xff] }
 0x695   : > { %9813 = vst [vmem:[#allocation24_spill] sm:$0xff] %v7379_v41  ;;  %v7387_v18 = vpop.f32.mrf.mxu2 }
 0x696   : > { %9818 = vst [vmem:[#allocation219_spill] sm:$0xff] %v7387_v18 }
 0x69b   : > { %v7327_v54 = vld [vmem:[#allocation1] sm:$0xff] }
 0x69c   : > { %3402 = vst [vmem:[#allocation1] ss:$9 sm:$0xff] %v9785_v10  ;;  %v7394_v10 = vpop.f32.mrf.mxu3 }
 0x69d   : > { %3403 = vst [vmem:[#allocation1 + $0x1] ss:$9 sm:$0xff] %v9786_v61  ;;  %v9820_v61 = vld [vmem:[#allocation145_spill] sm:$0xff] }
 0x69e   : > { %3404 = vst [vmem:[#allocation1 + $0x2] ss:$9 sm:$0xff] %v9789_v48  ;;  %v7398_v48 = vpop.f32.mrf.mxu0 }
 0x69f   : > { %3405 = vst [vmem:[#allocation1 + $0x3] ss:$9 sm:$0xff] %v9790_v7  ;;  %v9822_v7 = vld [vmem:[#allocation156_spill] sm:$0xff] }
 0x6a0   : > { %3406 = vst [vmem:[#allocation1 + $0x4] ss:$9 sm:$0xff] %v9791_v39  ;;  %v9823_v39 = vld [vmem:[#allocation158_spill] sm:$0xff] }
 0x6a1   : > { %3407 = vst [vmem:[#allocation1 + $0x5] ss:$9 sm:$0xff] %v9792_v56  ;;  %v7402_v56 = vpop.f32.mrf.mxu1 }
 0x6a2   : > { %3408 = vst [vmem:[#allocation1 + $0x6] ss:$9 sm:$0xff] %v9793_v36  ;;  %v7404_v36 = vpop.f32.mrf.mxu2 }
 0x6a3   : > { %3409 = vst [vmem:[#allocation1 + $0x7] ss:$9 sm:$0xff] %v9794_v29  ;;  %v9826_v29 = vld [vmem:[#allocation160_spill] sm:$0xff] }
 0x6a4   : > { %9824 = vst [vmem:[#allocation235_spill] sm:$0xff] %v7404_v36  ;;  %v9868_v36 = vld [vmem:[#allocation227_spill] sm:$0xff] }
 0x6a6   : > { %v7413_v16 = vpop.f32.mrf.mxu0 }
 0x6a7   : > { %9829 = vst [vmem:[#allocation25_spill] sm:$0xff] %v7413_v16 }
 0x6aa   : > { %v7349_v28 = vld [vmem:[#allocation1] sm:$0xff] }
 0x6ab   : > { %3411 = vst [vmem:[#allocation1] ss:$9 sm:$0xff] %v9797_v38  ;;  %v9827_v38 = vld [vmem:[#allocation163_spill] sm:$0xff] }
 0x6ac   : > { %3412 = vst [vmem:[#allocation1 + $0x1] ss:$9 sm:$0xff] %v9798_v51  ;;  %v7409_v51 = vpop.f32.mrf.mxu3 }
 0x6ad   : > { %3413 = vst [vmem:[#allocation1 + $0x2] ss:$9 sm:$0xff] %v9799_v9  ;;  %v9828_v9 = vld [vmem:[#allocation220_spill] sm:$0xff] }
 0x6ae   : > { %3414 = vst [vmem:[#allocation1 + $0x3] ss:$9 sm:$0xff] %v9803_v27  ;;  %4639 = vmatmul.msk.bf16.gmra.mxu3 %vm1664_vm0, %v9828_v9  ;;  %v9830_v27 = vld [vmem:[#allocation236_spill] sm:$0xff] }
 0x6af   : > { %3415 = vst [vmem:[#allocation1 + $0x4] ss:$9 sm:$0xff] %v9804_v52  ;;  %4660 = vmatmul.msk.bf16.gmra.mxu0 %vm1664_vm0, %v9830_v27  ;;  %v7417_v52 = vpop.f32.mrf.mxu1  ;;  %4674 = vmatmul.msk.bf16.gmra.mxu1 %vm1664_vm0, %v7245_v1  ;;  %v9845_v27 = vld [vmem:[#allocation181_spill] sm:$0xff] }
 0x6b0   : > { %3416 = vst [vmem:[#allocation1 + $0x5] ss:$9 sm:$0xff] %v9805_v24  ;;  %v7419_v24 = vpop.f32.mrf.mxu2 }
 0x6b1   : > { %3417 = vst [vmem:[#allocation1 + $0x6] ss:$9 sm:$0xff] %v9806_v6 }
 0x6b2   : > { %3418 = vst [vmem:[#allocation1 + $0x7] ss:$9 sm:$0xff] %v9807_v42  ;;  %v9832_v42 = vld [vmem:[#allocation162_spill] sm:$0xff] }
 0x6b3   : > { %9831 = vst [vmem:[#allocation26_spill] sm:$0xff] %v7419_v24 }
 0x6b8   : > { %v7437_v1 = vpop.f32.mrf.mxu2 }
 0x6b9   : > { %v7371_v25 = vld [vmem:[#allocation1] sm:$0xff]  ;;  %9839 = vst [vmem:[#allocation252_spill] sm:$0xff] %v7437_v1 }
 0x6ba   : > { %3420 = vst [vmem:[#allocation1] ss:$9 sm:$0xff] %v9809_v34  ;;  %v9833_v34 = vld [vmem:[#allocation164_spill] sm:$0xff] }
 0x6bb   : > { %3421 = vst [vmem:[#allocation1 + $0x1] ss:$9 sm:$0xff] %v9810_v22  ;;  %v7427_v22 = vpop.f32.mrf.mxu3 }
 0x6bc   : > { %3422 = vst [vmem:[#allocation1 + $0x2] ss:$9 sm:$0xff] %v9811_v43  ;;  %v9834_v43 = vld [vmem:[#allocation165_spill] sm:$0xff] }
 0x6bd   : > { %3423 = vst [vmem:[#allocation1 + $0x3] ss:$9 sm:$0xff] %v9812_v30  ;;  %v9835_v30 = vld [vmem:[#allocation176_spill] sm:$0xff] }
 0x6be   : > { %3424 = vst [vmem:[#allocation1 + $0x4] ss:$9 sm:$0xff] %v9814_v45  ;;  %v7431_v45 = vpop.f32.mrf.mxu0 }
 0x6bf   : > { %3425 = vst [vmem:[#allocation1 + $0x5] ss:$9 sm:$0xff] %v9815_v32  ;;  %v9837_v32 = vld [vmem:[#allocation177_spill] sm:$0xff] }
 0x6c0   : > { %3426 = vst [vmem:[#allocation1 + $0x6] ss:$9 sm:$0xff] %v9816_v58  ;;  %v9838_v58 = vld [vmem:[#allocation178_spill] sm:$0xff] }
 0x6c1   : > { %3427 = vst [vmem:[#allocation1 + $0x7] ss:$9 sm:$0xff] %v9817_v19  ;;  %v7435_v19 = vpop.f32.mrf.mxu1 }
 0x6c2   : > { %9836 = vst [vmem:[#allocation3_spill] sm:$0xff] %v7431_v45  ;;  %v9939_v45 = vld [vmem:[#allocation98_spill] sm:$0xff] }
 0x6c8   : > { %v7391_v46 = vld [vmem:[#allocation1] sm:$0xff] }
 0x6c9   : > { %3429 = vst [vmem:[#allocation1] ss:$9 sm:$0xff] %v9819_v44  ;;  %v9840_v44 = vld [vmem:[#allocation180_spill] sm:$0xff] }
 0x6ca   : > { %3430 = vst [vmem:[#allocation1 + $0x1] ss:$9 sm:$0xff] %v9820_v61  ;;  %v9841_v61 = vld [vmem:[#allocation179_spill] sm:$0xff] }
 0x6cb   : > { %3431 = vst [vmem:[#allocation1 + $0x2] ss:$9 sm:$0xff] %v9821_v13  ;;  %v7441_v13 = vpop.f32.mrf.mxu3 }
 0x6cc   : > { %3432 = vst [vmem:[#allocation1 + $0x3] ss:$9 sm:$0xff] %v9822_v7  ;;  %v9842_v7 = vld [vmem:[#allocation221_spill] sm:$0xff] }
 0x6cd   : > { %3433 = vst [vmem:[#allocation1 + $0x4] ss:$9 sm:$0xff] %v9823_v39  ;;  %4640 = vmatmul.msk.bf16.gmra.mxu3 %vm1664_vm0, %v9842_v7  ;;  %v7445_v39 = vpop.f32.mrf.mxu0 }
 0x6ce   : > { %3434 = vst [vmem:[#allocation1 + $0x5] ss:$9 sm:$0xff] %v9825_v12  ;;  %v9844_v12 = vld [vmem:[#allocation238_spill] sm:$0xff] }
 0x6cf   : > { %3435 = vst [vmem:[#allocation1 + $0x6] ss:$9 sm:$0xff] %v9826_v29  ;;  %4661 = vmatmul.msk.bf16.gmra.mxu0 %vm1664_vm0, %v9844_v12  ;;  %v7449_v29 = vpop.f32.mrf.mxu1  ;;  %4675 = vmatmul.msk.bf16.gmra.mxu1 %vm1664_vm0, %v7255_v17  ;;  %v9852_v17 = vld [vmem:[#allocation197_spill] sm:$0xff] }
 0x6d0   : > { %3436 = vst [vmem:[#allocation1 + $0x7] ss:$9 sm:$0xff] %v9827_v38  ;;  %v7451_v38 = vpop.f32.mrf.mxu2 }
 0x6d1   : > { %9843 = vst [vmem:[#allocation253_spill] sm:$0xff] %v7445_v39 }
 0x6d7   : > { %v7423_v6 = vld [vmem:[#allocation1] sm:$0xff]  ;;  %v7469_v7 = vpop.f32.mrf.mxu1 }
 0x6d8   : > { %3438 = vst [vmem:[#allocation1] ss:$9 sm:$0xff] %v9832_v42  ;;  %v9846_v42 = vld [vmem:[#allocation182_spill] sm:$0xff]  ;;  %v7471_v12 = vpop.f32.mrf.mxu2 }
 0x6d9   : > { %3439 = vst [vmem:[#allocation1 + $0x1] ss:$9 sm:$0xff] %v9833_v34  ;;  %v9847_v34 = vld [vmem:[#allocation184_spill] sm:$0xff] }
 0x6da   : > { %3440 = vst [vmem:[#allocation1 + $0x2] ss:$9 sm:$0xff] %v9834_v43  ;;  %v7460_v43 = vpop.f32.mrf.mxu3 }
 0x6db   : > { %3441 = vst [vmem:[#allocation1 + $0x3] ss:$9 sm:$0xff] %v9835_v30  ;;  %v9848_v30 = vld [vmem:[#allocation193_spill] sm:$0xff] }
 0x6dc   : > { %3442 = vst [vmem:[#allocation1 + $0x4] ss:$9 sm:$0xff] %v9837_v32  ;;  %v9849_v32 = vld [vmem:[#allocation195_spill] sm:$0xff] }
 0x6dd   : > { %3443 = vst [vmem:[#allocation1 + $0x5] ss:$9 sm:$0xff] %v9838_v58  ;;  %v7464_v58 = vpop.f32.mrf.mxu0 }
 0x6de   : > { %3444 = vst [vmem:[#allocation1 + $0x6] ss:$9 sm:$0xff] %v9840_v44  ;;  %v230_v44 = vld [vmem:[%s4789_s22 + $0xf0] sm:$0xff] }
 0x6df   : > { %3445 = vst [vmem:[#allocation1 + $0x7] ss:$9 sm:$0xff] %v9841_v61  ;;  %v9851_v61 = vld [vmem:[#allocation196_spill] sm:$0xff] }
 0x6e0   : > { %9850 = vst [vmem:[#allocation5_spill] sm:$0xff] %v7464_v58 }
 0x6e1   : > { %9853 = vst [vmem:[#allocation215_spill] sm:$0xff] %v7471_v12 }
 0x6e2   : > { %v7481_v49 = vpop.f32.mrf.mxu3 }
 0x6e5   : > { %v7490_v59 = vpop.f32.mrf.mxu0 }
 0x6e6   : > { %v7455_v9 = vld [vmem:[#allocation1] sm:$0xff]  ;;  %9858 = vst [vmem:[#allocation216_spill] sm:$0xff] %v7490_v59 }
 0x6e7   : > { %3447 = vst [vmem:[#allocation1] ss:$9 sm:$0xff] %v9845_v27  ;;  %v4679_v27 = vld [vmem:[%s8589_s1 + $0xc] sm:$0x3] }
 0x6e8   : > { %3448 = vst [vmem:[#allocation1 + $0x1] ss:$9 sm:$0xff] %v9846_v42  ;;  %v9854_v42 = vld [vmem:[#allocation198_spill] sm:$0xff] }
 0x6e9   : > { %3449 = vst [vmem:[#allocation1 + $0x2] ss:$9 sm:$0xff] %v9847_v34  ;;  %v3509_v34 = vsel %vm9855_vm13, %v4679_v27, 0  ;;  %v7496_v27 = vpop.f32.mrf.mxu1  ;;  %4676 = vmatmul.msk.bf16.gmra.mxu1 %vm1664_vm0, %v7265_v40 }
 0x6ea   : > { %3450 = vst [vmem:[#allocation1 + $0x3] ss:$9 sm:$0xff] %v9848_v30  ;;  %v7478_v30 = vpack.c.bf16 %v230_v44, %v230_v44  ;;  %3518 = vmatpush.bf16.msra.mxu2 %v3509_v34  ;;  %v7498_v34 = vpop.f32.mrf.mxu2  ;;  %v7518_v8 = vpop.f32.mrf.mxu3 }
 0x6eb   : > { %3451 = vst [vmem:[#allocation1 + $0x4] ss:$9 sm:$0xff] %v9849_v32  ;;  %v231_v32 = vld [vmem:[%s4789_s22 + $0xf8] sm:$0xff] }
 0x6ec   : > { %3452 = vst [vmem:[#allocation1 + $0x5] ss:$9 sm:$0xff] %v9851_v61  ;;  %v9857_v61 = vld [vmem:[#allocation224_spill] sm:$0xff]  ;;  %v3334_v31 = vrot.slane %v7478_v30, 3 }
 0x6ed   : > { %3453 = vst [vmem:[#allocation1 + $0x6] ss:$9 sm:$0xff] %v9852_v17  ;;  %4641 = vmatmul.msk.bf16.gmra.mxu3 %vm1664_vm0, %v9857_v61  ;;  %4680 = vmatmul.msk.bf16.vlgmr.msra.gmra.mxu2 %vm1664_vm0, %v7289_v60  ;;  %v7487_v17 = vpack.c.bf16 %v231_v32, %v231_v32  ;;  %v9861_v61 = vld [vmem:[#allocation199_spill] sm:$0xff] }
 0x6ee   : > { %3454 = vst [vmem:[#allocation1 + $0x7] ss:$9 sm:$0xff] %v9854_v42  ;;  %v9859_v42 = vld [vmem:[#allocation241_spill] sm:$0xff]  ;;  %v3339_v32 = vsel %vm324_vm1, %v7478_v30, %v3334_v31  ;;  %v3345_v37 = vsel %vm332_vm3, %v7478_v30, %v3334_v31  ;;  %v3338_v1 = vsel %vm320_vm4, %v7478_v30, %v3334_v31 }
 0x6ef   : > { %9856 = vst [vmem:[#allocation4_spill] sm:$0xff] %v7478_v30  ;;  %4662 = vmatmul.msk.bf16.gmra.mxu0 %vm1664_vm0, %v9859_v42  ;;  %v7504_v60 = vrot.slane %v7487_v17, 3  ;;  %v3342_v42 = vsel %vm328_vm2, %v7478_v30, %v3334_v31  ;;  %v3341_v12 = vrot.slane %v3339_v32, 1  ;;  %v3612_v23 = vshrl.u32 %v3338_v1, 16 }
 0x6f0   : > { %9860 = vst [vmem:[#allocation258_spill] sm:$0xff] %v7498_v34  ;;  %v9863_v34 = vld [vmem:[#allocation201_spill] sm:$0xff]  ;;  %v3344_v33 = vrot.slane %v3342_v42, 2 }
 0x6f1   : > { %v3351_v40 = vsel %vm324_vm1, %v7487_v17, %v7504_v60  ;;  %v3350_v24 = vsel %vm320_vm4, %v7487_v17, %v7504_v60  ;;  %v3616_v59 = vshll.u32 %v3341_v12, 16  ;;  %v3619_v18 = vshrl.u32 %v3341_v12, 16  ;;  %v7536_v30 = vpop.f32.mrf.mxu1  ;;  %vm9944_vm1 = vmmov %vm9137_vm8 }
 0x6f2   : > { %v3353_v32 = vrot.slane %v3351_v40, 1  ;;  %v3623_v31 = vshll.u32 %v3344_v33, 16  ;;  %v7538_v58 = vpop.f32.mrf.mxu2  ;;  %v3640_v41 = vshrl.u32 %v3350_v24, 16  ;;  %v1766_v55 = vpop.f32.mrf.mxu3 }
 0x6f3   : > { %9871 = vst [vmem:[#allocation254_spill] sm:$0xff] %v7538_v58 }
 0x6f4   : > { %v3644_v5 = vshll.u32 %v3353_v32, 16  ;;  %v3647_v39 = vshrl.u32 %v3353_v32, 16 }
 0x6f5   : > { %v7494_v44 = vld [vmem:[#allocation1] sm:$0xff] }
 0x6f6   : > { %3456 = vst [vmem:[#allocation1] ss:$9 sm:$0xff] %v9861_v61  ;;  %v9864_v61 = vld [vmem:[#allocation209_spill] sm:$0xff] }
 0x6f7   : > { %3457 = vst [vmem:[#allocation1 + $0x1] ss:$9 sm:$0xff] %v9862_v47  ;;  %v3354_v47 = vsel %vm328_vm2, %v7487_v17, %v7504_v60  ;;  %vm10030_vm2 = vmmov %vm9944_vm1 }
 0x6f8   : > { %3458 = vst [vmem:[#allocation1 + $0x2] ss:$9 sm:$0xff] %v9863_v34  ;;  %v3347_v34 = vrot.slane %v3345_v37, 3  ;;  %v3626_v37 = vshrl.u32 %v3344_v33, 16 }
 0x6f9   : > { %3459 = vst [vmem:[#allocation1 + $0x3] ss:$9 sm:$0xff] %v9864_v61  ;;  %v7530_v61 = vpop.f32.mrf.mxu0  ;;  %v1986_v55 = vpop.f32.mrf.mxu1  ;;  %4677 = vmatmul.msk.bf16.gmra.mxu1 %vm1664_vm0, %v7275_v20  ;;  %v9886_v20 = vld [vmem:[#allocation233_spill] sm:$0xff] }
 0x6fa   : > { %3460 = vst [vmem:[#allocation1 + $0x4] ss:$9 sm:$0xff] %v9865_v63  ;;  %v7533_v63 = vrot.slane %v3354_v47, 2  ;;  %v3630_v42 = vshll.u32 %v3347_v34, 16  ;;  %v3633_v40 = vshrl.u32 %v3347_v34, 16  ;;  %v7546_v47 = vsel %vm4874_vm7, %v3619_v18, %v3623_v31 }
 0x6fb   : > { %3461 = vst [vmem:[#allocation1 + $0x5] ss:$9 sm:$0xff] %v9866_v62 }
 0x6fc   : > { %9867 = vst [vmem:[#allocation259_spill] sm:$0xff] %v7530_v61  ;;  %v7542_v61 = vsel %vm4874_vm7, %v3612_v23, %v3616_v59  ;;  %v3651_v59 = vshll.u32 %v7533_v63, 16  ;;  %v7559_v23 = vsel %vm4874_vm7, %v3640_v41, %v3644_v5  ;;  %v9877_v5 = vld [vmem:[#allocation229_spill] sm:$0xff]  ;;  %v7576_v41 = vpop.f32.mrf.mxu2 }
 0x6fd   : > { %3462 = vst [vmem:[#allocation1 + $0x6] ss:$9 sm:$0xff] %v9868_v36  ;;  %v3637_v36 = vshll.u32 %v3350_v24, 16  ;;  %4642 = vmatmul.msk.bf16.gmra.mxu3 %vm1664_vm0, %v9873_v35  ;;  %4681 = vmatmul.msk.bf16.gmra.mxu2 %vm1664_vm0, %v7299_v26  ;;  %v9879_v35 = vld [vmem:[#allocation230_spill] sm:$0xff]  ;;  %v7582_v26 = vpop.f32.mrf.mxu3 }
 0x6fe   : > { %9869 = vst [vmem:[#allocation260_spill] sm:$0xff] %v7533_v63  ;;  %v7565_v18 = vsel %vm4874_vm7, %v3647_v39, %v3651_v59  ;;  %v9880_v39 = vld [vmem:[#allocation231_spill] sm:$0xff] }
 0x6ff   : > { %3463 = vst [vmem:[#allocation1 + $0x7] ss:$9 sm:$0xff] %v9870_v53  ;;  %v7550_v53 = vsel %vm4874_vm7, %v3626_v37, %v3630_v42  ;;  %v7554_v58 = vsel %vm4874_vm7, %v3633_v40, %v3637_v36  ;;  %v9876_v37 = vld [vmem:[#allocation251_spill] sm:$0xff] }
 0x700   : > { %9874 = vst [vmem:[#allocation255_spill] sm:$0xff] %v7565_v18  ;;  %v9951_v18 = vld [vmem:[#allocation113_spill] sm:$0xff] }
 0x701   : > { %v7569_v31 = vpop.f32.mrf.mxu0  ;;  %4663 = vmatmul.msk.bf16.gmra.mxu0 %vm1664_vm0, %v9876_v37  ;;  %9878 = vst [vmem:[#allocation257_spill] sm:$0xff] %v7576_v41  ;;  %v7588_v59 = vpop.f32.mrf.mxu1  ;;  %v9900_v41 = vld [vmem:[#allocation42_spill] sm:$0xff] }
 0x702   : > { %9875 = vst [vmem:[#allocation256_spill] sm:$0xff] %v7569_v31 }
 0x703   : > { %9881 = vst [vmem:[#allocation261_spill] sm:$0xff] %v7582_v26  ;;  %v9953_v26 = vld [vmem:[#allocation114_spill] sm:$0xff] }
 0x704   : > { %v7586_v36 = vpop.f32.mrf.mxu2  ;;  %9884 = vst [vmem:[#allocation264_spill] sm:$0xff] %v7588_v59  ;;  %v9937_v59 = vld [vmem:[#allocation96_spill] sm:$0xff] }
 0x705   : > { %9883 = vst [vmem:[#allocation263_spill] sm:$0xff] %v7586_v36  ;;  %v7590_v37 = vpop.f32.mrf.mxu3  ;;  %v9898_v36 = vld [vmem:[#allocation41_spill] sm:$0xff] }
 0x706   : > { %v7573_v42 = vld [vmem:[#allocation1] sm:$0xff]  ;;  %9885 = vst [vmem:[#allocation269_spill] sm:$0xff] %v7590_v37 }
 0x707   : > { %3465 = vst [vmem:[#allocation1] ss:$9 sm:$0xff] %v9877_v5 }
 0x708   : > { %3466 = vst [vmem:[#allocation1 + $0x1] ss:$9 sm:$0xff] %v9879_v35  ;;  %v9893_v35 = vld [vmem:[#allocation27_spill] sm:$0xff] }
 0x709   : > { %3467 = vst [vmem:[#allocation1 + $0x2] ss:$9 sm:$0xff] %v9880_v39  ;;  %v7584_v40 = vpop.f32.mrf.mxu0 }
 0x70a   : > { %3468 = vst [vmem:[#allocation1 + $0x3] ss:$9 sm:$0xff] %v3338_v1 }
 0x70b   : > { %3470 = vst [vmem:[#allocation1 + $0x4] ss:$9 sm:$0xff] %v3341_v12 }
 0x70c   : > { %3472 = vst [vmem:[#allocation1 + $0x5] ss:$9 sm:$0xff] %v3344_v33  ;;  %v9888_v33 = vld [vmem:[#allocation6_spill] sm:$0xff] }
 0x70d   : > { %3474 = vst [vmem:[#allocation1 + $0x6] ss:$9 sm:$0xff] %v3347_v34  ;;  %4643 = vmatmul.msk.bf16.gmra.mxu3 %vm1664_vm0, %v9886_v20  ;;  %4682 = vmatmul.msk.bf16.gmra.mxu2 %vm1664_vm0, %v7311_v3  ;;  %v7605_v34 = vpop.f32.mrf.mxu1  ;;  %v7609_v5 = vpop.f32.mrf.mxu3  ;;  %v9895_v20 = vld [vmem:[#allocation29_spill] sm:$0xff] }
 0x70e   : > { %9882 = vst [vmem:[#allocation262_spill] sm:$0xff] %v7584_v40  ;;  %4678 = vmatmul.msk.bf16.gmra.mxu1 %vm1664_vm0, %v7279_v57  ;;  %v9950_v40 = vld [vmem:[#allocation112_spill] sm:$0xff] }
 0x70f   : > { %3475 = vst [vmem:[#allocation1 + $0x7] ss:$9 sm:$0xff] %v3350_v24  ;;  %v7603_v24 = vpop.f32.mrf.mxu2 }
 0x710   : > { %9889 = vst [vmem:[#allocation265_spill] sm:$0xff] %v7603_v24  ;;  %v9897_v24 = vld [vmem:[#allocation40_spill] sm:$0xff] }
 0x711   : > { %v7598_v12 = vpop.f32.mrf.mxu0  ;;  %4664 = vmatmul.msk.bf16.gmra.mxu0 %vm1664_vm0, %v9888_v33  ;;  %9890 = vst [vmem:[#allocation266_spill] sm:$0xff] %v7605_v34  ;;  %v9896_v33 = vld [vmem:[#allocation39_spill] sm:$0xff]  ;;  %v9915_v34 = vld [vmem:[#allocation62_spill] sm:$0xff] }
 0x712   : > { %9887 = vst [vmem:[#allocation270_spill] sm:$0xff] %v7598_v12  ;;  %v9926_v12 = vld [vmem:[#allocation77_spill] sm:$0xff] }
 0x713   : > { %9891 = vst [vmem:[#allocation267_spill] sm:$0xff] %v7609_v5  ;;  %v9912_v5 = vld [vmem:[#allocation60_spill] sm:$0xff] }
 0x715   : > { %v7624_v57 = vpop.f32.mrf.mxu3 }
 0x716   : > { %v7596_v1 = vld [vmem:[#allocation1] sm:$0xff]  ;;  %9899 = vst [vmem:[#allocation272_spill] sm:$0xff] %v7624_v57  ;;  %v9907_v57 = vld [vmem:[#allocation46_spill] sm:$0xff] }
 0x717   : > { %3478 = vst [vmem:[#allocation1] ss:$9 sm:$0xff] %v3353_v32  ;;  %v7616_v39 = vpop.f32.mrf.mxu2  ;;  %v7618_v32 = vpop.f32.mrf.mxu1 }
 0x718   : > { %3480 = vst [vmem:[#allocation1 + $0x1] ss:$9 sm:$0xff] %v7533_v63 }
 0x719   : > { %v7611_v3 = vpop.f32.mrf.mxu0  ;;  %9894 = vst [vmem:[#allocation271_spill] sm:$0xff] %v7618_v32  ;;  %v9903_v32 = vld [vmem:[#allocation44_spill] sm:$0xff] }
 0x71a   : > { %9892 = vst [vmem:[#allocation268_spill] sm:$0xff] %v7611_v3 }
 0x71d   : > { %4683 = vmatmul.msk.bf16.gmra.mxu2 %vm1664_vm0, %v7327_v54 }
 0x71f   : > { %v7613_v55 = vld [vmem:[#allocation1] sm:$0xff] }
 0x720   : > { %3664 = vst [vmem:[#allocation1] ss:$9 sm:$0xff] %v9893_v35  ;;  %v9901_v35 = vld [vmem:[#allocation43_spill] sm:$0xff] }
 0x721   : > { %3666 = vst [vmem:[#allocation1 + $0x1] ss:$9 sm:$0xff] %v9895_v20  ;;  %v7630_v31 = vpop.f32.mrf.mxu0  ;;  %v7633_v20 = vpop.f32.mrf.mxu2 }
 0x722   : > { %3668 = vst [vmem:[#allocation1 + $0x2] ss:$9 sm:$0xff] %v9896_v33  ;;  %v7635_v33 = vpop.f32.mrf.mxu1 }
 0x723   : > { %3670 = vst [vmem:[#allocation1 + $0x3] ss:$9 sm:$0xff] %v9897_v24  ;;  %v7637_v24 = vpop.f32.mrf.mxu3 }
 0x724   : > { %3672 = vst [vmem:[#allocation1 + $0x4] ss:$9 sm:$0xff] %v9898_v36 }
 0x725   : > { %3674 = vst [vmem:[#allocation1 + $0x5] ss:$9 sm:$0xff] %v9900_v41  ;;  %v9908_v41 = vld [vmem:[#allocation47_spill] sm:$0xff] }
 0x726   : > { %3676 = vst [vmem:[#allocation1 + $0x6] ss:$9 sm:$0xff] %v9901_v35 }
 0x727   : > { %9902 = vst [vmem:[#allocation273_spill] sm:$0xff] %v7630_v31  ;;  %v9910_v31 = vld [vmem:[#allocation57_spill] sm:$0xff] }
 0x728   : > { %3678 = vst [vmem:[#allocation1 + $0x7] ss:$9 sm:$0xff] %v9903_v32  ;;  %v9911_v32 = vld [vmem:[#allocation58_spill] sm:$0xff] }
 0x729   : > { %9904 = vst [vmem:[#allocation274_spill] sm:$0xff] %v7635_v33  ;;  %v7639_v3 = vpop.f32.mrf.mxu0  ;;  %v7643_v54 = vpop.f32.mrf.mxu2  ;;  %v9913_v33 = vld [vmem:[#allocation61_spill] sm:$0xff] }
 0x72a   : > { %9905 = vst [vmem:[#allocation275_spill] sm:$0xff] %v7637_v24  ;;  %v7645_v35 = vpop.f32.mrf.mxu1 }
 0x72b   : > { %9906 = vst [vmem:[#allocation276_spill] sm:$0xff] %v7639_v3  ;;  %v7651_v24 = vpop.f32.mrf.mxu3  ;;  %v9920_v3 = vld [vmem:[#allocation64_spill] sm:$0xff] }
 0x72c   : > { %9909 = vst [vmem:[#allocation281_spill] sm:$0xff] %v7645_v35 }
 0x72d   : > { %9914 = vst [vmem:[#allocation277_spill] sm:$0xff] %v7651_v24  ;;  %4684 = vmatmul.msk.bf16.gmra.mxu2 %vm1664_vm0, %v7349_v28  ;;  %v9922_v24 = vld [vmem:[#allocation66_spill] sm:$0xff] }
 0x72f   : > { %v3679_v36 = vld [vmem:[#allocation1] sm:$0xff] }
 0x730   : > { %3680 = vst [vmem:[#allocation1] ss:$9 sm:$0xff] %v9907_v57  ;;  %v9916_v57 = vld [vmem:[#allocation63_spill] sm:$0xff] }
 0x731   : > { %3681 = vst [vmem:[#allocation1 + $0x1] ss:$9 sm:$0xff] %v9908_v41  ;;  %v7657_v41 = vpop.f32.mrf.mxu0  ;;  %v7659_v35 = vpop.f32.mrf.mxu2 }
 0x732   : > { %3682 = vst [vmem:[#allocation1 + $0x2] ss:$9 sm:$0xff] %v9910_v31  ;;  %v7661_v31 = vpop.f32.mrf.mxu1 }
 0x733   : > { %3683 = vst [vmem:[#allocation1 + $0x3] ss:$9 sm:$0xff] %v9911_v32  ;;  %v7663_v32 = vpop.f32.mrf.mxu3 }
 0x734   : > { %3684 = vst [vmem:[#allocation1 + $0x4] ss:$9 sm:$0xff] %v9912_v5 }
 0x735   : > { %3685 = vst [vmem:[#allocation1 + $0x5] ss:$9 sm:$0xff] %v9913_v33 }
 0x736   : > { %3686 = vst [vmem:[#allocation1 + $0x6] ss:$9 sm:$0xff] %v9915_v34  ;;  %v9923_v34 = vld [vmem:[#allocation75_spill] sm:$0xff] }
 0x737   : > { %3687 = vst [vmem:[#allocation1 + $0x7] ss:$9 sm:$0xff] %v9916_v57 }
 0x738   : > { %9917 = vst [vmem:[#allocation278_spill] sm:$0xff] %v7657_v41  ;;  %v9925_v41 = vld [vmem:[#allocation76_spill] sm:$0xff] }
 0x739   : > { %9918 = vst [vmem:[#allocation279_spill] sm:$0xff] %v7661_v31  ;;  %v7666_v33 = vpop.f32.mrf.mxu0  ;;  %v7670_v28 = vpop.f32.mrf.mxu2  ;;  %v9927_v31 = vld [vmem:[#allocation79_spill] sm:$0xff] }
 0x73a   : > { %9919 = vst [vmem:[#allocation280_spill] sm:$0xff] %v7663_v32  ;;  %v7672_v57 = vpop.f32.mrf.mxu1  ;;  %v9928_v32 = vld [vmem:[#allocation80_spill] sm:$0xff] }
 0x73b   : > { %9921 = vst [vmem:[#allocation18_spill] sm:$0xff] %v7666_v33  ;;  %v7678_v37 = vpop.f32.mrf.mxu3  ;;  %v9936_v33 = vld [vmem:[#allocation95_spill] sm:$0xff] }
 0x73c   : > { %9924 = vst [vmem:[#allocation17_spill] sm:$0xff] %v7672_v57 }
 0x73d   : > { %9929 = vst [vmem:[#allocation19_spill] sm:$0xff] %v7678_v37  ;;  %4685 = vmatmul.msk.bf16.gmra.mxu2 %vm1664_vm0, %v7371_v25 }
 0x73e   : > { %v3688_v5 = vld [vmem:[#allocation1] sm:$0xff] }
 0x73f   : > { %3689 = vst [vmem:[#allocation1] ss:$9 sm:$0xff] %v9920_v3  ;;  %v9930_v3 = vld [vmem:[#allocation81_spill] sm:$0xff] }
 0x740   : > { %3690 = vst [vmem:[#allocation1 + $0x1] ss:$9 sm:$0xff] %v9922_v24 }
 0x741   : > { %3691 = vst [vmem:[#allocation1 + $0x2] ss:$9 sm:$0xff] %v9923_v34  ;;  %v7683_v24 = vpop.f32.mrf.mxu0  ;;  %v7685_v34 = vpop.f32.mrf.mxu2 }
 0x742   : > { %3692 = vst [vmem:[#allocation1 + $0x3] ss:$9 sm:$0xff] %v9925_v41  ;;  %v7687_v57 = vpop.f32.mrf.mxu1 }
 0x743   : > { %3693 = vst [vmem:[#allocation1 + $0x4] ss:$9 sm:$0xff] %v9926_v12  ;;  %v7691_v12 = vpop.f32.mrf.mxu3 }
 0x744   : > { %3694 = vst [vmem:[#allocation1 + $0x5] ss:$9 sm:$0xff] %v9927_v31  ;;  %v9933_v31 = vld [vmem:[#allocation82_spill] sm:$0xff] }
 0x745   : > { %3695 = vst [vmem:[#allocation1 + $0x6] ss:$9 sm:$0xff] %v9928_v32  ;;  %v9934_v32 = vld [vmem:[#allocation83_spill] sm:$0xff] }
 0x746   : > { %3696 = vst [vmem:[#allocation1 + $0x7] ss:$9 sm:$0xff] %v9930_v3  ;;  %v9935_v3 = vld [vmem:[#allocation94_spill] sm:$0xff] }
 0x747   : > { %9931 = vst [vmem:[#allocation28_spill] sm:$0xff] %v7683_v24 }
 0x748   : > { %9932 = vst [vmem:[#allocation30_spill] sm:$0xff] %v7687_v57  ;;  %v9938_v57 = vld [vmem:[#allocation97_spill] sm:$0xff] }
 0x749   : > { %v7695_v37 = vpop.f32.mrf.mxu0  ;;  %v7699_v25 = vpop.f32.mrf.mxu2 }
 0x74a   : > { %v7701_v24 = vpop.f32.mrf.mxu1 }
 0x74d   : > { %v7689_v41 = vld [vmem:[#allocation1] sm:$0xff]  ;;  %4686 = vmatmul.msk.bf16.gmra.mxu2 %vm1664_vm0, %v7391_v46 }
 0x74e   : > { %3698 = vst [vmem:[#allocation1] ss:$9 sm:$0xff] %v9933_v31  ;;  %v7707_v31 = vpop.f32.mrf.mxu3  ;;  %v9947_v46 = vld [vmem:[#allocation101_spill] sm:$0xff] }
 0x74f   : > { %3699 = vst [vmem:[#allocation1 + $0x1] ss:$9 sm:$0xff] %v9934_v32 }
 0x750   : > { %3700 = vst [vmem:[#allocation1 + $0x2] ss:$9 sm:$0xff] %v9935_v3 }
 0x751   : > { %3701 = vst [vmem:[#allocation1 + $0x3] ss:$9 sm:$0xff] %v9936_v33  ;;  %v7711_v32 = vpop.f32.mrf.mxu0  ;;  %v7713_v33 = vpop.f32.mrf.mxu2 }
 0x752   : > { %3702 = vst [vmem:[#allocation1 + $0x4] ss:$9 sm:$0xff] %v9937_v59  ;;  %v7715_v3 = vpop.f32.mrf.mxu1  ;;  %v4700_v59 = vld [vmem:[%s8589_s1 + $0xe] sm:$0x3] }
 0x753   : > { %3703 = vst [vmem:[#allocation1 + $0x5] ss:$9 sm:$0xff] %v9938_v57  ;;  %v3816_v57 = vsel %vm9944_vm1, %v4700_v59, 0 }
 0x754   : > { %3704 = vst [vmem:[#allocation1 + $0x6] ss:$9 sm:$0xff] %v9939_v45  ;;  %3825 = vmatpush.bf16.msra.mxu3 %v3816_v57 }
 0x755   : > { %3705 = vst [vmem:[#allocation1 + $0x7] ss:$9 sm:$0xff] %v9940_v15  ;;  %v9945_v15 = vld [vmem:[#allocation100_spill] sm:$0xff] }
 0x756   : > { %9941 = vst [vmem:[#allocation31_spill] sm:$0xff] %v7707_v31  ;;  %v7724_v31 = vpop.f32.mrf.mxu3 }
 0x757   : > { %9942 = vst [vmem:[#allocation32_spill] sm:$0xff] %v7711_v32  ;;  %4701 = vmatmul.msk.bf16.vlgmr.msra.gmra.mxu3 %vm1664_vm0, %v3679_v36  ;;  %v9948_v32 = vld [vmem:[#allocation111_spill] sm:$0xff] }
 0x758   : > { %9943 = vst [vmem:[#allocation35_spill] sm:$0xff] %v7715_v3 }
 0x759   : > { %9946 = vst [vmem:[#allocation34_spill] sm:$0xff] %v7724_v31  ;;  %v7729_v3 = vpop.f32.mrf.mxu0  ;;  %v7733_v59 = vpop.f32.mrf.mxu2  ;;  %v9955_v31 = vld [vmem:[#allocation117_spill] sm:$0xff] }
 0x75a   : > { %9949 = vst [vmem:[#allocation36_spill] sm:$0xff] %v7729_v3  ;;  %v7735_v57 = vpop.f32.mrf.mxu1  ;;  %v9966_v3 = vld [vmem:[#allocation134_spill] sm:$0xff] }
 0x75b   : > { %9952 = vst [vmem:[#allocation37_spill] sm:$0xff] %v7735_v57  ;;  %v9959_v57 = vld [vmem:[#allocation118_spill] sm:$0xff] }
 0x75c   : > { %v7721_v45 = vld [vmem:[#allocation1] sm:$0xff] }
 0x75d   : > { %3707 = vst [vmem:[#allocation1] ss:$9 sm:$0xff] %v9945_v15  ;;  %v9954_v15 = vld [vmem:[#allocation116_spill] sm:$0xff]  ;;  %4687 = vmatmul.msk.bf16.gmra.mxu2 %vm1664_vm0, %v7423_v6 }
 0x75e   : > { %3708 = vst [vmem:[#allocation1 + $0x1] ss:$9 sm:$0xff] %v9947_v46  ;;  %v7740_v46 = vpop.f32.mrf.mxu3 }
 0x75f   : > { %3709 = vst [vmem:[#allocation1 + $0x2] ss:$9 sm:$0xff] %v9948_v32 }
 0x760   : > { %3710 = vst [vmem:[#allocation1 + $0x3] ss:$9 sm:$0xff] %v9950_v40 }
 0x761   : > { %3711 = vst [vmem:[#allocation1 + $0x4] ss:$9 sm:$0xff] %v9951_v18  ;;  %v7744_v36 = vpop.f32.mrf.mxu0  ;;  %v7746_v40 = vpop.f32.mrf.mxu2 }
 0x762   : > { %3712 = vst [vmem:[#allocation1 + $0x5] ss:$9 sm:$0xff] %v9953_v26  ;;  %v7748_v18 = vpop.f32.mrf.mxu1  ;;  %v9960_v26 = vld [vmem:[#allocation119_spill] sm:$0xff] }
 0x763   : > { %3713 = vst [vmem:[#allocation1 + $0x6] ss:$9 sm:$0xff] %v9954_v15 }
 0x764   : > { %3714 = vst [vmem:[#allocation1 + $0x7] ss:$9 sm:$0xff] %v9955_v31  ;;  %v9962_v31 = vld [vmem:[#allocation130_spill] sm:$0xff] }
 0x765   : > { %9956 = vst [vmem:[#allocation48_spill] sm:$0xff] %v7740_v46  ;;  %v9963_v46 = vld [vmem:[#allocation131_spill] sm:$0xff] }
 0x766   : > { %9957 = vst [vmem:[#allocation49_spill] sm:$0xff] %v7744_v36  ;;  %v7754_v15 = vpop.f32.mrf.mxu3  ;;  %v9965_v36 = vld [vmem:[#allocation132_spill] sm:$0xff] }
 0x767   : > { %9958 = vst [vmem:[#allocation50_spill] sm:$0xff] %v7748_v18  ;;  %4702 = vmatmul.msk.bf16.gmra.mxu3 %vm1664_vm0, %v3688_v5 }
 0x768   : > { %9961 = vst [vmem:[#allocation52_spill] sm:$0xff] %v7754_v15 }
 0x769   : > { %v7759_v6 = vpop.f32.mrf.mxu0  ;;  %v2341_v18 = vpop.f32.mrf.mxu2 }
 0x76a   : > { %9964 = vst [vmem:[#allocation51_spill] sm:$0xff] %v7759_v6  ;;  %v7763_v16 = vpop.f32.mrf.mxu1  ;;  %v9975_v18 = vld [vmem:[#allocation138_spill] sm:$0xff] }
 0x76b   : > { %v7750_v32 = vld [vmem:[#allocation1] sm:$0xff]  ;;  %9967 = vst [vmem:[#allocation53_spill] sm:$0xff] %v7763_v16 }
 0x76c   : > { %3716 = vst [vmem:[#allocation1] ss:$9 sm:$0xff] %v9959_v57  ;;  %v9968_v57 = vld [vmem:[#allocation135_spill] sm:$0xff]  ;;  %v9982_v16 = vld [vmem:[#allocation153_spill] sm:$0xff] }
 0x76d   : > { %3717 = vst [vmem:[#allocation1 + $0x1] ss:$9 sm:$0xff] %v9960_v26  ;;  %v9969_v26 = vld [vmem:[#allocation136_spill] sm:$0xff]  ;;  %4688 = vmatmul.msk.bf16.gmra.mxu2 %vm1664_vm0, %v7455_v9  ;;  %v9979_v9 = vld [vmem:[#allocation151_spill] sm:$0xff] }
 0x76e   : > { %3718 = vst [vmem:[#allocation1 + $0x2] ss:$9 sm:$0xff] %v9962_v31  ;;  %v7767_v15 = vpop.f32.mrf.mxu3 }
 0x76f   : > { %3719 = vst [vmem:[#allocation1 + $0x3] ss:$9 sm:$0xff] %v9963_v46 }
 0x770   : > { %3720 = vst [vmem:[#allocation1 + $0x4] ss:$9 sm:$0xff] %v9965_v36 }
 0x771   : > { %3721 = vst [vmem:[#allocation1 + $0x5] ss:$9 sm:$0xff] %v9966_v3  ;;  %v7771_v5 = vpop.f32.mrf.mxu0  ;;  %v7775_v31 = vpop.f32.mrf.mxu2  ;;  %v9974_v3 = vld [vmem:[#allocation137_spill] sm:$0xff] }
 0x772   : > { %3722 = vst [vmem:[#allocation1 + $0x6] ss:$9 sm:$0xff] %v9968_v57  ;;  %v7773_v46 = vpop.f32.mrf.mxu1  ;;  %v9976_v57 = vld [vmem:[#allocation148_spill] sm:$0xff] }
 0x773   : > { %3723 = vst [vmem:[#allocation1 + $0x7] ss:$9 sm:$0xff] %v9969_v26 }
 0x774   : > { %9970 = vst [vmem:[#allocation54_spill] sm:$0xff] %v7767_v15  ;;  %v9978_v15 = vld [vmem:[#allocation150_spill] sm:$0xff] }
 0x775   : > { %9971 = vst [vmem:[#allocation56_spill] sm:$0xff] %v7771_v5  ;;  %v9981_v5 = vld [vmem:[#allocation152_spill] sm:$0xff] }
 0x776   : > { %9972 = vst [vmem:[#allocation65_spill] sm:$0xff] %v7773_v46  ;;  %v7782_v26 = vpop.f32.mrf.mxu3 }
 0x777   : > { %9973 = vst [vmem:[#allocation67_spill] sm:$0xff] %v7775_v31  ;;  %4703 = vmatmul.msk.bf16.gmra.mxu3 %vm1664_vm0, %v7689_v41 }
 0x778   : > { %9977 = vst [vmem:[#allocation68_spill] sm:$0xff] %v7782_v26 }
 0x779   : > { %v7788_v46 = vpop.f32.mrf.mxu0 }
 0x77a   : > { %v7777_v36 = vld [vmem:[#allocation1] sm:$0xff]  ;;  %9980 = vst [vmem:[#allocation69_spill] sm:$0xff] %v7788_v46  ;;  %v9990_v46 = vld [vmem:[#allocation167_spill] sm:$0xff] }
 0x77b   : > { %3725 = vst [vmem:[#allocation1] ss:$9 sm:$0xff] %v9974_v3  ;;  %v7792_v3 = vpop.f32.mrf.mxu1 }
 0x77c   : > { %3726 = vst [vmem:[#allocation1 + $0x1] ss:$9 sm:$0xff] %v9975_v18  ;;  %v7794_v18 = vpop.f32.mrf.mxu2 }
 0x77d   : > { %3727 = vst [vmem:[#allocation1 + $0x2] ss:$9 sm:$0xff] %v9976_v57  ;;  %v9985_v57 = vld [vmem:[#allocation154_spill] sm:$0xff]  ;;  %4689 = vmatmul.msk.bf16.gmra.mxu2 %vm1664_vm0, %v7494_v44 }
 0x77e   : > { %3728 = vst [vmem:[#allocation1 + $0x3] ss:$9 sm:$0xff] %v9978_v15  ;;  %v7797_v26 = vpop.f32.mrf.mxu3  ;;  %v9993_v44 = vld [vmem:[#allocation170_spill] sm:$0xff] }
 0x77f   : > { %3729 = vst [vmem:[#allocation1 + $0x4] ss:$9 sm:$0xff] %v9979_v9 }
 0x780   : > { %3730 = vst [vmem:[#allocation1 + $0x5] ss:$9 sm:$0xff] %v9981_v5 }
 0x781   : > { %3731 = vst [vmem:[#allocation1 + $0x6] ss:$9 sm:$0xff] %v9982_v16  ;;  %v7801_v41 = vpop.f32.mrf.mxu0  ;;  %v9988_v16 = vld [vmem:[#allocation155_spill] sm:$0xff] }
 0x782   : > { %9983 = vst [vmem:[#allocation70_spill] sm:$0xff] %v7792_v3  ;;  %v9989_v3 = vld [vmem:[#allocation157_spill] sm:$0xff] }
 0x783   : > { %9984 = vst [vmem:[#allocation71_spill] sm:$0xff] %v7794_v18  ;;  %v7805_v9 = vpop.f32.mrf.mxu1  ;;  %v9992_v18 = vld [vmem:[#allocation169_spill] sm:$0xff] }
 0x784   : > { %3732 = vst [vmem:[#allocation1 + $0x7] ss:$9 sm:$0xff] %v9985_v57  ;;  %v7807_v5 = vpop.f32.mrf.mxu2  ;;  %v9991_v57 = vld [vmem:[#allocation168_spill] sm:$0xff] }
 0x785   : > { %9986 = vst [vmem:[#allocation73_spill] sm:$0xff] %v7805_v9 }
 0x786   : > { %9987 = vst [vmem:[#allocation74_spill] sm:$0xff] %v7807_v5  ;;  %v7813_v6 = vpop.f32.mrf.mxu3  ;;  %v9995_v5 = vld [vmem:[#allocation171_spill] sm:$0xff] }
 0x787   : > { %4704 = vmatmul.msk.bf16.gmra.mxu3 %vm1664_vm0, %v7721_v45 }
 0x789   : > { %v7819_v31 = vpop.f32.mrf.mxu0 }
 0x78a   : > { %9994 = vst [vmem:[#allocation84_spill] sm:$0xff] %v7819_v31 }
 0x78b   : > { %v7803_v15 = vld [vmem:[#allocation1] sm:$0xff] }
 0x78c   : > { %3734 = vst [vmem:[#allocation1] ss:$9 sm:$0xff] %v9988_v16  ;;  %v9996_v16 = vld [vmem:[#allocation172_spill] sm:$0xff] }
 0x78d   : > { %3735 = vst [vmem:[#allocation1 + $0x1] ss:$9 sm:$0xff] %v9989_v3  ;;  %v7823_v3 = vpop.f32.mrf.mxu1  ;;  %4690 = vmatmul.msk.bf16.gmra.mxu2 %vm1664_vm0, %v7573_v42  ;;  %v10008_v42 = vld [vmem:[#allocation189_spill] sm:$0xff] }
 0x78e   : > { %3736 = vst [vmem:[#allocation1 + $0x2] ss:$9 sm:$0xff] %v9990_v46  ;;  %v7825_v46 = vpop.f32.mrf.mxu2 }
 0x78f   : > { %3737 = vst [vmem:[#allocation1 + $0x3] ss:$9 sm:$0xff] %v9991_v57  ;;  %v7827_v57 = vpop.f32.mrf.mxu3 }
 0x790   : > { %3738 = vst [vmem:[#allocation1 + $0x4] ss:$9 sm:$0xff] %v9992_v18 }
 0x791   : > { %3739 = vst [vmem:[#allocation1 + $0x5] ss:$9 sm:$0xff] %v9993_v44  ;;  %v7831_v18 = vpop.f32.mrf.mxu0  ;;  %v10001_v44 = vld [vmem:[#allocation173_spill] sm:$0xff] }
 0x792   : > { %3740 = vst [vmem:[#allocation1 + $0x6] ss:$9 sm:$0xff] %v9995_v5 }
 0x793   : > { %3741 = vst [vmem:[#allocation1 + $0x7] ss:$9 sm:$0xff] %v9996_v16  ;;  %v10004_v16 = vld [vmem:[#allocation175_spill] sm:$0xff] }
 0x794   : > { %9997 = vst [vmem:[#allocation86_spill] sm:$0xff] %v7823_v3  ;;  %v10005_v3 = vld [vmem:[#allocation185_spill] sm:$0xff] }
 0x795   : > { %9998 = vst [vmem:[#allocation85_spill] sm:$0xff] %v7825_v46  ;;  %v7836_v62 = vpop.f32.mrf.mxu1  ;;  %v10006_v46 = vld [vmem:[#allocation186_spill] sm:$0xff] }
 0x796   : > { %9999 = vst [vmem:[#allocation87_spill] sm:$0xff] %v7831_v18  ;;  %v7838_v5 = vpop.f32.mrf.mxu2 }
 0x797   : > { %10002 = vst [vmem:[#allocation90_spill] sm:$0xff] %v7836_v62  ;;  %v2601_v63 = vpop.f32.mrf.mxu3  ;;  %4705 = vmatmul.msk.bf16.gmra.mxu3 %vm1664_vm0, %v7750_v32  ;;  %v10010_v62 = vld [vmem:[#allocation191_spill] sm:$0xff] }
 0x798   : > { %10003 = vst [vmem:[#allocation91_spill] sm:$0xff] %v7838_v5 }
 0x79a   : > { %v7833_v45 = vld [vmem:[#allocation1] sm:$0xff] }
 0x79b   : > { %10000 = vst [vmem:[#allocation88_spill] sm:$0xff] %v7833_v45  ;;  %v10009_v45 = vld [vmem:[#allocation190_spill] sm:$0xff] }
 0x79c   : > { %3743 = vst [vmem:[#allocation1] ss:$9 sm:$0xff] %v10001_v44  ;;  %v2908_v44 = vpop.f32.mrf.mxu0 }
 0x79d   : > { %3744 = vst [vmem:[#allocation1 + $0x1] ss:$9 sm:$0xff] %v10004_v16  ;;  %v3288_v5 = vpop.f32.mrf.mxu1  ;;  %4691 = vmatmul.msk.bf16.gmra.mxu2 %vm1664_vm0, %v7596_v1 }
 0x79e   : > { %3745 = vst [vmem:[#allocation1 + $0x2] ss:$9 sm:$0xff] %v10005_v3  ;;  %v7849_v18 = vpop.f32.mrf.mxu2  ;;  %v1970_v3 = vadd.f32 %v7402_v56, %v7394_v10  ;;  %v10013_v56 = vld [vmem:[#allocation237_spill] sm:$0xff] }
 0x79f   : > { %3746 = vst [vmem:[#allocation1 + $0x3] ss:$9 sm:$0xff] %v10006_v46 }
 0x7a0   : > { %3747 = vst [vmem:[#allocation1 + $0x4] ss:$9 sm:$0xff] %v10007_v2  ;;  %v1972_v2 = vadd.f32 %v7417_v52, %v7409_v51  ;;  %v2361_v46 = vadd.f32 %v7659_v35, %v1970_v3  ;;  %v1945_v51 = vadd.f32 %v7184_v50, %v10013_v56  ;;  %v10014_v52 = vld [vmem:[#allocation194_spill] sm:$0xff] }
 0x7a1   : > { %3748 = vst [vmem:[#allocation1 + $0x5] ss:$9 sm:$0xff] %v10008_v42  ;;  %v2603_v42 = vpop.f32.mrf.mxu3 }
 0x7a2   : > { %3749 = vst [vmem:[#allocation1 + $0x6] ss:$9 sm:$0xff] %v10009_v45  ;;  %v2362_v16 = vadd.f32 %v7670_v28, %v1972_v2  ;;  %v2638_v32 = vadd.f32 %v2601_v63, %v2361_v46  ;;  %v10015_v63 = vld [vmem:[#allocation202_spill] sm:$0xff]  ;;  %v10016_v2 = vld [vmem:[#allocation203_spill] sm:$0xff]  ;;  %v10017_v46 = vld [vmem:[#allocation204_spill] sm:$0xff] }
 0x7a3   : > { %3750 = vst [vmem:[#allocation1 + $0x7] ss:$9 sm:$0xff] %v10010_v62 }
 0x7a4   : > { %10011 = vst [vmem:[#allocation2_spill] sm:$0xff] %v7849_v18  ;;  %v2639_v31 = vadd.f32 %v2603_v42, %v2362_v16  ;;  %v2910_v45 = vpop.f32.mrf.mxu0  ;;  %v10012_v18 = vld [vmem:[#allocation192_spill] sm:$0xff]  ;;  %v2945_v9 = vadd.f32 %v2908_v44, %v2638_v32  ;;  %v10019_v44 = vld [vmem:[#allocation206_spill] sm:$0xff]  ;;  %v10020_v16 = vld [vmem:[#allocation207_spill] sm:$0xff] }
 0x7a5   : > { %v3290_v35 = vpop.f32.mrf.mxu1 }
 0x7a6   : > { %v2946_v10 = vadd.f32 %v2910_v45, %v2639_v31  ;;  %v7865_v28 = vpop.f32.mrf.mxu2  ;;  %v7868_v3 = vadd.f32 %v3288_v5, %v2945_v9  ;;  %v2351_v31 = vadd.f32 %v7451_v38, %v1945_v51  ;;  %v1975_v45 = vadd.f32 %v7435_v19, %v7427_v22  ;;  %v10022_v19 = vld [vmem:[#allocation210_spill] sm:$0xff] }
 0x7a7   : > { %4706 = vmatmul.msk.bf16.gmra.mxu3 %vm1664_vm0, %v7777_v36  ;;  %v1977_v38 = vadd.f32 %v7449_v29, %v7441_v13 }
 0x7a8   : > { %v7870_v1 = vadd.f32 %v3290_v35, %v2946_v10  ;;  %v2628_v5 = vadd.f32 %v7691_v12, %v2351_v31  ;;  %v2363_v10 = vadd.f32 %v7685_v34, %v1975_v45  ;;  %v10023_v34 = vld [vmem:[#allocation211_spill] sm:$0xff]  ;;  %v10029_v45 = vld [vmem:[#allocation12_spill] sm:$0xff] }
 0x7a9   : > { %v2606_v50 = vpop.f32.mrf.mxu3  ;;  %v2364_v56 = vadd.f32 %v7699_v25, %v1977_v38 }
 0x7aa   : > { %v7859_v62 = vld [vmem:[#allocation1] sm:$0xff]  ;;  %v2935_v36 = vadd.f32 %v7695_v37, %v2628_v5  ;;  %v2640_v35 = vadd.f32 %v2606_v50, %v2363_v10  ;;  %v10028_v5 = vld [vmem:[#allocation246_spill] sm:$0xff] }
 0x7ab   : > { %3752 = vst [vmem:[#allocation1] ss:$9 sm:$0xff] %v10012_v18  ;;  %v10018_v18 = vld [vmem:[#allocation205_spill] sm:$0xff] }
 0x7ac   : > { %3753 = vst [vmem:[#allocation1 + $0x1] ss:$9 sm:$0xff] %v10014_v52  ;;  %v2913_v9 = vpop.f32.mrf.mxu0  ;;  %v3315_v25 = vadd.f32 %v7701_v24, %v2935_v36  ;;  %v1965_v36 = vadd.f32 %v7377_v11, %v7321_v14  ;;  %v1982_v14 = vadd.f32 %v7496_v27, %v7481_v49 }
 0x7ad   : > { %3754 = vst [vmem:[#allocation1 + $0x2] ss:$9 sm:$0xff] %v10015_v63  ;;  %v3293_v42 = vpop.f32.mrf.mxu1  ;;  %4692 = vmatmul.msk.bf16.gmra.mxu2 %vm1664_vm0, %v7613_v55  ;;  %v10021_v63 = vld [vmem:[#allocation208_spill] sm:$0xff]  ;;  %v2947_v13 = vadd.f32 %v2913_v9, %v2640_v35  ;;  %v10025_v55 = vld [vmem:[#allocation242_spill] sm:$0xff] }
 0x7ae   : > { %3755 = vst [vmem:[#allocation1 + $0x3] ss:$9 sm:$0xff] %v10016_v2  ;;  %v7881_v32 = vpop.f32.mrf.mxu2  ;;  %v2366_v27 = vadd.f32 %v7733_v59, %v1982_v14  ;;  %v10036_v59 = vld [vmem:[#allocation84_spill] sm:$0xff] }
 0x7af   : > { %3756 = vst [vmem:[#allocation1 + $0x4] ss:$9 sm:$0xff] %v10017_v46  ;;  %v10024_v46 = vld [vmem:[#allocation212_spill] sm:$0xff] }
 0x7b0   : > { %3757 = vst [vmem:[#allocation1 + $0x5] ss:$9 sm:$0xff] %v10018_v18  ;;  %v7899_v18 = vadd.f32 %v3293_v42, %v2947_v13  ;;  %v1962_v42 = vadd.f32 %v7365_v0, %v10029_v45  ;;  %v2359_v13 = vadd.f32 %v7633_v20, %v1965_v36  ;;  %v10042_v45 = vld [vmem:[#allocation90_spill] sm:$0xff] }
 0x7b1   : > { %3758 = vst [vmem:[#allocation1 + $0x6] ss:$9 sm:$0xff] %v10019_v44  ;;  %v2608_v51 = vpop.f32.mrf.mxu3  ;;  %v10026_v44 = vld [vmem:[#allocation243_spill] sm:$0xff] }
 0x7b2   : > { %3759 = vst [vmem:[#allocation1 + $0x7] ss:$9 sm:$0xff] %v10020_v16  ;;  %v2641_v12 = vadd.f32 %v2608_v51, %v2364_v56  ;;  %v10027_v16 = vld [vmem:[#allocation245_spill] sm:$0xff]  ;;  %v4714_v56 = vld [vmem:[%s8589_s1 + $0x10] sm:$0x3]  ;;  %v1967_v51 = vadd.f32 %v7385_v4, %v7331_v21  ;;  %v1985_v21 = vadd.f32 %v7536_v30, %v7518_v8  ;;  %v3609_v4 = vsel %vm332_vm3, %v7487_v17, %v7504_v60 }
 0x7b3   : > { %v3611_v30 = vrot.slane %v3609_v4, 3  ;;  %v10045_v4 = vld [vmem:[#allocation14_spill] sm:$0xff]  ;;  %vm4345_vm3 = vcmask 1043456  }
 0x7b4   : > { %v2915_v22 = vpop.f32.mrf.mxu0  ;;  %v2367_v60 = vadd.f32 %v7746_v40, %v1985_v21  ;;  %v10037_v40 = vld [vmem:[#allocation87_spill] sm:$0xff]  ;;  %v10044_v21 = vld [vmem:[#allocation25_spill] sm:$0xff] }
 0x7b5   : > { %v2948_v29 = vadd.f32 %v2915_v22, %v2641_v12  ;;  %v3295_v37 = vpop.f32.mrf.mxu1  ;;  %v4196_v12 = vsel %vm10030_vm2, %v4714_v56, 0  ;;  %v1980_v22 = vadd.f32 %v7469_v7, %v7460_v43  ;;  %v2360_v43 = vadd.f32 %v7643_v54, %v1967_v51 }
 0x7b6   : > { %v3540_v2 = vpop.f32.mrf.mxu2  ;;  %4205 = vmatpush.bf16.msra.mxu0 %v4196_v12 }
 0x7b7   : > { %v7901_v31 = vadd.f32 %v3295_v37, %v2948_v29  ;;  %v7904_v50 = vadd.f32 %v3540_v2, %v3315_v25  ;;  %4707 = vmatmul.msk.bf16.gmra.mxu3 %vm1664_vm0, %v7803_v15  ;;  %v2358_v15 = vadd.f32 %v7616_v39, %v1962_v42  ;;  %v10033_v39 = vld [vmem:[#allocation250_spill] sm:$0xff]  ;;  %v2365_v8 = vadd.f32 %v7713_v33, %v1980_v22  ;;  %v10035_v33 = vld [vmem:[#allocation73_spill] sm:$0xff]  ;;  %v10038_v2 = vld [vmem:[#allocation260_spill] sm:$0xff] }
 0x7b9   : > { %v7890_v52 = vld [vmem:[#allocation1] sm:$0xff]  ;;  %v2611_v9 = vpop.f32.mrf.mxu3  ;;  %v2635_v7 = vadd.f32 %v7797_v26, %v2358_v15  ;;  %v2636_v26 = vadd.f32 %v7813_v6, %v2359_v13  ;;  %v10047_v13 = vld [vmem:[#allocation255_spill] sm:$0xff] }
 0x7ba   : > { %3761 = vst [vmem:[#allocation1] ss:$9 sm:$0xff] %v10021_v63  ;;  %v10031_v63 = vld [vmem:[#allocation247_spill] sm:$0xff] }
 0x7bb   : > { %3762 = vst [vmem:[#allocation1 + $0x1] ss:$9 sm:$0xff] %v10022_v19  ;;  %v10032_v19 = vld [vmem:[#allocation249_spill] sm:$0xff]  ;;  %v2942_v20 = vadd.f32 %v7801_v41, %v2635_v7  ;;  %v2943_v25 = vadd.f32 %v10036_v59, %v2636_v26  ;;  %v2642_v41 = vadd.f32 %v2611_v9, %v2365_v8  ;;  %v10049_v8 = vld [vmem:[#allocation262_spill] sm:$0xff] }
 0x7bc   : > { %3763 = vst [vmem:[#allocation1 + $0x2] ss:$9 sm:$0xff] %v10023_v34  ;;  %v2918_v24 = vpop.f32.mrf.mxu0 }
 0x7bd   : > { %3764 = vst [vmem:[#allocation1 + $0x3] ss:$9 sm:$0xff] %v10024_v46  ;;  %v3298_v38 = vpop.f32.mrf.mxu1  ;;  %v7957_v34 = vadd.f32 %v10035_v33, %v2942_v20  ;;  %v3659_v46 = vshll.u32 %v3611_v30, 16  ;;  %v2949_v56 = vadd.f32 %v2918_v24, %v2642_v41  ;;  %v10046_v24 = vld [vmem:[#allocation261_spill] sm:$0xff] }
 0x7be   : > { %3765 = vst [vmem:[#allocation1 + $0x4] ss:$9 sm:$0xff] %v10025_v55  ;;  %v7913_v10 = vpop.f32.mrf.mxu2 }
 0x7bf   : > { %3766 = vst [vmem:[#allocation1 + $0x5] ss:$9 sm:$0xff] %v10026_v44  ;;  %v10040_v44 = vld [vmem:[#allocation22_spill] sm:$0xff]  ;;  %v7973_v12 = vadd.f32 %v3298_v38, %v2949_v56  ;;  %v10048_v38 = vld [vmem:[#allocation16_spill] sm:$0xff] }
 0x7c0   : > { %3767 = vst [vmem:[#allocation1 + $0x6] ss:$9 sm:$0xff] %v10027_v16  ;;  %v10041_v16 = vld [vmem:[#allocation86_spill] sm:$0xff] }
 0x7c1   : > { %3768 = vst [vmem:[#allocation1 + $0x7] ss:$9 sm:$0xff] %v10028_v5  ;;  %v2613_v0 = vpop.f32.mrf.mxu3  ;;  %v7966_v5 = vadd.f32 %v10041_v16, %v2943_v25 }
 0x7c2   : > { %v2643_v55 = vadd.f32 %v2613_v0, %v2366_v27  ;;  %v10063_v0 = vld [vmem:[#allocation266_spill] sm:$0xff] }
 0x7c4   : > { %v2920_v11 = vpop.f32.mrf.mxu0 }
 0x7c5   : > { %v3300_v29 = vpop.f32.mrf.mxu1  ;;  %v2950_v36 = vadd.f32 %v2920_v11, %v2643_v55  ;;  %v10057_v55 = vld [vmem:[#allocation270_spill] sm:$0xff] }
 0x7c6   : > { %v7942_v49 = vpop.f32.mrf.mxu2 }
 0x7c7   : > { %v7977_v22 = vadd.f32 %v3300_v29, %v2950_v36  ;;  %v10050_v29 = vld [vmem:[#allocation214_spill] sm:$0xff]  ;;  %v10061_v36 = vld [vmem:[#allocation253_spill] sm:$0xff] }
 0x7c8   : > { %v7922_v35 = vld [vmem:[#allocation1] sm:$0xff] }
 0x7c9   : > { %3770 = vst [vmem:[#allocation1] ss:$9 sm:$0xff] %v10031_v63 }
 0x7ca   : > { %3771 = vst [vmem:[#allocation1 + $0x1] ss:$9 sm:$0xff] %v10032_v19 }
 0x7cb   : > { %3772 = vst [vmem:[#allocation1 + $0x2] ss:$9 sm:$0xff] %v10033_v39  ;;  %v1927_v39 = vadd.f32 %v10045_v4, %v10044_v21 }
 0x7cc   : > { %3774 = vst [vmem:[#allocation1 + $0x3] ss:$9 sm:$0xff] %v7542_v61  ;;  %v10034_v61 = vld [vmem:[#allocation13_spill] sm:$0xff] }
 0x7cd   : > { %3776 = vst [vmem:[#allocation1 + $0x4] ss:$9 sm:$0xff] %v7546_v47  ;;  %v1925_v54 = vadd.f32 %v10034_v61, %v7398_v48  ;;  %v2637_v47 = vadd.f32 %v7827_v57, %v2360_v43  ;;  %v10039_v48 = vld [vmem:[#allocation88_spill] sm:$0xff]  ;;  %v2923_v57 = vpop.f32.mrf.mxu0  ;;  %v3303_v15 = vpop.f32.mrf.mxu1  ;;  %v2344_v27 = vadd.f32 %v10050_v29, %v1927_v39  ;;  %v10051_v61 = vld [vmem:[#allocation3_spill] sm:$0xff] }
 0x7ce   : > { %3778 = vst [vmem:[#allocation1 + $0x5] ss:$9 sm:$0xff] %v7550_v53  ;;  %v2616_v53 = vpop.f32.mrf.mxu3  ;;  %4708 = vmatmul.msk.bf16.gmra.mxu3 %vm1664_vm0, %v10039_v48  ;;  %v7971_v9 = vpop.f32.mrf.mxu2  ;;  %v10068_v29 = vld [vmem:[#allocation71_spill] sm:$0xff] }
 0x7cf   : > { %3780 = vst [vmem:[#allocation1 + $0x6] ss:$9 sm:$0xff] %v7554_v58  ;;  %v2944_v37 = vadd.f32 %v10037_v40, %v2637_v47  ;;  %v3654_v58 = vshrl.u32 %v10038_v2, 16  ;;  %v2644_v6 = vadd.f32 %v2616_v53, %v2367_v60  ;;  %v10053_v47 = vld [vmem:[#allocation264_spill] sm:$0xff]  ;;  %v10054_v53 = vld [vmem:[#allocation269_spill] sm:$0xff] }
 0x7d0   : > { %3782 = vst [vmem:[#allocation1 + $0x7] ss:$9 sm:$0xff] %v7559_v23  ;;  %v2343_v23 = vadd.f32 %v10040_v44, %v1925_v54  ;;  %v10052_v54 = vld [vmem:[#allocation282_spill] sm:$0xff]  ;;  %v2621_v59 = vadd.f32 %v10054_v53, %v2344_v27  ;;  %v10059_v44 = vld [vmem:[#allocation67_spill] sm:$0xff]  ;;  %v10071_v53 = vld [vmem:[#allocation5_spill] sm:$0xff] }
 0x7d1   : > { %v7969_v42 = vadd.f32 %v10042_v45, %v2944_v37  ;;  %v2951_v51 = vadd.f32 %v2923_v57, %v2644_v6  ;;  %v3661_v63 = vsel %vm4874_vm7, %v3654_v58, %v3659_v46  ;;  %v1930_v26 = vadd.f32 %v10052_v54, %v10051_v61  ;;  %v10055_v58 = vld [vmem:[#allocation8_spill] sm:$0xff]  ;;  %v10056_v46 = vld [vmem:[#allocation33_spill] sm:$0xff]  ;;  %v10058_v6 = vld [vmem:[#allocation23_spill] sm:$0xff] }
 0x7d2   : > { %v2620_v11 = vadd.f32 %v10046_v24, %v2343_v23  ;;  %v2928_v48 = vadd.f32 %v10057_v55, %v2621_v59  ;;  %v10072_v59 = vld [vmem:[#allocation284_spill] sm:$0xff] }
 0x7d3   : > { %v7979_v19 = vadd.f32 %v3303_v15, %v2951_v51  ;;  %v2345_v57 = vadd.f32 %v10058_v6, %v1930_v26  ;;  %v10062_v51 = vld [vmem:[#allocation283_spill] sm:$0xff] }
 0x7d4   : > { %v2927_v30 = vadd.f32 %v10049_v8, %v2620_v11  ;;  %v1932_v15 = vadd.f32 %v10062_v51, %v10061_v36  ;;  %v10065_v11 = vld [vmem:[#allocation21_spill] sm:$0xff]  ;;  %v10067_v8 = vld [vmem:[#allocation24_spill] sm:$0xff] }
 0x7d5   : > { %v2925_v7 = vpop.f32.mrf.mxu0  ;;  %v3305_v20 = vpop.f32.mrf.mxu1  ;;  %v10076_v36 = vld [vmem:[#allocation273_spill] sm:$0xff] }
 0x7d6   : > { %v2618_v43 = vpop.f32.mrf.mxu3  ;;  %v7990_v60 = vpop.f32.mrf.mxu2  ;;  %v3307_v33 = vadd.f32 %v10053_v47, %v2927_v30  ;;  %v2346_v30 = vadd.f32 %v10067_v8, %v1932_v15  ;;  %v10069_v47 = vld [vmem:[#allocation45_spill] sm:$0xff]  ;;  %v10077_v15 = vld [vmem:[#allocation219_spill] sm:$0xff] }
 0x7d7   : > { %v7981_v14 = vld [vmem:[#allocation1] sm:$0xff] }
 0x7d8   : > { %3785 = vst [vmem:[#allocation1] ss:$9 sm:$0xff] %v10047_v13  ;;  %v3584_v23 = vadd.f32 %v10059_v44, %v3307_v33 }
 0x7d9   : > { %3787 = vst [vmem:[#allocation1 + $0x1] ss:$9 sm:$0xff] %v3661_v63  ;;  %v10064_v63 = vld [vmem:[#allocation267_spill] sm:$0xff] }
 0x7da   : > { %3917 = vst [vmem:[#allocation1 + $0x20] sm:$0xff] %v10048_v38  ;;  %v2622_v21 = vadd.f32 %v10064_v63, %v2345_v57  ;;  %v10066_v38 = vld [vmem:[#allocation268_spill] sm:$0xff] }
 0x7dc   : > { %v2929_v7 = vadd.f32 %v10066_v38, %v2622_v21 }
 0x7de   : > { %4709 = vmatmul.msk.bf16.gmra.mxu3 %vm1664_vm0, %v7859_v62  ;;  %v8013_v16 = vpop.f32.mrf.mxu2  ;;  %v3827_v45 = vpop.f32.mrf.mxu3  ;;  %v3308_v62 = vadd.f32 %v10063_v0, %v2928_v48  ;;  %v10074_v48 = vld [vmem:[#allocation272_spill] sm:$0xff] }
 0x7df   : > { %v8015_v56 = vadd.f32 %v3827_v45, %v3584_v23  ;;  %v2623_v6 = vadd.f32 %v10074_v48, %v2346_v30  ;;  %v10075_v45 = vld [vmem:[#allocation38_spill] sm:$0xff] }
 0x7e0   : > { %v7996_v25 = vld [vmem:[#allocation1] sm:$0xff]  ;;  %v3585_v27 = vadd.f32 %v10068_v29, %v3308_v62  ;;  %v10078_v62 = vld [vmem:[#allocation74_spill] sm:$0xff] }
 0x7e1   : > { %v7998_v40 = vld [vmem:[#allocation1 + $0x20] ss:$4 sm:$0xff]  ;;  %v8000_v37 = vld [vmem:[#allocation1 + $0x21] ss:$4 sm:$0xff]  ;;  %v8002_v41 = vld [vmem:[#allocation1 + $0x22] ss:$4 sm:$0xff]  ;;  %v2930_v51 = vadd.f32 %v10076_v36, %v2623_v6 }
 0x7e2   : > { %v8004_v2 = vld [vmem:[#allocation1 + $0x23] ss:$4 sm:$0xff]  ;;  %3916 = vst [vmem:[#allocation1] sm:$0xff] %v10055_v58  ;;  %v1935_v58 = vadd.f32 %v10072_v59, %v10071_v53 }
 0x7e3   : > { %3933 = vst [vmem:[#allocation1 + $0x20] sm:$0xff] %v10056_v46  ;;  %v10073_v46 = vld [vmem:[#allocation271_spill] sm:$0xff]  ;;  %v10083_v59 = vld [vmem:[#allocation274_spill] sm:$0xff] }
 0x7e4   : > { %10060 = vst [vmem:[#allocation92_spill] sm:$0xff] %v8015_v56  ;;  %v3309_v55 = vadd.f32 %v10073_v46, %v2929_v7  ;;  %v2347_v0 = vadd.f32 %v10077_v15, %v1935_v58  ;;  %v3310_v58 = vadd.f32 %v10083_v59, %v2930_v51  ;;  %v10084_v46 = vld [vmem:[#allocation275_spill] sm:$0xff] }
 0x7e5   : > { %v10085_v36 = vld [vmem:[#allocation55_spill] sm:$0xff] }
 0x7e6   : > { %v8039_v54 = vpop.f32.mrf.mxu2  ;;  %v3829_v26 = vpop.f32.mrf.mxu3  ;;  %v3586_v63 = vadd.f32 %v10078_v62, %v3309_v55  ;;  %v2624_v55 = vadd.f32 %v10084_v46, %v2347_v0  ;;  %v10087_v62 = vld [vmem:[#allocation235_spill] sm:$0xff] }
 0x7e7   : > { %v8042_v33 = vadd.f32 %v3829_v26, %v3585_v27  ;;  %v10080_v27 = vld [vmem:[#allocation59_spill] sm:$0xff]  ;;  %v10081_v26 = vld [vmem:[#allocation216_spill] sm:$0xff] }
 0x7e9   : > { %v8021_v4 = vld [vmem:[#allocation1 + $0x1] ss:$4 sm:$0xff]  ;;  %v8023_v39 = vld [vmem:[#allocation1 + $0x2] ss:$4 sm:$0xff]  ;;  %v8025_v24 = vld [vmem:[#allocation1 + $0x3] ss:$4 sm:$0xff] }
 0x7ea   : > { %3932 = vst [vmem:[#allocation1] sm:$0xff] %v10065_v11  ;;  %v8028_v13 = vld [vmem:[#allocation1 + $0x20] ss:$4 sm:$0xff]  ;;  %v8030_v43 = vld [vmem:[#allocation1 + $0x21] ss:$4 sm:$0xff] }
 0x7eb   : > { %v8035_v20 = vld [vmem:[#allocation1 + $0x22] ss:$4 sm:$0xff]  ;;  %v8037_v61 = vld [vmem:[#allocation1 + $0x23] ss:$4 sm:$0xff]  ;;  %10070 = vst [vmem:[#allocation103_spill] sm:$0xff] %v8042_v33 }
 0x7ec   : > { %3942 = vst [vmem:[#allocation1 + $0x20] sm:$0xff] %v10069_v47  ;;  %v10082_v47 = vld [vmem:[#allocation285_spill] sm:$0xff] }
 0x7ed   : > { %v1937_v53 = vadd.f32 %v10082_v47, %v10081_v26 }
 0x7ee   : > { %4710 = vmatmul.msk.bf16.gmra.mxu3 %vm1664_vm0, %v7890_v52  ;;  %v3557_v7 = vpop.f32.mrf.mxu2  ;;  %v3832_v8 = vpop.f32.mrf.mxu3 }
 0x7ef   : > { %v8069_v52 = vadd.f32 %v3557_v7, %v7957_v34  ;;  %v8071_v29 = vadd.f32 %v3832_v8, %v3586_v63  ;;  %v10086_v34 = vld [vmem:[#allocation276_spill] sm:$0xff]  ;;  %v2348_v63 = vadd.f32 %v10087_v62, %v1937_v53  ;;  %v10088_v7 = vld [vmem:[#allocation85_spill] sm:$0xff]  ;;  %v10095_v53 = vld [vmem:[#allocation259_spill] sm:$0xff] }
 0x7f0   : > { %v2931_v15 = vadd.f32 %v10086_v34, %v2624_v55  ;;  %v3587_v8 = vadd.f32 %v10088_v7, %v3310_v58  ;;  %v10094_v55 = vld [vmem:[#allocation78_spill] sm:$0xff]  ;;  %v10097_v62 = vld [vmem:[#allocation281_spill] sm:$0xff] }
 0x7f1   : > { %v8048_v57 = vld [vmem:[#allocation1 + $0x1] ss:$4 sm:$0xff]  ;;  %v8050_v44 = vld [vmem:[#allocation1 + $0x2] ss:$4 sm:$0xff]  ;;  %v8052_v23 = vld [vmem:[#allocation1 + $0x3] ss:$4 sm:$0xff] }
 0x7f2   : > { %3941 = vst [vmem:[#allocation1] sm:$0xff] %v10075_v45  ;;  %v10096_v34 = vld [vmem:[#allocation286_spill] sm:$0xff]  ;;  %v3311_v7 = vadd.f32 %v10097_v62, %v2931_v15 }
 0x7f3   : > { %v8060_v21 = vld [vmem:[#allocation1 + $0x20] ss:$4 sm:$0xff]  ;;  %v8062_v11 = vld [vmem:[#allocation1 + $0x21] ss:$4 sm:$0xff]  ;;  %v8064_v38 = vld [vmem:[#allocation1 + $0x22] ss:$4 sm:$0xff]  ;;  %v1940_v58 = vadd.f32 %v10096_v34, %v10095_v53 }
 0x7f4   : > { %v8066_v30 = vld [vmem:[#allocation1 + $0x23] ss:$4 sm:$0xff]  ;;  %10079 = vst [vmem:[#allocation102_spill] sm:$0xff] %v8071_v29 }
 0x7f5   : > { %3951 = vst [vmem:[#allocation1 + $0x20] sm:$0xff] %v10080_v27  ;;  %v10098_v29 = vld [vmem:[#allocation277_spill] sm:$0xff]  ;;  %v10103_v53 = vld [vmem:[#allocation91_spill] sm:$0xff] }
 0x7f6   : > { %v3560_v27 = vpop.f32.mrf.mxu2  ;;  %v3834_v26 = vpop.f32.mrf.mxu3  ;;  %v2625_v33 = vadd.f32 %v10098_v29, %v2348_v63  ;;  %v3588_v34 = vadd.f32 %v10103_v53, %v3311_v7  ;;  %v10112_v53 = vld [vmem:[#allocation280_spill] sm:$0xff] }
 0x7f7   : > { %v8095_v59 = vadd.f32 %v3560_v27, %v7966_v5  ;;  %v8097_v46 = vadd.f32 %v3834_v26, %v3587_v8  ;;  %v10100_v5 = vld [vmem:[#allocation72_spill] sm:$0xff]  ;;  %v10101_v8 = vld [vmem:[#allocation278_spill] sm:$0xff] }
 0x7f8   : > { %v2932_v27 = vadd.f32 %v10101_v8, %v2625_v33  ;;  %v10102_v26 = vld [vmem:[#allocation26_spill] sm:$0xff]  ;;  %v10109_v33 = vld [vmem:[#allocation256_spill] sm:$0xff]  ;;  %v10110_v8 = vld [vmem:[#allocation287_spill] sm:$0xff] }
 0x7f9   : > { %v8078_v48 = vld [vmem:[#allocation1 + $0x1] ss:$4 sm:$0xff]  ;;  %v8080_v6 = vld [vmem:[#allocation1 + $0x2] ss:$4 sm:$0xff]  ;;  %v8082_v45 = vld [vmem:[#allocation1 + $0x3] ss:$4 sm:$0xff] }
 0x7fa   : > { %3950 = vst [vmem:[#allocation1] sm:$0xff] %v10085_v36 }
 0x7fb   : > { %10092 = vst [vmem:[#allocation106_spill] sm:$0xff] %v8097_v46 }
 0x7fc   : > { %v8088_v47 = vld [vmem:[#allocation1 + $0x20] ss:$4 sm:$0xff]  ;;  %v8090_v51 = vld [vmem:[#allocation1 + $0x21] ss:$4 sm:$0xff]  ;;  %v8092_v0 = vld [vmem:[#allocation1 + $0x22] ss:$4 sm:$0xff] }
 0x7fd   : > { %10089 = vst [vmem:[#allocation104_spill] sm:$0xff] %v8088_v47  ;;  %v8099_v36 = vld [vmem:[#allocation1 + $0x23] ss:$4 sm:$0xff] }
 0x7fe   : > { %10090 = vst [vmem:[#allocation105_spill] sm:$0xff] %v8090_v51  ;;  %4711 = vmatmul.msk.bf16.gmra.mxu3 %vm1664_vm0, %v7922_v35  ;;  %v3562_v15 = vpop.f32.mrf.mxu2  ;;  %v3837_v62 = vpop.f32.mrf.mxu3 }
 0x7ff   : > { %10091 = vst [vmem:[#allocation108_spill] sm:$0xff] %v8092_v0  ;;  %v8119_v29 = vadd.f32 %v3562_v15, %v7969_v42  ;;  %v8121_v63 = vadd.f32 %v3837_v62, %v3588_v34  ;;  %v10116_v62 = vld [vmem:[#allocation89_spill] sm:$0xff] }
 0x800   : > { %10093 = vst [vmem:[#allocation109_spill] sm:$0xff] %v8099_v36 }
 0x801   : > { %3960 = vst [vmem:[#allocation1 + $0x20] sm:$0xff] %v10094_v55  ;;  %v8106_v56 = vld [vmem:[#allocation1 + $0x1] ss:$4 sm:$0xff]  ;;  %v8108_v51 = vld [vmem:[#allocation1 + $0x2] ss:$4 sm:$0xff]  ;;  %v2349_v55 = vadd.f32 %v10102_v26, %v1940_v58  ;;  %v1942_v58 = vadd.f32 %v10110_v8, %v10109_v33 }
 0x802   : > { %v8110_v0 = vld [vmem:[#allocation1 + $0x3] ss:$4 sm:$0xff]  ;;  %10104 = vst [vmem:[#allocation217_spill] sm:$0xff] %v8121_v63 }
 0x803   : > { %10099 = vst [vmem:[#allocation121_spill] sm:$0xff] %v8110_v0  ;;  %v10111_v26 = vld [vmem:[#allocation279_spill] sm:$0xff]  ;;  %v2626_v47 = vadd.f32 %v10112_v53, %v2349_v55  ;;  %v10113_v0 = vld [vmem:[#allocation93_spill] sm:$0xff]  ;;  %v10117_v63 = vld [vmem:[#allocation18_spill] sm:$0xff] }
 0x804   : > { %3959 = vst [vmem:[#allocation1] sm:$0xff] %v10100_v5  ;;  %v3312_v7 = vadd.f32 %v10111_v26, %v2932_v27 }
 0x806   : > { %v3565_v8 = vpop.f32.mrf.mxu2  ;;  %v3839_v27 = vpop.f32.mrf.mxu3 }
 0x807   : > { %v8147_v55 = vadd.f32 %v3565_v8, %v7868_v3  ;;  %v10129_v8 = vld [vmem:[#allocation28_spill] sm:$0xff] }
 0x808   : > { %v8123_v46 = vld [vmem:[#allocation1 + $0x20] ss:$4 sm:$0xff]  ;;  %v8125_v36 = vld [vmem:[#allocation1 + $0x21] ss:$4 sm:$0xff]  ;;  %v8127_v35 = vld [vmem:[#allocation1 + $0x22] ss:$4 sm:$0xff] }
 0x809   : > { %10105 = vst [vmem:[#allocation120_spill] sm:$0xff] %v8123_v46  ;;  %v8129_v5 = vld [vmem:[#allocation1 + $0x23] ss:$4 sm:$0xff] }
 0x80a   : > { %10106 = vst [vmem:[#allocation122_spill] sm:$0xff] %v8125_v36  ;;  %v10119_v46 = vld [vmem:[#allocation2_spill] sm:$0xff] }
 0x80b   : > { %10107 = vst [vmem:[#allocation123_spill] sm:$0xff] %v8127_v35  ;;  %v8136_v42 = vld [vmem:[#allocation1 + $0x1] ss:$4 sm:$0xff]  ;;  %v8138_v34 = vld [vmem:[#allocation1 + $0x2] ss:$4 sm:$0xff]  ;;  %v2933_v35 = vadd.f32 %v10117_v63, %v2626_v47  ;;  %v3589_v33 = vadd.f32 %v10119_v46, %v3312_v7 }
 0x80c   : > { %10108 = vst [vmem:[#allocation125_spill] sm:$0xff] %v8129_v5  ;;  %v8140_v15 = vld [vmem:[#allocation1 + $0x3] ss:$4 sm:$0xff] }
 0x80d   : > { %3969 = vst [vmem:[#allocation1 + $0x20] sm:$0xff] %v10113_v0  ;;  %v10118_v5 = vld [vmem:[#allocation252_spill] sm:$0xff]  ;;  %v8149_v0 = vadd.f32 %v3839_v27, %v3589_v33  ;;  %v10125_v47 = vld [vmem:[#allocation19_spill] sm:$0xff]  ;;  %v10127_v46 = vld [vmem:[#allocation110_spill] sm:$0xff] }
 0x80e   : > { %10114 = vst [vmem:[#allocation124_spill] sm:$0xff] %v8138_v34  ;;  %v2350_v36 = vadd.f32 %v10118_v5, %v1942_v58  ;;  %4712 = vmatmul.msk.bf16.gmra.mxu3 %vm1664_vm0, %v7981_v14  ;;  %v10128_v33 = vld [vmem:[#allocation107_spill] sm:$0xff] }
 0x80f   : > { %10115 = vst [vmem:[#allocation126_spill] sm:$0xff] %v8140_v15 }
 0x810   : > { %3968 = vst [vmem:[#allocation1] sm:$0xff] %v10116_v62  ;;  %v10124_v62 = vld [vmem:[#allocation17_spill] sm:$0xff]  ;;  %v2627_v63 = vadd.f32 %v10125_v47, %v2350_v36  ;;  %v3567_v36 = vpop.f32.mrf.mxu2 }
 0x811   : > { %10120 = vst [vmem:[#allocation129_spill] sm:$0xff] %v8149_v0  ;;  %v3313_v34 = vadd.f32 %v10124_v62, %v2933_v35  ;;  %v3842_v62 = vpop.f32.mrf.mxu3  ;;  %v8174_v47 = vadd.f32 %v3567_v36, %v7870_v1  ;;  %v10131_v0 = vld [vmem:[#allocation30_spill] sm:$0xff] }
 0x812   : > { %v2934_v27 = vadd.f32 %v10129_v8, %v2627_v63  ;;  %v10136_v63 = vld [vmem:[#allocation239_spill] sm:$0xff] }
 0x813   : > { %v3590_v35 = vadd.f32 %v7865_v28, %v3313_v34  ;;  %v10137_v8 = vld [vmem:[#allocation15_spill] sm:$0xff] }
 0x814   : > { %v8151_v26 = vld [vmem:[#allocation1 + $0x20] ss:$4 sm:$0xff]  ;;  %v8153_v53 = vld [vmem:[#allocation1 + $0x21] ss:$4 sm:$0xff]  ;;  %v8155_v15 = vld [vmem:[#allocation1 + $0x22] ss:$4 sm:$0xff]  ;;  %v1947_v28 = vadd.f32 %v10137_v8, %v10136_v63 }
 0x815   : > { %10121 = vst [vmem:[#allocation127_spill] sm:$0xff] %v8151_v26  ;;  %v8159_v5 = vld [vmem:[#allocation1 + $0x23] ss:$4 sm:$0xff] }
 0x816   : > { %10122 = vst [vmem:[#allocation139_spill] sm:$0xff] %v8153_v53  ;;  %v10145_v8 = vld [vmem:[#allocation240_spill] sm:$0xff] }
 0x817   : > { %10123 = vst [vmem:[#allocation140_spill] sm:$0xff] %v8155_v15  ;;  %v8162_v58 = vld [vmem:[#allocation1 + $0x1] ss:$4 sm:$0xff]  ;;  %v8164_v3 = vld [vmem:[#allocation1 + $0x2] ss:$4 sm:$0xff] }
 0x818   : > { %10126 = vst [vmem:[#allocation141_spill] sm:$0xff] %v8159_v5  ;;  %v8166_v7 = vld [vmem:[#allocation1 + $0x3] ss:$4 sm:$0xff]  ;;  %v3314_v5 = vadd.f32 %v10131_v0, %v2934_v27  ;;  %v3570_v36 = vpop.f32.mrf.mxu2 }
 0x819   : > { %3978 = vst [vmem:[#allocation1 + $0x20] sm:$0xff] %v10127_v46  ;;  %v8176_v46 = vadd.f32 %v3842_v62, %v3590_v35  ;;  %v10141_v35 = vld [vmem:[#allocation115_spill] sm:$0xff]  ;;  %v10142_v27 = vld [vmem:[#allocation128_spill] sm:$0xff]  ;;  %v3844_v62 = vpop.f32.mrf.mxu3 }
 0x81a   : > { %3977 = vst [vmem:[#allocation1] sm:$0xff] %v10128_v33  ;;  %v3591_v0 = vadd.f32 %v7881_v32, %v3314_v5 }
 0x81b   : > { %10130 = vst [vmem:[#allocation142_spill] sm:$0xff] %v8176_v46  ;;  %v10143_v46 = vld [vmem:[#allocation215_spill] sm:$0xff] }
 0x81c   : > { %v8202_v63 = vadd.f32 %v3844_v62, %v3591_v0  ;;  %v10155_v0 = vld [vmem:[#allocation144_spill] sm:$0xff] }
 0x81d   : > { %v10157_v62 = vld [vmem:[#allocation32_spill] sm:$0xff] }
 0x81e   : > { %10144 = vst [vmem:[#allocation160_spill] sm:$0xff] %v8202_v63  ;;  %4713 = vmatmul.msk.bf16.gmra.mxu3 %vm1664_vm0, %v7996_v25 }
 0x820   : > { %v8179_v15 = vld [vmem:[#allocation1 + $0x20] ss:$4 sm:$0xff]  ;;  %v8181_v53 = vld [vmem:[#allocation1 + $0x21] ss:$4 sm:$0xff]  ;;  %v8183_v14 = vld [vmem:[#allocation1 + $0x22] ss:$4 sm:$0xff] }
 0x821   : > { %10132 = vst [vmem:[#allocation143_spill] sm:$0xff] %v8179_v15  ;;  %v8185_v33 = vld [vmem:[#allocation1 + $0x23] ss:$4 sm:$0xff]  ;;  %v8189_v34 = vld [vmem:[#allocation1 + $0x1] ss:$4 sm:$0xff] }
 0x822   : > { %10133 = vst [vmem:[#allocation146_spill] sm:$0xff] %v8181_v53  ;;  %v8191_v26 = vld [vmem:[#allocation1 + $0x2] ss:$4 sm:$0xff]  ;;  %v8193_v1 = vld [vmem:[#allocation1 + $0x3] ss:$4 sm:$0xff] }
 0x823   : > { %10134 = vst [vmem:[#allocation145_spill] sm:$0xff] %v8183_v14  ;;  %v2352_v14 = vadd.f32 %v10143_v46, %v1947_v28  ;;  %v10146_v53 = vld [vmem:[#allocation218_spill] sm:$0xff] }
 0x824   : > { %10135 = vst [vmem:[#allocation147_spill] sm:$0xff] %v8185_v33  ;;  %v8200_v33 = vadd.f32 %v3570_v36, %v7899_v18  ;;  %v1950_v15 = vadd.f32 %v10146_v53, %v10145_v8  ;;  %v10154_v53 = vld [vmem:[#allocation133_spill] sm:$0xff] }
 0x825   : > { %10138 = vst [vmem:[#allocation156_spill] sm:$0xff] %v8189_v34 }
 0x826   : > { %10139 = vst [vmem:[#allocation158_spill] sm:$0xff] %v8191_v26  ;;  %v10147_v26 = vld [vmem:[#allocation31_spill] sm:$0xff] }
 0x827   : > { %10140 = vst [vmem:[#allocation159_spill] sm:$0xff] %v8193_v1  ;;  %v2629_v1 = vadd.f32 %v10147_v26, %v2352_v14  ;;  %v3572_v26 = vpop.f32.mrf.mxu2  ;;  %v3847_v14 = vpop.f32.mrf.mxu3 }
 0x828   : > { %3986 = vst [vmem:[#allocation1] sm:$0xff] %v10141_v35  ;;  %v8228_v25 = vadd.f32 %v3572_v26, %v7901_v31  ;;  %v8231_v63 = vadd.f32 %v3847_v14, %v7904_v50 }
 0x829   : > { %3987 = vst [vmem:[#allocation1 + $0x20] sm:$0xff] %v10142_v27  ;;  %v10156_v27 = vld [vmem:[#allocation258_spill] sm:$0xff]  ;;  %v2936_v8 = vadd.f32 %v10157_v62, %v2629_v1 }
 0x82a   : > { %v2353_v36 = vadd.f32 %v10156_v27, %v1950_v15  ;;  %10158 = vst [vmem:[#allocation176_spill] sm:$0xff] %v8231_v63 }
 0x82f   : > { %v8207_v34 = vld [vmem:[#allocation1 + $0x1] ss:$4 sm:$0xff]  ;;  %v8209_v35 = vld [vmem:[#allocation1 + $0x2] ss:$4 sm:$0xff]  ;;  %v8211_v32 = vld [vmem:[#allocation1 + $0x3] ss:$4 sm:$0xff]  ;;  %v3575_v50 = vpop.f32.mrf.mxu2  ;;  %v3849_v26 = vpop.f32.mrf.mxu3 }
 0x830   : > { %10148 = vst [vmem:[#allocation163_spill] sm:$0xff] %v8209_v35  ;;  %v8215_v5 = vld [vmem:[#allocation1 + $0x20] ss:$4 sm:$0xff]  ;;  %v8217_v18 = vld [vmem:[#allocation1 + $0x21] ss:$4 sm:$0xff] }
 0x831   : > { %10149 = vst [vmem:[#allocation220_spill] sm:$0xff] %v8211_v32  ;;  %v8219_v46 = vld [vmem:[#allocation1 + $0x22] ss:$4 sm:$0xff]  ;;  %v8221_v28 = vld [vmem:[#allocation1 + $0x23] ss:$4 sm:$0xff] }
 0x832   : > { %10150 = vst [vmem:[#allocation236_spill] sm:$0xff] %v8215_v5  ;;  %v10160_v5 = vld [vmem:[#allocation34_spill] sm:$0xff] }
 0x833   : > { %10151 = vst [vmem:[#allocation162_spill] sm:$0xff] %v8217_v18  ;;  %v10159_v18 = vld [vmem:[#allocation35_spill] sm:$0xff] }
 0x834   : > { %10152 = vst [vmem:[#allocation164_spill] sm:$0xff] %v8219_v46  ;;  %v3316_v46 = vadd.f32 %v10159_v18, %v2936_v8  ;;  %v10166_v18 = vld [vmem:[#allocation149_spill] sm:$0xff] }
 0x835   : > { %10153 = vst [vmem:[#allocation165_spill] sm:$0xff] %v8221_v28  ;;  %v2630_v28 = vadd.f32 %v10160_v5, %v2353_v36  ;;  %v10167_v5 = vld [vmem:[#allocation36_spill] sm:$0xff]  ;;  %v8253_v36 = vadd.f32 %v3575_v50, %v7973_v12 }
 0x836   : > { %3995 = vst [vmem:[#allocation1] sm:$0xff] %v10154_v53  ;;  %v3593_v15 = vadd.f32 %v7913_v10, %v3316_v46  ;;  %v10169_v10 = vld [vmem:[#allocation161_spill] sm:$0xff] }
 0x837   : > { %3996 = vst [vmem:[#allocation1 + $0x20] sm:$0xff] %v10155_v0  ;;  %v2937_v27 = vadd.f32 %v10167_v5, %v2630_v28  ;;  %v10170_v46 = vld [vmem:[#allocation37_spill] sm:$0xff]  ;;  %v10179_v5 = vld [vmem:[#allocation166_spill] sm:$0xff] }
 0x838   : > { %v8255_v62 = vadd.f32 %v3849_v26, %v3593_v15 }
 0x839   : > { %v3317_v8 = vadd.f32 %v10170_v46, %v2937_v27  ;;  %v10180_v27 = vld [vmem:[#allocation174_spill] sm:$0xff] }
 0x83a   : > { %10168 = vst [vmem:[#allocation238_spill] sm:$0xff] %v8255_v62  ;;  %v10182_v46 = vld [vmem:[#allocation234_spill] sm:$0xff] }
 0x83b   : > { %v3594_v63 = vadd.f32 %v7942_v49, %v3317_v8  ;;  %v10183_v62 = vld [vmem:[#allocation254_spill] sm:$0xff] }
 0x83d   : > { %v8235_v32 = vld [vmem:[#allocation1 + $0x1] ss:$4 sm:$0xff]  ;;  %v8237_v53 = vld [vmem:[#allocation1 + $0x2] ss:$4 sm:$0xff]  ;;  %v8239_v35 = vld [vmem:[#allocation1 + $0x3] ss:$4 sm:$0xff] }
 0x83e   : > { %10161 = vst [vmem:[#allocation177_spill] sm:$0xff] %v8239_v35  ;;  %v8242_v0 = vld [vmem:[#allocation1 + $0x20] ss:$4 sm:$0xff]  ;;  %v8244_v1 = vld [vmem:[#allocation1 + $0x21] ss:$4 sm:$0xff] }
 0x83f   : > { %10162 = vst [vmem:[#allocation178_spill] sm:$0xff] %v8242_v0  ;;  %v8246_v31 = vld [vmem:[#allocation1 + $0x22] ss:$4 sm:$0xff]  ;;  %v8248_v14 = vld [vmem:[#allocation1 + $0x23] ss:$4 sm:$0xff]  ;;  %v3852_v0 = vpop.f32.mrf.mxu3 }
 0x840   : > { %10163 = vst [vmem:[#allocation180_spill] sm:$0xff] %v8244_v1  ;;  %v8275_v26 = vadd.f32 %v3852_v0, %v3594_v63 }
 0x841   : > { %10164 = vst [vmem:[#allocation179_spill] sm:$0xff] %v8246_v31 }
 0x842   : > { %10165 = vst [vmem:[#allocation221_spill] sm:$0xff] %v8248_v14 }
 0x843   : > { %4004 = vst [vmem:[#allocation1] sm:$0xff] %v10166_v18  ;;  %v3577_v18 = vpop.f32.mrf.mxu2 }
 0x844   : > { %4005 = vst [vmem:[#allocation1 + $0x20] sm:$0xff] %v10169_v10  ;;  %v8273_v50 = vadd.f32 %v3577_v18, %v7977_v22  ;;  %v10181_v10 = vld [vmem:[#allocation244_spill] sm:$0xff] }
 0x845   : > { %10177 = vst [vmem:[#allocation197_spill] sm:$0xff] %v8275_v26  ;;  %v1952_v8 = vadd.f32 %v10182_v46, %v10181_v10  ;;  %v10193_v10 = vld [vmem:[#allocation248_spill] sm:$0xff] }
 0x84a   : > { %v8260_v31 = vld [vmem:[#allocation1 + $0x1] ss:$4 sm:$0xff]  ;;  %v8262_v1 = vld [vmem:[#allocation1 + $0x2] ss:$4 sm:$0xff]  ;;  %v8264_v14 = vld [vmem:[#allocation1 + $0x3] ss:$4 sm:$0xff] }
 0x84b   : > { %10171 = vst [vmem:[#allocation181_spill] sm:$0xff] %v8260_v31  ;;  %v8266_v28 = vld [vmem:[#allocation1 + $0x20] ss:$4 sm:$0xff]  ;;  %v8268_v12 = vld [vmem:[#allocation1 + $0x21] ss:$4 sm:$0xff] }
 0x84c   : > { %10172 = vst [vmem:[#allocation182_spill] sm:$0xff] %v8262_v1  ;;  %v8270_v15 = vld [vmem:[#allocation1 + $0x22] ss:$4 sm:$0xff]  ;;  %v8277_v49 = vld [vmem:[#allocation1 + $0x23] ss:$4 sm:$0xff] }
 0x84d   : > { %10173 = vst [vmem:[#allocation184_spill] sm:$0xff] %v8264_v14 }
 0x84e   : > { %10174 = vst [vmem:[#allocation193_spill] sm:$0xff] %v8266_v28  ;;  %v2354_v28 = vadd.f32 %v10183_v62, %v1952_v8  ;;  %v10194_v62 = vld [vmem:[#allocation11_spill] sm:$0xff]  ;;  %v10195_v8 = vld [vmem:[#allocation48_spill] sm:$0xff] }
 0x84f   : > { %10175 = vst [vmem:[#allocation195_spill] sm:$0xff] %v8268_v12  ;;  %v1955_v46 = vadd.f32 %v10194_v62, %v10193_v10  ;;  %v10205_v10 = vld [vmem:[#allocation222_spill] sm:$0xff] }
 0x850   : > { %10176 = vst [vmem:[#allocation196_spill] sm:$0xff] %v8270_v15  ;;  %v2631_v26 = vadd.f32 %v10195_v8, %v2354_v28  ;;  %v10206_v28 = vld [vmem:[#allocation7_spill] sm:$0xff] }
 0x851   : > { %10178 = vst [vmem:[#allocation198_spill] sm:$0xff] %v8277_v49 }
 0x852   : > { %4013 = vst [vmem:[#allocation1] sm:$0xff] %v10179_v5  ;;  %v10191_v5 = vld [vmem:[#allocation183_spill] sm:$0xff] }
 0x853   : > { %4014 = vst [vmem:[#allocation1 + $0x20] sm:$0xff] %v10180_v27  ;;  %v10192_v27 = vld [vmem:[#allocation187_spill] sm:$0xff] }
 0x859   : > { %v8284_v14 = vld [vmem:[#allocation1 + $0x1] ss:$4 sm:$0xff]  ;;  %v8286_v12 = vld [vmem:[#allocation1 + $0x2] ss:$4 sm:$0xff]  ;;  %v8288_v15 = vld [vmem:[#allocation1 + $0x3] ss:$4 sm:$0xff] }
 0x85a   : > { %10184 = vst [vmem:[#allocation224_spill] sm:$0xff] %v8284_v14  ;;  %v8290_v22 = vld [vmem:[#allocation1 + $0x20] ss:$4 sm:$0xff]  ;;  %v8292_v63 = vld [vmem:[#allocation1 + $0x21] ss:$4 sm:$0xff] }
 0x85b   : > { %10185 = vst [vmem:[#allocation241_spill] sm:$0xff] %v8286_v12  ;;  %v8294_v0 = vld [vmem:[#allocation1 + $0x22] ss:$4 sm:$0xff]  ;;  %v8296_v18 = vld [vmem:[#allocation1 + $0x23] ss:$4 sm:$0xff] }
 0x85c   : > { %10186 = vst [vmem:[#allocation199_spill] sm:$0xff] %v8288_v15  ;;  %v10196_v12 = vld [vmem:[#allocation257_spill] sm:$0xff] }
 0x85d   : > { %10187 = vst [vmem:[#allocation200_spill] sm:$0xff] %v8290_v22  ;;  %v2355_v14 = vadd.f32 %v10196_v12, %v1955_v46  ;;  %v10197_v15 = vld [vmem:[#allocation49_spill] sm:$0xff]  ;;  %v10207_v12 = vld [vmem:[#allocation20_spill] sm:$0xff] }
 0x85e   : > { %10188 = vst [vmem:[#allocation201_spill] sm:$0xff] %v8292_v63  ;;  %v2938_v49 = vadd.f32 %v10197_v15, %v2631_v26  ;;  %v1957_v62 = vadd.f32 %v10207_v12, %v10206_v28  ;;  %v10208_v15 = vld [vmem:[#allocation50_spill] sm:$0xff]  ;;  %v10209_v46 = vld [vmem:[#allocation52_spill] sm:$0xff] }
 0x85f   : > { %10189 = vst [vmem:[#allocation209_spill] sm:$0xff] %v8294_v0  ;;  %v2632_v8 = vadd.f32 %v10209_v46, %v2355_v14 }
 0x860   : > { %10190 = vst [vmem:[#allocation225_spill] sm:$0xff] %v8296_v18  ;;  %v3318_v26 = vadd.f32 %v10208_v15, %v2938_v49  ;;  %v10221_v15 = vld [vmem:[#allocation53_spill] sm:$0xff] }
 0x861   : > { %4022 = vst [vmem:[#allocation1] sm:$0xff] %v10191_v5 }
 0x862   : > { %4023 = vst [vmem:[#allocation1 + $0x20] sm:$0xff] %v10192_v27 }
 0x868   : > { %v8305_v22 = vld [vmem:[#allocation1 + $0x1] ss:$4 sm:$0xff]  ;;  %v8307_v63 = vld [vmem:[#allocation1 + $0x2] ss:$4 sm:$0xff]  ;;  %v8309_v0 = vld [vmem:[#allocation1 + $0x3] ss:$4 sm:$0xff] }
 0x869   : > { %10198 = vst [vmem:[#allocation226_spill] sm:$0xff] %v8305_v22  ;;  %v8311_v18 = vld [vmem:[#allocation1 + $0x20] ss:$4 sm:$0xff]  ;;  %v8313_v5 = vld [vmem:[#allocation1 + $0x21] ss:$4 sm:$0xff]  ;;  %v3854_v22 = vpop.f32.mrf.mxu3 }
 0x86a   : > { %10199 = vst [vmem:[#allocation227_spill] sm:$0xff] %v8307_v63  ;;  %v8315_v27 = vld [vmem:[#allocation1 + $0x22] ss:$4 sm:$0xff]  ;;  %v8317_v1 = vld [vmem:[#allocation1 + $0x23] ss:$4 sm:$0xff] }
 0x86b   : > { %10200 = vst [vmem:[#allocation228_spill] sm:$0xff] %v8309_v0  ;;  %v10210_v63 = vld [vmem:[#allocation223_spill] sm:$0xff]  ;;  %v3595_v0 = vadd.f32 %v7971_v9, %v3318_v26  ;;  %v10223_v26 = vld [vmem:[#allocation4_spill] sm:$0xff] }
 0x86c   : > { %10201 = vst [vmem:[#allocation232_spill] sm:$0xff] %v8311_v18  ;;  %v3580_v18 = vpop.f32.mrf.mxu2 }
 0x86d   : > { %10202 = vst [vmem:[#allocation251_spill] sm:$0xff] %v8313_v5  ;;  %v10211_v5 = vld [vmem:[#allocation263_spill] sm:$0xff] }
 0x86e   : > { %10203 = vst [vmem:[#allocation229_spill] sm:$0xff] %v8315_v27  ;;  %v2356_v31 = vadd.f32 %v10211_v5, %v1957_v62  ;;  %v10212_v27 = vld [vmem:[#allocation51_spill] sm:$0xff]  ;;  %v10219_v5 = vld [vmem:[#allocation10_spill] sm:$0xff]  ;;  %v10220_v62 = vld [vmem:[#allocation213_spill] sm:$0xff] }
 0x86f   : > { %10204 = vst [vmem:[#allocation230_spill] sm:$0xff] %v8317_v1  ;;  %v2939_v35 = vadd.f32 %v10212_v27, %v2632_v8  ;;  %v8329_v1 = vadd.f32 %v3580_v18, %v7979_v19  ;;  %v1960_v27 = vadd.f32 %v10220_v62, %v10219_v5  ;;  %v10222_v18 = vld [vmem:[#allocation54_spill] sm:$0xff]  ;;  %v10226_v62 = vld [vmem:[#allocation65_spill] sm:$0xff] }
 0x870   : > { %4031 = vst [vmem:[#allocation1] sm:$0xff] %v10205_v10  ;;  %v8331_v10 = vadd.f32 %v3854_v22, %v3595_v0  ;;  %v2633_v22 = vadd.f32 %v10222_v18, %v2356_v31  ;;  %v10227_v18 = vld [vmem:[#allocation68_spill] sm:$0xff] }
 0x871   : > { %4032 = vst [vmem:[#allocation1 + $0x20] sm:$0xff] %v10210_v63  ;;  %v3319_v19 = vadd.f32 %v10221_v15, %v2939_v35  ;;  %v3857_v8 = vpop.f32.mrf.mxu3 }
 0x872   : > { %10213 = vst [vmem:[#allocation231_spill] sm:$0xff] %v8331_v10 }
 0x873   : > { %v3596_v46 = vadd.f32 %v7990_v60, %v3319_v19 }
 0x874   : > { %v3582_v10 = vpop.f32.mrf.mxu2 }
 0x877   : > { %v8333_v28 = vld [vmem:[#allocation1 + $0x1] ss:$4 sm:$0xff]  ;;  %v8335_v49 = vld [vmem:[#allocation1 + $0x2] ss:$4 sm:$0xff]  ;;  %v8337_v14 = vld [vmem:[#allocation1 + $0x3] ss:$4 sm:$0xff] }
 0x878   : > { %10214 = vst [vmem:[#allocation233_spill] sm:$0xff] %v8335_v49  ;;  %v8339_v63 = vld [vmem:[#allocation1 + $0x20] ss:$4 sm:$0xff]  ;;  %v8341_v9 = vld [vmem:[#allocation1 + $0x21] ss:$4 sm:$0xff]  ;;  %v8356_v49 = vadd.f32 %v3857_v8, %v3596_v46 }
 0x879   : > { %10215 = vst [vmem:[#allocation6_spill] sm:$0xff] %v8337_v14  ;;  %v8343_v12 = vld [vmem:[#allocation1 + $0x22] ss:$4 sm:$0xff]  ;;  %v8349_v0 = vld [vmem:[#allocation1 + $0x23] ss:$4 sm:$0xff] }
 0x87a   : > { %10216 = vst [vmem:[#allocation27_spill] sm:$0xff] %v8339_v63 }
 0x87b   : > { %10217 = vst [vmem:[#allocation29_spill] sm:$0xff] %v8341_v9  ;;  %v10224_v9 = vld [vmem:[#allocation265_spill] sm:$0xff] }
 0x87c   : > { %10218 = vst [vmem:[#allocation39_spill] sm:$0xff] %v8343_v12  ;;  %v2357_v63 = vadd.f32 %v10224_v9, %v1960_v27  ;;  %v10225_v12 = vld [vmem:[#allocation56_spill] sm:$0xff]  ;;  %v3859_v27 = vpop.f32.mrf.mxu3 }
 0x87d   : > { %4040 = vst [vmem:[#allocation1] sm:$0xff] %v10223_v26  ;;  %v2940_v14 = vadd.f32 %v10225_v12, %v2633_v22 }
 0x87e   : > { %4041 = vst [vmem:[#allocation1 + $0x20] sm:$0xff] %v7487_v17  ;;  %v2634_v17 = vadd.f32 %v10227_v18, %v2357_v63 }
 0x87f   : > { %v3320_v15 = vadd.f32 %v10226_v62, %v2940_v14  ;;  %v10228_v14 = vld [vmem:[#allocation69_spill] sm:$0xff]  ;;  %v10242_v62 = vld [vmem:[#allocation139_spill] sm:$0xff] }
 0x880   : > { %v2941_v19 = vadd.f32 %v10228_v14, %v2634_v17  ;;  %v10243_v17 = vld [vmem:[#allocation140_spill] sm:$0xff]  ;;  %v10248_v14 = vld [vmem:[#allocation143_spill] sm:$0xff] }
 0x881   : > { %v3597_v12 = vadd.f32 %v8013_v16, %v3320_v15 }
 0x883   : > { %v8380_v63 = vadd.f32 %v3859_v27, %v3597_v12  ;;  %v10247_v27 = vld [vmem:[#allocation159_spill] sm:$0xff] }
 0x884   : > { %v8358_v5 = vld [vmem:[#allocation1 + $0x1] ss:$4 sm:$0xff]  ;;  %v8360_v35 = vld [vmem:[#allocation1 + $0x2] ss:$4 sm:$0xff]  ;;  %v8362_v31 = vld [vmem:[#allocation1 + $0x3] ss:$4 sm:$0xff] }
 0x885   : > { %v8366_v26 = vld [vmem:[#allocation1 + $0x20] ss:$4 sm:$0xff]  ;;  %v8368_v60 = vld [vmem:[#allocation1 + $0x21] ss:$4 sm:$0xff]  ;;  %v8370_v10 = vld [vmem:[#allocation1 + $0x22] ss:$4 sm:$0xff] }
 0x886   : > { %v8372_v9 = vld [vmem:[#allocation1 + $0x23] ss:$4 sm:$0xff]  ;;  %4059 = vst [vmem:[#allocation1 + $0x4] ss:$9 sm:$0xff] %v8000_v37 }
 0x887   : > { %4051 = vst [vmem:[#allocation1] ss:$9 sm:$0xff] %v8021_v4  ;;  %v10229_v37 = vld [vmem:[#allocation70_spill] sm:$0xff]  ;;  %v3862_v4 = vpop.f32.mrf.mxu3 }
 0x888   : > { %4053 = vst [vmem:[#allocation1 + $0x1] ss:$9 sm:$0xff] %v8023_v39  ;;  %v3321_v22 = vadd.f32 %v10229_v37, %v2941_v19  ;;  %v10250_v19 = vld [vmem:[#allocation145_spill] sm:$0xff] }
 0x889   : > { %4055 = vst [vmem:[#allocation1 + $0x2] ss:$9 sm:$0xff] %v8025_v24 }
 0x88a   : > { %4057 = vst [vmem:[#allocation1 + $0x3] ss:$9 sm:$0xff] %v7998_v40  ;;  %v3598_v16 = vadd.f32 %v8039_v54, %v3321_v22 }
 0x88b   : > { %4061 = vst [vmem:[#allocation1 + $0x5] ss:$9 sm:$0xff] %v8002_v41 }
 0x88c   : > { %4063 = vst [vmem:[#allocation1 + $0x6] ss:$9 sm:$0xff] %v8004_v2  ;;  %v8388_v39 = vadd.f32 %v3862_v4, %v3598_v16  ;;  %v10251_v16 = vld [vmem:[#allocation147_spill] sm:$0xff] }
 0x88d   : > { %4065 = vst [vmem:[#allocation1 + $0x7] ss:$9 sm:$0xff] %v8048_v57 }
 0x88f   : > { %v3864_v40 = vpop.f32.mrf.mxu3 }
 0x890   : > { %v8397_v41 = vadd.f32 %v3864_v40, %v8069_v52  ;;  %v10236_v52 = vld [vmem:[#allocation126_spill] sm:$0xff]  ;;  %v10252_v40 = vld [vmem:[#allocation163_spill] sm:$0xff] }
 0x894   : > { %v4066_v46 = vld [vmem:[#allocation1] sm:$0xff] }
 0x895   : > { %4715 = vmatmul.msk.bf16.vlgmr.msra.gmra.mxu0 %vm1664_vm0, %v4066_v46  ;;  %4067 = vst [vmem:[#allocation1] ss:$9 sm:$0xff] %v8050_v44 }
 0x896   : > { %4068 = vst [vmem:[#allocation1 + $0x1] ss:$9 sm:$0xff] %v8052_v23  ;;  %v10231_v23 = vld [vmem:[#allocation104_spill] sm:$0xff] }
 0x897   : > { %4069 = vst [vmem:[#allocation1 + $0x2] ss:$9 sm:$0xff] %v8028_v13  ;;  %v3867_v2 = vpop.f32.mrf.mxu3 }
 0x898   : > { %4070 = vst [vmem:[#allocation1 + $0x3] ss:$9 sm:$0xff] %v8030_v43  ;;  %v8403_v24 = vadd.f32 %v3867_v2, %v8095_v59  ;;  %v10253_v2 = vld [vmem:[#allocation220_spill] sm:$0xff] }
 0x899   : > { %4071 = vst [vmem:[#allocation1 + $0x4] ss:$9 sm:$0xff] %v8035_v20  ;;  %v10230_v20 = vld [vmem:[#allocation121_spill] sm:$0xff] }
 0x89a   : > { %4072 = vst [vmem:[#allocation1 + $0x5] ss:$9 sm:$0xff] %v8037_v61 }
 0x89b   : > { %4073 = vst [vmem:[#allocation1 + $0x6] ss:$9 sm:$0xff] %v8078_v48 }
 0x89c   : > { %4074 = vst [vmem:[#allocation1 + $0x7] ss:$9 sm:$0xff] %v8080_v6  ;;  %v10237_v6 = vld [vmem:[#allocation120_spill] sm:$0xff] }
 0x89f   : > { %v3869_v13 = vpop.f32.mrf.mxu3 }
 0x8a0   : > { %v8413_v43 = vadd.f32 %v3869_v13, %v8119_v29  ;;  %v10238_v29 = vld [vmem:[#allocation122_spill] sm:$0xff] }
 0x8a1   : > { %v10255_v13 = vld [vmem:[#allocation162_spill] sm:$0xff] }
 0x8a3   : > { %v4075_v54 = vld [vmem:[#allocation1] sm:$0xff] }
 0x8a4   : > { %4076 = vst [vmem:[#allocation1] ss:$9 sm:$0xff] %v8082_v45 }
 0x8a5   : > { %4716 = vmatmul.msk.bf16.gmra.mxu0 %vm1664_vm0, %v4075_v54  ;;  %4077 = vst [vmem:[#allocation1 + $0x1] ss:$9 sm:$0xff] %v8060_v21  ;;  %v10232_v21 = vld [vmem:[#allocation105_spill] sm:$0xff]  ;;  %v10254_v54 = vld [vmem:[#allocation236_spill] sm:$0xff] }
 0x8a6   : > { %4078 = vst [vmem:[#allocation1 + $0x2] ss:$9 sm:$0xff] %v8062_v11  ;;  %v10233_v11 = vld [vmem:[#allocation108_spill] sm:$0xff] }
 0x8a7   : > { %4079 = vst [vmem:[#allocation1 + $0x3] ss:$9 sm:$0xff] %v8064_v38  ;;  %v3872_v61 = vpop.f32.mrf.mxu3  ;;  %v10235_v38 = vld [vmem:[#allocation124_spill] sm:$0xff] }
 0x8a8   : > { %4080 = vst [vmem:[#allocation1 + $0x4] ss:$9 sm:$0xff] %v8066_v30  ;;  %v8418_v57 = vadd.f32 %v3872_v61, %v8147_v55  ;;  %v10239_v55 = vld [vmem:[#allocation123_spill] sm:$0xff] }
 0x8a9   : > { %4081 = vst [vmem:[#allocation1 + $0x5] ss:$9 sm:$0xff] %v8106_v56  ;;  %v10234_v56 = vld [vmem:[#allocation109_spill] sm:$0xff] }
 0x8aa   : > { %4082 = vst [vmem:[#allocation1 + $0x6] ss:$9 sm:$0xff] %v8108_v51 }
 0x8ab   : > { %4083 = vst [vmem:[#allocation1 + $0x7] ss:$9 sm:$0xff] %v10230_v20  ;;  %v10257_v20 = vld [vmem:[#allocation165_spill] sm:$0xff] }
 0x8af   : > { %v3874_v30 = vpop.f32.mrf.mxu3 }
 0x8b0   : > { %v8429_v48 = vadd.f32 %v3874_v30, %v8174_v47  ;;  %v10241_v47 = vld [vmem:[#allocation127_spill] sm:$0xff]  ;;  %v10264_v30 = vld [vmem:[#allocation182_spill] sm:$0xff] }
 0x8b2   : > { %v4084_v44 = vld [vmem:[#allocation1] sm:$0xff] }
 0x8b3   : > { %4085 = vst [vmem:[#allocation1] ss:$9 sm:$0xff] %v10231_v23  ;;  %v10260_v23 = vld [vmem:[#allocation180_spill] sm:$0xff] }
 0x8b4   : > { %4086 = vst [vmem:[#allocation1 + $0x1] ss:$9 sm:$0xff] %v10232_v21  ;;  %v10261_v21 = vld [vmem:[#allocation179_spill] sm:$0xff] }
 0x8b5   : > { %4717 = vmatmul.msk.bf16.gmra.mxu0 %vm1664_vm0, %v4084_v44  ;;  %4087 = vst [vmem:[#allocation1 + $0x2] ss:$9 sm:$0xff] %v10233_v11  ;;  %v10262_v11 = vld [vmem:[#allocation221_spill] sm:$0xff] }
 0x8b6   : > { %4088 = vst [vmem:[#allocation1 + $0x3] ss:$9 sm:$0xff] %v10234_v56  ;;  %v10263_v56 = vld [vmem:[#allocation181_spill] sm:$0xff] }
 0x8b7   : > { %4089 = vst [vmem:[#allocation1 + $0x4] ss:$9 sm:$0xff] %v8136_v42  ;;  %v3877_v45 = vpop.f32.mrf.mxu3  ;;  %v10240_v42 = vld [vmem:[#allocation125_spill] sm:$0xff] }
 0x8b8   : > { %4090 = vst [vmem:[#allocation1 + $0x5] ss:$9 sm:$0xff] %v10235_v38  ;;  %v8433_v59 = vadd.f32 %v3877_v45, %v8200_v33  ;;  %v10269_v45 = vld [vmem:[#allocation198_spill] sm:$0xff] }
 0x8b9   : > { %4091 = vst [vmem:[#allocation1 + $0x6] ss:$9 sm:$0xff] %v10236_v52  ;;  %v10267_v52 = vld [vmem:[#allocation195_spill] sm:$0xff] }
 0x8ba   : > { %4092 = vst [vmem:[#allocation1 + $0x7] ss:$9 sm:$0xff] %v10237_v6  ;;  %v10268_v6 = vld [vmem:[#allocation196_spill] sm:$0xff] }
 0x8bf   : > { %v3879_v8 = vpop.f32.mrf.mxu3 }
 0x8c0   : > { %v8445_v33 = vadd.f32 %v3879_v8, %v8228_v25  ;;  %v10249_v25 = vld [vmem:[#allocation146_spill] sm:$0xff]  ;;  %v10274_v8 = vld [vmem:[#allocation201_spill] sm:$0xff] }
 0x8c1   : > { %v4093_v51 = vld [vmem:[#allocation1] sm:$0xff] }
 0x8c2   : > { %4094 = vst [vmem:[#allocation1] ss:$9 sm:$0xff] %v10238_v29  ;;  %v10271_v29 = vld [vmem:[#allocation241_spill] sm:$0xff] }
 0x8c3   : > { %4095 = vst [vmem:[#allocation1 + $0x1] ss:$9 sm:$0xff] %v10239_v55 }
 0x8c4   : > { %4096 = vst [vmem:[#allocation1 + $0x2] ss:$9 sm:$0xff] %v10240_v42  ;;  %v10272_v42 = vld [vmem:[#allocation199_spill] sm:$0xff] }
 0x8c5   : > { %4718 = vmatmul.msk.bf16.gmra.mxu0 %vm1664_vm0, %v4093_v51  ;;  %4097 = vst [vmem:[#allocation1 + $0x3] ss:$9 sm:$0xff] %v8162_v58  ;;  %v10244_v58 = vld [vmem:[#allocation141_spill] sm:$0xff]  ;;  %v10270_v51 = vld [vmem:[#allocation224_spill] sm:$0xff] }
 0x8c6   : > { %4098 = vst [vmem:[#allocation1 + $0x4] ss:$9 sm:$0xff] %v8164_v3  ;;  %v10245_v3 = vld [vmem:[#allocation156_spill] sm:$0xff] }
 0x8c7   : > { %4099 = vst [vmem:[#allocation1 + $0x5] ss:$9 sm:$0xff] %v8166_v7  ;;  %v3882_v18 = vpop.f32.mrf.mxu3  ;;  %v10246_v7 = vld [vmem:[#allocation158_spill] sm:$0xff] }
 0x8c8   : > { %4100 = vst [vmem:[#allocation1 + $0x6] ss:$9 sm:$0xff] %v10241_v47  ;;  %v8449_v12 = vadd.f32 %v3882_v18, %v8253_v36  ;;  %v10273_v47 = vld [vmem:[#allocation200_spill] sm:$0xff] }
 0x8c9   : > { %4101 = vst [vmem:[#allocation1 + $0x7] ss:$9 sm:$0xff] %v10242_v62  ;;  %v10275_v62 = vld [vmem:[#allocation209_spill] sm:$0xff] }
 0x8cf   : > { %v3884_v37 = vpop.f32.mrf.mxu3 }
 0x8d0   : > { %v4102_v15 = vld [vmem:[#allocation1] sm:$0xff]  ;;  %v8460_v36 = vadd.f32 %v3884_v37, %v8273_v50  ;;  %v10256_v50 = vld [vmem:[#allocation164_spill] sm:$0xff] }
 0x8d1   : > { %4103 = vst [vmem:[#allocation1] ss:$9 sm:$0xff] %v10243_v17  ;;  %v10277_v17 = vld [vmem:[#allocation226_spill] sm:$0xff] }
 0x8d2   : > { %4104 = vst [vmem:[#allocation1 + $0x1] ss:$9 sm:$0xff] %v10244_v58  ;;  %v10278_v58 = vld [vmem:[#allocation92_spill] sm:$0xff] }
 0x8d3   : > { %4105 = vst [vmem:[#allocation1 + $0x2] ss:$9 sm:$0xff] %v10245_v3 }
 0x8d4   : > { %4106 = vst [vmem:[#allocation1 + $0x3] ss:$9 sm:$0xff] %v10246_v7  ;;  %v10279_v7 = vld [vmem:[#allocation227_spill] sm:$0xff] }
 0x8d5   : > { %4719 = vmatmul.msk.bf16.gmra.mxu0 %vm1664_vm0, %v4102_v15  ;;  %4107 = vst [vmem:[#allocation1 + $0x4] ss:$9 sm:$0xff] %v10247_v27  ;;  %v10276_v15 = vld [vmem:[#allocation225_spill] sm:$0xff]  ;;  %v10280_v27 = vld [vmem:[#allocation228_spill] sm:$0xff] }
 0x8d6   : > { %4108 = vst [vmem:[#allocation1 + $0x5] ss:$9 sm:$0xff] %v10248_v14 }
 0x8d7   : > { %4109 = vst [vmem:[#allocation1 + $0x6] ss:$9 sm:$0xff] %v10249_v25  ;;  %v3887_v4 = vpop.f32.mrf.mxu3  ;;  %v10281_v25 = vld [vmem:[#allocation103_spill] sm:$0xff] }
 0x8d8   : > { %4110 = vst [vmem:[#allocation1 + $0x7] ss:$9 sm:$0xff] %v10250_v19  ;;  %v8465_v46 = vadd.f32 %v3887_v4, %v8329_v1  ;;  %v10259_v1 = vld [vmem:[#allocation178_spill] sm:$0xff] }
 0x8df   : > { %v4111_v22 = vld [vmem:[#allocation1] sm:$0xff]  ;;  %v3889_v61 = vpop.f32.mrf.mxu3 }
 0x8e0   : > { %4112 = vst [vmem:[#allocation1] ss:$9 sm:$0xff] %v10251_v16  ;;  %v10286_v61 = vld [vmem:[#allocation233_spill] sm:$0xff] }
 0x8e1   : > { %4113 = vst [vmem:[#allocation1 + $0x1] ss:$9 sm:$0xff] %v8207_v34  ;;  %v10258_v34 = vld [vmem:[#allocation177_spill] sm:$0xff] }
 0x8e2   : > { %4114 = vst [vmem:[#allocation1 + $0x2] ss:$9 sm:$0xff] %v10252_v40 }
 0x8e3   : > { %4115 = vst [vmem:[#allocation1 + $0x3] ss:$9 sm:$0xff] %v10253_v2  ;;  %v10283_v2 = vld [vmem:[#allocation251_spill] sm:$0xff] }
 0x8e4   : > { %4116 = vst [vmem:[#allocation1 + $0x4] ss:$9 sm:$0xff] %v10254_v54 }
 0x8e5   : > { %4720 = vmatmul.msk.bf16.gmra.mxu0 %vm1664_vm0, %v4111_v22  ;;  %4117 = vst [vmem:[#allocation1 + $0x5] ss:$9 sm:$0xff] %v10255_v13  ;;  %v10282_v22 = vld [vmem:[#allocation232_spill] sm:$0xff]  ;;  %v10284_v13 = vld [vmem:[#allocation229_spill] sm:$0xff] }
 0x8e6   : > { %4118 = vst [vmem:[#allocation1 + $0x6] ss:$9 sm:$0xff] %v10256_v50  ;;  %v10285_v50 = vld [vmem:[#allocation230_spill] sm:$0xff] }
 0x8e7   : > { %4119 = vst [vmem:[#allocation1 + $0x7] ss:$9 sm:$0xff] %v10257_v20 }
 0x8ee   : > { %v4120_v44 = vld [vmem:[#allocation1] sm:$0xff] }
 0x8ef   : > { %4121 = vst [vmem:[#allocation1] ss:$9 sm:$0xff] %v8235_v32  ;;  %v10265_v32 = vld [vmem:[#allocation184_spill] sm:$0xff] }
 0x8f0   : > { %4122 = vst [vmem:[#allocation1 + $0x1] ss:$9 sm:$0xff] %v8237_v53  ;;  %v10266_v53 = vld [vmem:[#allocation193_spill] sm:$0xff] }
 0x8f1   : > { %4123 = vst [vmem:[#allocation1 + $0x2] ss:$9 sm:$0xff] %v10258_v34 }
 0x8f2   : > { %4124 = vst [vmem:[#allocation1 + $0x3] ss:$9 sm:$0xff] %v10259_v1  ;;  %v10288_v1 = vld [vmem:[#allocation6_spill] sm:$0xff] }
 0x8f3   : > { %4125 = vst [vmem:[#allocation1 + $0x4] ss:$9 sm:$0xff] %v10260_v23  ;;  %v10289_v23 = vld [vmem:[#allocation27_spill] sm:$0xff] }
 0x8f4   : > { %4126 = vst [vmem:[#allocation1 + $0x5] ss:$9 sm:$0xff] %v10261_v21 }
 0x8f5   : > { %4721 = vmatmul.msk.bf16.gmra.mxu0 %vm1664_vm0, %v4120_v44  ;;  %4127 = vst [vmem:[#allocation1 + $0x6] ss:$9 sm:$0xff] %v10262_v11  ;;  %v10287_v44 = vld [vmem:[#allocation102_spill] sm:$0xff] }
 0x8f6   : > { %4128 = vst [vmem:[#allocation1 + $0x7] ss:$9 sm:$0xff] %v10263_v56 }
 0x8fd   : > { %v4129_v38 = vld [vmem:[#allocation1] sm:$0xff] }
 0x8fe   : > { %4130 = vst [vmem:[#allocation1] ss:$9 sm:$0xff] %v10264_v30  ;;  %v10290_v30 = vld [vmem:[#allocation106_spill] sm:$0xff] }
 0x8ff   : > { %4131 = vst [vmem:[#allocation1 + $0x1] ss:$9 sm:$0xff] %v10265_v32 }
 0x900   : > { %4132 = vst [vmem:[#allocation1 + $0x2] ss:$9 sm:$0xff] %v10266_v53  ;;  %v10291_v53 = vld [vmem:[#allocation29_spill] sm:$0xff] }
 0x901   : > { %4133 = vst [vmem:[#allocation1 + $0x3] ss:$9 sm:$0xff] %v10267_v52 }
 0x902   : > { %4134 = vst [vmem:[#allocation1 + $0x4] ss:$9 sm:$0xff] %v10268_v6 }
 0x903   : > { %4135 = vst [vmem:[#allocation1 + $0x5] ss:$9 sm:$0xff] %v10269_v45  ;;  %v10292_v45 = vld [vmem:[#allocation39_spill] sm:$0xff] }
 0x904   : > { %4136 = vst [vmem:[#allocation1 + $0x6] ss:$9 sm:$0xff] %v10270_v51 }
 0x905   : > { %4722 = vmatmul.msk.bf16.gmra.mxu0 %vm1664_vm0, %v4129_v38  ;;  %4137 = vst [vmem:[#allocation1 + $0x7] ss:$9 sm:$0xff] %v10271_v29 }
 0x90c   : > { %v4138_v55 = vld [vmem:[#allocation1] sm:$0xff] }
 0x90d   : > { %4139 = vst [vmem:[#allocation1] ss:$9 sm:$0xff] %v10272_v42 }
 0x90e   : > { %4140 = vst [vmem:[#allocation1 + $0x1] ss:$9 sm:$0xff] %v10273_v47 }
 0x90f   : > { %4141 = vst [vmem:[#allocation1 + $0x2] ss:$9 sm:$0xff] %v10274_v8 }
 0x910   : > { %4142 = vst [vmem:[#allocation1 + $0x3] ss:$9 sm:$0xff] %v10275_v62  ;;  %v10294_v62 = vld [vmem:[#allocation129_spill] sm:$0xff] }
 0x911   : > { %4143 = vst [vmem:[#allocation1 + $0x4] ss:$9 sm:$0xff] %v10276_v15 }
 0x912   : > { %v4207_v18 = vpop.f32.mrf.mxu0  ;;  %4144 = vst [vmem:[#allocation1 + $0x5] ss:$9 sm:$0xff] %v10277_v17  ;;  %v10295_v17 = vld [vmem:[#allocation142_spill] sm:$0xff] }
 0x913   : > { %v4271_v3 = vadd.f32 %v4207_v18, %v10278_v58  ;;  %4145 = vst [vmem:[#allocation1 + $0x6] ss:$9 sm:$0xff] %v10279_v7 }
 0x914   : > { %4146 = vst [vmem:[#allocation1 + $0x7] ss:$9 sm:$0xff] %v10280_v27 }
 0x915   : > { %4296 = vst [vmem:[%s4794_s25] sm:$0xff] %v4271_v3  ;;  %4723 = vmatmul.msk.bf16.gmra.mxu0 %vm1664_vm0, %v4138_v55  ;;  %v4357_v16 = vmul.f32 %v4271_v3, %v4271_v3  ;;  %v10293_v55 = vld [vmem:[#allocation217_spill] sm:$0xff] }
 0x91a   : > { %v4209_v14 = vpop.f32.mrf.mxu0 }
 0x91b   : > { %v4272_v19 = vadd.f32 %v4209_v14, %v10281_v25  ;;  %v4147_v37 = vld [vmem:[#allocation1] sm:$0xff]  ;;  %v10296_v25 = vld [vmem:[#allocation160_spill] sm:$0xff] }
 0x91c   : > { %4148 = vst [vmem:[#allocation1] ss:$9 sm:$0xff] %v10282_v22 }
 0x91d   : > { %4297 = vst [vmem:[%s4794_s25 + $0x8] sm:$0xff] %v4272_v19  ;;  %v4322_v4 = vadd.f32 %v4272_v19, %v4271_v3  ;;  %v4358_v40 = vmul.f32 %v4272_v19, %v4272_v19 }
 0x91e   : > { %4149 = vst [vmem:[#allocation1 + $0x1] ss:$9 sm:$0xff] %v10283_v2 }
 0x91f   : > { %v4382_v54 = vadd.f32 %v4358_v40, %v4357_v16  ;;  %4150 = vst [vmem:[#allocation1 + $0x2] ss:$9 sm:$0xff] %v10284_v13 }
 0x920   : > { %4151 = vst [vmem:[#allocation1 + $0x3] ss:$9 sm:$0xff] %v10285_v50 }
 0x921   : > { %4152 = vst [vmem:[#allocation1 + $0x4] ss:$9 sm:$0xff] %v8333_v28 }
 0x922   : > { %v4212_v20 = vpop.f32.mrf.mxu0  ;;  %4153 = vst [vmem:[#allocation1 + $0x5] ss:$9 sm:$0xff] %v10286_v61 }
 0x923   : > { %v4273_v34 = vadd.f32 %v4212_v20, %v10287_v44  ;;  %4154 = vst [vmem:[#allocation1 + $0x6] ss:$9 sm:$0xff] %v10288_v1  ;;  %v10298_v20 = vld [vmem:[#allocation238_spill] sm:$0xff] }
 0x924   : > { %4155 = vst [vmem:[#allocation1 + $0x7] ss:$9 sm:$0xff] %v10289_v23 }
 0x925   : > { %4298 = vst [vmem:[%s4794_s25 + $0x10] sm:$0xff] %v4273_v34  ;;  %v4323_v21 = vadd.f32 %v4322_v4, %v4273_v34  ;;  %v4359_v11 = vmul.f32 %v4273_v34, %v4273_v34  ;;  %4724 = vmatmul.msk.bf16.gmra.mxu0 %vm1664_vm0, %v4147_v37  ;;  %v10297_v4 = vld [vmem:[#allocation176_spill] sm:$0xff] }
 0x927   : > { %v4383_v56 = vadd.f32 %v4382_v54, %v4359_v11 }
 0x92a   : > { %v4214_v38 = vpop.f32.mrf.mxu0 }
 0x92b   : > { %v4274_v32 = vadd.f32 %v4214_v38, %v10290_v30  ;;  %v4156_v28 = vld [vmem:[#allocation1] sm:$0xff] }
 0x92c   : > { %4157 = vst [vmem:[#allocation1] ss:$9 sm:$0xff] %v10291_v53 }
 0x92d   : > { %4299 = vst [vmem:[%s4794_s25 + $0x18] sm:$0xff] %v4274_v32  ;;  %v4324_v52 = vadd.f32 %v4323_v21, %v4274_v32  ;;  %v4360_v6 = vmul.f32 %v4274_v32, %v4274_v32  ;;  %v10299_v21 = vld [vmem:[#allocation197_spill] sm:$0xff] }
 0x92e   : > { %4158 = vst [vmem:[#allocation1 + $0x1] ss:$9 sm:$0xff] %v10292_v45 }
 0x92f   : > { %v4384_v51 = vadd.f32 %v4383_v56, %v4360_v6  ;;  %4159 = vst [vmem:[#allocation1 + $0x2] ss:$9 sm:$0xff] %v8349_v0 }
 0x930   : > { %4160 = vst [vmem:[#allocation1 + $0x3] ss:$9 sm:$0xff] %v8358_v5 }
 0x931   : > { %4161 = vst [vmem:[#allocation1 + $0x4] ss:$9 sm:$0xff] %v8360_v35 }
 0x932   : > { %v4217_v29 = vpop.f32.mrf.mxu0  ;;  %4162 = vst [vmem:[#allocation1 + $0x5] ss:$9 sm:$0xff] %v8362_v31 }
 0x933   : > { %v4275_v42 = vadd.f32 %v4217_v29, %v10293_v55  ;;  %4163 = vst [vmem:[#allocation1 + $0x6] ss:$9 sm:$0xff] %v8366_v26 }
 0x934   : > { %4164 = vst [vmem:[#allocation1 + $0x7] ss:$9 sm:$0xff] %v8368_v60 }
 0x935   : > { %4300 = vst [vmem:[%s4794_s25 + $0x20] sm:$0xff] %v4275_v42  ;;  %v4325_v47 = vadd.f32 %v4324_v52, %v4275_v42  ;;  %v4361_v8 = vmul.f32 %v4275_v42, %v4275_v42  ;;  %4725 = vmatmul.msk.bf16.gmra.mxu0 %vm1664_vm0, %v4156_v28  ;;  %v10300_v28 = vld [vmem:[#allocation231_spill] sm:$0xff] }
 0x937   : > { %v4385_v0 = vadd.f32 %v4384_v51, %v4361_v8 }
 0x93a   : > { %v4219_v5 = vpop.f32.mrf.mxu0 }
 0x93b   : > { %v4276_v15 = vadd.f32 %v4219_v5, %v10294_v62  ;;  %v4165_v35 = vld [vmem:[#allocation1] sm:$0xff] }
 0x93c   : > { %4166 = vst [vmem:[#allocation1] ss:$9 sm:$0xff] %v8370_v10 }
 0x93d   : > { %4301 = vst [vmem:[%s4794_s25 + $0x28] sm:$0xff] %v4276_v15  ;;  %v4326_v31 = vadd.f32 %v4325_v47, %v4276_v15  ;;  %v4362_v18 = vmul.f32 %v4276_v15, %v4276_v15 }
 0x93e   : > { %4167 = vst [vmem:[#allocation1 + $0x1] ss:$9 sm:$0xff] %v8372_v9 }
 0x93f   : > { %v4386_v26 = vadd.f32 %v4385_v0, %v4362_v18 }
 0x942   : > { %v4222_v60 = vpop.f32.mrf.mxu0 }
 0x943   : > { %v4277_v58 = vadd.f32 %v4222_v60, %v10295_v17 }
 0x945   : > { %4302 = vst [vmem:[%s4794_s25 + $0x30] sm:$0xff] %v4277_v58  ;;  %v4327_v3 = vadd.f32 %v4326_v31, %v4277_v58  ;;  %v4363_v7 = vmul.f32 %v4277_v58, %v4277_v58  ;;  %4726 = vmatmul.msk.bf16.gmra.mxu0 %vm1664_vm0, %v4165_v35  ;;  %v4168_v16 = vld [vmem:[#allocation1] sm:$0xff] }
 0x947   : > { %v4387_v27 = vadd.f32 %v4386_v26, %v4363_v7 }
 0x94a   : > { %v4224_v14 = vpop.f32.mrf.mxu0 }
 0x94b   : > { %v4278_v10 = vadd.f32 %v4224_v14, %v10296_v25 }
 0x94d   : > { %4303 = vst [vmem:[%s4794_s25 + $0x38] sm:$0xff] %v4278_v10  ;;  %v4328_v19 = vadd.f32 %v4327_v3, %v4278_v10  ;;  %v4364_v37 = vmul.f32 %v4278_v10, %v4278_v10 }
 0x94f   : > { %v4388_v22 = vadd.f32 %v4387_v27, %v4364_v37 }
 0x952   : > { %v4227_v9 = vpop.f32.mrf.mxu0 }
 0x953   : > { %v4279_v40 = vadd.f32 %v4227_v9, %v10297_v4 }
 0x955   : > { %4304 = vst [vmem:[%s4794_s25 + $0x40] sm:$0xff] %v4279_v40  ;;  %v4329_v2 = vadd.f32 %v4328_v19, %v4279_v40  ;;  %v4365_v54 = vmul.f32 %v4279_v40, %v4279_v40  ;;  %4727 = vmatmul.msk.bf16.gmra.mxu0 %vm1664_vm0, %v4168_v16 }
 0x957   : > { %v4389_v13 = vadd.f32 %v4388_v22, %v4365_v54 }
 0x95a   : > { %v4229_v50 = vpop.f32.mrf.mxu0 }
 0x95b   : > { %v4280_v61 = vadd.f32 %v4229_v50, %v10298_v20 }
 0x95d   : > { %4305 = vst [vmem:[%s4794_s25 + $0x48] sm:$0xff] %v4280_v61  ;;  %v4330_v44 = vadd.f32 %v4329_v2, %v4280_v61  ;;  %v4366_v34 = vmul.f32 %v4280_v61, %v4280_v61 }
 0x95f   : > { %v4390_v1 = vadd.f32 %v4389_v13, %v4366_v34 }
 0x962   : > { %v4232_v23 = vpop.f32.mrf.mxu0 }
 0x963   : > { %v4281_v11 = vadd.f32 %v4232_v23, %v10299_v21 }
 0x965   : > { %4306 = vst [vmem:[%s4794_s25 + $0x50] sm:$0xff] %v4281_v11  ;;  %v4331_v56 = vadd.f32 %v4330_v44, %v4281_v11  ;;  %v4367_v38 = vmul.f32 %v4281_v11, %v4281_v11 }
 0x967   : > { %v4391_v30 = vadd.f32 %v4390_v1, %v4367_v38 }
 0x96a   : > { %v4234_v32 = vpop.f32.mrf.mxu0 }
 0x96b   : > { %v4282_v53 = vadd.f32 %v4234_v32, %v10300_v28 }
 0x96d   : > { %4307 = vst [vmem:[%s4794_s25 + $0x58] sm:$0xff] %v4282_v53  ;;  %v4332_v52 = vadd.f32 %v4331_v56, %v4282_v53  ;;  %v4368_v6 = vmul.f32 %v4282_v53, %v4282_v53 }
 0x96f   : > { %v4392_v45 = vadd.f32 %v4391_v30, %v4368_v6 }
 0x972   : > { %v4237_v51 = vpop.f32.mrf.mxu0 }
 0x973   : > { %v4283_v29 = vadd.f32 %v4237_v51, %v8356_v49 }
 0x975   : > { %4308 = vst [vmem:[%s4794_s25 + $0x60] sm:$0xff] %v4283_v29  ;;  %v4333_v55 = vadd.f32 %v4332_v52, %v4283_v29  ;;  %v4369_v42 = vmul.f32 %v4283_v29, %v4283_v29 }
 0x977   : > { %v4393_v47 = vadd.f32 %v4392_v45, %v4369_v42 }
 0x97a   : > { %v4239_v8 = vpop.f32.mrf.mxu0 }
 0x97b   : > { %v4284_v0 = vadd.f32 %v4239_v8, %v8380_v63 }
 0x97d   : > { %4309 = vst [vmem:[%s4794_s25 + $0x68] sm:$0xff] %v4284_v0  ;;  %v4334_v5 = vadd.f32 %v4333_v55, %v4284_v0  ;;  %v4370_v62 = vmul.f32 %v4284_v0, %v4284_v0 }
 0x97f   : > { %v4394_v15 = vadd.f32 %v4393_v47, %v4370_v62 }
 0x982   : > { %v4242_v35 = vpop.f32.mrf.mxu0 }
 0x983   : > { %v4285_v31 = vadd.f32 %v4242_v35, %v8388_v39 }
 0x985   : > { %4310 = vst [vmem:[%s4794_s25 + $0x70] sm:$0xff] %v4285_v31  ;;  %v4335_v18 = vadd.f32 %v4334_v5, %v4285_v31  ;;  %v4371_v26 = vmul.f32 %v4285_v31, %v4285_v31 }
 0x987   : > { %v4395_v49 = vadd.f32 %v4394_v15, %v4371_v26 }
 0x98a   : > { %v4244_v60 = vpop.f32.mrf.mxu0 }
 0x98b   : > { %v4286_v17 = vadd.f32 %v4244_v60, %v8397_v41 }
 0x98d   : > { %4311 = vst [vmem:[%s4794_s25 + $0x78] sm:$0xff] %v4286_v17  ;;  %v4336_v58 = vadd.f32 %v4335_v18, %v4286_v17  ;;  %v4372_v3 = vmul.f32 %v4286_v17, %v4286_v17  ;;  %v4356_v17 = vld [vmem:[%s8592_s4] sm:$0x1] }
 0x98f   : > { %v4396_v63 = vadd.f32 %v4395_v49, %v4372_v3 }
 0x992   : > { %v4247_v7 = vpop.f32.mrf.mxu0 }
 0x993   : > { %v4287_v27 = vadd.f32 %v4247_v7, %v8403_v24 }
 0x995   : > { %4312 = vst [vmem:[%s4794_s25 + $0x80] sm:$0xff] %v4287_v27  ;;  %v4337_v14 = vadd.f32 %v4336_v58, %v4287_v27  ;;  %v4373_v25 = vmul.f32 %v4287_v27, %v4287_v27 }
 0x997   : > { %v4397_v39 = vadd.f32 %v4396_v63, %v4373_v25 }
 0x99a   : > { %v4249_v10 = vpop.f32.mrf.mxu0 }
 0x99b   : > { %v4288_v19 = vadd.f32 %v4249_v10, %v8413_v43 }
 0x99d   : > { %4313 = vst [vmem:[%s4794_s25 + $0x88] sm:$0xff] %v4288_v19  ;;  %v4338_v37 = vadd.f32 %v4337_v14, %v4288_v19  ;;  %v4374_v22 = vmul.f32 %v4288_v19, %v4288_v19 }
 0x99f   : > { %v4398_v41 = vadd.f32 %v4397_v39, %v4374_v22 }
 0x9a2   : > { %v4252_v9 = vpop.f32.mrf.mxu0 }
 0x9a3   : > { %v4289_v16 = vadd.f32 %v4252_v9, %v8418_v57 }
 0x9a5   : > { %4314 = vst [vmem:[%s4794_s25 + $0x90] sm:$0xff] %v4289_v16  ;;  %v4339_v4 = vadd.f32 %v4338_v37, %v4289_v16  ;;  %v4375_v40 = vmul.f32 %v4289_v16, %v4289_v16 }
 0x9a7   : > { %v4399_v24 = vadd.f32 %v4398_v41, %v4375_v40 }
 0x9aa   : > { %v4254_v2 = vpop.f32.mrf.mxu0 }
 0x9ab   : > { %v4290_v54 = vadd.f32 %v4254_v2, %v8429_v48 }
 0x9ad   : > { %4315 = vst [vmem:[%s4794_s25 + $0x98] sm:$0xff] %v4290_v54  ;;  %v4340_v13 = vadd.f32 %v4339_v4, %v4290_v54  ;;  %v4376_v50 = vmul.f32 %v4290_v54, %v4290_v54 }
 0x9af   : > { %v4400_v43 = vadd.f32 %v4399_v24, %v4376_v50 }
 0x9b2   : > { %v4257_v20 = vpop.f32.mrf.mxu0 }
 0x9b3   : > { %v4291_v61 = vadd.f32 %v4257_v20, %v8433_v59 }
 0x9b5   : > { %4316 = vst [vmem:[%s4794_s25 + $0xa0] sm:$0xff] %v4291_v61  ;;  %v4341_v44 = vadd.f32 %v4340_v13, %v4291_v61  ;;  %v4377_v34 = vmul.f32 %v4291_v61, %v4291_v61 }
 0x9b7   : > { %v4401_v57 = vadd.f32 %v4400_v43, %v4377_v34 }
 0x9ba   : > { %v4259_v1 = vpop.f32.mrf.mxu0 }
 0x9bb   : > { %v4292_v23 = vadd.f32 %v4259_v1, %v8445_v33 }
 0x9bd   : > { %4317 = vst [vmem:[%s4794_s25 + $0xa8] sm:$0xff] %v4292_v23  ;;  %v4342_v21 = vadd.f32 %v4341_v44, %v4292_v23  ;;  %v4378_v11 = vmul.f32 %v4292_v23, %v4292_v23 }
 0x9bf   : > { %v4402_v48 = vadd.f32 %v4401_v57, %v4378_v11 }
 0x9c2   : > { %v4262_v56 = vpop.f32.mrf.mxu0 }
 0x9c3   : > { %v4293_v38 = vadd.f32 %v4262_v56, %v8449_v12 }
 0x9c5   : > { %4318 = vst [vmem:[%s4794_s25 + $0xb0] sm:$0xff] %v4293_v38  ;;  %v4343_v30 = vadd.f32 %v4342_v21, %v4293_v38  ;;  %v4379_v32 = vmul.f32 %v4293_v38, %v4293_v38 }
 0x9c7   : > { %v4403_v59 = vadd.f32 %v4402_v48, %v4379_v32 }
 0x9ca   : > { %v4264_v28 = vpop.f32.mrf.mxu0 }
 0x9cb   : > { %v4294_v53 = vadd.f32 %v4264_v28, %v8460_v36 }
 0x9cd   : > { %4319 = vst [vmem:[%s4794_s25 + $0xb8] sm:$0xff] %v4294_v53  ;;  %v4344_v52 = vadd.f32 %v4343_v30, %v4294_v53  ;;  %v4380_v6 = vmul.f32 %v4294_v53, %v4294_v53 }
 0x9cf   : > { %v4404_v45 = vadd.f32 %v4403_v59, %v4380_v6 }
 0x9d2   : > { %v4267_v33 = vpop.f32.mrf.mxu0 }
 0x9d3   : > { %v4295_v51 = vadd.f32 %v4267_v33, %v8465_v46  ;;  %v4321_v46 = vld [vmem:[%s8591_s3] sm:$0x1] }
 0x9d5   : > { %4320 = vst [vmem:[%s4794_s25 + $0xc0] sm:$0xf] %v4295_v51  ;;  %v4346_v29 = vsel %vm4345_vm3, %v4295_v51, 0.0  ;;  %v4381_v55 = vmul.f32 %v4295_v51, %v4295_v51 }
 0x9d6   : > { %v4347_v42 = vadd.f32 %v4346_v29, %v4344_v52 }
 0x9d7   : > { %v4405_v12 = vsel %vm4345_vm3, %v4381_v55, 0.0 }
 0x9d8   : > { %v4348_v47 = vrot.slane %v4347_v42, 4  ;;  %v4406_v8 = vadd.f32 %v4405_v12, %v4404_v45 }
 0x9da   : > { %v4349_v0 = vadd.f32 %v4348_v47, %v4347_v42  ;;  %v4407_v5 = vrot.slane %v4406_v8, 4  ;;  %v4269_v62 = vpop.f32.mrf.mxu0 }
 0x9dc   : > { %v4350_v15 = vrot.slane %v4349_v0, 2  ;;  %v4408_v36 = vadd.f32 %v4407_v5, %v4406_v8 }
 0x9de   : > { %v4351_v35 = vadd.f32 %v4350_v15, %v4349_v0  ;;  %v4409_v31 = vrot.slane %v4408_v36, 2 }
 0x9e0   : > { %v4352_v18 = vrot.slane %v4351_v35, 1  ;;  %v4410_v26 = vadd.f32 %v4409_v31, %v4408_v36 }
 0x9e2   : > { %v4353_v49 = vadd.f32 %v4352_v18, %v4351_v35  ;;  %v4411_v60 = vrot.slane %v4410_v26, 1 }
 0x9e4   : > { %v4354_v58 = vadd.f32 %v4353_v49, %v4321_v46  ;;  %v4412_v3 = vadd.f32 %v4411_v60, %v4410_v26 }
 0x9e6   : > { %4355 = vst [vmem:[%s8591_s3] sm:$0x1] %v4354_v58  ;;  %v4413_v63 = vadd.f32 %v4412_v3, %v4356_v17 }
 0x9e8   : > { %4414 = vst [vmem:[%s8592_s4] sm:$0x1] %v4413_v63 }
 0x9e9 PF: > { %s15_s15 = sadd.s32 1, %s4750_s15  }
 0x9ea   : > { %p12_p5 = scmp.ge.s32.totalorder %s15_s15, 4  }
 0x9ec   :  { %14 = sbr.rel (!%p12_p5) target bundleno = 1 (0x1), region = 170 }

</bundles_post_ra>
